<compile_context>
chip_gen: v7x
topology: tpu7x:2x2x1
jax: 0.10.0
libtpu: 0.0.40
codegen_flags: <defaults>
</compile_context>

<pallas_src>
import math

import jax
import jax.numpy as jnp
from jax.experimental import pallas as pl
from jax.experimental.pallas import tpu as pltpu

# ----------------------- scaled-down hyperparameters -----------------------
d_k = 32
d_v = 32
d_model = 128        # n_heads * d_k == d_model -> lane-dense (128) feature axis
n_heads = 4
d_ff = 256
n_layers = 2
src_vocab_size = 16
tgt_vocab_size = 16
max_len = 50
LN_EPS = 1e-5

# --------------------------- in-kernel building blocks ---------------------------


def _layernorm(x, g, b):
    mean = jnp.mean(x, axis=-1, keepdims=True)
    var = jnp.mean((x - mean) ** 2, axis=-1, keepdims=True)
    return (x - mean) * jax.lax.rsqrt(var + LN_EPS) * g + b


def _mha_block(x_q, x_kv, mask, w_q, w_fc, ln_g, ln_b, attn_ref, head_base):
    """Fused multi-head attention for one batch element (all in VMEM/vregs).

    x_q: [Lq, D]   x_kv: [Lk, D]   mask: [Lq, Lk] bool (True = masked)
    Writes per-head attention probs into attn_ref[0, head_base + h]; returns
    LayerNorm(fc(context) + x_q)  : [Lq, D].

    NOTE: the reference model uses W_Q for Q, K and V, and K/V always share
    the same input tensor, so one K-projection doubles as the V-projection.
    """
    q_proj = jnp.dot(x_q, w_q, preferred_element_type=jnp.float32)    # [Lq, H*dk]
    kv_proj = jnp.dot(x_kv, w_q, preferred_element_type=jnp.float32)  # [Lk, H*dk]
    scale = 1.0 / math.sqrt(d_k)

    ctx_heads = []
    for h in range(n_heads):                       # static 4-iteration loop
        qh = q_proj[:, h * d_k:(h + 1) * d_k]
        kh = kv_proj[:, h * d_k:(h + 1) * d_k]
        vh = kv_proj[:, h * d_v:(h + 1) * d_v]
        scores = jax.lax.dot_general(
            qh, kh, (((1,), (1,)), ((), ())),
            preferred_element_type=jnp.float32) * scale
        scores = jnp.where(mask, jnp.float32(-1e9), scores)
        mx = jnp.max(scores, axis=-1, keepdims=True)
        e = jnp.exp(scores - mx)
        p = e / jnp.sum(e, axis=-1, keepdims=True)
        attn_ref[0, head_base + h] = p
        ctx_heads.append(jnp.dot(p, vh, preferred_element_type=jnp.float32))

    context = jnp.concatenate(ctx_heads, axis=-1)                      # [Lq, H*dv]
    out = jnp.dot(context, w_fc, preferred_element_type=jnp.float32) + x_q
    return _layernorm(out, ln_g, ln_b)


def _ffn_block(x, w1, w2, ln_g, ln_b):
    """fc1 -> ReLU -> fc2 -> +residual -> LayerNorm, hidden never leaves VMEM."""
    h = jnp.maximum(jnp.dot(x, w1, preferred_element_type=jnp.float32), 0.0)
    y = jnp.dot(h, w2, preferred_element_type=jnp.float32) + x
    return _layernorm(y, ln_g, ln_b)


# ------------------------------ fully fused forward kernel ------------------------------


def _transformer_kernel(
        enc_x_ref, dec_x_ref, emask_ref, smask_ref, cmask_ref,
        e_wq_ref, e_fc_ref, e_ln1g_ref, e_ln1b_ref,
        e_w1_ref, e_w2_ref, e_ln2g_ref, e_ln2b_ref,
        sa_wq_ref, sa_fc_ref, sa_lng_ref, sa_lnb_ref,
        ea_wq_ref, ea_fc_ref, ea_lng_ref, ea_lnb_ref,
        d_w1_ref, d_w2_ref, d_lng_ref, d_lnb_ref,
        proj_ref,
        logits_ref, eattn_ref, dsattn_ref, deattn_ref):
    """Whole Transformer forward for one batch element.

    enc_x_ref: [1,S,D]  dec_x_ref: [1,T,D]
    emask/smask/cmask: int32 masks (nonzero = masked)
    per-layer weights stacked along a leading [n_layers] axis (VMEM-resident)
    outputs: logits [1,T,V], attn maps [1, n_layers*n_heads, Lq, Lk].
    """
    emask = emask_ref[0] != 0                       # [S, S]
    smask = smask_ref[0] != 0                       # [T, T]
    cmask = cmask_ref[0] != 0                       # [T, S]

    # ---------------- Encoder stack ----------------
    x = enc_x_ref[0]                                # [S, D]
    for l in range(n_layers):                       # static layer loop
        x = _mha_block(x, x, emask,
                       e_wq_ref[l], e_fc_ref[l],
                       e_ln1g_ref[l], e_ln1b_ref[l],
                       eattn_ref, l * n_heads)
        x = _ffn_block(x, e_w1_ref[l], e_w2_ref[l],
                       e_ln2g_ref[l], e_ln2b_ref[l])
    enc_out = x                                     # stays in VMEM/vregs

    # ---------------- Decoder stack ----------------
    y = dec_x_ref[0]                                # [T, D]
    for l in range(n_layers):
        y = _mha_block(y, y, smask,
                       sa_wq_ref[l], sa_fc_ref[l],
                       sa_lng_ref[l], sa_lnb_ref[l],
                       dsattn_ref, l * n_heads)
        y = _mha_block(y, enc_out, cmask,
                       ea_wq_ref[l], ea_fc_ref[l],
                       ea_lng_ref[l], ea_lnb_ref[l],
                       deattn_ref, l * n_heads)
        y = _ffn_block(y, d_w1_ref[l], d_w2_ref[l],
                       d_lng_ref[l], d_lnb_ref[l])

    # ---------------- Output projection ----------------
    logits_ref[0] = jnp.dot(y, proj_ref[...],
                            preferred_element_type=jnp.float32)


# ------------------------------ pallas_call wrapper ------------------------------


def _wspec(shape):
    """Grid-resident (constant index_map) weight BlockSpec."""
    zeros = (0,) * len(shape)
    return pl.BlockSpec(shape, lambda b, _z=zeros: _z)


def _stack(layers, *path):
    def get(lp):
        v = lp
        for p in path:
            v = v[p]
        return v
    return jnp.stack([get(lp) for lp in layers], axis=0)


def fused_transformer(params, enc_x, dec_x, enc_mask_i32, dec_self_mask_i32,
                      dec_enc_mask_i32):
    B, S, D = enc_x.shape
    T = dec_x.shape[1]
    V = params["projection"].shape[1]
    LH = n_layers * n_heads

    ep, dp = params["enc_layers"], params["dec_layers"]
    # Stack per-layer weights along a leading layer axis.
    e_wq = _stack(ep, "self_attn", "W_Q")
    e_fc = _stack(ep, "self_attn", "fc")
    e_ln1g = _stack(ep, "self_attn", "ln_g")
    e_ln1b = _stack(ep, "self_attn", "ln_b")
    e_w1 = _stack(ep, "ffn", "fc1")
    e_w2 = _stack(ep, "ffn", "fc2")
    e_ln2g = _stack(ep, "ffn", "ln_g")
    e_ln2b = _stack(ep, "ffn", "ln_b")
    sa_wq = _stack(dp, "self_attn", "W_Q")
    sa_fc = _stack(dp, "self_attn", "fc")
    sa_lng = _stack(dp, "self_attn", "ln_g")
    sa_lnb = _stack(dp, "self_attn", "ln_b")
    ea_wq = _stack(dp, "enc_attn", "W_Q")
    ea_fc = _stack(dp, "enc_attn", "fc")
    ea_lng = _stack(dp, "enc_attn", "ln_g")
    ea_lnb = _stack(dp, "enc_attn", "ln_b")
    d_w1 = _stack(dp, "ffn", "fc1")
    d_w2 = _stack(dp, "ffn", "fc2")
    d_lng = _stack(dp, "ffn", "ln_g")
    d_lnb = _stack(dp, "ffn", "ln_b")

    logits, eattn, dsattn, deattn = pl.pallas_call(
        _transformer_kernel,
        out_shape=(jax.ShapeDtypeStruct((B, T, V), jnp.float32),
                   jax.ShapeDtypeStruct((B, LH, S, S), jnp.float32),
                   jax.ShapeDtypeStruct((B, LH, T, T), jnp.float32),
                   jax.ShapeDtypeStruct((B, LH, T, S), jnp.float32)),
        grid=(B,),
        in_specs=[
            pl.BlockSpec((1, S, D), lambda b: (b, 0, 0)),
            pl.BlockSpec((1, T, D), lambda b: (b, 0, 0)),
            pl.BlockSpec((1, S, S), lambda b: (b, 0, 0)),
            pl.BlockSpec((1, T, T), lambda b: (b, 0, 0)),
            pl.BlockSpec((1, T, S), lambda b: (b, 0, 0)),
            _wspec((n_layers, d_model, n_heads * d_k)),
            _wspec((n_layers, n_heads * d_v, d_model)),
            _wspec((n_layers, 1, d_model)),
            _wspec((n_layers, 1, d_model)),
            _wspec((n_layers, d_model, d_ff)),
            _wspec((n_layers, d_ff, d_model)),
            _wspec((n_layers, 1, d_model)),
            _wspec((n_layers, 1, d_model)),
            _wspec((n_layers, d_model, n_heads * d_k)),
            _wspec((n_layers, n_heads * d_v, d_model)),
            _wspec((n_layers, 1, d_model)),
            _wspec((n_layers, 1, d_model)),
            _wspec((n_layers, d_model, n_heads * d_k)),
            _wspec((n_layers, n_heads * d_v, d_model)),
            _wspec((n_layers, 1, d_model)),
            _wspec((n_layers, 1, d_model)),
            _wspec((n_layers, d_model, d_ff)),
            _wspec((n_layers, d_ff, d_model)),
            _wspec((n_layers, 1, d_model)),
            _wspec((n_layers, 1, d_model)),
            _wspec((d_model, tgt_vocab_size)),
        ],
        out_specs=(
            pl.BlockSpec((1, T, V), lambda b: (b, 0, 0)),
            pl.BlockSpec((1, LH, S, S), lambda b: (b, 0, 0, 0)),
            pl.BlockSpec((1, LH, T, T), lambda b: (b, 0, 0, 0)),
            pl.BlockSpec((1, LH, T, S), lambda b: (b, 0, 0, 0)),
        ),
        compiler_params=pltpu.CompilerParams(
            dimension_semantics=("parallel",)),
    )(enc_x, dec_x, enc_mask_i32, dec_self_mask_i32, dec_enc_mask_i32,
      e_wq, e_fc, e_ln1g, e_ln1b, e_w1, e_w2, e_ln2g, e_ln2b,
      sa_wq, sa_fc, sa_lng, sa_lnb,
      ea_wq, ea_fc, ea_lng, ea_lnb,
      d_w1, d_w2, d_lng, d_lnb,
      params["projection"])
    return logits, eattn, dsattn, deattn


# ------------------------------- masks / positional encoding -------------------------------


def get_attn_pad_mask(seq_q, seq_k):
    B, Lq = seq_q.shape
    Lk = seq_k.shape[1]
    mask = (seq_k == 0)[:, None, :].astype(jnp.int32)
    return jnp.broadcast_to(mask, (B, Lq, Lk))


def get_attn_subsequence_mask(seq):
    B, L = seq.shape
    sub = jnp.triu(jnp.ones((L, L), jnp.int32), k=1)
    return jnp.broadcast_to(sub[None], (B, L, L))


def make_pe_table():
    position = jnp.arange(max_len, dtype=jnp.float32)[:, None]
    div_term = 10000.0 ** (
        jnp.arange(0, d_model, 2, dtype=jnp.float32) / d_model)
    pe = jnp.zeros((max_len, d_model), jnp.float32)
    pe = pe.at[:, 0::2].set(jnp.sin(position * div_term))
    pe = pe.at[:, 1::2].set(jnp.cos(position * div_term))
    return pe[:, None, :]          # [max_len, 1, d_model]


# ------------------------------------ forward ------------------------------------


def transformer_forward(params, enc_inputs, dec_inputs):
    B, S = enc_inputs.shape
    _, T = dec_inputs.shape

    # Embedding + positional encoding (data-dependent gather stays in JAX).
    enc_x = params["src_emb"][enc_inputs]                          # [B,S,D]
    enc_x = enc_x + jnp.transpose(params["pe"][:S], (1, 0, 2))     # seq-wise PE
    dec_x = params["tgt_emb"][dec_inputs]                          # [B,T,D]
    # Reference applies pos_emb without transpose -> PE indexed by batch idx.
    dec_x = dec_x + params["pe"][:B]

    # Masks (int32; nonzero = masked).
    enc_self_mask = get_attn_pad_mask(enc_inputs, enc_inputs)
    pad_mask = get_attn_pad_mask(dec_inputs, dec_inputs)
    sub_mask = get_attn_subsequence_mask(dec_inputs)
    dec_self_mask = ((pad_mask + sub_mask) > 0).astype(jnp.int32)
    dec_enc_mask = get_attn_pad_mask(dec_inputs, enc_inputs)

    logits, eattn, dsattn, deattn = fused_transformer(
        params, enc_x, dec_x, enc_self_mask, dec_self_mask, dec_enc_mask)

    enc_self_attns = [eattn[:, l * n_heads:(l + 1) * n_heads]
                      for l in range(n_layers)]
    dec_self_attns = [dsattn[:, l * n_heads:(l + 1) * n_heads]
                      for l in range(n_layers)]
    dec_enc_attns = [deattn[:, l * n_heads:(l + 1) * n_heads]
                     for l in range(n_layers)]
    return (logits.reshape(B * T, tgt_vocab_size),
            enc_self_attns, dec_self_attns, dec_enc_attns)


# ------------------------------ parameter init ------------------------------


def _w(key, shape):
    return (jax.random.normal(key, shape, jnp.float32) * 0.02).astype(jnp.float32)


def init_mha(key):
    k1, k2 = jax.random.split(key)
    return {
        "W_Q": _w(k1, (d_model, d_k * n_heads)),
        "fc": _w(k2, (n_heads * d_v, d_model)),
        "ln_g": jnp.ones((1, d_model), jnp.float32),
        "ln_b": jnp.zeros((1, d_model), jnp.float32),
    }


def init_ffn(key):
    k1, k2 = jax.random.split(key)
    return {
        "fc1": _w(k1, (d_model, d_ff)),
        "fc2": _w(k2, (d_ff, d_model)),
        "ln_g": jnp.ones((1, d_model), jnp.float32),
        "ln_b": jnp.zeros((1, d_model), jnp.float32),
    }


def init_params(key):
    keys = jax.random.split(key, 4 + 4 * n_layers + 6 * n_layers)
    it = iter(keys)
    params = {
        "src_emb": _w(next(it), (src_vocab_size, d_model)),
        "tgt_emb": _w(next(it), (tgt_vocab_size, d_model)),
        "projection": _w(next(it), (d_model, tgt_vocab_size)),
        "pe": make_pe_table(),
    }
    params["enc_layers"] = [
        {"self_attn": init_mha(next(it)), "ffn": init_ffn(next(it))}
        for _ in range(n_layers)
    ]
    params["dec_layers"] = [
        {
            "self_attn": init_mha(next(it)),
            "enc_attn": init_mha(next(it)),
            "ffn": init_ffn(next(it)),
        }
        for _ in range(n_layers)
    ]
    return params


# ----------------------------------- main -----------------------------------

if __name__ == "__main__":
    root = jax.random.PRNGKey(0)
    k_params, k_enc, k_dec = jax.random.split(root, 3)

    params = init_params(k_params)

    batch, src_len, tgt_len = 2, 8, 8
    enc_inputs = jax.random.randint(k_enc, (batch, src_len), 1, src_vocab_size)
    enc_inputs = enc_inputs.at[:, -2:].set(0)      # some pad tokens
    dec_inputs = jax.random.randint(k_dec, (batch, tgt_len), 1, tgt_vocab_size)
    dec_inputs = dec_inputs.at[:, -1:].set(0)      # some pad tokens

    fwd = jax.jit(transformer_forward)
    logits, enc_attns, dec_self_attns, dec_enc_attns = fwd(
        params, enc_inputs, dec_inputs)

    jax.block_until_ready(logits)
    assert logits.shape == (batch * tgt_len, tgt_vocab_size)
    assert len(enc_attns) == n_layers and len(dec_enc_attns) == n_layers
    assert enc_attns[0].shape == (batch, n_heads, src_len, src_len)
    assert dec_self_attns[0].shape == (batch, n_heads, tgt_len, tgt_len)
    assert dec_enc_attns[0].shape == (batch, n_heads, tgt_len, src_len)
    assert bool(jnp.all(jnp.isfinite(logits)))
    print("KERNEL_OK")
</pallas_src>

<mosaic_0001>
module attributes {stable_mosaic.version = 11 : i64} {
  func.func @_transformer_kernel(%arg0: i32, %arg1: memref<1x8x128xf32, #tpu.memory_space<vmem>>, %arg2: memref<1x8x128xf32, #tpu.memory_space<vmem>>, %arg3: memref<1x8x8xi32, #tpu.memory_space<vmem>>, %arg4: memref<1x8x8xi32, #tpu.memory_space<vmem>>, %arg5: memref<1x8x8xi32, #tpu.memory_space<vmem>>, %arg6: memref<2x128x128xf32, #tpu.memory_space<vmem>>, %arg7: memref<2x128x128xf32, #tpu.memory_space<vmem>>, %arg8: memref<2x1x128xf32, #tpu.memory_space<vmem>>, %arg9: memref<2x1x128xf32, #tpu.memory_space<vmem>>, %arg10: memref<2x128x256xf32, #tpu.memory_space<vmem>>, %arg11: memref<2x256x128xf32, #tpu.memory_space<vmem>>, %arg12: memref<2x1x128xf32, #tpu.memory_space<vmem>>, %arg13: memref<2x1x128xf32, #tpu.memory_space<vmem>>, %arg14: memref<2x128x128xf32, #tpu.memory_space<vmem>>, %arg15: memref<2x128x128xf32, #tpu.memory_space<vmem>>, %arg16: memref<2x1x128xf32, #tpu.memory_space<vmem>>, %arg17: memref<2x1x128xf32, #tpu.memory_space<vmem>>, %arg18: memref<2x128x128xf32, #tpu.memory_space<vmem>>, %arg19: memref<2x128x128xf32, #tpu.memory_space<vmem>>, %arg20: memref<2x1x128xf32, #tpu.memory_space<vmem>>, %arg21: memref<2x1x128xf32, #tpu.memory_space<vmem>>, %arg22: memref<2x128x256xf32, #tpu.memory_space<vmem>>, %arg23: memref<2x256x128xf32, #tpu.memory_space<vmem>>, %arg24: memref<2x1x128xf32, #tpu.memory_space<vmem>>, %arg25: memref<2x1x128xf32, #tpu.memory_space<vmem>>, %arg26: memref<128x16xf32, #tpu.memory_space<vmem>>, %arg27: memref<1x8x16xf32, #tpu.memory_space<vmem>>, %arg28: memref<1x8x8x8xf32, #tpu.memory_space<vmem>>, %arg29: memref<1x8x8x8xf32, #tpu.memory_space<vmem>>, %arg30: memref<1x8x8x8xf32, #tpu.memory_space<vmem>>) attributes {dimension_semantics = [#tpu.dimension_semantics<parallel>], iteration_bounds = array<i64: 2>, scalar_prefetch = 0 : i64, scratch_operands = 0 : i64, tpu.core_type = #tpu.core_type<tc>, window_params = [{transform_indices = @transform_0, window_bounds = array<i64: 1, 8, 128>}, {transform_indices = @transform_1, window_bounds = array<i64: 1, 8, 128>}, {transform_indices = @transform_2, window_bounds = array<i64: 1, 8, 8>}, {transform_indices = @transform_3, window_bounds = array<i64: 1, 8, 8>}, {transform_indices = @transform_4, window_bounds = array<i64: 1, 8, 8>}, {pipeline_mode = #tpu.pipeline_mode<synchronous>, transform_indices = @transform_5, window_bounds = array<i64: 2, 128, 128>}, {pipeline_mode = #tpu.pipeline_mode<synchronous>, transform_indices = @transform_6, window_bounds = array<i64: 2, 128, 128>}, {pipeline_mode = #tpu.pipeline_mode<synchronous>, transform_indices = @transform_7, window_bounds = array<i64: 2, 1, 128>}, {pipeline_mode = #tpu.pipeline_mode<synchronous>, transform_indices = @transform_8, window_bounds = array<i64: 2, 1, 128>}, {pipeline_mode = #tpu.pipeline_mode<synchronous>, transform_indices = @transform_9, window_bounds = array<i64: 2, 128, 256>}, {pipeline_mode = #tpu.pipeline_mode<synchronous>, transform_indices = @transform_10, window_bounds = array<i64: 2, 256, 128>}, {pipeline_mode = #tpu.pipeline_mode<synchronous>, transform_indices = @transform_11, window_bounds = array<i64: 2, 1, 128>}, {pipeline_mode = #tpu.pipeline_mode<synchronous>, transform_indices = @transform_12, window_bounds = array<i64: 2, 1, 128>}, {pipeline_mode = #tpu.pipeline_mode<synchronous>, transform_indices = @transform_13, window_bounds = array<i64: 2, 128, 128>}, {pipeline_mode = #tpu.pipeline_mode<synchronous>, transform_indices = @transform_14, window_bounds = array<i64: 2, 128, 128>}, {pipeline_mode = #tpu.pipeline_mode<synchronous>, transform_indices = @transform_15, window_bounds = array<i64: 2, 1, 128>}, {pipeline_mode = #tpu.pipeline_mode<synchronous>, transform_indices = @transform_16, window_bounds = array<i64: 2, 1, 128>}, {pipeline_mode = #tpu.pipeline_mode<synchronous>, transform_indices = @transform_17, window_bounds = array<i64: 2, 128, 128>}, {pipeline_mode = #tpu.pipeline_mode<synchronous>, transform_indices = @transform_18, window_bounds = array<i64: 2, 128, 128>}, {pipeline_mode = #tpu.pipeline_mode<synchronous>, transform_indices = @transform_19, window_bounds = array<i64: 2, 1, 128>}, {pipeline_mode = #tpu.pipeline_mode<synchronous>, transform_indices = @transform_20, window_bounds = array<i64: 2, 1, 128>}, {pipeline_mode = #tpu.pipeline_mode<synchronous>, transform_indices = @transform_21, window_bounds = array<i64: 2, 128, 256>}, {pipeline_mode = #tpu.pipeline_mode<synchronous>, transform_indices = @transform_22, window_bounds = array<i64: 2, 256, 128>}, {pipeline_mode = #tpu.pipeline_mode<synchronous>, transform_indices = @transform_23, window_bounds = array<i64: 2, 1, 128>}, {pipeline_mode = #tpu.pipeline_mode<synchronous>, transform_indices = @transform_24, window_bounds = array<i64: 2, 1, 128>}, {pipeline_mode = #tpu.pipeline_mode<synchronous>, transform_indices = @transform_25, window_bounds = array<i64: 128, 16>}, {transform_indices = @transform_26, window_bounds = array<i64: 1, 8, 16>}, {transform_indices = @transform_27, window_bounds = array<i64: 1, 8, 8, 8>}, {transform_indices = @transform_28, window_bounds = array<i64: 1, 8, 8, 8>}, {transform_indices = @transform_29, window_bounds = array<i64: 1, 8, 8, 8>}]} {
    %c0 = arith.constant 0 : index
    %c0_0 = arith.constant 0 : index
    %c0_1 = arith.constant 0 : index
    %0 = vector.load %arg3[%c0, %c0_0, %c0_1] : memref<1x8x8xi32, #tpu.memory_space<vmem>>, vector<1x8x8xi32>
    %1 = vector.shape_cast %0 : vector<1x8x8xi32> to vector<8x8xi32>
    %c0_i32 = arith.constant 0 : i32
    %2 = vector.broadcast %c0_i32 : i32 to vector<8x8xi32>
    %3 = arith.cmpi ne, %1, %2 : vector<8x8xi32>
    %c0_2 = arith.constant 0 : index
    %c0_3 = arith.constant 0 : index
    %c0_4 = arith.constant 0 : index
    %4 = vector.load %arg4[%c0_2, %c0_3, %c0_4] : memref<1x8x8xi32, #tpu.memory_space<vmem>>, vector<1x8x8xi32>
    %5 = vector.shape_cast %4 : vector<1x8x8xi32> to vector<8x8xi32>
    %c0_i32_5 = arith.constant 0 : i32
    %6 = vector.broadcast %c0_i32_5 : i32 to vector<8x8xi32>
    %7 = arith.cmpi ne, %5, %6 : vector<8x8xi32>
    %c0_6 = arith.constant 0 : index
    %c0_7 = arith.constant 0 : index
    %c0_8 = arith.constant 0 : index
    %8 = vector.load %arg5[%c0_6, %c0_7, %c0_8] : memref<1x8x8xi32, #tpu.memory_space<vmem>>, vector<1x8x8xi32>
    %9 = vector.shape_cast %8 : vector<1x8x8xi32> to vector<8x8xi32>
    %c0_i32_9 = arith.constant 0 : i32
    %10 = vector.broadcast %c0_i32_9 : i32 to vector<8x8xi32>
    %11 = arith.cmpi ne, %9, %10 : vector<8x8xi32>
    %c0_10 = arith.constant 0 : index
    %c0_11 = arith.constant 0 : index
    %c0_12 = arith.constant 0 : index
    %12 = vector.load %arg1[%c0_10, %c0_11, %c0_12] : memref<1x8x128xf32, #tpu.memory_space<vmem>>, vector<1x8x128xf32>
    %13 = vector.shape_cast %12 : vector<1x8x128xf32> to vector<8x128xf32>
    %c0_13 = arith.constant 0 : index
    %c0_14 = arith.constant 0 : index
    %c0_15 = arith.constant 0 : index
    %14 = vector.load %arg6[%c0_13, %c0_14, %c0_15] : memref<2x128x128xf32, #tpu.memory_space<vmem>>, vector<1x128x128xf32>
    %15 = vector.shape_cast %14 : vector<1x128x128xf32> to vector<128x128xf32>
    %c0_16 = arith.constant 0 : index
    %c0_17 = arith.constant 0 : index
    %c0_18 = arith.constant 0 : index
    %16 = vector.load %arg7[%c0_16, %c0_17, %c0_18] : memref<2x128x128xf32, #tpu.memory_space<vmem>>, vector<1x128x128xf32>
    %17 = vector.shape_cast %16 : vector<1x128x128xf32> to vector<128x128xf32>
    %c0_19 = arith.constant 0 : index
    %c0_20 = arith.constant 0 : index
    %c0_21 = arith.constant 0 : index
    %18 = vector.load %arg8[%c0_19, %c0_20, %c0_21] : memref<2x1x128xf32, #tpu.memory_space<vmem>>, vector<1x1x128xf32>
    %19 = vector.shape_cast %18 : vector<1x1x128xf32> to vector<1x128xf32>
    %c0_22 = arith.constant 0 : index
    %c0_23 = arith.constant 0 : index
    %c0_24 = arith.constant 0 : index
    %20 = vector.load %arg9[%c0_22, %c0_23, %c0_24] : memref<2x1x128xf32, #tpu.memory_space<vmem>>, vector<1x1x128xf32>
    %21 = vector.shape_cast %20 : vector<1x1x128xf32> to vector<1x128xf32>
    %cst = arith.constant dense<0.000000e+00> : vector<8x128xf32>
    %22 = tpu.matmul %13, %15, %cst {dimension_numbers = #tpu.dot_dimension_numbers<[1], [0], [0], [1], [0, 0, 1, 1], [], []>} : vector<8x128xf32>, vector<128x128xf32>, vector<8x128xf32> -> vector<8x128xf32>
    %cst_25 = arith.constant dense<0.000000e+00> : vector<8x128xf32>
    %23 = tpu.matmul %13, %15, %cst_25 {dimension_numbers = #tpu.dot_dimension_numbers<[1], [0], [0], [1], [0, 0, 1, 1], [], []>} : vector<8x128xf32>, vector<128x128xf32>, vector<8x128xf32> -> vector<8x128xf32>
    %24 = vector.extract_strided_slice %22 {offsets = [0, 0], sizes = [8, 32], strides = [1, 1]} : vector<8x128xf32> to vector<8x32xf32>
    %25 = vector.extract_strided_slice %23 {offsets = [0, 0], sizes = [8, 32], strides = [1, 1]} : vector<8x128xf32> to vector<8x32xf32>
    %26 = vector.extract_strided_slice %23 {offsets = [0, 0], sizes = [8, 32], strides = [1, 1]} : vector<8x128xf32> to vector<8x32xf32>
    %cst_26 = arith.constant dense<0.000000e+00> : vector<8x8xf32>
    %27 = tpu.matmul %24, %25, %cst_26 {dimension_numbers = #tpu.dot_dimension_numbers<[1], [1], [0], [0], [0, 0, 1, 0], [], []>} : vector<8x32xf32>, vector<8x32xf32>, vector<8x8xf32> -> vector<8x8xf32>
    %cst_27 = arith.constant 0.176776692 : f32
    %28 = vector.broadcast %cst_27 : f32 to vector<8x8xf32>
    %29 = arith.mulf %27, %28 : vector<8x8xf32>
    %cst_28 = arith.constant -1.000000e+09 : f32
    %30 = vector.broadcast %cst_28 : f32 to vector<8x8xf32>
    %31 = arith.select %3, %30, %29 : vector<8x8xi1>, vector<8x8xf32>
    %cst_29 = arith.constant dense<0xFF800000> : vector<8xf32>
    %32 = vector.multi_reduction <maximumf>, %31, %cst_29 [1] : vector<8x8xf32> to vector<8xf32>
    %33 = vector.shape_cast %32 : vector<8xf32> to vector<8x1xf32>
    %34 = vector.broadcast %33 : vector<8x1xf32> to vector<8x8xf32>
    %35 = arith.subf %31, %34 : vector<8x8xf32>
    %36 = math.exp %35 : vector<8x8xf32>
    %cst_30 = arith.constant dense<0.000000e+00> : vector<8xf32>
    %37 = vector.multi_reduction <add>, %36, %cst_30 [1] : vector<8x8xf32> to vector<8xf32>
    %38 = vector.shape_cast %37 : vector<8xf32> to vector<8x1xf32>
    %39 = vector.broadcast %38 : vector<8x1xf32> to vector<8x8xf32>
    %40 = arith.divf %36, %39 : vector<8x8xf32>
    %c0_31 = arith.constant 0 : index
    %c0_32 = arith.constant 0 : index
    %c0_33 = arith.constant 0 : index
    %c0_34 = arith.constant 0 : index
    %41 = vector.load %arg28[%c0_31, %c0_32, %c0_33, %c0_34] : memref<1x8x8x8xf32, #tpu.memory_space<vmem>>, vector<1x1x8x8xf32>
    %42 = vector.shape_cast %41 : vector<1x1x8x8xf32> to vector<8x8xf32>
    %43 = vector.shape_cast %40 : vector<8x8xf32> to vector<1x1x8x8xf32>
    tpu.vector_store %arg28[%c0_31, %c0_32, %c0_33, %c0_34], %43 {strides = array<i32>} : memref<1x8x8x8xf32, #tpu.memory_space<vmem>>, vector<1x1x8x8xf32>,
    %cst_35 = arith.constant dense<0.000000e+00> : vector<8x32xf32>
    %44 = tpu.matmul %40, %26, %cst_35 {dimension_numbers = #tpu.dot_dimension_numbers<[1], [0], [0], [1], [0, 0, 1, 1], [], []>} : vector<8x8xf32>, vector<8x32xf32>, vector<8x32xf32> -> vector<8x32xf32>
    %45 = vector.extract_strided_slice %22 {offsets = [0, 32], sizes = [8, 32], strides = [1, 1]} : vector<8x128xf32> to vector<8x32xf32>
    %46 = vector.extract_strided_slice %23 {offsets = [0, 32], sizes = [8, 32], strides = [1, 1]} : vector<8x128xf32> to vector<8x32xf32>
    %47 = vector.extract_strided_slice %23 {offsets = [0, 32], sizes = [8, 32], strides = [1, 1]} : vector<8x128xf32> to vector<8x32xf32>
    %cst_36 = arith.constant dense<0.000000e+00> : vector<8x8xf32>
    %48 = tpu.matmul %45, %46, %cst_36 {dimension_numbers = #tpu.dot_dimension_numbers<[1], [1], [0], [0], [0, 0, 1, 0], [], []>} : vector<8x32xf32>, vector<8x32xf32>, vector<8x8xf32> -> vector<8x8xf32>
    %cst_37 = arith.constant 0.176776692 : f32
    %49 = vector.broadcast %cst_37 : f32 to vector<8x8xf32>
    %50 = arith.mulf %48, %49 : vector<8x8xf32>
    %cst_38 = arith.constant -1.000000e+09 : f32
    %51 = vector.broadcast %cst_38 : f32 to vector<8x8xf32>
    %52 = arith.select %3, %51, %50 : vector<8x8xi1>, vector<8x8xf32>
    %cst_39 = arith.constant dense<0xFF800000> : vector<8xf32>
    %53 = vector.multi_reduction <maximumf>, %52, %cst_39 [1] : vector<8x8xf32> to vector<8xf32>
    %54 = vector.shape_cast %53 : vector<8xf32> to vector<8x1xf32>
    %55 = vector.broadcast %54 : vector<8x1xf32> to vector<8x8xf32>
    %56 = arith.subf %52, %55 : vector<8x8xf32>
    %57 = math.exp %56 : vector<8x8xf32>
    %cst_40 = arith.constant dense<0.000000e+00> : vector<8xf32>
    %58 = vector.multi_reduction <add>, %57, %cst_40 [1] : vector<8x8xf32> to vector<8xf32>
    %59 = vector.shape_cast %58 : vector<8xf32> to vector<8x1xf32>
    %60 = vector.broadcast %59 : vector<8x1xf32> to vector<8x8xf32>
    %61 = arith.divf %57, %60 : vector<8x8xf32>
    %c0_41 = arith.constant 0 : index
    %c1 = arith.constant 1 : index
    %c0_42 = arith.constant 0 : index
    %c0_43 = arith.constant 0 : index
    %62 = vector.load %arg28[%c0_41, %c1, %c0_42, %c0_43] : memref<1x8x8x8xf32, #tpu.memory_space<vmem>>, vector<1x1x8x8xf32>
    %63 = vector.shape_cast %62 : vector<1x1x8x8xf32> to vector<8x8xf32>
    %64 = vector.shape_cast %61 : vector<8x8xf32> to vector<1x1x8x8xf32>
    tpu.vector_store %arg28[%c0_41, %c1, %c0_42, %c0_43], %64 {strides = array<i32>} : memref<1x8x8x8xf32, #tpu.memory_space<vmem>>, vector<1x1x8x8xf32>,
    %cst_44 = arith.constant dense<0.000000e+00> : vector<8x32xf32>
    %65 = tpu.matmul %61, %47, %cst_44 {dimension_numbers = #tpu.dot_dimension_numbers<[1], [0], [0], [1], [0, 0, 1, 1], [], []>} : vector<8x8xf32>, vector<8x32xf32>, vector<8x32xf32> -> vector<8x32xf32>
    %66 = vector.extract_strided_slice %22 {offsets = [0, 64], sizes = [8, 32], strides = [1, 1]} : vector<8x128xf32> to vector<8x32xf32>
    %67 = vector.extract_strided_slice %23 {offsets = [0, 64], sizes = [8, 32], strides = [1, 1]} : vector<8x128xf32> to vector<8x32xf32>
    %68 = vector.extract_strided_slice %23 {offsets = [0, 64], sizes = [8, 32], strides = [1, 1]} : vector<8x128xf32> to vector<8x32xf32>
    %cst_45 = arith.constant dense<0.000000e+00> : vector<8x8xf32>
    %69 = tpu.matmul %66, %67, %cst_45 {dimension_numbers = #tpu.dot_dimension_numbers<[1], [1], [0], [0], [0, 0, 1, 0], [], []>} : vector<8x32xf32>, vector<8x32xf32>, vector<8x8xf32> -> vector<8x8xf32>
    %cst_46 = arith.constant 0.176776692 : f32
    %70 = vector.broadcast %cst_46 : f32 to vector<8x8xf32>
    %71 = arith.mulf %69, %70 : vector<8x8xf32>
    %cst_47 = arith.constant -1.000000e+09 : f32
    %72 = vector.broadcast %cst_47 : f32 to vector<8x8xf32>
    %73 = arith.select %3, %72, %71 : vector<8x8xi1>, vector<8x8xf32>
    %cst_48 = arith.constant dense<0xFF800000> : vector<8xf32>
    %74 = vector.multi_reduction <maximumf>, %73, %cst_48 [1] : vector<8x8xf32> to vector<8xf32>
    %75 = vector.shape_cast %74 : vector<8xf32> to vector<8x1xf32>
    %76 = vector.broadcast %75 : vector<8x1xf32> to vector<8x8xf32>
    %77 = arith.subf %73, %76 : vector<8x8xf32>
    %78 = math.exp %77 : vector<8x8xf32>
    %cst_49 = arith.constant dense<0.000000e+00> : vector<8xf32>
    %79 = vector.multi_reduction <add>, %78, %cst_49 [1] : vector<8x8xf32> to vector<8xf32>
    %80 = vector.shape_cast %79 : vector<8xf32> to vector<8x1xf32>
    %81 = vector.broadcast %80 : vector<8x1xf32> to vector<8x8xf32>
    %82 = arith.divf %78, %81 : vector<8x8xf32>
    %c0_50 = arith.constant 0 : index
    %c2 = arith.constant 2 : index
    %c0_51 = arith.constant 0 : index
    %c0_52 = arith.constant 0 : index
    %83 = vector.load %arg28[%c0_50, %c2, %c0_51, %c0_52] : memref<1x8x8x8xf32, #tpu.memory_space<vmem>>, vector<1x1x8x8xf32>
    %84 = vector.shape_cast %83 : vector<1x1x8x8xf32> to vector<8x8xf32>
    %85 = vector.shape_cast %82 : vector<8x8xf32> to vector<1x1x8x8xf32>
    tpu.vector_store %arg28[%c0_50, %c2, %c0_51, %c0_52], %85 {strides = array<i32>} : memref<1x8x8x8xf32, #tpu.memory_space<vmem>>, vector<1x1x8x8xf32>,
    %cst_53 = arith.constant dense<0.000000e+00> : vector<8x32xf32>
    %86 = tpu.matmul %82, %68, %cst_53 {dimension_numbers = #tpu.dot_dimension_numbers<[1], [0], [0], [1], [0, 0, 1, 1], [], []>} : vector<8x8xf32>, vector<8x32xf32>, vector<8x32xf32> -> vector<8x32xf32>
    %87 = vector.extract_strided_slice %22 {offsets = [0, 96], sizes = [8, 32], strides = [1, 1]} : vector<8x128xf32> to vector<8x32xf32>
    %88 = vector.extract_strided_slice %23 {offsets = [0, 96], sizes = [8, 32], strides = [1, 1]} : vector<8x128xf32> to vector<8x32xf32>
    %89 = vector.extract_strided_slice %23 {offsets = [0, 96], sizes = [8, 32], strides = [1, 1]} : vector<8x128xf32> to vector<8x32xf32>
    %cst_54 = arith.constant dense<0.000000e+00> : vector<8x8xf32>
    %90 = tpu.matmul %87, %88, %cst_54 {dimension_numbers = #tpu.dot_dimension_numbers<[1], [1], [0], [0], [0, 0, 1, 0], [], []>} : vector<8x32xf32>, vector<8x32xf32>, vector<8x8xf32> -> vector<8x8xf32>
    %cst_55 = arith.constant 0.176776692 : f32
    %91 = vector.broadcast %cst_55 : f32 to vector<8x8xf32>
    %92 = arith.mulf %90, %91 : vector<8x8xf32>
    %cst_56 = arith.constant -1.000000e+09 : f32
    %93 = vector.broadcast %cst_56 : f32 to vector<8x8xf32>
    %94 = arith.select %3, %93, %92 : vector<8x8xi1>, vector<8x8xf32>
    %cst_57 = arith.constant dense<0xFF800000> : vector<8xf32>
    %95 = vector.multi_reduction <maximumf>, %94, %cst_57 [1] : vector<8x8xf32> to vector<8xf32>
    %96 = vector.shape_cast %95 : vector<8xf32> to vector<8x1xf32>
    %97 = vector.broadcast %96 : vector<8x1xf32> to vector<8x8xf32>
    %98 = arith.subf %94, %97 : vector<8x8xf32>
    %99 = math.exp %98 : vector<8x8xf32>
    %cst_58 = arith.constant dense<0.000000e+00> : vector<8xf32>
    %100 = vector.multi_reduction <add>, %99, %cst_58 [1] : vector<8x8xf32> to vector<8xf32>
    %101 = vector.shape_cast %100 : vector<8xf32> to vector<8x1xf32>
    %102 = vector.broadcast %101 : vector<8x1xf32> to vector<8x8xf32>
    %103 = arith.divf %99, %102 : vector<8x8xf32>
    %c0_59 = arith.constant 0 : index
    %c3 = arith.constant 3 : index
    %c0_60 = arith.constant 0 : index
    %c0_61 = arith.constant 0 : index
    %104 = vector.load %arg28[%c0_59, %c3, %c0_60, %c0_61] : memref<1x8x8x8xf32, #tpu.memory_space<vmem>>, vector<1x1x8x8xf32>
    %105 = vector.shape_cast %104 : vector<1x1x8x8xf32> to vector<8x8xf32>
    %106 = vector.shape_cast %103 : vector<8x8xf32> to vector<1x1x8x8xf32>
    tpu.vector_store %arg28[%c0_59, %c3, %c0_60, %c0_61], %106 {strides = array<i32>} : memref<1x8x8x8xf32, #tpu.memory_space<vmem>>, vector<1x1x8x8xf32>,
    %cst_62 = arith.constant dense<0.000000e+00> : vector<8x32xf32>
    %107 = tpu.matmul %103, %89, %cst_62 {dimension_numbers = #tpu.dot_dimension_numbers<[1], [0], [0], [1], [0, 0, 1, 1], [], []>} : vector<8x8xf32>, vector<8x32xf32>, vector<8x32xf32> -> vector<8x32xf32>
    %108 = tpu.concatenate %44, %65, %86, %107 in 1 : vector<8x32xf32>, vector<8x32xf32>, vector<8x32xf32>, vector<8x32xf32> -> vector<8x128xf32>
    %cst_63 = arith.constant dense<0.000000e+00> : vector<8x128xf32>
    %109 = tpu.matmul %108, %17, %cst_63 {dimension_numbers = #tpu.dot_dimension_numbers<[1], [0], [0], [1], [0, 0, 1, 1], [], []>} : vector<8x128xf32>, vector<128x128xf32>, vector<8x128xf32> -> vector<8x128xf32>
    %110 = arith.addf %109, %13 : vector<8x128xf32>
    %cst_64 = arith.constant dense<0.000000e+00> : vector<8xf32>
    %111 = vector.multi_reduction <add>, %110, %cst_64 [1] : vector<8x128xf32> to vector<8xf32>
    %112 = vector.shape_cast %111 : vector<8xf32> to vector<8x1xf32>
    %cst_65 = arith.constant 1.280000e+02 : f32
    %113 = vector.broadcast %cst_65 : f32 to vector<8x1xf32>
    %114 = arith.divf %112, %113 : vector<8x1xf32>
    %115 = vector.broadcast %114 : vector<8x1xf32> to vector<8x128xf32>
    %116 = arith.subf %110, %115 : vector<8x128xf32>
    %117 = arith.mulf %116, %116 : vector<8x128xf32>
    %cst_66 = arith.constant dense<0.000000e+00> : vector<8xf32>
    %118 = vector.multi_reduction <add>, %117, %cst_66 [1] : vector<8x128xf32> to vector<8xf32>
    %119 = vector.shape_cast %118 : vector<8xf32> to vector<8x1xf32>
    %cst_67 = arith.constant 1.280000e+02 : f32
    %120 = vector.broadcast %cst_67 : f32 to vector<8x1xf32>
    %121 = arith.divf %119, %120 : vector<8x1xf32>
    %122 = vector.broadcast %114 : vector<8x1xf32> to vector<8x128xf32>
    %123 = arith.subf %110, %122 : vector<8x128xf32>
    %cst_68 = arith.constant 9.99999974E-6 : f32
    %124 = vector.broadcast %cst_68 : f32 to vector<8x1xf32>
    %125 = arith.addf %121, %124 : vector<8x1xf32>
    %126 = math.rsqrt %125 : vector<8x1xf32>
    %127 = vector.broadcast %126 : vector<8x1xf32> to vector<8x128xf32>
    %128 = arith.mulf %123, %127 : vector<8x128xf32>
    %129 = vector.broadcast %19 : vector<1x128xf32> to vector<8x128xf32>
    %130 = arith.mulf %128, %129 : vector<8x128xf32>
    %131 = vector.broadcast %21 : vector<1x128xf32> to vector<8x128xf32>
    %132 = arith.addf %130, %131 : vector<8x128xf32>
    %c0_69 = arith.constant 0 : index
    %c0_70 = arith.constant 0 : index
    %c0_71 = arith.constant 0 : index
    %133 = vector.load %arg10[%c0_69, %c0_70, %c0_71] : memref<2x128x256xf32, #tpu.memory_space<vmem>>, vector<1x128x256xf32>
    %134 = vector.shape_cast %133 : vector<1x128x256xf32> to vector<128x256xf32>
    %c0_72 = arith.constant 0 : index
    %c0_73 = arith.constant 0 : index
    %c0_74 = arith.constant 0 : index
    %135 = vector.load %arg11[%c0_72, %c0_73, %c0_74] : memref<2x256x128xf32, #tpu.memory_space<vmem>>, vector<1x256x128xf32>
    %136 = vector.shape_cast %135 : vector<1x256x128xf32> to vector<256x128xf32>
    %c0_75 = arith.constant 0 : index
    %c0_76 = arith.constant 0 : index
    %c0_77 = arith.constant 0 : index
    %137 = vector.load %arg12[%c0_75, %c0_76, %c0_77] : memref<2x1x128xf32, #tpu.memory_space<vmem>>, vector<1x1x128xf32>
    %138 = vector.shape_cast %137 : vector<1x1x128xf32> to vector<1x128xf32>
    %c0_78 = arith.constant 0 : index
    %c0_79 = arith.constant 0 : index
    %c0_80 = arith.constant 0 : index
    %139 = vector.load %arg13[%c0_78, %c0_79, %c0_80] : memref<2x1x128xf32, #tpu.memory_space<vmem>>, vector<1x1x128xf32>
    %140 = vector.shape_cast %139 : vector<1x1x128xf32> to vector<1x128xf32>
    %cst_81 = arith.constant dense<0.000000e+00> : vector<8x256xf32>
    %141 = tpu.matmul %132, %134, %cst_81 {dimension_numbers = #tpu.dot_dimension_numbers<[1], [0], [0], [1], [0, 0, 1, 1], [], []>} : vector<8x128xf32>, vector<128x256xf32>, vector<8x256xf32> -> vector<8x256xf32>
    %cst_82 = arith.constant 0.000000e+00 : f32
    %142 = vector.broadcast %cst_82 : f32 to vector<8x256xf32>
    %143 = arith.maximumf %141, %142 : vector<8x256xf32>
    %cst_83 = arith.constant dense<0.000000e+00> : vector<8x128xf32>
    %144 = tpu.matmul %143, %136, %cst_83 {dimension_numbers = #tpu.dot_dimension_numbers<[1], [0], [0], [1], [0, 0, 1, 1], [], []>} : vector<8x256xf32>, vector<256x128xf32>, vector<8x128xf32> -> vector<8x128xf32>
    %145 = arith.addf %144, %132 : vector<8x128xf32>
    %cst_84 = arith.constant dense<0.000000e+00> : vector<8xf32>
    %146 = vector.multi_reduction <add>, %145, %cst_84 [1] : vector<8x128xf32> to vector<8xf32>
    %147 = vector.shape_cast %146 : vector<8xf32> to vector<8x1xf32>
    %cst_85 = arith.constant 1.280000e+02 : f32
    %148 = vector.broadcast %cst_85 : f32 to vector<8x1xf32>
    %149 = arith.divf %147, %148 : vector<8x1xf32>
    %150 = vector.broadcast %149 : vector<8x1xf32> to vector<8x128xf32>
    %151 = arith.subf %145, %150 : vector<8x128xf32>
    %152 = arith.mulf %151, %151 : vector<8x128xf32>
    %cst_86 = arith.constant dense<0.000000e+00> : vector<8xf32>
    %153 = vector.multi_reduction <add>, %152, %cst_86 [1] : vector<8x128xf32> to vector<8xf32>
    %154 = vector.shape_cast %153 : vector<8xf32> to vector<8x1xf32>
    %cst_87 = arith.constant 1.280000e+02 : f32
    %155 = vector.broadcast %cst_87 : f32 to vector<8x1xf32>
    %156 = arith.divf %154, %155 : vector<8x1xf32>
    %157 = vector.broadcast %149 : vector<8x1xf32> to vector<8x128xf32>
    %158 = arith.subf %145, %157 : vector<8x128xf32>
    %cst_88 = arith.constant 9.99999974E-6 : f32
    %159 = vector.broadcast %cst_88 : f32 to vector<8x1xf32>
    %160 = arith.addf %156, %159 : vector<8x1xf32>
    %161 = math.rsqrt %160 : vector<8x1xf32>
    %162 = vector.broadcast %161 : vector<8x1xf32> to vector<8x128xf32>
    %163 = arith.mulf %158, %162 : vector<8x128xf32>
    %164 = vector.broadcast %138 : vector<1x128xf32> to vector<8x128xf32>
    %165 = arith.mulf %163, %164 : vector<8x128xf32>
    %166 = vector.broadcast %140 : vector<1x128xf32> to vector<8x128xf32>
    %167 = arith.addf %165, %166 : vector<8x128xf32>
    %c1_89 = arith.constant 1 : index
    %c0_90 = arith.constant 0 : index
    %c0_91 = arith.constant 0 : index
    %168 = vector.load %arg6[%c1_89, %c0_90, %c0_91] : memref<2x128x128xf32, #tpu.memory_space<vmem>>, vector<1x128x128xf32>
    %169 = vector.shape_cast %168 : vector<1x128x128xf32> to vector<128x128xf32>
    %c1_92 = arith.constant 1 : index
    %c0_93 = arith.constant 0 : index
    %c0_94 = arith.constant 0 : index
    %170 = vector.load %arg7[%c1_92, %c0_93, %c0_94] : memref<2x128x128xf32, #tpu.memory_space<vmem>>, vector<1x128x128xf32>
    %171 = vector.shape_cast %170 : vector<1x128x128xf32> to vector<128x128xf32>
    %c1_95 = arith.constant 1 : index
    %c0_96 = arith.constant 0 : index
    %c0_97 = arith.constant 0 : index
    %172 = vector.load %arg8[%c1_95, %c0_96, %c0_97] : memref<2x1x128xf32, #tpu.memory_space<vmem>>, vector<1x1x128xf32>
    %173 = vector.shape_cast %172 : vector<1x1x128xf32> to vector<1x128xf32>
    %c1_98 = arith.constant 1 : index
    %c0_99 = arith.constant 0 : index
    %c0_100 = arith.constant 0 : index
    %174 = vector.load %arg9[%c1_98, %c0_99, %c0_100] : memref<2x1x128xf32, #tpu.memory_space<vmem>>, vector<1x1x128xf32>
    %175 = vector.shape_cast %174 : vector<1x1x128xf32> to vector<1x128xf32>
    %cst_101 = arith.constant dense<0.000000e+00> : vector<8x128xf32>
    %176 = tpu.matmul %167, %169, %cst_101 {dimension_numbers = #tpu.dot_dimension_numbers<[1], [0], [0], [1], [0, 0, 1, 1], [], []>} : vector<8x128xf32>, vector<128x128xf32>, vector<8x128xf32> -> vector<8x128xf32>
    %cst_102 = arith.constant dense<0.000000e+00> : vector<8x128xf32>
    %177 = tpu.matmul %167, %169, %cst_102 {dimension_numbers = #tpu.dot_dimension_numbers<[1], [0], [0], [1], [0, 0, 1, 1], [], []>} : vector<8x128xf32>, vector<128x128xf32>, vector<8x128xf32> -> vector<8x128xf32>
    %178 = vector.extract_strided_slice %176 {offsets = [0, 0], sizes = [8, 32], strides = [1, 1]} : vector<8x128xf32> to vector<8x32xf32>
    %179 = vector.extract_strided_slice %177 {offsets = [0, 0], sizes = [8, 32], strides = [1, 1]} : vector<8x128xf32> to vector<8x32xf32>
    %180 = vector.extract_strided_slice %177 {offsets = [0, 0], sizes = [8, 32], strides = [1, 1]} : vector<8x128xf32> to vector<8x32xf32>
    %cst_103 = arith.constant dense<0.000000e+00> : vector<8x8xf32>
    %181 = tpu.matmul %178, %179, %cst_103 {dimension_numbers = #tpu.dot_dimension_numbers<[1], [1], [0], [0], [0, 0, 1, 0], [], []>} : vector<8x32xf32>, vector<8x32xf32>, vector<8x8xf32> -> vector<8x8xf32>
    %cst_104 = arith.constant 0.176776692 : f32
    %182 = vector.broadcast %cst_104 : f32 to vector<8x8xf32>
    %183 = arith.mulf %181, %182 : vector<8x8xf32>
    %cst_105 = arith.constant -1.000000e+09 : f32
    %184 = vector.broadcast %cst_105 : f32 to vector<8x8xf32>
    %185 = arith.select %3, %184, %183 : vector<8x8xi1>, vector<8x8xf32>
    %cst_106 = arith.constant dense<0xFF800000> : vector<8xf32>
    %186 = vector.multi_reduction <maximumf>, %185, %cst_106 [1] : vector<8x8xf32> to vector<8xf32>
    %187 = vector.shape_cast %186 : vector<8xf32> to vector<8x1xf32>
    %188 = vector.broadcast %187 : vector<8x1xf32> to vector<8x8xf32>
    %189 = arith.subf %185, %188 : vector<8x8xf32>
    %190 = math.exp %189 : vector<8x8xf32>
    %cst_107 = arith.constant dense<0.000000e+00> : vector<8xf32>
    %191 = vector.multi_reduction <add>, %190, %cst_107 [1] : vector<8x8xf32> to vector<8xf32>
    %192 = vector.shape_cast %191 : vector<8xf32> to vector<8x1xf32>
    %193 = vector.broadcast %192 : vector<8x1xf32> to vector<8x8xf32>
    %194 = arith.divf %190, %193 : vector<8x8xf32>
    %c0_108 = arith.constant 0 : index
    %c4 = arith.constant 4 : index
    %c0_109 = arith.constant 0 : index
    %c0_110 = arith.constant 0 : index
    %195 = vector.load %arg28[%c0_108, %c4, %c0_109, %c0_110] : memref<1x8x8x8xf32, #tpu.memory_space<vmem>>, vector<1x1x8x8xf32>
    %196 = vector.shape_cast %195 : vector<1x1x8x8xf32> to vector<8x8xf32>
    %197 = vector.shape_cast %194 : vector<8x8xf32> to vector<1x1x8x8xf32>
    tpu.vector_store %arg28[%c0_108, %c4, %c0_109, %c0_110], %197 {strides = array<i32>} : memref<1x8x8x8xf32, #tpu.memory_space<vmem>>, vector<1x1x8x8xf32>,
    %cst_111 = arith.constant dense<0.000000e+00> : vector<8x32xf32>
    %198 = tpu.matmul %194, %180, %cst_111 {dimension_numbers = #tpu.dot_dimension_numbers<[1], [0], [0], [1], [0, 0, 1, 1], [], []>} : vector<8x8xf32>, vector<8x32xf32>, vector<8x32xf32> -> vector<8x32xf32>
    %199 = vector.extract_strided_slice %176 {offsets = [0, 32], sizes = [8, 32], strides = [1, 1]} : vector<8x128xf32> to vector<8x32xf32>
    %200 = vector.extract_strided_slice %177 {offsets = [0, 32], sizes = [8, 32], strides = [1, 1]} : vector<8x128xf32> to vector<8x32xf32>
    %201 = vector.extract_strided_slice %177 {offsets = [0, 32], sizes = [8, 32], strides = [1, 1]} : vector<8x128xf32> to vector<8x32xf32>
    %cst_112 = arith.constant dense<0.000000e+00> : vector<8x8xf32>
    %202 = tpu.matmul %199, %200, %cst_112 {dimension_numbers = #tpu.dot_dimension_numbers<[1], [1], [0], [0], [0, 0, 1, 0], [], []>} : vector<8x32xf32>, vector<8x32xf32>, vector<8x8xf32> -> vector<8x8xf32>
    %cst_113 = arith.constant 0.176776692 : f32
    %203 = vector.broadcast %cst_113 : f32 to vector<8x8xf32>
    %204 = arith.mulf %202, %203 : vector<8x8xf32>
    %cst_114 = arith.constant -1.000000e+09 : f32
    %205 = vector.broadcast %cst_114 : f32 to vector<8x8xf32>
    %206 = arith.select %3, %205, %204 : vector<8x8xi1>, vector<8x8xf32>
    %cst_115 = arith.constant dense<0xFF800000> : vector<8xf32>
    %207 = vector.multi_reduction <maximumf>, %206, %cst_115 [1] : vector<8x8xf32> to vector<8xf32>
    %208 = vector.shape_cast %207 : vector<8xf32> to vector<8x1xf32>
    %209 = vector.broadcast %208 : vector<8x1xf32> to vector<8x8xf32>
    %210 = arith.subf %206, %209 : vector<8x8xf32>
    %211 = math.exp %210 : vector<8x8xf32>
    %cst_116 = arith.constant dense<0.000000e+00> : vector<8xf32>
    %212 = vector.multi_reduction <add>, %211, %cst_116 [1] : vector<8x8xf32> to vector<8xf32>
    %213 = vector.shape_cast %212 : vector<8xf32> to vector<8x1xf32>
    %214 = vector.broadcast %213 : vector<8x1xf32> to vector<8x8xf32>
    %215 = arith.divf %211, %214 : vector<8x8xf32>
    %c0_117 = arith.constant 0 : index
    %c5 = arith.constant 5 : index
    %c0_118 = arith.constant 0 : index
    %c0_119 = arith.constant 0 : index
    %216 = vector.load %arg28[%c0_117, %c5, %c0_118, %c0_119] : memref<1x8x8x8xf32, #tpu.memory_space<vmem>>, vector<1x1x8x8xf32>
    %217 = vector.shape_cast %216 : vector<1x1x8x8xf32> to vector<8x8xf32>
    %218 = vector.shape_cast %215 : vector<8x8xf32> to vector<1x1x8x8xf32>
    tpu.vector_store %arg28[%c0_117, %c5, %c0_118, %c0_119], %218 {strides = array<i32>} : memref<1x8x8x8xf32, #tpu.memory_space<vmem>>, vector<1x1x8x8xf32>,
    %cst_120 = arith.constant dense<0.000000e+00> : vector<8x32xf32>
    %219 = tpu.matmul %215, %201, %cst_120 {dimension_numbers = #tpu.dot_dimension_numbers<[1], [0], [0], [1], [0, 0, 1, 1], [], []>} : vector<8x8xf32>, vector<8x32xf32>, vector<8x32xf32> -> vector<8x32xf32>
    %220 = vector.extract_strided_slice %176 {offsets = [0, 64], sizes = [8, 32], strides = [1, 1]} : vector<8x128xf32> to vector<8x32xf32>
    %221 = vector.extract_strided_slice %177 {offsets = [0, 64], sizes = [8, 32], strides = [1, 1]} : vector<8x128xf32> to vector<8x32xf32>
    %222 = vector.extract_strided_slice %177 {offsets = [0, 64], sizes = [8, 32], strides = [1, 1]} : vector<8x128xf32> to vector<8x32xf32>
    %cst_121 = arith.constant dense<0.000000e+00> : vector<8x8xf32>
    %223 = tpu.matmul %220, %221, %cst_121 {dimension_numbers = #tpu.dot_dimension_numbers<[1], [1], [0], [0], [0, 0, 1, 0], [], []>} : vector<8x32xf32>, vector<8x32xf32>, vector<8x8xf32> -> vector<8x8xf32>
    %cst_122 = arith.constant 0.176776692 : f32
    %224 = vector.broadcast %cst_122 : f32 to vector<8x8xf32>
    %225 = arith.mulf %223, %224 : vector<8x8xf32>
    %cst_123 = arith.constant -1.000000e+09 : f32
    %226 = vector.broadcast %cst_123 : f32 to vector<8x8xf32>
    %227 = arith.select %3, %226, %225 : vector<8x8xi1>, vector<8x8xf32>
    %cst_124 = arith.constant dense<0xFF800000> : vector<8xf32>
    %228 = vector.multi_reduction <maximumf>, %227, %cst_124 [1] : vector<8x8xf32> to vector<8xf32>
    %229 = vector.shape_cast %228 : vector<8xf32> to vector<8x1xf32>
    %230 = vector.broadcast %229 : vector<8x1xf32> to vector<8x8xf32>
    %231 = arith.subf %227, %230 : vector<8x8xf32>
    %232 = math.exp %231 : vector<8x8xf32>
    %cst_125 = arith.constant dense<0.000000e+00> : vector<8xf32>
    %233 = vector.multi_reduction <add>, %232, %cst_125 [1] : vector<8x8xf32> to vector<8xf32>
    %234 = vector.shape_cast %233 : vector<8xf32> to vector<8x1xf32>
    %235 = vector.broadcast %234 : vector<8x1xf32> to vector<8x8xf32>
    %236 = arith.divf %232, %235 : vector<8x8xf32>
    %c0_126 = arith.constant 0 : index
    %c6 = arith.constant 6 : index
    %c0_127 = arith.constant 0 : index
    %c0_128 = arith.constant 0 : index
    %237 = vector.load %arg28[%c0_126, %c6, %c0_127, %c0_128] : memref<1x8x8x8xf32, #tpu.memory_space<vmem>>, vector<1x1x8x8xf32>
    %238 = vector.shape_cast %237 : vector<1x1x8x8xf32> to vector<8x8xf32>
    %239 = vector.shape_cast %236 : vector<8x8xf32> to vector<1x1x8x8xf32>
    tpu.vector_store %arg28[%c0_126, %c6, %c0_127, %c0_128], %239 {strides = array<i32>} : memref<1x8x8x8xf32, #tpu.memory_space<vmem>>, vector<1x1x8x8xf32>,
    %cst_129 = arith.constant dense<0.000000e+00> : vector<8x32xf32>
    %240 = tpu.matmul %236, %222, %cst_129 {dimension_numbers = #tpu.dot_dimension_numbers<[1], [0], [0], [1], [0, 0, 1, 1], [], []>} : vector<8x8xf32>, vector<8x32xf32>, vector<8x32xf32> -> vector<8x32xf32>
    %241 = vector.extract_strided_slice %176 {offsets = [0, 96], sizes = [8, 32], strides = [1, 1]} : vector<8x128xf32> to vector<8x32xf32>
    %242 = vector.extract_strided_slice %177 {offsets = [0, 96], sizes = [8, 32], strides = [1, 1]} : vector<8x128xf32> to vector<8x32xf32>
    %243 = vector.extract_strided_slice %177 {offsets = [0, 96], sizes = [8, 32], strides = [1, 1]} : vector<8x128xf32> to vector<8x32xf32>
    %cst_130 = arith.constant dense<0.000000e+00> : vector<8x8xf32>
    %244 = tpu.matmul %241, %242, %cst_130 {dimension_numbers = #tpu.dot_dimension_numbers<[1], [1], [0], [0], [0, 0, 1, 0], [], []>} : vector<8x32xf32>, vector<8x32xf32>, vector<8x8xf32> -> vector<8x8xf32>
    %cst_131 = arith.constant 0.176776692 : f32
    %245 = vector.broadcast %cst_131 : f32 to vector<8x8xf32>
    %246 = arith.mulf %244, %245 : vector<8x8xf32>
    %cst_132 = arith.constant -1.000000e+09 : f32
    %247 = vector.broadcast %cst_132 : f32 to vector<8x8xf32>
    %248 = arith.select %3, %247, %246 : vector<8x8xi1>, vector<8x8xf32>
    %cst_133 = arith.constant dense<0xFF800000> : vector<8xf32>
    %249 = vector.multi_reduction <maximumf>, %248, %cst_133 [1] : vector<8x8xf32> to vector<8xf32>
    %250 = vector.shape_cast %249 : vector<8xf32> to vector<8x1xf32>
    %251 = vector.broadcast %250 : vector<8x1xf32> to vector<8x8xf32>
    %252 = arith.subf %248, %251 : vector<8x8xf32>
    %253 = math.exp %252 : vector<8x8xf32>
    %cst_134 = arith.constant dense<0.000000e+00> : vector<8xf32>
    %254 = vector.multi_reduction <add>, %253, %cst_134 [1] : vector<8x8xf32> to vector<8xf32>
    %255 = vector.shape_cast %254 : vector<8xf32> to vector<8x1xf32>
    %256 = vector.broadcast %255 : vector<8x1xf32> to vector<8x8xf32>
    %257 = arith.divf %253, %256 : vector<8x8xf32>
    %c0_135 = arith.constant 0 : index
    %c7 = arith.constant 7 : index
    %c0_136 = arith.constant 0 : index
    %c0_137 = arith.constant 0 : index
    %258 = vector.load %arg28[%c0_135, %c7, %c0_136, %c0_137] : memref<1x8x8x8xf32, #tpu.memory_space<vmem>>, vector<1x1x8x8xf32>
    %259 = vector.shape_cast %258 : vector<1x1x8x8xf32> to vector<8x8xf32>
    %260 = vector.shape_cast %257 : vector<8x8xf32> to vector<1x1x8x8xf32>
    tpu.vector_store %arg28[%c0_135, %c7, %c0_136, %c0_137], %260 {strides = array<i32>} : memref<1x8x8x8xf32, #tpu.memory_space<vmem>>, vector<1x1x8x8xf32>,
    %cst_138 = arith.constant dense<0.000000e+00> : vector<8x32xf32>
    %261 = tpu.matmul %257, %243, %cst_138 {dimension_numbers = #tpu.dot_dimension_numbers<[1], [0], [0], [1], [0, 0, 1, 1], [], []>} : vector<8x8xf32>, vector<8x32xf32>, vector<8x32xf32> -> vector<8x32xf32>
    %262 = tpu.concatenate %198, %219, %240, %261 in 1 : vector<8x32xf32>, vector<8x32xf32>, vector<8x32xf32>, vector<8x32xf32> -> vector<8x128xf32>
    %cst_139 = arith.constant dense<0.000000e+00> : vector<8x128xf32>
    %263 = tpu.matmul %262, %171, %cst_139 {dimension_numbers = #tpu.dot_dimension_numbers<[1], [0], [0], [1], [0, 0, 1, 1], [], []>} : vector<8x128xf32>, vector<128x128xf32>, vector<8x128xf32> -> vector<8x128xf32>
    %264 = arith.addf %263, %167 : vector<8x128xf32>
    %cst_140 = arith.constant dense<0.000000e+00> : vector<8xf32>
    %265 = vector.multi_reduction <add>, %264, %cst_140 [1] : vector<8x128xf32> to vector<8xf32>
    %266 = vector.shape_cast %265 : vector<8xf32> to vector<8x1xf32>
    %cst_141 = arith.constant 1.280000e+02 : f32
    %267 = vector.broadcast %cst_141 : f32 to vector<8x1xf32>
    %268 = arith.divf %266, %267 : vector<8x1xf32>
    %269 = vector.broadcast %268 : vector<8x1xf32> to vector<8x128xf32>
    %270 = arith.subf %264, %269 : vector<8x128xf32>
    %271 = arith.mulf %270, %270 : vector<8x128xf32>
    %cst_142 = arith.constant dense<0.000000e+00> : vector<8xf32>
    %272 = vector.multi_reduction <add>, %271, %cst_142 [1] : vector<8x128xf32> to vector<8xf32>
    %273 = vector.shape_cast %272 : vector<8xf32> to vector<8x1xf32>
    %cst_143 = arith.constant 1.280000e+02 : f32
    %274 = vector.broadcast %cst_143 : f32 to vector<8x1xf32>
    %275 = arith.divf %273, %274 : vector<8x1xf32>
    %276 = vector.broadcast %268 : vector<8x1xf32> to vector<8x128xf32>
    %277 = arith.subf %264, %276 : vector<8x128xf32>
    %cst_144 = arith.constant 9.99999974E-6 : f32
    %278 = vector.broadcast %cst_144 : f32 to vector<8x1xf32>
    %279 = arith.addf %275, %278 : vector<8x1xf32>
    %280 = math.rsqrt %279 : vector<8x1xf32>
    %281 = vector.broadcast %280 : vector<8x1xf32> to vector<8x128xf32>
    %282 = arith.mulf %277, %281 : vector<8x128xf32>
    %283 = vector.broadcast %173 : vector<1x128xf32> to vector<8x128xf32>
    %284 = arith.mulf %282, %283 : vector<8x128xf32>
    %285 = vector.broadcast %175 : vector<1x128xf32> to vector<8x128xf32>
    %286 = arith.addf %284, %285 : vector<8x128xf32>
    %c1_145 = arith.constant 1 : index
    %c0_146 = arith.constant 0 : index
    %c0_147 = arith.constant 0 : index
    %287 = vector.load %arg10[%c1_145, %c0_146, %c0_147] : memref<2x128x256xf32, #tpu.memory_space<vmem>>, vector<1x128x256xf32>
    %288 = vector.shape_cast %287 : vector<1x128x256xf32> to vector<128x256xf32>
    %c1_148 = arith.constant 1 : index
    %c0_149 = arith.constant 0 : index
    %c0_150 = arith.constant 0 : index
    %289 = vector.load %arg11[%c1_148, %c0_149, %c0_150] : memref<2x256x128xf32, #tpu.memory_space<vmem>>, vector<1x256x128xf32>
    %290 = vector.shape_cast %289 : vector<1x256x128xf32> to vector<256x128xf32>
    %c1_151 = arith.constant 1 : index
    %c0_152 = arith.constant 0 : index
    %c0_153 = arith.constant 0 : index
    %291 = vector.load %arg12[%c1_151, %c0_152, %c0_153] : memref<2x1x128xf32, #tpu.memory_space<vmem>>, vector<1x1x128xf32>
    %292 = vector.shape_cast %291 : vector<1x1x128xf32> to vector<1x128xf32>
    %c1_154 = arith.constant 1 : index
    %c0_155 = arith.constant 0 : index
    %c0_156 = arith.constant 0 : index
    %293 = vector.load %arg13[%c1_154, %c0_155, %c0_156] : memref<2x1x128xf32, #tpu.memory_space<vmem>>, vector<1x1x128xf32>
    %294 = vector.shape_cast %293 : vector<1x1x128xf32> to vector<1x128xf32>
    %cst_157 = arith.constant dense<0.000000e+00> : vector<8x256xf32>
    %295 = tpu.matmul %286, %288, %cst_157 {dimension_numbers = #tpu.dot_dimension_numbers<[1], [0], [0], [1], [0, 0, 1, 1], [], []>} : vector<8x128xf32>, vector<128x256xf32>, vector<8x256xf32> -> vector<8x256xf32>
    %cst_158 = arith.constant 0.000000e+00 : f32
    %296 = vector.broadcast %cst_158 : f32 to vector<8x256xf32>
    %297 = arith.maximumf %295, %296 : vector<8x256xf32>
    %cst_159 = arith.constant dense<0.000000e+00> : vector<8x128xf32>
    %298 = tpu.matmul %297, %290, %cst_159 {dimension_numbers = #tpu.dot_dimension_numbers<[1], [0], [0], [1], [0, 0, 1, 1], [], []>} : vector<8x256xf32>, vector<256x128xf32>, vector<8x128xf32> -> vector<8x128xf32>
    %299 = arith.addf %298, %286 : vector<8x128xf32>
    %cst_160 = arith.constant dense<0.000000e+00> : vector<8xf32>
    %300 = vector.multi_reduction <add>, %299, %cst_160 [1] : vector<8x128xf32> to vector<8xf32>
    %301 = vector.shape_cast %300 : vector<8xf32> to vector<8x1xf32>
    %cst_161 = arith.constant 1.280000e+02 : f32
    %302 = vector.broadcast %cst_161 : f32 to vector<8x1xf32>
    %303 = arith.divf %301, %302 : vector<8x1xf32>
    %304 = vector.broadcast %303 : vector<8x1xf32> to vector<8x128xf32>
    %305 = arith.subf %299, %304 : vector<8x128xf32>
    %306 = arith.mulf %305, %305 : vector<8x128xf32>
    %cst_162 = arith.constant dense<0.000000e+00> : vector<8xf32>
    %307 = vector.multi_reduction <add>, %306, %cst_162 [1] : vector<8x128xf32> to vector<8xf32>
    %308 = vector.shape_cast %307 : vector<8xf32> to vector<8x1xf32>
    %cst_163 = arith.constant 1.280000e+02 : f32
    %309 = vector.broadcast %cst_163 : f32 to vector<8x1xf32>
    %310 = arith.divf %308, %309 : vector<8x1xf32>
    %311 = vector.broadcast %303 : vector<8x1xf32> to vector<8x128xf32>
    %312 = arith.subf %299, %311 : vector<8x128xf32>
    %cst_164 = arith.constant 9.99999974E-6 : f32
    %313 = vector.broadcast %cst_164 : f32 to vector<8x1xf32>
    %314 = arith.addf %310, %313 : vector<8x1xf32>
    %315 = math.rsqrt %314 : vector<8x1xf32>
    %316 = vector.broadcast %315 : vector<8x1xf32> to vector<8x128xf32>
    %317 = arith.mulf %312, %316 : vector<8x128xf32>
    %318 = vector.broadcast %292 : vector<1x128xf32> to vector<8x128xf32>
    %319 = arith.mulf %317, %318 : vector<8x128xf32>
    %320 = vector.broadcast %294 : vector<1x128xf32> to vector<8x128xf32>
    %321 = arith.addf %319, %320 : vector<8x128xf32>
    %c0_165 = arith.constant 0 : index
    %c0_166 = arith.constant 0 : index
    %c0_167 = arith.constant 0 : index
    %322 = vector.load %arg2[%c0_165, %c0_166, %c0_167] : memref<1x8x128xf32, #tpu.memory_space<vmem>>, vector<1x8x128xf32>
    %323 = vector.shape_cast %322 : vector<1x8x128xf32> to vector<8x128xf32>
    %c0_168 = arith.constant 0 : index
    %c0_169 = arith.constant 0 : index
    %c0_170 = arith.constant 0 : index
    %324 = vector.load %arg14[%c0_168, %c0_169, %c0_170] : memref<2x128x128xf32, #tpu.memory_space<vmem>>, vector<1x128x128xf32>
    %325 = vector.shape_cast %324 : vector<1x128x128xf32> to vector<128x128xf32>
    %c0_171 = arith.constant 0 : index
    %c0_172 = arith.constant 0 : index
    %c0_173 = arith.constant 0 : index
    %326 = vector.load %arg15[%c0_171, %c0_172, %c0_173] : memref<2x128x128xf32, #tpu.memory_space<vmem>>, vector<1x128x128xf32>
    %327 = vector.shape_cast %326 : vector<1x128x128xf32> to vector<128x128xf32>
    %c0_174 = arith.constant 0 : index
    %c0_175 = arith.constant 0 : index
    %c0_176 = arith.constant 0 : index
    %328 = vector.load %arg16[%c0_174, %c0_175, %c0_176] : memref<2x1x128xf32, #tpu.memory_space<vmem>>, vector<1x1x128xf32>
    %329 = vector.shape_cast %328 : vector<1x1x128xf32> to vector<1x128xf32>
    %c0_177 = arith.constant 0 : index
    %c0_178 = arith.constant 0 : index
    %c0_179 = arith.constant 0 : index
    %330 = vector.load %arg17[%c0_177, %c0_178, %c0_179] : memref<2x1x128xf32, #tpu.memory_space<vmem>>, vector<1x1x128xf32>
    %331 = vector.shape_cast %330 : vector<1x1x128xf32> to vector<1x128xf32>
    %cst_180 = arith.constant dense<0.000000e+00> : vector<8x128xf32>
    %332 = tpu.matmul %323, %325, %cst_180 {dimension_numbers = #tpu.dot_dimension_numbers<[1], [0], [0], [1], [0, 0, 1, 1], [], []>} : vector<8x128xf32>, vector<128x128xf32>, vector<8x128xf32> -> vector<8x128xf32>
    %cst_181 = arith.constant dense<0.000000e+00> : vector<8x128xf32>
    %333 = tpu.matmul %323, %325, %cst_181 {dimension_numbers = #tpu.dot_dimension_numbers<[1], [0], [0], [1], [0, 0, 1, 1], [], []>} : vector<8x128xf32>, vector<128x128xf32>, vector<8x128xf32> -> vector<8x128xf32>
    %334 = vector.extract_strided_slice %332 {offsets = [0, 0], sizes = [8, 32], strides = [1, 1]} : vector<8x128xf32> to vector<8x32xf32>
    %335 = vector.extract_strided_slice %333 {offsets = [0, 0], sizes = [8, 32], strides = [1, 1]} : vector<8x128xf32> to vector<8x32xf32>
    %336 = vector.extract_strided_slice %333 {offsets = [0, 0], sizes = [8, 32], strides = [1, 1]} : vector<8x128xf32> to vector<8x32xf32>
    %cst_182 = arith.constant dense<0.000000e+00> : vector<8x8xf32>
    %337 = tpu.matmul %334, %335, %cst_182 {dimension_numbers = #tpu.dot_dimension_numbers<[1], [1], [0], [0], [0, 0, 1, 0], [], []>} : vector<8x32xf32>, vector<8x32xf32>, vector<8x8xf32> -> vector<8x8xf32>
    %cst_183 = arith.constant 0.176776692 : f32
    %338 = vector.broadcast %cst_183 : f32 to vector<8x8xf32>
    %339 = arith.mulf %337, %338 : vector<8x8xf32>
    %cst_184 = arith.constant -1.000000e+09 : f32
    %340 = vector.broadcast %cst_184 : f32 to vector<8x8xf32>
    %341 = arith.select %7, %340, %339 : vector<8x8xi1>, vector<8x8xf32>
    %cst_185 = arith.constant dense<0xFF800000> : vector<8xf32>
    %342 = vector.multi_reduction <maximumf>, %341, %cst_185 [1] : vector<8x8xf32> to vector<8xf32>
    %343 = vector.shape_cast %342 : vector<8xf32> to vector<8x1xf32>
    %344 = vector.broadcast %343 : vector<8x1xf32> to vector<8x8xf32>
    %345 = arith.subf %341, %344 : vector<8x8xf32>
    %346 = math.exp %345 : vector<8x8xf32>
    %cst_186 = arith.constant dense<0.000000e+00> : vector<8xf32>
    %347 = vector.multi_reduction <add>, %346, %cst_186 [1] : vector<8x8xf32> to vector<8xf32>
    %348 = vector.shape_cast %347 : vector<8xf32> to vector<8x1xf32>
    %349 = vector.broadcast %348 : vector<8x1xf32> to vector<8x8xf32>
    %350 = arith.divf %346, %349 : vector<8x8xf32>
    %c0_187 = arith.constant 0 : index
    %c0_188 = arith.constant 0 : index
    %c0_189 = arith.constant 0 : index
    %c0_190 = arith.constant 0 : index
    %351 = vector.load %arg29[%c0_187, %c0_188, %c0_189, %c0_190] : memref<1x8x8x8xf32, #tpu.memory_space<vmem>>, vector<1x1x8x8xf32>
    %352 = vector.shape_cast %351 : vector<1x1x8x8xf32> to vector<8x8xf32>
    %353 = vector.shape_cast %350 : vector<8x8xf32> to vector<1x1x8x8xf32>
    tpu.vector_store %arg29[%c0_187, %c0_188, %c0_189, %c0_190], %353 {strides = array<i32>} : memref<1x8x8x8xf32, #tpu.memory_space<vmem>>, vector<1x1x8x8xf32>,
    %cst_191 = arith.constant dense<0.000000e+00> : vector<8x32xf32>
    %354 = tpu.matmul %350, %336, %cst_191 {dimension_numbers = #tpu.dot_dimension_numbers<[1], [0], [0], [1], [0, 0, 1, 1], [], []>} : vector<8x8xf32>, vector<8x32xf32>, vector<8x32xf32> -> vector<8x32xf32>
    %355 = vector.extract_strided_slice %332 {offsets = [0, 32], sizes = [8, 32], strides = [1, 1]} : vector<8x128xf32> to vector<8x32xf32>
    %356 = vector.extract_strided_slice %333 {offsets = [0, 32], sizes = [8, 32], strides = [1, 1]} : vector<8x128xf32> to vector<8x32xf32>
    %357 = vector.extract_strided_slice %333 {offsets = [0, 32], sizes = [8, 32], strides = [1, 1]} : vector<8x128xf32> to vector<8x32xf32>
    %cst_192 = arith.constant dense<0.000000e+00> : vector<8x8xf32>
    %358 = tpu.matmul %355, %356, %cst_192 {dimension_numbers = #tpu.dot_dimension_numbers<[1], [1], [0], [0], [0, 0, 1, 0], [], []>} : vector<8x32xf32>, vector<8x32xf32>, vector<8x8xf32> -> vector<8x8xf32>
    %cst_193 = arith.constant 0.176776692 : f32
    %359 = vector.broadcast %cst_193 : f32 to vector<8x8xf32>
    %360 = arith.mulf %358, %359 : vector<8x8xf32>
    %cst_194 = arith.constant -1.000000e+09 : f32
    %361 = vector.broadcast %cst_194 : f32 to vector<8x8xf32>
    %362 = arith.select %7, %361, %360 : vector<8x8xi1>, vector<8x8xf32>
    %cst_195 = arith.constant dense<0xFF800000> : vector<8xf32>
    %363 = vector.multi_reduction <maximumf>, %362, %cst_195 [1] : vector<8x8xf32> to vector<8xf32>
    %364 = vector.shape_cast %363 : vector<8xf32> to vector<8x1xf32>
    %365 = vector.broadcast %364 : vector<8x1xf32> to vector<8x8xf32>
    %366 = arith.subf %362, %365 : vector<8x8xf32>
    %367 = math.exp %366 : vector<8x8xf32>
    %cst_196 = arith.constant dense<0.000000e+00> : vector<8xf32>
    %368 = vector.multi_reduction <add>, %367, %cst_196 [1] : vector<8x8xf32> to vector<8xf32>
    %369 = vector.shape_cast %368 : vector<8xf32> to vector<8x1xf32>
    %370 = vector.broadcast %369 : vector<8x1xf32> to vector<8x8xf32>
    %371 = arith.divf %367, %370 : vector<8x8xf32>
    %c0_197 = arith.constant 0 : index
    %c1_198 = arith.constant 1 : index
    %c0_199 = arith.constant 0 : index
    %c0_200 = arith.constant 0 : index
    %372 = vector.load %arg29[%c0_197, %c1_198, %c0_199, %c0_200] : memref<1x8x8x8xf32, #tpu.memory_space<vmem>>, vector<1x1x8x8xf32>
    %373 = vector.shape_cast %372 : vector<1x1x8x8xf32> to vector<8x8xf32>
    %374 = vector.shape_cast %371 : vector<8x8xf32> to vector<1x1x8x8xf32>
    tpu.vector_store %arg29[%c0_197, %c1_198, %c0_199, %c0_200], %374 {strides = array<i32>} : memref<1x8x8x8xf32, #tpu.memory_space<vmem>>, vector<1x1x8x8xf32>,
    %cst_201 = arith.constant dense<0.000000e+00> : vector<8x32xf32>
    %375 = tpu.matmul %371, %357, %cst_201 {dimension_numbers = #tpu.dot_dimension_numbers<[1], [0], [0], [1], [0, 0, 1, 1], [], []>} : vector<8x8xf32>, vector<8x32xf32>, vector<8x32xf32> -> vector<8x32xf32>
    %376 = vector.extract_strided_slice %332 {offsets = [0, 64], sizes = [8, 32], strides = [1, 1]} : vector<8x128xf32> to vector<8x32xf32>
    %377 = vector.extract_strided_slice %333 {offsets = [0, 64], sizes = [8, 32], strides = [1, 1]} : vector<8x128xf32> to vector<8x32xf32>
    %378 = vector.extract_strided_slice %333 {offsets = [0, 64], sizes = [8, 32], strides = [1, 1]} : vector<8x128xf32> to vector<8x32xf32>
    %cst_202 = arith.constant dense<0.000000e+00> : vector<8x8xf32>
    %379 = tpu.matmul %376, %377, %cst_202 {dimension_numbers = #tpu.dot_dimension_numbers<[1], [1], [0], [0], [0, 0, 1, 0], [], []>} : vector<8x32xf32>, vector<8x32xf32>, vector<8x8xf32> -> vector<8x8xf32>
    %cst_203 = arith.constant 0.176776692 : f32
    %380 = vector.broadcast %cst_203 : f32 to vector<8x8xf32>
    %381 = arith.mulf %379, %380 : vector<8x8xf32>
    %cst_204 = arith.constant -1.000000e+09 : f32
    %382 = vector.broadcast %cst_204 : f32 to vector<8x8xf32>
    %383 = arith.select %7, %382, %381 : vector<8x8xi1>, vector<8x8xf32>
    %cst_205 = arith.constant dense<0xFF800000> : vector<8xf32>
    %384 = vector.multi_reduction <maximumf>, %383, %cst_205 [1] : vector<8x8xf32> to vector<8xf32>
    %385 = vector.shape_cast %384 : vector<8xf32> to vector<8x1xf32>
    %386 = vector.broadcast %385 : vector<8x1xf32> to vector<8x8xf32>
    %387 = arith.subf %383, %386 : vector<8x8xf32>
    %388 = math.exp %387 : vector<8x8xf32>
    %cst_206 = arith.constant dense<0.000000e+00> : vector<8xf32>
    %389 = vector.multi_reduction <add>, %388, %cst_206 [1] : vector<8x8xf32> to vector<8xf32>
    %390 = vector.shape_cast %389 : vector<8xf32> to vector<8x1xf32>
    %391 = vector.broadcast %390 : vector<8x1xf32> to vector<8x8xf32>
    %392 = arith.divf %388, %391 : vector<8x8xf32>
    %c0_207 = arith.constant 0 : index
    %c2_208 = arith.constant 2 : index
    %c0_209 = arith.constant 0 : index
    %c0_210 = arith.constant 0 : index
    %393 = vector.load %arg29[%c0_207, %c2_208, %c0_209, %c0_210] : memref<1x8x8x8xf32, #tpu.memory_space<vmem>>, vector<1x1x8x8xf32>
    %394 = vector.shape_cast %393 : vector<1x1x8x8xf32> to vector<8x8xf32>
    %395 = vector.shape_cast %392 : vector<8x8xf32> to vector<1x1x8x8xf32>
    tpu.vector_store %arg29[%c0_207, %c2_208, %c0_209, %c0_210], %395 {strides = array<i32>} : memref<1x8x8x8xf32, #tpu.memory_space<vmem>>, vector<1x1x8x8xf32>,
    %cst_211 = arith.constant dense<0.000000e+00> : vector<8x32xf32>
    %396 = tpu.matmul %392, %378, %cst_211 {dimension_numbers = #tpu.dot_dimension_numbers<[1], [0], [0], [1], [0, 0, 1, 1], [], []>} : vector<8x8xf32>, vector<8x32xf32>, vector<8x32xf32> -> vector<8x32xf32>
    %397 = vector.extract_strided_slice %332 {offsets = [0, 96], sizes = [8, 32], strides = [1, 1]} : vector<8x128xf32> to vector<8x32xf32>
    %398 = vector.extract_strided_slice %333 {offsets = [0, 96], sizes = [8, 32], strides = [1, 1]} : vector<8x128xf32> to vector<8x32xf32>
    %399 = vector.extract_strided_slice %333 {offsets = [0, 96], sizes = [8, 32], strides = [1, 1]} : vector<8x128xf32> to vector<8x32xf32>
    %cst_212 = arith.constant dense<0.000000e+00> : vector<8x8xf32>
    %400 = tpu.matmul %397, %398, %cst_212 {dimension_numbers = #tpu.dot_dimension_numbers<[1], [1], [0], [0], [0, 0, 1, 0], [], []>} : vector<8x32xf32>, vector<8x32xf32>, vector<8x8xf32> -> vector<8x8xf32>
    %cst_213 = arith.constant 0.176776692 : f32
    %401 = vector.broadcast %cst_213 : f32 to vector<8x8xf32>
    %402 = arith.mulf %400, %401 : vector<8x8xf32>
    %cst_214 = arith.constant -1.000000e+09 : f32
    %403 = vector.broadcast %cst_214 : f32 to vector<8x8xf32>
    %404 = arith.select %7, %403, %402 : vector<8x8xi1>, vector<8x8xf32>
    %cst_215 = arith.constant dense<0xFF800000> : vector<8xf32>
    %405 = vector.multi_reduction <maximumf>, %404, %cst_215 [1] : vector<8x8xf32> to vector<8xf32>
    %406 = vector.shape_cast %405 : vector<8xf32> to vector<8x1xf32>
    %407 = vector.broadcast %406 : vector<8x1xf32> to vector<8x8xf32>
    %408 = arith.subf %404, %407 : vector<8x8xf32>
    %409 = math.exp %408 : vector<8x8xf32>
    %cst_216 = arith.constant dense<0.000000e+00> : vector<8xf32>
    %410 = vector.multi_reduction <add>, %409, %cst_216 [1] : vector<8x8xf32> to vector<8xf32>
    %411 = vector.shape_cast %410 : vector<8xf32> to vector<8x1xf32>
    %412 = vector.broadcast %411 : vector<8x1xf32> to vector<8x8xf32>
    %413 = arith.divf %409, %412 : vector<8x8xf32>
    %c0_217 = arith.constant 0 : index
    %c3_218 = arith.constant 3 : index
    %c0_219 = arith.constant 0 : index
    %c0_220 = arith.constant 0 : index
    %414 = vector.load %arg29[%c0_217, %c3_218, %c0_219, %c0_220] : memref<1x8x8x8xf32, #tpu.memory_space<vmem>>, vector<1x1x8x8xf32>
    %415 = vector.shape_cast %414 : vector<1x1x8x8xf32> to vector<8x8xf32>
    %416 = vector.shape_cast %413 : vector<8x8xf32> to vector<1x1x8x8xf32>
    tpu.vector_store %arg29[%c0_217, %c3_218, %c0_219, %c0_220], %416 {strides = array<i32>} : memref<1x8x8x8xf32, #tpu.memory_space<vmem>>, vector<1x1x8x8xf32>,
    %cst_221 = arith.constant dense<0.000000e+00> : vector<8x32xf32>
    %417 = tpu.matmul %413, %399, %cst_221 {dimension_numbers = #tpu.dot_dimension_numbers<[1], [0], [0], [1], [0, 0, 1, 1], [], []>} : vector<8x8xf32>, vector<8x32xf32>, vector<8x32xf32> -> vector<8x32xf32>
    %418 = tpu.concatenate %354, %375, %396, %417 in 1 : vector<8x32xf32>, vector<8x32xf32>, vector<8x32xf32>, vector<8x32xf32> -> vector<8x128xf32>
    %cst_222 = arith.constant dense<0.000000e+00> : vector<8x128xf32>
    %419 = tpu.matmul %418, %327, %cst_222 {dimension_numbers = #tpu.dot_dimension_numbers<[1], [0], [0], [1], [0, 0, 1, 1], [], []>} : vector<8x128xf32>, vector<128x128xf32>, vector<8x128xf32> -> vector<8x128xf32>
    %420 = arith.addf %419, %323 : vector<8x128xf32>
    %cst_223 = arith.constant dense<0.000000e+00> : vector<8xf32>
    %421 = vector.multi_reduction <add>, %420, %cst_223 [1] : vector<8x128xf32> to vector<8xf32>
    %422 = vector.shape_cast %421 : vector<8xf32> to vector<8x1xf32>
    %cst_224 = arith.constant 1.280000e+02 : f32
    %423 = vector.broadcast %cst_224 : f32 to vector<8x1xf32>
    %424 = arith.divf %422, %423 : vector<8x1xf32>
    %425 = vector.broadcast %424 : vector<8x1xf32> to vector<8x128xf32>
    %426 = arith.subf %420, %425 : vector<8x128xf32>
    %427 = arith.mulf %426, %426 : vector<8x128xf32>
    %cst_225 = arith.constant dense<0.000000e+00> : vector<8xf32>
    %428 = vector.multi_reduction <add>, %427, %cst_225 [1] : vector<8x128xf32> to vector<8xf32>
    %429 = vector.shape_cast %428 : vector<8xf32> to vector<8x1xf32>
    %cst_226 = arith.constant 1.280000e+02 : f32
    %430 = vector.broadcast %cst_226 : f32 to vector<8x1xf32>
    %431 = arith.divf %429, %430 : vector<8x1xf32>
    %432 = vector.broadcast %424 : vector<8x1xf32> to vector<8x128xf32>
    %433 = arith.subf %420, %432 : vector<8x128xf32>
    %cst_227 = arith.constant 9.99999974E-6 : f32
    %434 = vector.broadcast %cst_227 : f32 to vector<8x1xf32>
    %435 = arith.addf %431, %434 : vector<8x1xf32>
    %436 = math.rsqrt %435 : vector<8x1xf32>
    %437 = vector.broadcast %436 : vector<8x1xf32> to vector<8x128xf32>
    %438 = arith.mulf %433, %437 : vector<8x128xf32>
    %439 = vector.broadcast %329 : vector<1x128xf32> to vector<8x128xf32>
    %440 = arith.mulf %438, %439 : vector<8x128xf32>
    %441 = vector.broadcast %331 : vector<1x128xf32> to vector<8x128xf32>
    %442 = arith.addf %440, %441 : vector<8x128xf32>
    %c0_228 = arith.constant 0 : index
    %c0_229 = arith.constant 0 : index
    %c0_230 = arith.constant 0 : index
    %443 = vector.load %arg18[%c0_228, %c0_229, %c0_230] : memref<2x128x128xf32, #tpu.memory_space<vmem>>, vector<1x128x128xf32>
    %444 = vector.shape_cast %443 : vector<1x128x128xf32> to vector<128x128xf32>
    %c0_231 = arith.constant 0 : index
    %c0_232 = arith.constant 0 : index
    %c0_233 = arith.constant 0 : index
    %445 = vector.load %arg19[%c0_231, %c0_232, %c0_233] : memref<2x128x128xf32, #tpu.memory_space<vmem>>, vector<1x128x128xf32>
    %446 = vector.shape_cast %445 : vector<1x128x128xf32> to vector<128x128xf32>
    %c0_234 = arith.constant 0 : index
    %c0_235 = arith.constant 0 : index
    %c0_236 = arith.constant 0 : index
    %447 = vector.load %arg20[%c0_234, %c0_235, %c0_236] : memref<2x1x128xf32, #tpu.memory_space<vmem>>, vector<1x1x128xf32>
    %448 = vector.shape_cast %447 : vector<1x1x128xf32> to vector<1x128xf32>
    %c0_237 = arith.constant 0 : index
    %c0_238 = arith.constant 0 : index
    %c0_239 = arith.constant 0 : index
    %449 = vector.load %arg21[%c0_237, %c0_238, %c0_239] : memref<2x1x128xf32, #tpu.memory_space<vmem>>, vector<1x1x128xf32>
    %450 = vector.shape_cast %449 : vector<1x1x128xf32> to vector<1x128xf32>
    %cst_240 = arith.constant dense<0.000000e+00> : vector<8x128xf32>
    %451 = tpu.matmul %442, %444, %cst_240 {dimension_numbers = #tpu.dot_dimension_numbers<[1], [0], [0], [1], [0, 0, 1, 1], [], []>} : vector<8x128xf32>, vector<128x128xf32>, vector<8x128xf32> -> vector<8x128xf32>
    %cst_241 = arith.constant dense<0.000000e+00> : vector<8x128xf32>
    %452 = tpu.matmul %321, %444, %cst_241 {dimension_numbers = #tpu.dot_dimension_numbers<[1], [0], [0], [1], [0, 0, 1, 1], [], []>} : vector<8x128xf32>, vector<128x128xf32>, vector<8x128xf32> -> vector<8x128xf32>
    %453 = vector.extract_strided_slice %451 {offsets = [0, 0], sizes = [8, 32], strides = [1, 1]} : vector<8x128xf32> to vector<8x32xf32>
    %454 = vector.extract_strided_slice %452 {offsets = [0, 0], sizes = [8, 32], strides = [1, 1]} : vector<8x128xf32> to vector<8x32xf32>
    %455 = vector.extract_strided_slice %452 {offsets = [0, 0], sizes = [8, 32], strides = [1, 1]} : vector<8x128xf32> to vector<8x32xf32>
    %cst_242 = arith.constant dense<0.000000e+00> : vector<8x8xf32>
    %456 = tpu.matmul %453, %454, %cst_242 {dimension_numbers = #tpu.dot_dimension_numbers<[1], [1], [0], [0], [0, 0, 1, 0], [], []>} : vector<8x32xf32>, vector<8x32xf32>, vector<8x8xf32> -> vector<8x8xf32>
    %cst_243 = arith.constant 0.176776692 : f32
    %457 = vector.broadcast %cst_243 : f32 to vector<8x8xf32>
    %458 = arith.mulf %456, %457 : vector<8x8xf32>
    %cst_244 = arith.constant -1.000000e+09 : f32
    %459 = vector.broadcast %cst_244 : f32 to vector<8x8xf32>
    %460 = arith.select %11, %459, %458 : vector<8x8xi1>, vector<8x8xf32>
    %cst_245 = arith.constant dense<0xFF800000> : vector<8xf32>
    %461 = vector.multi_reduction <maximumf>, %460, %cst_245 [1] : vector<8x8xf32> to vector<8xf32>
    %462 = vector.shape_cast %461 : vector<8xf32> to vector<8x1xf32>
    %463 = vector.broadcast %462 : vector<8x1xf32> to vector<8x8xf32>
    %464 = arith.subf %460, %463 : vector<8x8xf32>
    %465 = math.exp %464 : vector<8x8xf32>
    %cst_246 = arith.constant dense<0.000000e+00> : vector<8xf32>
    %466 = vector.multi_reduction <add>, %465, %cst_246 [1] : vector<8x8xf32> to vector<8xf32>
    %467 = vector.shape_cast %466 : vector<8xf32> to vector<8x1xf32>
    %468 = vector.broadcast %467 : vector<8x1xf32> to vector<8x8xf32>
    %469 = arith.divf %465, %468 : vector<8x8xf32>
    %c0_247 = arith.constant 0 : index
    %c0_248 = arith.constant 0 : index
    %c0_249 = arith.constant 0 : index
    %c0_250 = arith.constant 0 : index
    %470 = vector.load %arg30[%c0_247, %c0_248, %c0_249, %c0_250] : memref<1x8x8x8xf32, #tpu.memory_space<vmem>>, vector<1x1x8x8xf32>
    %471 = vector.shape_cast %470 : vector<1x1x8x8xf32> to vector<8x8xf32>
    %472 = vector.shape_cast %469 : vector<8x8xf32> to vector<1x1x8x8xf32>
    tpu.vector_store %arg30[%c0_247, %c0_248, %c0_249, %c0_250], %472 {strides = array<i32>} : memref<1x8x8x8xf32, #tpu.memory_space<vmem>>, vector<1x1x8x8xf32>,
    %cst_251 = arith.constant dense<0.000000e+00> : vector<8x32xf32>
    %473 = tpu.matmul %469, %455, %cst_251 {dimension_numbers = #tpu.dot_dimension_numbers<[1], [0], [0], [1], [0, 0, 1, 1], [], []>} : vector<8x8xf32>, vector<8x32xf32>, vector<8x32xf32> -> vector<8x32xf32>
    %474 = vector.extract_strided_slice %451 {offsets = [0, 32], sizes = [8, 32], strides = [1, 1]} : vector<8x128xf32> to vector<8x32xf32>
    %475 = vector.extract_strided_slice %452 {offsets = [0, 32], sizes = [8, 32], strides = [1, 1]} : vector<8x128xf32> to vector<8x32xf32>
    %476 = vector.extract_strided_slice %452 {offsets = [0, 32], sizes = [8, 32], strides = [1, 1]} : vector<8x128xf32> to vector<8x32xf32>
    %cst_252 = arith.constant dense<0.000000e+00> : vector<8x8xf32>
    %477 = tpu.matmul %474, %475, %cst_252 {dimension_numbers = #tpu.dot_dimension_numbers<[1], [1], [0], [0], [0, 0, 1, 0], [], []>} : vector<8x32xf32>, vector<8x32xf32>, vector<8x8xf32> -> vector<8x8xf32>
    %cst_253 = arith.constant 0.176776692 : f32
    %478 = vector.broadcast %cst_253 : f32 to vector<8x8xf32>
    %479 = arith.mulf %477, %478 : vector<8x8xf32>
    %cst_254 = arith.constant -1.000000e+09 : f32
    %480 = vector.broadcast %cst_254 : f32 to vector<8x8xf32>
    %481 = arith.select %11, %480, %479 : vector<8x8xi1>, vector<8x8xf32>
    %cst_255 = arith.constant dense<0xFF800000> : vector<8xf32>
    %482 = vector.multi_reduction <maximumf>, %481, %cst_255 [1] : vector<8x8xf32> to vector<8xf32>
    %483 = vector.shape_cast %482 : vector<8xf32> to vector<8x1xf32>
    %484 = vector.broadcast %483 : vector<8x1xf32> to vector<8x8xf32>
    %485 = arith.subf %481, %484 : vector<8x8xf32>
    %486 = math.exp %485 : vector<8x8xf32>
    %cst_256 = arith.constant dense<0.000000e+00> : vector<8xf32>
    %487 = vector.multi_reduction <add>, %486, %cst_256 [1] : vector<8x8xf32> to vector<8xf32>
    %488 = vector.shape_cast %487 : vector<8xf32> to vector<8x1xf32>
    %489 = vector.broadcast %488 : vector<8x1xf32> to vector<8x8xf32>
    %490 = arith.divf %486, %489 : vector<8x8xf32>
    %c0_257 = arith.constant 0 : index
    %c1_258 = arith.constant 1 : index
    %c0_259 = arith.constant 0 : index
    %c0_260 = arith.constant 0 : index
    %491 = vector.load %arg30[%c0_257, %c1_258, %c0_259, %c0_260] : memref<1x8x8x8xf32, #tpu.memory_space<vmem>>, vector<1x1x8x8xf32>
    %492 = vector.shape_cast %491 : vector<1x1x8x8xf32> to vector<8x8xf32>
    %493 = vector.shape_cast %490 : vector<8x8xf32> to vector<1x1x8x8xf32>
    tpu.vector_store %arg30[%c0_257, %c1_258, %c0_259, %c0_260], %493 {strides = array<i32>} : memref<1x8x8x8xf32, #tpu.memory_space<vmem>>, vector<1x1x8x8xf32>,
    %cst_261 = arith.constant dense<0.000000e+00> : vector<8x32xf32>
    %494 = tpu.matmul %490, %476, %cst_261 {dimension_numbers = #tpu.dot_dimension_numbers<[1], [0], [0], [1], [0, 0, 1, 1], [], []>} : vector<8x8xf32>, vector<8x32xf32>, vector<8x32xf32> -> vector<8x32xf32>
    %495 = vector.extract_strided_slice %451 {offsets = [0, 64], sizes = [8, 32], strides = [1, 1]} : vector<8x128xf32> to vector<8x32xf32>
    %496 = vector.extract_strided_slice %452 {offsets = [0, 64], sizes = [8, 32], strides = [1, 1]} : vector<8x128xf32> to vector<8x32xf32>
    %497 = vector.extract_strided_slice %452 {offsets = [0, 64], sizes = [8, 32], strides = [1, 1]} : vector<8x128xf32> to vector<8x32xf32>
    %cst_262 = arith.constant dense<0.000000e+00> : vector<8x8xf32>
    %498 = tpu.matmul %495, %496, %cst_262 {dimension_numbers = #tpu.dot_dimension_numbers<[1], [1], [0], [0], [0, 0, 1, 0], [], []>} : vector<8x32xf32>, vector<8x32xf32>, vector<8x8xf32> -> vector<8x8xf32>
    %cst_263 = arith.constant 0.176776692 : f32
    %499 = vector.broadcast %cst_263 : f32 to vector<8x8xf32>
    %500 = arith.mulf %498, %499 : vector<8x8xf32>
    %cst_264 = arith.constant -1.000000e+09 : f32
    %501 = vector.broadcast %cst_264 : f32 to vector<8x8xf32>
    %502 = arith.select %11, %501, %500 : vector<8x8xi1>, vector<8x8xf32>
    %cst_265 = arith.constant dense<0xFF800000> : vector<8xf32>
    %503 = vector.multi_reduction <maximumf>, %502, %cst_265 [1] : vector<8x8xf32> to vector<8xf32>
    %504 = vector.shape_cast %503 : vector<8xf32> to vector<8x1xf32>
    %505 = vector.broadcast %504 : vector<8x1xf32> to vector<8x8xf32>
    %506 = arith.subf %502, %505 : vector<8x8xf32>
    %507 = math.exp %506 : vector<8x8xf32>
    %cst_266 = arith.constant dense<0.000000e+00> : vector<8xf32>
    %508 = vector.multi_reduction <add>, %507, %cst_266 [1] : vector<8x8xf32> to vector<8xf32>
    %509 = vector.shape_cast %508 : vector<8xf32> to vector<8x1xf32>
    %510 = vector.broadcast %509 : vector<8x1xf32> to vector<8x8xf32>
    %511 = arith.divf %507, %510 : vector<8x8xf32>
    %c0_267 = arith.constant 0 : index
    %c2_268 = arith.constant 2 : index
    %c0_269 = arith.constant 0 : index
    %c0_270 = arith.constant 0 : index
    %512 = vector.load %arg30[%c0_267, %c2_268, %c0_269, %c0_270] : memref<1x8x8x8xf32, #tpu.memory_space<vmem>>, vector<1x1x8x8xf32>
    %513 = vector.shape_cast %512 : vector<1x1x8x8xf32> to vector<8x8xf32>
    %514 = vector.shape_cast %511 : vector<8x8xf32> to vector<1x1x8x8xf32>
    tpu.vector_store %arg30[%c0_267, %c2_268, %c0_269, %c0_270], %514 {strides = array<i32>} : memref<1x8x8x8xf32, #tpu.memory_space<vmem>>, vector<1x1x8x8xf32>,
    %cst_271 = arith.constant dense<0.000000e+00> : vector<8x32xf32>
    %515 = tpu.matmul %511, %497, %cst_271 {dimension_numbers = #tpu.dot_dimension_numbers<[1], [0], [0], [1], [0, 0, 1, 1], [], []>} : vector<8x8xf32>, vector<8x32xf32>, vector<8x32xf32> -> vector<8x32xf32>
    %516 = vector.extract_strided_slice %451 {offsets = [0, 96], sizes = [8, 32], strides = [1, 1]} : vector<8x128xf32> to vector<8x32xf32>
    %517 = vector.extract_strided_slice %452 {offsets = [0, 96], sizes = [8, 32], strides = [1, 1]} : vector<8x128xf32> to vector<8x32xf32>
    %518 = vector.extract_strided_slice %452 {offsets = [0, 96], sizes = [8, 32], strides = [1, 1]} : vector<8x128xf32> to vector<8x32xf32>
    %cst_272 = arith.constant dense<0.000000e+00> : vector<8x8xf32>
    %519 = tpu.matmul %516, %517, %cst_272 {dimension_numbers = #tpu.dot_dimension_numbers<[1], [1], [0], [0], [0, 0, 1, 0], [], []>} : vector<8x32xf32>, vector<8x32xf32>, vector<8x8xf32> -> vector<8x8xf32>
    %cst_273 = arith.constant 0.176776692 : f32
    %520 = vector.broadcast %cst_273 : f32 to vector<8x8xf32>
    %521 = arith.mulf %519, %520 : vector<8x8xf32>
    %cst_274 = arith.constant -1.000000e+09 : f32
    %522 = vector.broadcast %cst_274 : f32 to vector<8x8xf32>
    %523 = arith.select %11, %522, %521 : vector<8x8xi1>, vector<8x8xf32>
    %cst_275 = arith.constant dense<0xFF800000> : vector<8xf32>
    %524 = vector.multi_reduction <maximumf>, %523, %cst_275 [1] : vector<8x8xf32> to vector<8xf32>
    %525 = vector.shape_cast %524 : vector<8xf32> to vector<8x1xf32>
    %526 = vector.broadcast %525 : vector<8x1xf32> to vector<8x8xf32>
    %527 = arith.subf %523, %526 : vector<8x8xf32>
    %528 = math.exp %527 : vector<8x8xf32>
    %cst_276 = arith.constant dense<0.000000e+00> : vector<8xf32>
    %529 = vector.multi_reduction <add>, %528, %cst_276 [1] : vector<8x8xf32> to vector<8xf32>
    %530 = vector.shape_cast %529 : vector<8xf32> to vector<8x1xf32>
    %531 = vector.broadcast %530 : vector<8x1xf32> to vector<8x8xf32>
    %532 = arith.divf %528, %531 : vector<8x8xf32>
    %c0_277 = arith.constant 0 : index
    %c3_278 = arith.constant 3 : index
    %c0_279 = arith.constant 0 : index
    %c0_280 = arith.constant 0 : index
    %533 = vector.load %arg30[%c0_277, %c3_278, %c0_279, %c0_280] : memref<1x8x8x8xf32, #tpu.memory_space<vmem>>, vector<1x1x8x8xf32>
    %534 = vector.shape_cast %533 : vector<1x1x8x8xf32> to vector<8x8xf32>
    %535 = vector.shape_cast %532 : vector<8x8xf32> to vector<1x1x8x8xf32>
    tpu.vector_store %arg30[%c0_277, %c3_278, %c0_279, %c0_280], %535 {strides = array<i32>} : memref<1x8x8x8xf32, #tpu.memory_space<vmem>>, vector<1x1x8x8xf32>,
    %cst_281 = arith.constant dense<0.000000e+00> : vector<8x32xf32>
    %536 = tpu.matmul %532, %518, %cst_281 {dimension_numbers = #tpu.dot_dimension_numbers<[1], [0], [0], [1], [0, 0, 1, 1], [], []>} : vector<8x8xf32>, vector<8x32xf32>, vector<8x32xf32> -> vector<8x32xf32>
    %537 = tpu.concatenate %473, %494, %515, %536 in 1 : vector<8x32xf32>, vector<8x32xf32>, vector<8x32xf32>, vector<8x32xf32> -> vector<8x128xf32>
    %cst_282 = arith.constant dense<0.000000e+00> : vector<8x128xf32>
    %538 = tpu.matmul %537, %446, %cst_282 {dimension_numbers = #tpu.dot_dimension_numbers<[1], [0], [0], [1], [0, 0, 1, 1], [], []>} : vector<8x128xf32>, vector<128x128xf32>, vector<8x128xf32> -> vector<8x128xf32>
    %539 = arith.addf %538, %442 : vector<8x128xf32>
    %cst_283 = arith.constant dense<0.000000e+00> : vector<8xf32>
    %540 = vector.multi_reduction <add>, %539, %cst_283 [1] : vector<8x128xf32> to vector<8xf32>
    %541 = vector.shape_cast %540 : vector<8xf32> to vector<8x1xf32>
    %cst_284 = arith.constant 1.280000e+02 : f32
    %542 = vector.broadcast %cst_284 : f32 to vector<8x1xf32>
    %543 = arith.divf %541, %542 : vector<8x1xf32>
    %544 = vector.broadcast %543 : vector<8x1xf32> to vector<8x128xf32>
    %545 = arith.subf %539, %544 : vector<8x128xf32>
    %546 = arith.mulf %545, %545 : vector<8x128xf32>
    %cst_285 = arith.constant dense<0.000000e+00> : vector<8xf32>
    %547 = vector.multi_reduction <add>, %546, %cst_285 [1] : vector<8x128xf32> to vector<8xf32>
    %548 = vector.shape_cast %547 : vector<8xf32> to vector<8x1xf32>
    %cst_286 = arith.constant 1.280000e+02 : f32
    %549 = vector.broadcast %cst_286 : f32 to vector<8x1xf32>
    %550 = arith.divf %548, %549 : vector<8x1xf32>
    %551 = vector.broadcast %543 : vector<8x1xf32> to vector<8x128xf32>
    %552 = arith.subf %539, %551 : vector<8x128xf32>
    %cst_287 = arith.constant 9.99999974E-6 : f32
    %553 = vector.broadcast %cst_287 : f32 to vector<8x1xf32>
    %554 = arith.addf %550, %553 : vector<8x1xf32>
    %555 = math.rsqrt %554 : vector<8x1xf32>
    %556 = vector.broadcast %555 : vector<8x1xf32> to vector<8x128xf32>
    %557 = arith.mulf %552, %556 : vector<8x128xf32>
    %558 = vector.broadcast %448 : vector<1x128xf32> to vector<8x128xf32>
    %559 = arith.mulf %557, %558 : vector<8x128xf32>
    %560 = vector.broadcast %450 : vector<1x128xf32> to vector<8x128xf32>
    %561 = arith.addf %559, %560 : vector<8x128xf32>
    %c0_288 = arith.constant 0 : index
    %c0_289 = arith.constant 0 : index
    %c0_290 = arith.constant 0 : index
    %562 = vector.load %arg22[%c0_288, %c0_289, %c0_290] : memref<2x128x256xf32, #tpu.memory_space<vmem>>, vector<1x128x256xf32>
    %563 = vector.shape_cast %562 : vector<1x128x256xf32> to vector<128x256xf32>
    %c0_291 = arith.constant 0 : index
    %c0_292 = arith.constant 0 : index
    %c0_293 = arith.constant 0 : index
    %564 = vector.load %arg23[%c0_291, %c0_292, %c0_293] : memref<2x256x128xf32, #tpu.memory_space<vmem>>, vector<1x256x128xf32>
    %565 = vector.shape_cast %564 : vector<1x256x128xf32> to vector<256x128xf32>
    %c0_294 = arith.constant 0 : index
    %c0_295 = arith.constant 0 : index
    %c0_296 = arith.constant 0 : index
    %566 = vector.load %arg24[%c0_294, %c0_295, %c0_296] : memref<2x1x128xf32, #tpu.memory_space<vmem>>, vector<1x1x128xf32>
    %567 = vector.shape_cast %566 : vector<1x1x128xf32> to vector<1x128xf32>
    %c0_297 = arith.constant 0 : index
    %c0_298 = arith.constant 0 : index
    %c0_299 = arith.constant 0 : index
    %568 = vector.load %arg25[%c0_297, %c0_298, %c0_299] : memref<2x1x128xf32, #tpu.memory_space<vmem>>, vector<1x1x128xf32>
    %569 = vector.shape_cast %568 : vector<1x1x128xf32> to vector<1x128xf32>
    %cst_300 = arith.constant dense<0.000000e+00> : vector<8x256xf32>
    %570 = tpu.matmul %561, %563, %cst_300 {dimension_numbers = #tpu.dot_dimension_numbers<[1], [0], [0], [1], [0, 0, 1, 1], [], []>} : vector<8x128xf32>, vector<128x256xf32>, vector<8x256xf32> -> vector<8x256xf32>
    %cst_301 = arith.constant 0.000000e+00 : f32
    %571 = vector.broadcast %cst_301 : f32 to vector<8x256xf32>
    %572 = arith.maximumf %570, %571 : vector<8x256xf32>
    %cst_302 = arith.constant dense<0.000000e+00> : vector<8x128xf32>
    %573 = tpu.matmul %572, %565, %cst_302 {dimension_numbers = #tpu.dot_dimension_numbers<[1], [0], [0], [1], [0, 0, 1, 1], [], []>} : vector<8x256xf32>, vector<256x128xf32>, vector<8x128xf32> -> vector<8x128xf32>
    %574 = arith.addf %573, %561 : vector<8x128xf32>
    %cst_303 = arith.constant dense<0.000000e+00> : vector<8xf32>
    %575 = vector.multi_reduction <add>, %574, %cst_303 [1] : vector<8x128xf32> to vector<8xf32>
    %576 = vector.shape_cast %575 : vector<8xf32> to vector<8x1xf32>
    %cst_304 = arith.constant 1.280000e+02 : f32
    %577 = vector.broadcast %cst_304 : f32 to vector<8x1xf32>
    %578 = arith.divf %576, %577 : vector<8x1xf32>
    %579 = vector.broadcast %578 : vector<8x1xf32> to vector<8x128xf32>
    %580 = arith.subf %574, %579 : vector<8x128xf32>
    %581 = arith.mulf %580, %580 : vector<8x128xf32>
    %cst_305 = arith.constant dense<0.000000e+00> : vector<8xf32>
    %582 = vector.multi_reduction <add>, %581, %cst_305 [1] : vector<8x128xf32> to vector<8xf32>
    %583 = vector.shape_cast %582 : vector<8xf32> to vector<8x1xf32>
    %cst_306 = arith.constant 1.280000e+02 : f32
    %584 = vector.broadcast %cst_306 : f32 to vector<8x1xf32>
    %585 = arith.divf %583, %584 : vector<8x1xf32>
    %586 = vector.broadcast %578 : vector<8x1xf32> to vector<8x128xf32>
    %587 = arith.subf %574, %586 : vector<8x128xf32>
    %cst_307 = arith.constant 9.99999974E-6 : f32
    %588 = vector.broadcast %cst_307 : f32 to vector<8x1xf32>
    %589 = arith.addf %585, %588 : vector<8x1xf32>
    %590 = math.rsqrt %589 : vector<8x1xf32>
    %591 = vector.broadcast %590 : vector<8x1xf32> to vector<8x128xf32>
    %592 = arith.mulf %587, %591 : vector<8x128xf32>
    %593 = vector.broadcast %567 : vector<1x128xf32> to vector<8x128xf32>
    %594 = arith.mulf %592, %593 : vector<8x128xf32>
    %595 = vector.broadcast %569 : vector<1x128xf32> to vector<8x128xf32>
    %596 = arith.addf %594, %595 : vector<8x128xf32>
    %c1_308 = arith.constant 1 : index
    %c0_309 = arith.constant 0 : index
    %c0_310 = arith.constant 0 : index
    %597 = vector.load %arg14[%c1_308, %c0_309, %c0_310] : memref<2x128x128xf32, #tpu.memory_space<vmem>>, vector<1x128x128xf32>
    %598 = vector.shape_cast %597 : vector<1x128x128xf32> to vector<128x128xf32>
    %c1_311 = arith.constant 1 : index
    %c0_312 = arith.constant 0 : index
    %c0_313 = arith.constant 0 : index
    %599 = vector.load %arg15[%c1_311, %c0_312, %c0_313] : memref<2x128x128xf32, #tpu.memory_space<vmem>>, vector<1x128x128xf32>
    %600 = vector.shape_cast %599 : vector<1x128x128xf32> to vector<128x128xf32>
    %c1_314 = arith.constant 1 : index
    %c0_315 = arith.constant 0 : index
    %c0_316 = arith.constant 0 : index
    %601 = vector.load %arg16[%c1_314, %c0_315, %c0_316] : memref<2x1x128xf32, #tpu.memory_space<vmem>>, vector<1x1x128xf32>
    %602 = vector.shape_cast %601 : vector<1x1x128xf32> to vector<1x128xf32>
    %c1_317 = arith.constant 1 : index
    %c0_318 = arith.constant 0 : index
    %c0_319 = arith.constant 0 : index
    %603 = vector.load %arg17[%c1_317, %c0_318, %c0_319] : memref<2x1x128xf32, #tpu.memory_space<vmem>>, vector<1x1x128xf32>
    %604 = vector.shape_cast %603 : vector<1x1x128xf32> to vector<1x128xf32>
    %cst_320 = arith.constant dense<0.000000e+00> : vector<8x128xf32>
    %605 = tpu.matmul %596, %598, %cst_320 {dimension_numbers = #tpu.dot_dimension_numbers<[1], [0], [0], [1], [0, 0, 1, 1], [], []>} : vector<8x128xf32>, vector<128x128xf32>, vector<8x128xf32> -> vector<8x128xf32>
    %cst_321 = arith.constant dense<0.000000e+00> : vector<8x128xf32>
    %606 = tpu.matmul %596, %598, %cst_321 {dimension_numbers = #tpu.dot_dimension_numbers<[1], [0], [0], [1], [0, 0, 1, 1], [], []>} : vector<8x128xf32>, vector<128x128xf32>, vector<8x128xf32> -> vector<8x128xf32>
    %607 = vector.extract_strided_slice %605 {offsets = [0, 0], sizes = [8, 32], strides = [1, 1]} : vector<8x128xf32> to vector<8x32xf32>
    %608 = vector.extract_strided_slice %606 {offsets = [0, 0], sizes = [8, 32], strides = [1, 1]} : vector<8x128xf32> to vector<8x32xf32>
    %609 = vector.extract_strided_slice %606 {offsets = [0, 0], sizes = [8, 32], strides = [1, 1]} : vector<8x128xf32> to vector<8x32xf32>
    %cst_322 = arith.constant dense<0.000000e+00> : vector<8x8xf32>
    %610 = tpu.matmul %607, %608, %cst_322 {dimension_numbers = #tpu.dot_dimension_numbers<[1], [1], [0], [0], [0, 0, 1, 0], [], []>} : vector<8x32xf32>, vector<8x32xf32>, vector<8x8xf32> -> vector<8x8xf32>
    %cst_323 = arith.constant 0.176776692 : f32
    %611 = vector.broadcast %cst_323 : f32 to vector<8x8xf32>
    %612 = arith.mulf %610, %611 : vector<8x8xf32>
    %cst_324 = arith.constant -1.000000e+09 : f32
    %613 = vector.broadcast %cst_324 : f32 to vector<8x8xf32>
    %614 = arith.select %7, %613, %612 : vector<8x8xi1>, vector<8x8xf32>
    %cst_325 = arith.constant dense<0xFF800000> : vector<8xf32>
    %615 = vector.multi_reduction <maximumf>, %614, %cst_325 [1] : vector<8x8xf32> to vector<8xf32>
    %616 = vector.shape_cast %615 : vector<8xf32> to vector<8x1xf32>
    %617 = vector.broadcast %616 : vector<8x1xf32> to vector<8x8xf32>
    %618 = arith.subf %614, %617 : vector<8x8xf32>
    %619 = math.exp %618 : vector<8x8xf32>
    %cst_326 = arith.constant dense<0.000000e+00> : vector<8xf32>
    %620 = vector.multi_reduction <add>, %619, %cst_326 [1] : vector<8x8xf32> to vector<8xf32>
    %621 = vector.shape_cast %620 : vector<8xf32> to vector<8x1xf32>
    %622 = vector.broadcast %621 : vector<8x1xf32> to vector<8x8xf32>
    %623 = arith.divf %619, %622 : vector<8x8xf32>
    %c0_327 = arith.constant 0 : index
    %c4_328 = arith.constant 4 : index
    %c0_329 = arith.constant 0 : index
    %c0_330 = arith.constant 0 : index
    %624 = vector.load %arg29[%c0_327, %c4_328, %c0_329, %c0_330] : memref<1x8x8x8xf32, #tpu.memory_space<vmem>>, vector<1x1x8x8xf32>
    %625 = vector.shape_cast %624 : vector<1x1x8x8xf32> to vector<8x8xf32>
    %626 = vector.shape_cast %623 : vector<8x8xf32> to vector<1x1x8x8xf32>
    tpu.vector_store %arg29[%c0_327, %c4_328, %c0_329, %c0_330], %626 {strides = array<i32>} : memref<1x8x8x8xf32, #tpu.memory_space<vmem>>, vector<1x1x8x8xf32>,
    %cst_331 = arith.constant dense<0.000000e+00> : vector<8x32xf32>
    %627 = tpu.matmul %623, %609, %cst_331 {dimension_numbers = #tpu.dot_dimension_numbers<[1], [0], [0], [1], [0, 0, 1, 1], [], []>} : vector<8x8xf32>, vector<8x32xf32>, vector<8x32xf32> -> vector<8x32xf32>
    %628 = vector.extract_strided_slice %605 {offsets = [0, 32], sizes = [8, 32], strides = [1, 1]} : vector<8x128xf32> to vector<8x32xf32>
    %629 = vector.extract_strided_slice %606 {offsets = [0, 32], sizes = [8, 32], strides = [1, 1]} : vector<8x128xf32> to vector<8x32xf32>
    %630 = vector.extract_strided_slice %606 {offsets = [0, 32], sizes = [8, 32], strides = [1, 1]} : vector<8x128xf32> to vector<8x32xf32>
    %cst_332 = arith.constant dense<0.000000e+00> : vector<8x8xf32>
    %631 = tpu.matmul %628, %629, %cst_332 {dimension_numbers = #tpu.dot_dimension_numbers<[1], [1], [0], [0], [0, 0, 1, 0], [], []>} : vector<8x32xf32>, vector<8x32xf32>, vector<8x8xf32> -> vector<8x8xf32>
    %cst_333 = arith.constant 0.176776692 : f32
    %632 = vector.broadcast %cst_333 : f32 to vector<8x8xf32>
    %633 = arith.mulf %631, %632 : vector<8x8xf32>
    %cst_334 = arith.constant -1.000000e+09 : f32
    %634 = vector.broadcast %cst_334 : f32 to vector<8x8xf32>
    %635 = arith.select %7, %634, %633 : vector<8x8xi1>, vector<8x8xf32>
    %cst_335 = arith.constant dense<0xFF800000> : vector<8xf32>
    %636 = vector.multi_reduction <maximumf>, %635, %cst_335 [1] : vector<8x8xf32> to vector<8xf32>
    %637 = vector.shape_cast %636 : vector<8xf32> to vector<8x1xf32>
    %638 = vector.broadcast %637 : vector<8x1xf32> to vector<8x8xf32>
    %639 = arith.subf %635, %638 : vector<8x8xf32>
    %640 = math.exp %639 : vector<8x8xf32>
    %cst_336 = arith.constant dense<0.000000e+00> : vector<8xf32>
    %641 = vector.multi_reduction <add>, %640, %cst_336 [1] : vector<8x8xf32> to vector<8xf32>
    %642 = vector.shape_cast %641 : vector<8xf32> to vector<8x1xf32>
    %643 = vector.broadcast %642 : vector<8x1xf32> to vector<8x8xf32>
    %644 = arith.divf %640, %643 : vector<8x8xf32>
    %c0_337 = arith.constant 0 : index
    %c5_338 = arith.constant 5 : index
    %c0_339 = arith.constant 0 : index
    %c0_340 = arith.constant 0 : index
    %645 = vector.load %arg29[%c0_337, %c5_338, %c0_339, %c0_340] : memref<1x8x8x8xf32, #tpu.memory_space<vmem>>, vector<1x1x8x8xf32>
    %646 = vector.shape_cast %645 : vector<1x1x8x8xf32> to vector<8x8xf32>
    %647 = vector.shape_cast %644 : vector<8x8xf32> to vector<1x1x8x8xf32>
    tpu.vector_store %arg29[%c0_337, %c5_338, %c0_339, %c0_340], %647 {strides = array<i32>} : memref<1x8x8x8xf32, #tpu.memory_space<vmem>>, vector<1x1x8x8xf32>,
    %cst_341 = arith.constant dense<0.000000e+00> : vector<8x32xf32>
    %648 = tpu.matmul %644, %630, %cst_341 {dimension_numbers = #tpu.dot_dimension_numbers<[1], [0], [0], [1], [0, 0, 1, 1], [], []>} : vector<8x8xf32>, vector<8x32xf32>, vector<8x32xf32> -> vector<8x32xf32>
    %649 = vector.extract_strided_slice %605 {offsets = [0, 64], sizes = [8, 32], strides = [1, 1]} : vector<8x128xf32> to vector<8x32xf32>
    %650 = vector.extract_strided_slice %606 {offsets = [0, 64], sizes = [8, 32], strides = [1, 1]} : vector<8x128xf32> to vector<8x32xf32>
    %651 = vector.extract_strided_slice %606 {offsets = [0, 64], sizes = [8, 32], strides = [1, 1]} : vector<8x128xf32> to vector<8x32xf32>
    %cst_342 = arith.constant dense<0.000000e+00> : vector<8x8xf32>
    %652 = tpu.matmul %649, %650, %cst_342 {dimension_numbers = #tpu.dot_dimension_numbers<[1], [1], [0], [0], [0, 0, 1, 0], [], []>} : vector<8x32xf32>, vector<8x32xf32>, vector<8x8xf32> -> vector<8x8xf32>
    %cst_343 = arith.constant 0.176776692 : f32
    %653 = vector.broadcast %cst_343 : f32 to vector<8x8xf32>
    %654 = arith.mulf %652, %653 : vector<8x8xf32>
    %cst_344 = arith.constant -1.000000e+09 : f32
    %655 = vector.broadcast %cst_344 : f32 to vector<8x8xf32>
    %656 = arith.select %7, %655, %654 : vector<8x8xi1>, vector<8x8xf32>
    %cst_345 = arith.constant dense<0xFF800000> : vector<8xf32>
    %657 = vector.multi_reduction <maximumf>, %656, %cst_345 [1] : vector<8x8xf32> to vector<8xf32>
    %658 = vector.shape_cast %657 : vector<8xf32> to vector<8x1xf32>
    %659 = vector.broadcast %658 : vector<8x1xf32> to vector<8x8xf32>
    %660 = arith.subf %656, %659 : vector<8x8xf32>
    %661 = math.exp %660 : vector<8x8xf32>
    %cst_346 = arith.constant dense<0.000000e+00> : vector<8xf32>
    %662 = vector.multi_reduction <add>, %661, %cst_346 [1] : vector<8x8xf32> to vector<8xf32>
    %663 = vector.shape_cast %662 : vector<8xf32> to vector<8x1xf32>
    %664 = vector.broadcast %663 : vector<8x1xf32> to vector<8x8xf32>
    %665 = arith.divf %661, %664 : vector<8x8xf32>
    %c0_347 = arith.constant 0 : index
    %c6_348 = arith.constant 6 : index
    %c0_349 = arith.constant 0 : index
    %c0_350 = arith.constant 0 : index
    %666 = vector.load %arg29[%c0_347, %c6_348, %c0_349, %c0_350] : memref<1x8x8x8xf32, #tpu.memory_space<vmem>>, vector<1x1x8x8xf32>
    %667 = vector.shape_cast %666 : vector<1x1x8x8xf32> to vector<8x8xf32>
    %668 = vector.shape_cast %665 : vector<8x8xf32> to vector<1x1x8x8xf32>
    tpu.vector_store %arg29[%c0_347, %c6_348, %c0_349, %c0_350], %668 {strides = array<i32>} : memref<1x8x8x8xf32, #tpu.memory_space<vmem>>, vector<1x1x8x8xf32>,
    %cst_351 = arith.constant dense<0.000000e+00> : vector<8x32xf32>
    %669 = tpu.matmul %665, %651, %cst_351 {dimension_numbers = #tpu.dot_dimension_numbers<[1], [0], [0], [1], [0, 0, 1, 1], [], []>} : vector<8x8xf32>, vector<8x32xf32>, vector<8x32xf32> -> vector<8x32xf32>
    %670 = vector.extract_strided_slice %605 {offsets = [0, 96], sizes = [8, 32], strides = [1, 1]} : vector<8x128xf32> to vector<8x32xf32>
    %671 = vector.extract_strided_slice %606 {offsets = [0, 96], sizes = [8, 32], strides = [1, 1]} : vector<8x128xf32> to vector<8x32xf32>
    %672 = vector.extract_strided_slice %606 {offsets = [0, 96], sizes = [8, 32], strides = [1, 1]} : vector<8x128xf32> to vector<8x32xf32>
    %cst_352 = arith.constant dense<0.000000e+00> : vector<8x8xf32>
    %673 = tpu.matmul %670, %671, %cst_352 {dimension_numbers = #tpu.dot_dimension_numbers<[1], [1], [0], [0], [0, 0, 1, 0], [], []>} : vector<8x32xf32>, vector<8x32xf32>, vector<8x8xf32> -> vector<8x8xf32>
    %cst_353 = arith.constant 0.176776692 : f32
    %674 = vector.broadcast %cst_353 : f32 to vector<8x8xf32>
    %675 = arith.mulf %673, %674 : vector<8x8xf32>
    %cst_354 = arith.constant -1.000000e+09 : f32
    %676 = vector.broadcast %cst_354 : f32 to vector<8x8xf32>
    %677 = arith.select %7, %676, %675 : vector<8x8xi1>, vector<8x8xf32>
    %cst_355 = arith.constant dense<0xFF800000> : vector<8xf32>
    %678 = vector.multi_reduction <maximumf>, %677, %cst_355 [1] : vector<8x8xf32> to vector<8xf32>
    %679 = vector.shape_cast %678 : vector<8xf32> to vector<8x1xf32>
    %680 = vector.broadcast %679 : vector<8x1xf32> to vector<8x8xf32>
    %681 = arith.subf %677, %680 : vector<8x8xf32>
    %682 = math.exp %681 : vector<8x8xf32>
    %cst_356 = arith.constant dense<0.000000e+00> : vector<8xf32>
    %683 = vector.multi_reduction <add>, %682, %cst_356 [1] : vector<8x8xf32> to vector<8xf32>
    %684 = vector.shape_cast %683 : vector<8xf32> to vector<8x1xf32>
    %685 = vector.broadcast %684 : vector<8x1xf32> to vector<8x8xf32>
    %686 = arith.divf %682, %685 : vector<8x8xf32>
    %c0_357 = arith.constant 0 : index
    %c7_358 = arith.constant 7 : index
    %c0_359 = arith.constant 0 : index
    %c0_360 = arith.constant 0 : index
    %687 = vector.load %arg29[%c0_357, %c7_358, %c0_359, %c0_360] : memref<1x8x8x8xf32, #tpu.memory_space<vmem>>, vector<1x1x8x8xf32>
    %688 = vector.shape_cast %687 : vector<1x1x8x8xf32> to vector<8x8xf32>
    %689 = vector.shape_cast %686 : vector<8x8xf32> to vector<1x1x8x8xf32>
    tpu.vector_store %arg29[%c0_357, %c7_358, %c0_359, %c0_360], %689 {strides = array<i32>} : memref<1x8x8x8xf32, #tpu.memory_space<vmem>>, vector<1x1x8x8xf32>,
    %cst_361 = arith.constant dense<0.000000e+00> : vector<8x32xf32>
    %690 = tpu.matmul %686, %672, %cst_361 {dimension_numbers = #tpu.dot_dimension_numbers<[1], [0], [0], [1], [0, 0, 1, 1], [], []>} : vector<8x8xf32>, vector<8x32xf32>, vector<8x32xf32> -> vector<8x32xf32>
    %691 = tpu.concatenate %627, %648, %669, %690 in 1 : vector<8x32xf32>, vector<8x32xf32>, vector<8x32xf32>, vector<8x32xf32> -> vector<8x128xf32>
    %cst_362 = arith.constant dense<0.000000e+00> : vector<8x128xf32>
    %692 = tpu.matmul %691, %600, %cst_362 {dimension_numbers = #tpu.dot_dimension_numbers<[1], [0], [0], [1], [0, 0, 1, 1], [], []>} : vector<8x128xf32>, vector<128x128xf32>, vector<8x128xf32> -> vector<8x128xf32>
    %693 = arith.addf %692, %596 : vector<8x128xf32>
    %cst_363 = arith.constant dense<0.000000e+00> : vector<8xf32>
    %694 = vector.multi_reduction <add>, %693, %cst_363 [1] : vector<8x128xf32> to vector<8xf32>
    %695 = vector.shape_cast %694 : vector<8xf32> to vector<8x1xf32>
    %cst_364 = arith.constant 1.280000e+02 : f32
    %696 = vector.broadcast %cst_364 : f32 to vector<8x1xf32>
    %697 = arith.divf %695, %696 : vector<8x1xf32>
    %698 = vector.broadcast %697 : vector<8x1xf32> to vector<8x128xf32>
    %699 = arith.subf %693, %698 : vector<8x128xf32>
    %700 = arith.mulf %699, %699 : vector<8x128xf32>
    %cst_365 = arith.constant dense<0.000000e+00> : vector<8xf32>
    %701 = vector.multi_reduction <add>, %700, %cst_365 [1] : vector<8x128xf32> to vector<8xf32>
    %702 = vector.shape_cast %701 : vector<8xf32> to vector<8x1xf32>
    %cst_366 = arith.constant 1.280000e+02 : f32
    %703 = vector.broadcast %cst_366 : f32 to vector<8x1xf32>
    %704 = arith.divf %702, %703 : vector<8x1xf32>
    %705 = vector.broadcast %697 : vector<8x1xf32> to vector<8x128xf32>
    %706 = arith.subf %693, %705 : vector<8x128xf32>
    %cst_367 = arith.constant 9.99999974E-6 : f32
    %707 = vector.broadcast %cst_367 : f32 to vector<8x1xf32>
    %708 = arith.addf %704, %707 : vector<8x1xf32>
    %709 = math.rsqrt %708 : vector<8x1xf32>
    %710 = vector.broadcast %709 : vector<8x1xf32> to vector<8x128xf32>
    %711 = arith.mulf %706, %710 : vector<8x128xf32>
    %712 = vector.broadcast %602 : vector<1x128xf32> to vector<8x128xf32>
    %713 = arith.mulf %711, %712 : vector<8x128xf32>
    %714 = vector.broadcast %604 : vector<1x128xf32> to vector<8x128xf32>
    %715 = arith.addf %713, %714 : vector<8x128xf32>
    %c1_368 = arith.constant 1 : index
    %c0_369 = arith.constant 0 : index
    %c0_370 = arith.constant 0 : index
    %716 = vector.load %arg18[%c1_368, %c0_369, %c0_370] : memref<2x128x128xf32, #tpu.memory_space<vmem>>, vector<1x128x128xf32>
    %717 = vector.shape_cast %716 : vector<1x128x128xf32> to vector<128x128xf32>
    %c1_371 = arith.constant 1 : index
    %c0_372 = arith.constant 0 : index
    %c0_373 = arith.constant 0 : index
    %718 = vector.load %arg19[%c1_371, %c0_372, %c0_373] : memref<2x128x128xf32, #tpu.memory_space<vmem>>, vector<1x128x128xf32>
    %719 = vector.shape_cast %718 : vector<1x128x128xf32> to vector<128x128xf32>
    %c1_374 = arith.constant 1 : index
    %c0_375 = arith.constant 0 : index
    %c0_376 = arith.constant 0 : index
    %720 = vector.load %arg20[%c1_374, %c0_375, %c0_376] : memref<2x1x128xf32, #tpu.memory_space<vmem>>, vector<1x1x128xf32>
    %721 = vector.shape_cast %720 : vector<1x1x128xf32> to vector<1x128xf32>
    %c1_377 = arith.constant 1 : index
    %c0_378 = arith.constant 0 : index
    %c0_379 = arith.constant 0 : index
    %722 = vector.load %arg21[%c1_377, %c0_378, %c0_379] : memref<2x1x128xf32, #tpu.memory_space<vmem>>, vector<1x1x128xf32>
    %723 = vector.shape_cast %722 : vector<1x1x128xf32> to vector<1x128xf32>
    %cst_380 = arith.constant dense<0.000000e+00> : vector<8x128xf32>
    %724 = tpu.matmul %715, %717, %cst_380 {dimension_numbers = #tpu.dot_dimension_numbers<[1], [0], [0], [1], [0, 0, 1, 1], [], []>} : vector<8x128xf32>, vector<128x128xf32>, vector<8x128xf32> -> vector<8x128xf32>
    %cst_381 = arith.constant dense<0.000000e+00> : vector<8x128xf32>
    %725 = tpu.matmul %321, %717, %cst_381 {dimension_numbers = #tpu.dot_dimension_numbers<[1], [0], [0], [1], [0, 0, 1, 1], [], []>} : vector<8x128xf32>, vector<128x128xf32>, vector<8x128xf32> -> vector<8x128xf32>
    %726 = vector.extract_strided_slice %724 {offsets = [0, 0], sizes = [8, 32], strides = [1, 1]} : vector<8x128xf32> to vector<8x32xf32>
    %727 = vector.extract_strided_slice %725 {offsets = [0, 0], sizes = [8, 32], strides = [1, 1]} : vector<8x128xf32> to vector<8x32xf32>
    %728 = vector.extract_strided_slice %725 {offsets = [0, 0], sizes = [8, 32], strides = [1, 1]} : vector<8x128xf32> to vector<8x32xf32>
    %cst_382 = arith.constant dense<0.000000e+00> : vector<8x8xf32>
    %729 = tpu.matmul %726, %727, %cst_382 {dimension_numbers = #tpu.dot_dimension_numbers<[1], [1], [0], [0], [0, 0, 1, 0], [], []>} : vector<8x32xf32>, vector<8x32xf32>, vector<8x8xf32> -> vector<8x8xf32>
    %cst_383 = arith.constant 0.176776692 : f32
    %730 = vector.broadcast %cst_383 : f32 to vector<8x8xf32>
    %731 = arith.mulf %729, %730 : vector<8x8xf32>
    %cst_384 = arith.constant -1.000000e+09 : f32
    %732 = vector.broadcast %cst_384 : f32 to vector<8x8xf32>
    %733 = arith.select %11, %732, %731 : vector<8x8xi1>, vector<8x8xf32>
    %cst_385 = arith.constant dense<0xFF800000> : vector<8xf32>
    %734 = vector.multi_reduction <maximumf>, %733, %cst_385 [1] : vector<8x8xf32> to vector<8xf32>
    %735 = vector.shape_cast %734 : vector<8xf32> to vector<8x1xf32>
    %736 = vector.broadcast %735 : vector<8x1xf32> to vector<8x8xf32>
    %737 = arith.subf %733, %736 : vector<8x8xf32>
    %738 = math.exp %737 : vector<8x8xf32>
    %cst_386 = arith.constant dense<0.000000e+00> : vector<8xf32>
    %739 = vector.multi_reduction <add>, %738, %cst_386 [1] : vector<8x8xf32> to vector<8xf32>
    %740 = vector.shape_cast %739 : vector<8xf32> to vector<8x1xf32>
    %741 = vector.broadcast %740 : vector<8x1xf32> to vector<8x8xf32>
    %742 = arith.divf %738, %741 : vector<8x8xf32>
    %c0_387 = arith.constant 0 : index
    %c4_388 = arith.constant 4 : index
    %c0_389 = arith.constant 0 : index
    %c0_390 = arith.constant 0 : index
    %743 = vector.load %arg30[%c0_387, %c4_388, %c0_389, %c0_390] : memref<1x8x8x8xf32, #tpu.memory_space<vmem>>, vector<1x1x8x8xf32>
    %744 = vector.shape_cast %743 : vector<1x1x8x8xf32> to vector<8x8xf32>
    %745 = vector.shape_cast %742 : vector<8x8xf32> to vector<1x1x8x8xf32>
    tpu.vector_store %arg30[%c0_387, %c4_388, %c0_389, %c0_390], %745 {strides = array<i32>} : memref<1x8x8x8xf32, #tpu.memory_space<vmem>>, vector<1x1x8x8xf32>,
    %cst_391 = arith.constant dense<0.000000e+00> : vector<8x32xf32>
    %746 = tpu.matmul %742, %728, %cst_391 {dimension_numbers = #tpu.dot_dimension_numbers<[1], [0], [0], [1], [0, 0, 1, 1], [], []>} : vector<8x8xf32>, vector<8x32xf32>, vector<8x32xf32> -> vector<8x32xf32>
    %747 = vector.extract_strided_slice %724 {offsets = [0, 32], sizes = [8, 32], strides = [1, 1]} : vector<8x128xf32> to vector<8x32xf32>
    %748 = vector.extract_strided_slice %725 {offsets = [0, 32], sizes = [8, 32], strides = [1, 1]} : vector<8x128xf32> to vector<8x32xf32>
    %749 = vector.extract_strided_slice %725 {offsets = [0, 32], sizes = [8, 32], strides = [1, 1]} : vector<8x128xf32> to vector<8x32xf32>
    %cst_392 = arith.constant dense<0.000000e+00> : vector<8x8xf32>
    %750 = tpu.matmul %747, %748, %cst_392 {dimension_numbers = #tpu.dot_dimension_numbers<[1], [1], [0], [0], [0, 0, 1, 0], [], []>} : vector<8x32xf32>, vector<8x32xf32>, vector<8x8xf32> -> vector<8x8xf32>
    %cst_393 = arith.constant 0.176776692 : f32
    %751 = vector.broadcast %cst_393 : f32 to vector<8x8xf32>
    %752 = arith.mulf %750, %751 : vector<8x8xf32>
    %cst_394 = arith.constant -1.000000e+09 : f32
    %753 = vector.broadcast %cst_394 : f32 to vector<8x8xf32>
    %754 = arith.select %11, %753, %752 : vector<8x8xi1>, vector<8x8xf32>
    %cst_395 = arith.constant dense<0xFF800000> : vector<8xf32>
    %755 = vector.multi_reduction <maximumf>, %754, %cst_395 [1] : vector<8x8xf32> to vector<8xf32>
    %756 = vector.shape_cast %755 : vector<8xf32> to vector<8x1xf32>
    %757 = vector.broadcast %756 : vector<8x1xf32> to vector<8x8xf32>
    %758 = arith.subf %754, %757 : vector<8x8xf32>
    %759 = math.exp %758 : vector<8x8xf32>
    %cst_396 = arith.constant dense<0.000000e+00> : vector<8xf32>
    %760 = vector.multi_reduction <add>, %759, %cst_396 [1] : vector<8x8xf32> to vector<8xf32>
    %761 = vector.shape_cast %760 : vector<8xf32> to vector<8x1xf32>
    %762 = vector.broadcast %761 : vector<8x1xf32> to vector<8x8xf32>
    %763 = arith.divf %759, %762 : vector<8x8xf32>
    %c0_397 = arith.constant 0 : index
    %c5_398 = arith.constant 5 : index
    %c0_399 = arith.constant 0 : index
    %c0_400 = arith.constant 0 : index
    %764 = vector.load %arg30[%c0_397, %c5_398, %c0_399, %c0_400] : memref<1x8x8x8xf32, #tpu.memory_space<vmem>>, vector<1x1x8x8xf32>
    %765 = vector.shape_cast %764 : vector<1x1x8x8xf32> to vector<8x8xf32>
    %766 = vector.shape_cast %763 : vector<8x8xf32> to vector<1x1x8x8xf32>
    tpu.vector_store %arg30[%c0_397, %c5_398, %c0_399, %c0_400], %766 {strides = array<i32>} : memref<1x8x8x8xf32, #tpu.memory_space<vmem>>, vector<1x1x8x8xf32>,
    %cst_401 = arith.constant dense<0.000000e+00> : vector<8x32xf32>
    %767 = tpu.matmul %763, %749, %cst_401 {dimension_numbers = #tpu.dot_dimension_numbers<[1], [0], [0], [1], [0, 0, 1, 1], [], []>} : vector<8x8xf32>, vector<8x32xf32>, vector<8x32xf32> -> vector<8x32xf32>
    %768 = vector.extract_strided_slice %724 {offsets = [0, 64], sizes = [8, 32], strides = [1, 1]} : vector<8x128xf32> to vector<8x32xf32>
    %769 = vector.extract_strided_slice %725 {offsets = [0, 64], sizes = [8, 32], strides = [1, 1]} : vector<8x128xf32> to vector<8x32xf32>
    %770 = vector.extract_strided_slice %725 {offsets = [0, 64], sizes = [8, 32], strides = [1, 1]} : vector<8x128xf32> to vector<8x32xf32>
    %cst_402 = arith.constant dense<0.000000e+00> : vector<8x8xf32>
    %771 = tpu.matmul %768, %769, %cst_402 {dimension_numbers = #tpu.dot_dimension_numbers<[1], [1], [0], [0], [0, 0, 1, 0], [], []>} : vector<8x32xf32>, vector<8x32xf32>, vector<8x8xf32> -> vector<8x8xf32>
    %cst_403 = arith.constant 0.176776692 : f32
    %772 = vector.broadcast %cst_403 : f32 to vector<8x8xf32>
    %773 = arith.mulf %771, %772 : vector<8x8xf32>
    %cst_404 = arith.constant -1.000000e+09 : f32
    %774 = vector.broadcast %cst_404 : f32 to vector<8x8xf32>
    %775 = arith.select %11, %774, %773 : vector<8x8xi1>, vector<8x8xf32>
    %cst_405 = arith.constant dense<0xFF800000> : vector<8xf32>
    %776 = vector.multi_reduction <maximumf>, %775, %cst_405 [1] : vector<8x8xf32> to vector<8xf32>
    %777 = vector.shape_cast %776 : vector<8xf32> to vector<8x1xf32>
    %778 = vector.broadcast %777 : vector<8x1xf32> to vector<8x8xf32>
    %779 = arith.subf %775, %778 : vector<8x8xf32>
    %780 = math.exp %779 : vector<8x8xf32>
    %cst_406 = arith.constant dense<0.000000e+00> : vector<8xf32>
    %781 = vector.multi_reduction <add>, %780, %cst_406 [1] : vector<8x8xf32> to vector<8xf32>
    %782 = vector.shape_cast %781 : vector<8xf32> to vector<8x1xf32>
    %783 = vector.broadcast %782 : vector<8x1xf32> to vector<8x8xf32>
    %784 = arith.divf %780, %783 : vector<8x8xf32>
    %c0_407 = arith.constant 0 : index
    %c6_408 = arith.constant 6 : index
    %c0_409 = arith.constant 0 : index
    %c0_410 = arith.constant 0 : index
    %785 = vector.load %arg30[%c0_407, %c6_408, %c0_409, %c0_410] : memref<1x8x8x8xf32, #tpu.memory_space<vmem>>, vector<1x1x8x8xf32>
    %786 = vector.shape_cast %785 : vector<1x1x8x8xf32> to vector<8x8xf32>
    %787 = vector.shape_cast %784 : vector<8x8xf32> to vector<1x1x8x8xf32>
    tpu.vector_store %arg30[%c0_407, %c6_408, %c0_409, %c0_410], %787 {strides = array<i32>} : memref<1x8x8x8xf32, #tpu.memory_space<vmem>>, vector<1x1x8x8xf32>,
    %cst_411 = arith.constant dense<0.000000e+00> : vector<8x32xf32>
    %788 = tpu.matmul %784, %770, %cst_411 {dimension_numbers = #tpu.dot_dimension_numbers<[1], [0], [0], [1], [0, 0, 1, 1], [], []>} : vector<8x8xf32>, vector<8x32xf32>, vector<8x32xf32> -> vector<8x32xf32>
    %789 = vector.extract_strided_slice %724 {offsets = [0, 96], sizes = [8, 32], strides = [1, 1]} : vector<8x128xf32> to vector<8x32xf32>
    %790 = vector.extract_strided_slice %725 {offsets = [0, 96], sizes = [8, 32], strides = [1, 1]} : vector<8x128xf32> to vector<8x32xf32>
    %791 = vector.extract_strided_slice %725 {offsets = [0, 96], sizes = [8, 32], strides = [1, 1]} : vector<8x128xf32> to vector<8x32xf32>
    %cst_412 = arith.constant dense<0.000000e+00> : vector<8x8xf32>
    %792 = tpu.matmul %789, %790, %cst_412 {dimension_numbers = #tpu.dot_dimension_numbers<[1], [1], [0], [0], [0, 0, 1, 0], [], []>} : vector<8x32xf32>, vector<8x32xf32>, vector<8x8xf32> -> vector<8x8xf32>
    %cst_413 = arith.constant 0.176776692 : f32
    %793 = vector.broadcast %cst_413 : f32 to vector<8x8xf32>
    %794 = arith.mulf %792, %793 : vector<8x8xf32>
    %cst_414 = arith.constant -1.000000e+09 : f32
    %795 = vector.broadcast %cst_414 : f32 to vector<8x8xf32>
    %796 = arith.select %11, %795, %794 : vector<8x8xi1>, vector<8x8xf32>
    %cst_415 = arith.constant dense<0xFF800000> : vector<8xf32>
    %797 = vector.multi_reduction <maximumf>, %796, %cst_415 [1] : vector<8x8xf32> to vector<8xf32>
    %798 = vector.shape_cast %797 : vector<8xf32> to vector<8x1xf32>
    %799 = vector.broadcast %798 : vector<8x1xf32> to vector<8x8xf32>
    %800 = arith.subf %796, %799 : vector<8x8xf32>
    %801 = math.exp %800 : vector<8x8xf32>
    %cst_416 = arith.constant dense<0.000000e+00> : vector<8xf32>
    %802 = vector.multi_reduction <add>, %801, %cst_416 [1] : vector<8x8xf32> to vector<8xf32>
    %803 = vector.shape_cast %802 : vector<8xf32> to vector<8x1xf32>
    %804 = vector.broadcast %803 : vector<8x1xf32> to vector<8x8xf32>
    %805 = arith.divf %801, %804 : vector<8x8xf32>
    %c0_417 = arith.constant 0 : index
    %c7_418 = arith.constant 7 : index
    %c0_419 = arith.constant 0 : index
    %c0_420 = arith.constant 0 : index
    %806 = vector.load %arg30[%c0_417, %c7_418, %c0_419, %c0_420] : memref<1x8x8x8xf32, #tpu.memory_space<vmem>>, vector<1x1x8x8xf32>
    %807 = vector.shape_cast %806 : vector<1x1x8x8xf32> to vector<8x8xf32>
    %808 = vector.shape_cast %805 : vector<8x8xf32> to vector<1x1x8x8xf32>
    tpu.vector_store %arg30[%c0_417, %c7_418, %c0_419, %c0_420], %808 {strides = array<i32>} : memref<1x8x8x8xf32, #tpu.memory_space<vmem>>, vector<1x1x8x8xf32>,
    %cst_421 = arith.constant dense<0.000000e+00> : vector<8x32xf32>
    %809 = tpu.matmul %805, %791, %cst_421 {dimension_numbers = #tpu.dot_dimension_numbers<[1], [0], [0], [1], [0, 0, 1, 1], [], []>} : vector<8x8xf32>, vector<8x32xf32>, vector<8x32xf32> -> vector<8x32xf32>
    %810 = tpu.concatenate %746, %767, %788, %809 in 1 : vector<8x32xf32>, vector<8x32xf32>, vector<8x32xf32>, vector<8x32xf32> -> vector<8x128xf32>
    %cst_422 = arith.constant dense<0.000000e+00> : vector<8x128xf32>
    %811 = tpu.matmul %810, %719, %cst_422 {dimension_numbers = #tpu.dot_dimension_numbers<[1], [0], [0], [1], [0, 0, 1, 1], [], []>} : vector<8x128xf32>, vector<128x128xf32>, vector<8x128xf32> -> vector<8x128xf32>
    %812 = arith.addf %811, %715 : vector<8x128xf32>
    %cst_423 = arith.constant dense<0.000000e+00> : vector<8xf32>
    %813 = vector.multi_reduction <add>, %812, %cst_423 [1] : vector<8x128xf32> to vector<8xf32>
    %814 = vector.shape_cast %813 : vector<8xf32> to vector<8x1xf32>
    %cst_424 = arith.constant 1.280000e+02 : f32
    %815 = vector.broadcast %cst_424 : f32 to vector<8x1xf32>
    %816 = arith.divf %814, %815 : vector<8x1xf32>
    %817 = vector.broadcast %816 : vector<8x1xf32> to vector<8x128xf32>
    %818 = arith.subf %812, %817 : vector<8x128xf32>
    %819 = arith.mulf %818, %818 : vector<8x128xf32>
    %cst_425 = arith.constant dense<0.000000e+00> : vector<8xf32>
    %820 = vector.multi_reduction <add>, %819, %cst_425 [1] : vector<8x128xf32> to vector<8xf32>
    %821 = vector.shape_cast %820 : vector<8xf32> to vector<8x1xf32>
    %cst_426 = arith.constant 1.280000e+02 : f32
    %822 = vector.broadcast %cst_426 : f32 to vector<8x1xf32>
    %823 = arith.divf %821, %822 : vector<8x1xf32>
    %824 = vector.broadcast %816 : vector<8x1xf32> to vector<8x128xf32>
    %825 = arith.subf %812, %824 : vector<8x128xf32>
    %cst_427 = arith.constant 9.99999974E-6 : f32
    %826 = vector.broadcast %cst_427 : f32 to vector<8x1xf32>
    %827 = arith.addf %823, %826 : vector<8x1xf32>
    %828 = math.rsqrt %827 : vector<8x1xf32>
    %829 = vector.broadcast %828 : vector<8x1xf32> to vector<8x128xf32>
    %830 = arith.mulf %825, %829 : vector<8x128xf32>
    %831 = vector.broadcast %721 : vector<1x128xf32> to vector<8x128xf32>
    %832 = arith.mulf %830, %831 : vector<8x128xf32>
    %833 = vector.broadcast %723 : vector<1x128xf32> to vector<8x128xf32>
    %834 = arith.addf %832, %833 : vector<8x128xf32>
    %c1_428 = arith.constant 1 : index
    %c0_429 = arith.constant 0 : index
    %c0_430 = arith.constant 0 : index
    %835 = vector.load %arg22[%c1_428, %c0_429, %c0_430] : memref<2x128x256xf32, #tpu.memory_space<vmem>>, vector<1x128x256xf32>
    %836 = vector.shape_cast %835 : vector<1x128x256xf32> to vector<128x256xf32>
    %c1_431 = arith.constant 1 : index
    %c0_432 = arith.constant 0 : index
    %c0_433 = arith.constant 0 : index
    %837 = vector.load %arg23[%c1_431, %c0_432, %c0_433] : memref<2x256x128xf32, #tpu.memory_space<vmem>>, vector<1x256x128xf32>
    %838 = vector.shape_cast %837 : vector<1x256x128xf32> to vector<256x128xf32>
    %c1_434 = arith.constant 1 : index
    %c0_435 = arith.constant 0 : index
    %c0_436 = arith.constant 0 : index
    %839 = vector.load %arg24[%c1_434, %c0_435, %c0_436] : memref<2x1x128xf32, #tpu.memory_space<vmem>>, vector<1x1x128xf32>
    %840 = vector.shape_cast %839 : vector<1x1x128xf32> to vector<1x128xf32>
    %c1_437 = arith.constant 1 : index
    %c0_438 = arith.constant 0 : index
    %c0_439 = arith.constant 0 : index
    %841 = vector.load %arg25[%c1_437, %c0_438, %c0_439] : memref<2x1x128xf32, #tpu.memory_space<vmem>>, vector<1x1x128xf32>
    %842 = vector.shape_cast %841 : vector<1x1x128xf32> to vector<1x128xf32>
    %cst_440 = arith.constant dense<0.000000e+00> : vector<8x256xf32>
    %843 = tpu.matmul %834, %836, %cst_440 {dimension_numbers = #tpu.dot_dimension_numbers<[1], [0], [0], [1], [0, 0, 1, 1], [], []>} : vector<8x128xf32>, vector<128x256xf32>, vector<8x256xf32> -> vector<8x256xf32>
    %cst_441 = arith.constant 0.000000e+00 : f32
    %844 = vector.broadcast %cst_441 : f32 to vector<8x256xf32>
    %845 = arith.maximumf %843, %844 : vector<8x256xf32>
    %cst_442 = arith.constant dense<0.000000e+00> : vector<8x128xf32>
    %846 = tpu.matmul %845, %838, %cst_442 {dimension_numbers = #tpu.dot_dimension_numbers<[1], [0], [0], [1], [0, 0, 1, 1], [], []>} : vector<8x256xf32>, vector<256x128xf32>, vector<8x128xf32> -> vector<8x128xf32>
    %847 = arith.addf %846, %834 : vector<8x128xf32>
    %cst_443 = arith.constant dense<0.000000e+00> : vector<8xf32>
    %848 = vector.multi_reduction <add>, %847, %cst_443 [1] : vector<8x128xf32> to vector<8xf32>
    %849 = vector.shape_cast %848 : vector<8xf32> to vector<8x1xf32>
    %cst_444 = arith.constant 1.280000e+02 : f32
    %850 = vector.broadcast %cst_444 : f32 to vector<8x1xf32>
    %851 = arith.divf %849, %850 : vector<8x1xf32>
    %852 = vector.broadcast %851 : vector<8x1xf32> to vector<8x128xf32>
    %853 = arith.subf %847, %852 : vector<8x128xf32>
    %854 = arith.mulf %853, %853 : vector<8x128xf32>
    %cst_445 = arith.constant dense<0.000000e+00> : vector<8xf32>
    %855 = vector.multi_reduction <add>, %854, %cst_445 [1] : vector<8x128xf32> to vector<8xf32>
    %856 = vector.shape_cast %855 : vector<8xf32> to vector<8x1xf32>
    %cst_446 = arith.constant 1.280000e+02 : f32
    %857 = vector.broadcast %cst_446 : f32 to vector<8x1xf32>
    %858 = arith.divf %856, %857 : vector<8x1xf32>
    %859 = vector.broadcast %851 : vector<8x1xf32> to vector<8x128xf32>
    %860 = arith.subf %847, %859 : vector<8x128xf32>
    %cst_447 = arith.constant 9.99999974E-6 : f32
    %861 = vector.broadcast %cst_447 : f32 to vector<8x1xf32>
    %862 = arith.addf %858, %861 : vector<8x1xf32>
    %863 = math.rsqrt %862 : vector<8x1xf32>
    %864 = vector.broadcast %863 : vector<8x1xf32> to vector<8x128xf32>
    %865 = arith.mulf %860, %864 : vector<8x128xf32>
    %866 = vector.broadcast %840 : vector<1x128xf32> to vector<8x128xf32>
    %867 = arith.mulf %865, %866 : vector<8x128xf32>
    %868 = vector.broadcast %842 : vector<1x128xf32> to vector<8x128xf32>
    %869 = arith.addf %867, %868 : vector<8x128xf32>
    %c0_448 = arith.constant 0 : index
    %c0_449 = arith.constant 0 : index
    %870 = vector.load %arg26[%c0_448, %c0_449] : memref<128x16xf32, #tpu.memory_space<vmem>>, vector<128x16xf32>
    %cst_450 = arith.constant dense<0.000000e+00> : vector<8x16xf32>
    %871 = tpu.matmul %869, %870, %cst_450 {dimension_numbers = #tpu.dot_dimension_numbers<[1], [0], [0], [1], [0, 0, 1, 1], [], []>} : vector<8x128xf32>, vector<128x16xf32>, vector<8x16xf32> -> vector<8x16xf32>
    %c0_451 = arith.constant 0 : index
    %c0_452 = arith.constant 0 : index
    %c0_453 = arith.constant 0 : index
    %872 = vector.load %arg27[%c0_451, %c0_452, %c0_453] : memref<1x8x16xf32, #tpu.memory_space<vmem>>, vector<1x8x16xf32>
    %873 = vector.shape_cast %872 : vector<1x8x16xf32> to vector<8x16xf32>
    %874 = vector.shape_cast %871 : vector<8x16xf32> to vector<1x8x16xf32>
    tpu.vector_store %arg27[%c0_451, %c0_452, %c0_453], %874 {strides = array<i32>} : memref<1x8x16xf32, #tpu.memory_space<vmem>>, vector<1x8x16xf32>,
    return
  }
  func.func @transform_0(%arg0: i32) -> (i32, i32, i32) {
    %c0_i32 = arith.constant 0 : i32
    %c0_i32_0 = arith.constant 0 : i32
    %c0_i32_1 = arith.constant 0 : i32
    return %arg0, %c0_i32, %c0_i32_0 : i32, i32, i32
  }
  func.func @transform_1(%arg0: i32) -> (i32, i32, i32) {
    %c0_i32 = arith.constant 0 : i32
    %c0_i32_0 = arith.constant 0 : i32
    %c0_i32_1 = arith.constant 0 : i32
    return %arg0, %c0_i32, %c0_i32_0 : i32, i32, i32
  }
  func.func @transform_2(%arg0: i32) -> (i32, i32, i32) {
    %c0_i32 = arith.constant 0 : i32
    %c0_i32_0 = arith.constant 0 : i32
    %c0_i32_1 = arith.constant 0 : i32
    return %arg0, %c0_i32, %c0_i32_0 : i32, i32, i32
  }
  func.func @transform_3(%arg0: i32) -> (i32, i32, i32) {
    %c0_i32 = arith.constant 0 : i32
    %c0_i32_0 = arith.constant 0 : i32
    %c0_i32_1 = arith.constant 0 : i32
    return %arg0, %c0_i32, %c0_i32_0 : i32, i32, i32
  }
  func.func @transform_4(%arg0: i32) -> (i32, i32, i32) {
    %c0_i32 = arith.constant 0 : i32
    %c0_i32_0 = arith.constant 0 : i32
    %c0_i32_1 = arith.constant 0 : i32
    return %arg0, %c0_i32, %c0_i32_0 : i32, i32, i32
  }
  func.func @transform_5(%arg0: i32) -> (i32, i32, i32) {
    %c0_i32 = arith.constant 0 : i32
    %c0_i32_0 = arith.constant 0 : i32
    %c0_i32_1 = arith.constant 0 : i32
    %c0_i32_2 = arith.constant 0 : i32
    return %c0_i32, %c0_i32_0, %c0_i32_1 : i32, i32, i32
  }
  func.func @transform_6(%arg0: i32) -> (i32, i32, i32) {
    %c0_i32 = arith.constant 0 : i32
    %c0_i32_0 = arith.constant 0 : i32
    %c0_i32_1 = arith.constant 0 : i32
    %c0_i32_2 = arith.constant 0 : i32
    return %c0_i32, %c0_i32_0, %c0_i32_1 : i32, i32, i32
  }
  func.func @transform_7(%arg0: i32) -> (i32, i32, i32) {
    %c0_i32 = arith.constant 0 : i32
    %c0_i32_0 = arith.constant 0 : i32
    %c0_i32_1 = arith.constant 0 : i32
    %c0_i32_2 = arith.constant 0 : i32
    return %c0_i32, %c0_i32_0, %c0_i32_1 : i32, i32, i32
  }
  func.func @transform_8(%arg0: i32) -> (i32, i32, i32) {
    %c0_i32 = arith.constant 0 : i32
    %c0_i32_0 = arith.constant 0 : i32
    %c0_i32_1 = arith.constant 0 : i32
    %c0_i32_2 = arith.constant 0 : i32
    return %c0_i32, %c0_i32_0, %c0_i32_1 : i32, i32, i32
  }
  func.func @transform_9(%arg0: i32) -> (i32, i32, i32) {
    %c0_i32 = arith.constant 0 : i32
    %c0_i32_0 = arith.constant 0 : i32
    %c0_i32_1 = arith.constant 0 : i32
    %c0_i32_2 = arith.constant 0 : i32
    return %c0_i32, %c0_i32_0, %c0_i32_1 : i32, i32, i32
  }
  func.func @transform_10(%arg0: i32) -> (i32, i32, i32) {
    %c0_i32 = arith.constant 0 : i32
    %c0_i32_0 = arith.constant 0 : i32
    %c0_i32_1 = arith.constant 0 : i32
    %c0_i32_2 = arith.constant 0 : i32
    return %c0_i32, %c0_i32_0, %c0_i32_1 : i32, i32, i32
  }
  func.func @transform_11(%arg0: i32) -> (i32, i32, i32) {
    %c0_i32 = arith.constant 0 : i32
    %c0_i32_0 = arith.constant 0 : i32
    %c0_i32_1 = arith.constant 0 : i32
    %c0_i32_2 = arith.constant 0 : i32
    return %c0_i32, %c0_i32_0, %c0_i32_1 : i32, i32, i32
  }
  func.func @transform_12(%arg0: i32) -> (i32, i32, i32) {
    %c0_i32 = arith.constant 0 : i32
    %c0_i32_0 = arith.constant 0 : i32
    %c0_i32_1 = arith.constant 0 : i32
    %c0_i32_2 = arith.constant 0 : i32
    return %c0_i32, %c0_i32_0, %c0_i32_1 : i32, i32, i32
  }
  func.func @transform_13(%arg0: i32) -> (i32, i32, i32) {
    %c0_i32 = arith.constant 0 : i32
    %c0_i32_0 = arith.constant 0 : i32
    %c0_i32_1 = arith.constant 0 : i32
    %c0_i32_2 = arith.constant 0 : i32
    return %c0_i32, %c0_i32_0, %c0_i32_1 : i32, i32, i32
  }
  func.func @transform_14(%arg0: i32) -> (i32, i32, i32) {
    %c0_i32 = arith.constant 0 : i32
    %c0_i32_0 = arith.constant 0 : i32
    %c0_i32_1 = arith.constant 0 : i32
    %c0_i32_2 = arith.constant 0 : i32
    return %c0_i32, %c0_i32_0, %c0_i32_1 : i32, i32, i32
  }
  func.func @transform_15(%arg0: i32) -> (i32, i32, i32) {
    %c0_i32 = arith.constant 0 : i32
    %c0_i32_0 = arith.constant 0 : i32
    %c0_i32_1 = arith.constant 0 : i32
    %c0_i32_2 = arith.constant 0 : i32
    return %c0_i32, %c0_i32_0, %c0_i32_1 : i32, i32, i32
  }
  func.func @transform_16(%arg0: i32) -> (i32, i32, i32) {
    %c0_i32 = arith.constant 0 : i32
    %c0_i32_0 = arith.constant 0 : i32
    %c0_i32_1 = arith.constant 0 : i32
    %c0_i32_2 = arith.constant 0 : i32
    return %c0_i32, %c0_i32_0, %c0_i32_1 : i32, i32, i32
  }
  func.func @transform_17(%arg0: i32) -> (i32, i32, i32) {
    %c0_i32 = arith.constant 0 : i32
    %c0_i32_0 = arith.constant 0 : i32
    %c0_i32_1 = arith.constant 0 : i32
    %c0_i32_2 = arith.constant 0 : i32
    return %c0_i32, %c0_i32_0, %c0_i32_1 : i32, i32, i32
  }
  func.func @transform_18(%arg0: i32) -> (i32, i32, i32) {
    %c0_i32 = arith.constant 0 : i32
    %c0_i32_0 = arith.constant 0 : i32
    %c0_i32_1 = arith.constant 0 : i32
    %c0_i32_2 = arith.constant 0 : i32
    return %c0_i32, %c0_i32_0, %c0_i32_1 : i32, i32, i32
  }
  func.func @transform_19(%arg0: i32) -> (i32, i32, i32) {
    %c0_i32 = arith.constant 0 : i32
    %c0_i32_0 = arith.constant 0 : i32
    %c0_i32_1 = arith.constant 0 : i32
    %c0_i32_2 = arith.constant 0 : i32
    return %c0_i32, %c0_i32_0, %c0_i32_1 : i32, i32, i32
  }
  func.func @transform_20(%arg0: i32) -> (i32, i32, i32) {
    %c0_i32 = arith.constant 0 : i32
    %c0_i32_0 = arith.constant 0 : i32
    %c0_i32_1 = arith.constant 0 : i32
    %c0_i32_2 = arith.constant 0 : i32
    return %c0_i32, %c0_i32_0, %c0_i32_1 : i32, i32, i32
  }
  func.func @transform_21(%arg0: i32) -> (i32, i32, i32) {
    %c0_i32 = arith.constant 0 : i32
    %c0_i32_0 = arith.constant 0 : i32
    %c0_i32_1 = arith.constant 0 : i32
    %c0_i32_2 = arith.constant 0 : i32
    return %c0_i32, %c0_i32_0, %c0_i32_1 : i32, i32, i32
  }
  func.func @transform_22(%arg0: i32) -> (i32, i32, i32) {
    %c0_i32 = arith.constant 0 : i32
    %c0_i32_0 = arith.constant 0 : i32
    %c0_i32_1 = arith.constant 0 : i32
    %c0_i32_2 = arith.constant 0 : i32
    return %c0_i32, %c0_i32_0, %c0_i32_1 : i32, i32, i32
  }
  func.func @transform_23(%arg0: i32) -> (i32, i32, i32) {
    %c0_i32 = arith.constant 0 : i32
    %c0_i32_0 = arith.constant 0 : i32
    %c0_i32_1 = arith.constant 0 : i32
    %c0_i32_2 = arith.constant 0 : i32
    return %c0_i32, %c0_i32_0, %c0_i32_1 : i32, i32, i32
  }
  func.func @transform_24(%arg0: i32) -> (i32, i32, i32) {
    %c0_i32 = arith.constant 0 : i32
    %c0_i32_0 = arith.constant 0 : i32
    %c0_i32_1 = arith.constant 0 : i32
    %c0_i32_2 = arith.constant 0 : i32
    return %c0_i32, %c0_i32_0, %c0_i32_1 : i32, i32, i32
  }
  func.func @transform_25(%arg0: i32) -> (i32, i32) {
    %c0_i32 = arith.constant 0 : i32
    %c0_i32_0 = arith.constant 0 : i32
    %c0_i32_1 = arith.constant 0 : i32
    return %c0_i32, %c0_i32_0 : i32, i32
  }
  func.func @transform_26(%arg0: i32) -> (i32, i32, i32) {
    %c0_i32 = arith.constant 0 : i32
    %c0_i32_0 = arith.constant 0 : i32
    %c0_i32_1 = arith.constant 0 : i32
    return %arg0, %c0_i32, %c0_i32_0 : i32, i32, i32
  }
  func.func @transform_27(%arg0: i32) -> (i32, i32, i32, i32) {
    %c0_i32 = arith.constant 0 : i32
    %c0_i32_0 = arith.constant 0 : i32
    %c0_i32_1 = arith.constant 0 : i32
    %c0_i32_2 = arith.constant 0 : i32
    return %arg0, %c0_i32, %c0_i32_0, %c0_i32_1 : i32, i32, i32, i32
  }
  func.func @transform_28(%arg0: i32) -> (i32, i32, i32, i32) {
    %c0_i32 = arith.constant 0 : i32
    %c0_i32_0 = arith.constant 0 : i32
    %c0_i32_1 = arith.constant 0 : i32
    %c0_i32_2 = arith.constant 0 : i32
    return %arg0, %c0_i32, %c0_i32_0, %c0_i32_1 : i32, i32, i32, i32
  }
  func.func @transform_29(%arg0: i32) -> (i32, i32, i32, i32) {
    %c0_i32 = arith.constant 0 : i32
    %c0_i32_0 = arith.constant 0 : i32
    %c0_i32_1 = arith.constant 0 : i32
    %c0_i32_2 = arith.constant 0 : i32
    return %arg0, %c0_i32, %c0_i32_0, %c0_i32_1 : i32, i32, i32, i32
  }
}

</mosaic_0001>

<bundles_post_ra>
// kernel: transformer_forward.1
= control target key start
LH: loop header
LB: loop body
LE: loop exit
PB: predicated region body
PF: predicated region fallthrough
CT: control target
= control target key end

     0   :  { %s10156_s6 = smov 1   ;;  %s10157_s10 = smov 2   ;;  %s11681_s0 = inlined_call_operand.smem [shape: u32[30], index: -1, kind: input, shape index: {}] }
   0x1   :  { %s10200_s5 = sld [smem:[%s11681_s0]]   ;;  %s10158_s14 = smov 3  }
   0x2   :  { %s10205_s9 = sld [smem:[%s11681_s0 + %s10156_s6]]   ;;  %s10159_s18 = smov 4  }
   0x3   :  { %s10210_s13 = sld [smem:[%s11681_s0 + %s10157_s10]]   ;;  %s10160_s22 = smov 5  }
   0x4   :  { %s10215_s17 = sld [smem:[%s11681_s0 + %s10158_s14]]   ;;  %s10161_s26 = smov 6  }
   0x5   :  { %s10220_s21 = sld [smem:[%s11681_s0 + %s10159_s18]]   ;;  %s10162_s30 = smov 7  }
   0x6   :  { %s10225_s25 = sld [smem:[%s11681_s0 + %s10160_s22]]   ;;  %s10163_s4 = smov 8  }
   0x7   :  { %11709 = sst [smem:[#allocation5_spill]] %s10200_s5  ;;  %s10164_s10 = smov 9  }
   0x8   :  { %11710 = sst [smem:[#allocation6_spill]] %s10205_s9  ;;  %s10165_s15 = smov 10  }
   0x9   :  { %11711 = sst [smem:[#allocation7_spill]] %s10210_s13  ;;  %s10166_s20 = smov 11  }
   0xa   :  { %11712 = sst [smem:[#allocation8_spill]] %s10215_s17  ;;  %s10168_s1 = smov 13  }
   0xb   :  { %11713 = sst [smem:[#allocation9_spill]] %s10220_s21  ;;  %s10169_s7 = smov 14  }
   0xc   :  { %s10230_s29 = sld [smem:[%s11681_s0 + %s10161_s26]]   ;;  %s10167_s26 = smov 12  }
   0xd   :  { %s10235_s3 = sld [smem:[%s11681_s0 + %s10162_s30]]   ;;  %s10171_s22 = smov 16  }
   0xe   :  { %s10240_s8 = sld [smem:[%s11681_s0 + %s10163_s4]]   ;;  %s10172_s28 = smov 17  }
   0xf   :  { %s10245_s14 = sld [smem:[%s11681_s0 + %s10164_s10]]  }
  0x10   :  { %s10250_s19 = sld [smem:[%s11681_s0 + %s10165_s15]]   ;;  %s10170_s15 = smov 15  }
  0x11   :  { %s10255_s24 = sld [smem:[%s11681_s0 + %s10166_s20]]  }
  0x12   :  { %s10260_s30 = sld [smem:[%s11681_s0 + %s10167_s26]]  }
  0x13   :  { %11714 = sst [smem:[#allocation10_spill]] %s10235_s3 }
  0x14   :  { %11715 = sst [smem:[#allocation11_spill]] %s10240_s8 }
  0x15   :  { %11716 = sst [smem:[#allocation12_spill]] %s10245_s14 }
  0x16   :  { %11717 = sst [smem:[#allocation13_spill]] %s10250_s19 }
  0x17   :  { %11718 = sst [smem:[#allocation14_spill]] %s10255_s24 }
  0x18   :  { %s10265_s6 = sld [smem:[%s11681_s0 + %s10168_s1]]  }
  0x19   :  { %s10270_s12 = sld [smem:[%s11681_s0 + %s10169_s7]]   ;;  %s10173_s7 = smov 18  }
  0x1a   :  { %s10275_s20 = sld [smem:[%s11681_s0 + %s10170_s15]]   ;;  %s10174_s15 = smov 19  }
  0x1b   :  { %s10280_s27 = sld [smem:[%s11681_s0 + %s10171_s22]]   ;;  %s10175_s22 = smov 20  }
  0x1c   :  { %s10285_s4 = sld [smem:[%s11681_s0 + %s10172_s28]]   ;;  %s10176_s28 = smov 21  }
  0x1d   :  { %s10290_s21 = sld [smem:[%s11681_s0 + %s10173_s7]]   ;;  %s10177_s7 = smov 22  }
  0x1e   :  { %11719 = sst [smem:[#allocation15_spill]] %s10265_s6 }
  0x20   :  { %11720 = sst [smem:[#allocation16_spill]] %s10275_s20 }
  0x21   :  { %11721 = sst [smem:[#allocation17_spill]] %s10280_s27 }
  0x22   :  { %11722 = sst [smem:[#allocation18_spill]] %s10285_s4 }
  0x23   :  { %11723 = sst [smem:[#allocation19_spill]] %s10290_s21 }
  0x24   :  { %s10295_s20 = sld [smem:[%s11681_s0 + %s10174_s15]]   ;;  %s10178_s15 = smov 23  }
  0x25   :  { %s10300_s27 = sld [smem:[%s11681_s0 + %s10175_s22]]   ;;  %s10179_s22 = smov 24  }
  0x26   :  { %s10305_s4 = sld [smem:[%s11681_s0 + %s10176_s28]]   ;;  %s10180_s28 = smov 25  }
  0x27   :  { %s10310_s21 = sld [smem:[%s11681_s0 + %s10177_s7]]   ;;  %s10181_s7 = smov 26  }
  0x2a   :  { %11724 = sst [smem:[#allocation20_spill]] %s10295_s20 }
  0x2b   :  { %11725 = sst [smem:[#allocation21_spill]] %s10300_s27 }
  0x2c   :  { %11726 = sst [smem:[#allocation22_spill]] %s10305_s4 }
  0x2d   :  { %11727 = sst [smem:[#allocation23_spill]] %s10310_s21 }
  0x2e   :  { %s10315_s20 = sld [smem:[%s11681_s0 + %s10178_s15]]   ;;  %s10182_s15 = smov 27  }
  0x2f   :  { %s10320_s27 = sld [smem:[%s11681_s0 + %s10179_s22]]   ;;  %s10183_s22 = smov 28  }
  0x30   :  { %s10325_s4 = sld [smem:[%s11681_s0 + %s10180_s28]]   ;;  %s10184_s28 = smov 29  }
  0x31   :  { %s10330_s21 = sld [smem:[%s11681_s0 + %s10181_s7]]  }
  0x34   :  { %11728 = sst [smem:[#allocation24_spill]] %s10315_s20 }
  0x35   :  { %11729 = sst [smem:[#allocation25_spill]] %s10320_s27 }
  0x36   :  { %11730 = sst [smem:[#allocation26_spill]] %s10325_s4 }
  0x37   :  { %s10335_s20 = sld [smem:[%s11681_s0 + %s10182_s15]]  }
  0x38   :  { %s10340_s27 = sld [smem:[%s11681_s0 + %s10183_s22]]  }
  0x39   :  { %s10345_s4 = sld [smem:[%s11681_s0 + %s10184_s28]]  }
  0x3d   :  { %11731 = sst [smem:[#allocation27_spill]] %s10335_s20 }
  0x3f   :  { %11732 = sst [smem:[#allocation28_spill]] %s10345_s4 }
  0x40   :  { %65 = vsyncpa [#allocation3], 0 }
  0x41   :  { %67 = vsyncpa [#allocation3 + $0x1], 0  ;;  %s10347_s7 = smov 0   ;;  %s10349_s10 = smov 0  }
  0x42   :  { %s10351_s11 = smov 0   ;;  %s10353_s15 = smov 0  }
  0x43 LB: > { %s11733_s6 = sld [smem:[#allocation15_spill]]  ;;  %s11734_s24 = sld [smem:[#allocation14_spill]]  ;;  %s10146_s10 = sphi %s10349_s10, %s11763_s10   ;;  %s10142_s7 = sphi %s10347_s7, %s11762_s7   ;;  %s10154_s15 = sphi %s10353_s15, %s11765_s15   ;;  %s10150_s11 = sphi %s10351_s11, %s11764_s11  }
  0x44   : > { %s11735_s19 = sld [smem:[#allocation13_spill]]  ;;  %s11736_s14 = sld [smem:[#allocation12_spill]] }
  0x45   : > { %s11737_s8 = sld [smem:[#allocation11_spill]]  ;;  %s11738_s3 = sld [smem:[#allocation10_spill]] }
  0x46   : > { %s10368_s0 = sadd.s32 4294967295, %s10154_s15   ;;  %s7660_s16 = sadd.s32 4294967294, %s10154_s15  }
  0x47   : > { %s10372_s18 = sadd.s32 1, %s10154_s15   ;;  %s651_s22 = sadd.s32 1, %s10150_s11 }
  0x48   : > { %s648_s23 = ssub.s32 %s10154_s15, %s10372_s18  ;;  %p661_p0 = scmp.ne.s32.totalorder %s10150_s11, %s10146_s10 }
  0x49   : > { %p649_p1 = scmp.eq.s32.totalorder %s648_s23, 0  ;;  %p662_p2 = scmp.eq.s32.totalorder %s10368_s0, 1 }
  0x4a   : > { %p667_p3 = scmp.ne.s32.totalorder %s10146_s10, %s10142_s7  ;;  %p668_p4 = scmp.eq.s32.totalorder %s7660_s16, 1 }
  0x4b   : > { %s10383_s26 = scalar_select %p649_p1, %s10150_s11, %s651_s22  }
  0x4c   : > { %p10385_p5 = por %p662_p2, %p661_p0  ;;  %p10389_p6 = por %p668_p4, %p667_p3 }
  0x4d   : > { %p7663_p7 = scmp.ge.s32.totalorder %s10154_s15, 1  ;;  %p862_p8 = scmp.lt.s32.totalorder %s10154_s15, 3 }
  0x4f   : > { %p863_p9 = pnand %p7663_p7, %p862_p8 }
  0x50   : > { %v1010_v0 = vld [vmem:[%s10225_s25] sm:$0xff] (!%p863_p9)  ;;  %v1011_v1 = vld [vmem:[%s10225_s25 + $0x8] sm:$0xff] (!%p863_p9)  ;;  %v1012_v2 = vld [vmem:[%s10225_s25 + $0x10] sm:$0xff] (!%p863_p9)  ;;  %v10185_v3 = vmov (!%p863_p9), 0.0|0.0   ;;  %vm10186_vm0 = vmmov (!%p863_p9), 0   ;;  %v10187_v6 = vmov (!%p863_p9), 0.0  }
  0x51   : > { %866 = sbr.rel (%p863_p9) target bundleno = 17346 (0x43c2), region = 124  ;;  %9286 = vmatprep.subr.bf16.mxu0 (!%p863_p9), %v10185_v3  ;;  %v9287_v4 = vpack.c.bf16 (!%p863_p9), %v1011_v1, %v1010_v0  ;;  %v1013_v5 = vld [vmem:[%s10225_s25 + $0x18] sm:$0xff] (!%p863_p9)  ;;  %8553 = vmatprep.mubr.msk.f32.mxu0 (!%p863_p9), %vm10186_vm0, %v10187_v6  ;;  %v1014_v8 = vld [vmem:[%s10225_s25 + $0x20] sm:$0xff] (!%p863_p9)  ;;  %v1015_v9 = vld [vmem:[%s10225_s25 + $0x28] sm:$0xff] (!%p863_p9)  ;;  %p968_p10 = scmp.lt.s32.totalorder (!%p863_p9), %s10368_s0, 1  ;;  %vm1114_vm1 = vcmask (!%p863_p9), 261120  }
  0x52   : > { %8556 = vmatprep.subr.mxu1 (!%p863_p9), %v10187_v6  ;;  %8558 = vmatprep.mubr.msk.f32.mxu1 (!%p863_p9), %vm10186_vm0, %v10187_v6  ;;  %v9290_v7 = vpack.c.bf16 (!%p863_p9), %v1013_v5, %v1012_v2  ;;  %v9293_v10 = vpack.c.bf16 (!%p863_p9), %v1015_v9, %v1014_v8  ;;  %v1016_v11 = vld [vmem:[%s10225_s25 + $0x30] sm:$0xff] (!%p863_p9)  ;;  %v1017_v12 = vld [vmem:[%s10225_s25 + $0x38] sm:$0xff] (!%p863_p9)  ;;  %v1018_v14 = vld [vmem:[%s10225_s25 + $0x40] sm:$0xff] (!%p863_p9)  ;;  %s11741_s5 = sld [smem:[#allocation5_spill]] (!%p863_p9)  ;;  %s11742_s13 = sld [smem:[#allocation7_spill]] (!%p863_p9)  ;;  %vm1190_vm3 = vcmask (!%p863_p9), 64512  }
  0x53   : > { %9288 = vmatpush3.bf16.msra.mxu0 (!%p863_p9), %v9287_v4  ;;  %v9296_v13 = vpack.c.bf16 (!%p863_p9), %v1017_v12, %v1016_v11  ;;  %v1019_v15 = vld [vmem:[%s10225_s25 + $0x48] sm:$0xff] (!%p863_p9)  ;;  %v1020_v17 = vld [vmem:[%s10225_s25 + $0x50] sm:$0xff] (!%p863_p9)  ;;  %v1021_v18 = vld [vmem:[%s10225_s25 + $0x58] sm:$0xff] (!%p863_p9)  ;;  %s11693_s23 = smov (!%p863_p9), 96   ;;  %s11743_s20 = sld [smem:[#allocation27_spill]] (!%p863_p9)  ;;  %vm1778_vm4 = vcmask (!%p863_p9), 523264  }
  0x54   : > { %9289 = vmatprep.subr.bf16.mxu0 (!%p863_p9), %v10185_v3  ;;  %v9299_v16 = vpack.c.bf16 (!%p863_p9), %v1019_v15, %v1018_v14  ;;  %v9302_v19 = vpack.c.bf16 (!%p863_p9), %v1021_v18, %v1020_v17  ;;  %v1022_v20 = vld [vmem:[%s10225_s25 + $0x60] sm:$0xff] (!%p863_p9)  ;;  %v1023_v21 = vld [vmem:[%s10225_s25 + $0x68] sm:$0xff] (!%p863_p9)  ;;  %v1024_v23 = vld [vmem:[%s10225_s25 + $0x70] sm:$0xff] (!%p863_p9)  ;;  %vm1780_vm5 = vcmask (!%p863_p9), 785408   ;;  %s11747_s9 = sld [smem:[#allocation6_spill]] (!%p863_p9)  ;;  %s11748_s17 = sld [smem:[#allocation8_spill]] (!%p863_p9) }
  0x55   : > { %v9305_v22 = vpack.c.bf16 (!%p863_p9), %v1023_v21, %v1022_v20  ;;  %v1025_v24 = vld [vmem:[%s10225_s25 + $0x78] sm:$0xff] (!%p863_p9)  ;;  %s11753_s4 = sld [smem:[#allocation28_spill]] (!%p863_p9)  ;;  %vm7409_vm8 = vcmask (!%p863_p9), 130048  }
  0x56   : > { %v9308_v25 = vpack.c.bf16 (!%p863_p9), %v1025_v24, %v1024_v23 }
  0x57   : > { %9291 = vmatpush3.bf16.msra.mxu0 (!%p863_p9), %v9290_v7 }
  0x58   : > { %9292 = vmatprep.subr.bf16.mxu0 %v10185_v3  ;;  %s10422_s2 = scalar_select %p968_p10, %s10368_s0, 1 }
  0x5a   : > { %s10428_s16 = sshll.u32 %s10422_s2, 3 }
  0x5b   : > { %9294 = vmatpush3.bf16.msra.mxu0 %v9293_v10  ;;  %s971_s22 = scalar_lea.vmem %s11741_s5, %s10428_s16  ;;  %s11744_s5 = smov 64  }
  0x5c   : > { %9295 = vmatprep.subr.bf16.mxu0 %v10185_v3  ;;  %v10433_v26 = vld [vmem:[%s971_s22] sm:$0xff]  ;;  %s979_s22 = scalar_lea.vmem %s11742_s13, %s10428_s16  ;;  %s11746_s13 = smov 32  }
  0x5d   : > { %v10454_v29 = vld [vmem:[%s979_s22] sm:$0xff]  ;;  %s10462_s22 = sshll.u32 %s10422_s2, 6  ;;  %s11695_s2 = smov 64  }
  0x5e   : > { %vm1004_vm2 = vcmp.ne.s32.totalorder %v10454_v29, 0 }
  0x5f   : > { %9297 = vmatpush3.bf16.msra.mxu0 %v9296_v13 }
  0x60   : > { %9298 = vmatprep.subr.bf16.mxu0 %v10185_v3 }
  0x63   : > { %9300 = vmatpush3.bf16.msra.mxu0 %v9299_v16 }
  0x64   : > { %9301 = vmatprep.subr.bf16.mxu0 %v10185_v3 }
  0x67   : > { %9303 = vmatpush3.bf16.msra.mxu0 %v9302_v19 }
  0x68   : > { %9304 = vmatprep.subr.bf16.mxu0 %v10185_v3 }
  0x6b   : > { %9306 = vmatpush3.bf16.msra.mxu0 %v9305_v22 }
  0x6c   : > { %9307 = vmatprep.subr.bf16.mxu0 %v10185_v3 }
  0x6f   : > { %9309 = vmatpush3.bf16.msra.mxu0 %v9308_v25 }
  0x70   : > { %9310 = vmatprep.subr.bf16.mxu0 %v10185_v3 }
  0x72   : > { %8554 = vmatmul.mubr.f32.vlgmr.msra.gmra.mrb[0].mxu0 %v10433_v26 }
  0x73   : > { %8628 = vmatprep.mubr.msk.f32.mxu0 %vm10186_vm0, %v10187_v6 }
 0x145   : > { %v10439_v27 = vpop.f32.mrb[0].mxu0 }
 0x146   : > { %1276 = vrot.lane.b32.xlu1 %v10439_v27, %s11693_s23  ;;  %v8555_v28 = vpop.f32.mrb[1].mxu0  ;;  %8557 = vmatpush3.xpose.msk.msra.mxu1 %vm1114_vm1, %v10439_v27  ;;  %s10466_s23 = scalar_lea.vmem %s11743_s20, %s10462_s22  ;;  %s11759_s20 = sld [smem:[#allocation24_spill]] }
 0x147   : > { %8561 = vmatprep.subr.mxu1 %v10187_v6 }
 0x149   : > { %8559 = vmatmul.mubr.msk.f32.vlgmr.msra.gmra.mrb[0].mxu1 %vm1114_vm1, %v10439_v27 }
 0x14a   : > { %8562 = vmatpush3.msra.mxu1 %v10439_v27  ;;  %8563 = vmatprep.mubr.msk.f32.mxu1 %vm10186_vm0, %v10187_v6 }
 0x14b   : > { %8566 = vmatprep.subr.mxu1 %v10187_v6 }
 0x1b8   : > { %v1277_v43 = vpop.permute.xlu1 %1276 }
 0x21c   : > { %v1184_v30 = vpop.f32.mrb[0].mxu1 }
 0x21d   : > { %v1188_v31 = vmul.f32 0.17677669, %v1184_v30  ;;  %v8560_v32 = vpop.f32.mrb[1].mxu1 }
 0x21e   : > { %v1027_v32 = vld [vmem:[%s10230_s29 + $0x8] sm:$0xff] }
 0x21f   : > { %v1189_v33 = vsel %vm1004_vm2, -1e+09, %v1188_v31  ;;  %v1026_v31 = vld [vmem:[%s10230_s29] sm:$0xff] }
 0x220   : > { %v1191_v34 = vsel %vm1190_vm3, %v1189_v33, -inf }
 0x221   : > { %1192 = vmax.xlane.f32.xlu0 %v1191_v34  ;;  %v9311_v34 = vpack.c.bf16 %v1027_v32, %v1026_v31  ;;  %v1892_v31 = vld [vmem:[%s11736_s14 + $0x70] sm:$0xff] }
 0x223   : > { %9312 = vmatpush3.bf16.msra.mxu0 %v9311_v34  ;;  %v1897_v34 = vld [vmem:[%s11736_s14 + $0x98] sm:$0xff] }
 0x224   : > { %9313 = vmatprep.subr.bf16.mxu0 %v10185_v3 }
 0x2ae   : > { %v1193_v35 = vpop.xlane.xlu0 %1192 }
 0x2af   : > { %v1194_v36 = vsub.f32 %v1189_v33, %v1193_v35  ;;  %v1028_v33 = vld [vmem:[%s10230_s29 + $0x10] sm:$0xff]  ;;  %v1029_v35 = vld [vmem:[%s10230_s29 + $0x18] sm:$0xff] }
 0x2b1   : > { %v1195_v37 = vmul.f32 1.442695, %v1194_v36  ;;  %v9314_v36 = vpack.c.bf16 %v1029_v35, %v1028_v33  ;;  %v1895_v33 = vld [vmem:[%s11736_s14 + $0x88] sm:$0xff] }
 0x2b2   : > { %v9350_v35 = vpack.c.bf16 %v1897_v34, %v1895_v33  ;;  %v1939_v33 = vld [vmem:[%s11735_s19 + $0xe8] sm:$0xff] }
 0x2b3   : > { %9976 = vpow2.f32 %v1195_v37  ;;  %v1030_v37 = vld [vmem:[%s10230_s29 + $0x20] sm:$0xff]  ;;  %9315 = vmatpush3.bf16.msra.mxu0 %v9314_v36 }
 0x2b4   : > { %9316 = vmatprep.subr.bf16.mxu0 %v10185_v3  ;;  %v1894_v36 = vld [vmem:[%s11736_s14 + $0x80] sm:$0xff] }
 0x2bd   : > { %v9977_v38 = vpop.eup %9976 }
 0x2be   : > { %v1197_v39 = vsel %vm1190_vm3, %v9977_v38, 0.0 }
 0x2bf   : > { %1198 = vadd.xlane.f32.xlu0 %v1197_v39 }
 0x34c   : > { %v1199_v40 = vpop.xlane.xlu0 %1198 }
 0x34d   : > { %9978 = vrcp.f32 %v1199_v40  ;;  %v1032_v40 = vld [vmem:[%s10230_s29 + $0x30] sm:$0xff] }
 0x357   : > { %v9979_v41 = vpop.eup %9978 }
 0x358   : > { %v1201_v42 = vmul.f32 %v9979_v41, %v9977_v38  ;;  %v1031_v38 = vld [vmem:[%s10230_s29 + $0x28] sm:$0xff]  ;;  %v1033_v41 = vld [vmem:[%s10230_s29 + $0x38] sm:$0xff] }
 0x359   : > { %v9317_v39 = vpack.c.bf16 %v1031_v38, %v1030_v37  ;;  %v1896_v37 = vld [vmem:[%s11736_s14 + $0x90] sm:$0xff]  ;;  %v1899_v38 = vld [vmem:[%s11736_s14 + $0xa8] sm:$0xff] }
 0x35a   : > { %1202 = vst.msk [vmem:[%s10466_s23] sm:$0xff] %vm1190_vm3, %v1201_v42  ;;  %8564 = vmatmul.mubr.msk.f32.vlgmr.msra.gmra.mrb[2].mxu1 %vm1190_vm3, %v1201_v42  ;;  %v9320_v42 = vpack.c.bf16 %v1033_v41, %v1032_v40  ;;  %v1901_v40 = vld [vmem:[%s11736_s14 + $0xb8] sm:$0xff]  ;;  %v1898_v41 = vld [vmem:[%s11736_s14 + $0xa0] sm:$0xff] }
 0x35b   : > { %8567 = vmatpush3.xpose.msk.msra.mxu1 %vm1114_vm1, %v1277_v43  ;;  %8568 = vmatprep.mubr.msk.f32.mxu1 %vm10186_vm0, %v10187_v6 }
 0x35c   : > { %8571 = vmatprep.subr.mxu1 %v10187_v6  ;;  %9318 = vmatpush3.bf16.msra.mxu0 %v9317_v39  ;;  %v9352_v39 = vpack.c.bf16 %v1896_v37, %v1894_v36  ;;  %v1922_v36 = vld [vmem:[%s11735_s19 + $0x60] sm:$0xff]  ;;  %v1923_v37 = vld [vmem:[%s11735_s19 + $0x68] sm:$0xff] }
 0x35d   : > { %9319 = vmatprep.subr.bf16.mxu0 %v10185_v3 }
 0x35e   : > { %8569 = vmatmul.mubr.msk.f32.vlgmr.msra.gmra.mrb[4].mxu1 %vm1114_vm1, %v1277_v43 }
 0x35f   : > { %8572 = vmatpush3.msra.mxu1 %v1277_v43  ;;  %8573 = vmatprep.mubr.msk.f32.mxu1 %vm10186_vm0, %v10187_v6  ;;  %v1034_v43 = vld [vmem:[%s10230_s29 + $0x40] sm:$0xff] }
 0x360   : > { %8576 = vmatprep.subr.mxu1 %v10187_v6  ;;  %9321 = vmatpush3.bf16.msra.mxu0 %v9320_v42  ;;  %v1900_v42 = vld [vmem:[%s11736_s14 + $0xb0] sm:$0xff] }
 0x361   : > { %9322 = vmatprep.subr.bf16.mxu0 %v10185_v3 }
 0x42d   : > { %v10479_v44 = vpop.f32.mrb[2].mxu1 }
 0x42e   : > { %v8565_v45 = vpop.f32.mrb[3].mxu1 }
 0x42f   : > { %v1035_v45 = vld [vmem:[%s10230_s29 + $0x48] sm:$0xff] }
 0x431   : > { %v1346_v46 = vpop.f32.mrb[4].mxu1 }
 0x432   : > { %v1350_v47 = vmul.f32 0.17677669, %v1346_v46  ;;  %v8570_v48 = vpop.f32.mrb[5].mxu1  ;;  %v9323_v46 = vpack.c.bf16 %v1035_v45, %v1034_v43  ;;  %v9354_v43 = vpack.c.bf16 %v1901_v40, %v1899_v38  ;;  %v1903_v45 = vld [vmem:[%s11736_s14 + $0xc8] sm:$0xff]  ;;  %v9392_v38 = vpack.c.bf16 %v1923_v37, %v1922_v36 }
 0x433   : > { %v1037_v48 = vld [vmem:[%s10230_s29 + $0x58] sm:$0xff] }
 0x434   : > { %v1351_v49 = vsel %vm1004_vm2, -1e+09, %v1350_v47  ;;  %v1036_v47 = vld [vmem:[%s10230_s29 + $0x50] sm:$0xff]  ;;  %9324 = vmatpush3.bf16.msra.mxu0 %v9323_v46  ;;  %v1905_v46 = vld [vmem:[%s11736_s14 + $0xd8] sm:$0xff] }
 0x435   : > { %v1352_v50 = vsel %vm1190_vm3, %v1351_v49, -inf  ;;  %9325 = vmatprep.subr.bf16.mxu0 %v10185_v3 }
 0x436   : > { %1353 = vmax.xlane.f32.xlu1 %v1352_v50  ;;  %v1038_v50 = vld [vmem:[%s10230_s29 + $0x60] sm:$0xff] }
 0x4c3   : > { %v1354_v51 = vpop.xlane.xlu1 %1353 }
 0x4c4   : > { %v1355_v52 = vsub.f32 %v1351_v49, %v1354_v51  ;;  %v9326_v49 = vpack.c.bf16 %v1037_v48, %v1036_v47  ;;  %v1039_v51 = vld [vmem:[%s10230_s29 + $0x68] sm:$0xff]  ;;  %v9356_v47 = vpack.c.bf16 %v1900_v42, %v1898_v41  ;;  %v9358_v48 = vpack.c.bf16 %v1905_v46, %v1903_v45  ;;  %v7692_v46 = vld [vmem:[%s11737_s8] ss:$0 sm:$0xff] }
 0x4c6   : > { %v1356_v53 = vmul.f32 1.442695, %v1355_v52  ;;  %9327 = vmatpush3.bf16.msra.mxu0 %v9326_v49  ;;  %v9329_v52 = vpack.c.bf16 %v1039_v51, %v1038_v50  ;;  %v1902_v49 = vld [vmem:[%s11736_s14 + $0xc0] sm:$0xff]  ;;  %v1904_v50 = vld [vmem:[%s11736_s14 + $0xd0] sm:$0xff]  ;;  %v1907_v51 = vld [vmem:[%s11736_s14 + $0xe8] sm:$0xff] }
 0x4c7   : > { %9328 = vmatprep.subr.bf16.mxu0 %v10185_v3 }
 0x4c8   : > { %9980 = vpow2.f32 %v1356_v53  ;;  %v1040_v53 = vld [vmem:[%s10230_s29 + $0x70] sm:$0xff] }
 0x4ca   : > { %9330 = vmatpush3.bf16.msra.mxu0 %v9329_v52  ;;  %v1909_v52 = vld [vmem:[%s11736_s14 + $0xf8] sm:$0xff] }
 0x4cb   : > { %9331 = vmatprep.subr.bf16.mxu0 %v10185_v3 }
 0x4d2   : > { %v9981_v54 = vpop.eup %9980 }
 0x4d3   : > { %v1358_v55 = vsel %vm1190_vm3, %v9981_v54, 0.0 }
 0x4d4   : > { %1359 = vadd.xlane.f32.xlu0 %v1358_v55 }
 0x4ea   : > { %1439 = vrot.lane.b32.xlu0 %v10439_v27, %s11695_s2  ;;  %s11697_s2 = smov 32  }
 0x561   : > { %v1360_v56 = vpop.xlane.xlu0 %1359 }
 0x562   : > { %9982 = vrcp.f32 %v1360_v56 }
 0x565   : > { %v1440_v59 = vpop.permute.xlu0 %1439 }
 0x56c   : > { %v9983_v57 = vpop.eup %9982 }
 0x56d   : > { %v1362_v58 = vmul.f32 %v9983_v57, %v9981_v54  ;;  %v1041_v54 = vld [vmem:[%s10230_s29 + $0x78] sm:$0xff] }
 0x56e   : > { %v9332_v55 = vpack.c.bf16 %v1041_v54, %v1040_v53  ;;  %v9360_v53 = vpack.c.bf16 %v1904_v50, %v1902_v49  ;;  %v9362_v54 = vpack.c.bf16 %v1909_v52, %v1907_v51  ;;  %v1940_v49 = vld [vmem:[%s11735_s19 + $0xf0] sm:$0xff]  ;;  %v1941_v50 = vld [vmem:[%s11735_s19 + $0xf8] sm:$0xff] }
 0x56f   : > { %7681 = vst.msk [vmem:[%s10466_s23 + $0x8] sm:$0xff] %vm1190_vm3, %v1362_v58  ;;  %8574 = vmatmul.mubr.msk.f32.vlgmr.msra.gmra.mrb[6].mxu1 %vm1190_vm3, %v1362_v58  ;;  %v9394_v51 = vpack.c.bf16 %v1941_v50, %v1940_v49  ;;  %v1924_v52 = vld [vmem:[%s11735_s19 + $0x70] sm:$0xff] }
 0x570   : > { %8577 = vmatpush3.xpose.msk.msra.mxu1 %vm1114_vm1, %v1440_v59  ;;  %8578 = vmatprep.mubr.msk.f32.mxu1 %vm10186_vm0, %v10187_v6 }
 0x571   : > { %8581 = vmatprep.subr.mxu1 %v10187_v6  ;;  %9333 = vmatpush3.bf16.msra.mxu0 %v9332_v55  ;;  %v1906_v55 = vld [vmem:[%s11736_s14 + $0xe0] sm:$0xff] }
 0x573   : > { %8579 = vmatmul.mubr.msk.f32.vlgmr.msra.gmra.mrb[8].mxu1 %vm1114_vm1, %v1440_v59 }
 0x574   : > { %8582 = vmatpush3.msra.mxu1 %v1440_v59  ;;  %8583 = vmatprep.mubr.msk.f32.mxu1 %vm10186_vm0, %v10187_v6 }
 0x575   : > { %8586 = vmatprep.subr.mxu1 %v10187_v6 }
 0x642   : > { %v1435_v60 = vpop.f32.mrb[6].mxu1 }
 0x643   : > { %v8575_v61 = vpop.f32.mrb[7].mxu1 }
 0x646   : > { %v1509_v62 = vpop.f32.mrb[8].mxu1 }
 0x647   : > { %v1513_v63 = vmul.f32 0.17677669, %v1509_v62  ;;  %v8580_v0 = vpop.f32.mrb[9].mxu1 }
 0x649   : > { %v1514_v1 = vsel %vm1004_vm2, -1e+09, %v1513_v63 }
 0x64a   : > { %v1515_v2 = vsel %vm1190_vm3, %v1514_v1, -inf }
 0x64b   : > { %1516 = vmax.xlane.f32.xlu0 %v1515_v2 }
 0x6d8   : > { %v1517_v4 = vpop.xlane.xlu0 %1516 }
 0x6d9   : > { %v1518_v5 = vsub.f32 %v1514_v1, %v1517_v4  ;;  %v1879_v4 = vld [vmem:[%s11736_s14 + $0x8] sm:$0xff] }
 0x6db   : > { %v1519_v7 = vmul.f32 1.442695, %v1518_v5  ;;  %v1881_v5 = vld [vmem:[%s11736_s14 + $0x18] sm:$0xff] }
 0x6dd   : > { %9984 = vpow2.f32 %v1519_v7  ;;  %v1878_v7 = vld [vmem:[%s11736_s14] sm:$0xff] }
 0x6e7   : > { %v9985_v8 = vpop.eup %9984 }
 0x6e8   : > { %v1521_v9 = vsel %vm1190_vm3, %v9985_v8, 0.0 }
 0x6e9   : > { %1522 = vadd.xlane.f32.xlu1 %v1521_v9  ;;  %v1883_v9 = vld [vmem:[%s11736_s14 + $0x28] sm:$0xff] }
 0x6fa   : > { %1602 = vrot.lane.b32.xlu1 %v10439_v27, %s11697_s2 }
 0x776   : > { %v1523_v10 = vpop.xlane.xlu1 %1522 }
 0x777   : > { %9986 = vrcp.f32 %v1523_v10  ;;  %v1885_v10 = vld [vmem:[%s11736_s14 + $0x38] sm:$0xff] }
 0x77a   : > { %v1603_v13 = vpop.permute.xlu1 %1602 }
 0x781   : > { %v9987_v11 = vpop.eup %9986 }
 0x782   : > { %v1525_v12 = vmul.f32 %v9987_v11, %v9985_v8  ;;  %v1880_v8 = vld [vmem:[%s11736_s14 + $0x10] sm:$0xff] }
 0x783   : > { %v9336_v11 = vpack.c.bf16 %v1880_v8, %v1878_v7  ;;  %v1930_v7 = vld [vmem:[%s11735_s19 + $0xa0] sm:$0xff] }
 0x784   : > { %7685 = vst.msk [vmem:[%s10466_s23 + $0x10] sm:$0xff] %vm1190_vm3, %v1525_v12  ;;  %8584 = vmatmul.mubr.msk.f32.vlgmr.msra.gmra.mrb[10].mxu1 %vm1190_vm3, %v1525_v12  ;;  %v9338_v12 = vpack.c.bf16 %v1885_v10, %v1883_v9  ;;  %v1914_v10 = vld [vmem:[%s11735_s19 + $0x20] sm:$0xff] }
 0x785   : > { %8587 = vmatpush3.xpose.msk.msra.mxu1 %vm1114_vm1, %v1603_v13  ;;  %8588 = vmatprep.mubr.msk.f32.mxu1 %vm10186_vm0, %v10187_v6 }
 0x786   : > { %8591 = vmatprep.subr.mxu1 %v10187_v6 }
 0x788   : > { %8589 = vmatmul.mubr.msk.f32.vlgmr.msra.gmra.mrb[12].mxu1 %vm1114_vm1, %v1603_v13 }
 0x789   : > { %8592 = vmatpush3.msra.mxu1 %v1603_v13  ;;  %8593 = vmatprep.mubr.msk.f32.mxu1 %vm10186_vm0, %v10187_v6  ;;  %v1882_v13 = vld [vmem:[%s11736_s14 + $0x20] sm:$0xff] }
 0x857   : > { %v1598_v14 = vpop.f32.mrb[10].mxu1 }
 0x858   : > { %v8585_v15 = vpop.f32.mrb[11].mxu1 }
 0x859   : > { %v1887_v15 = vld [vmem:[%s11736_s14 + $0x48] sm:$0xff] }
 0x85b   : > { %v1672_v16 = vpop.f32.mrb[12].mxu1 }
 0x85c   : > { %v1676_v17 = vmul.f32 0.17677669, %v1672_v16  ;;  %v8590_v18 = vpop.f32.mrb[13].mxu1  ;;  %v1889_v16 = vld [vmem:[%s11736_s14 + $0x58] sm:$0xff] }
 0x85d   : > { %v1886_v18 = vld [vmem:[%s11736_s14 + $0x40] sm:$0xff] }
 0x85e   : > { %v1677_v19 = vsel %vm1004_vm2, -1e+09, %v1676_v17  ;;  %v9342_v17 = vpack.c.bf16 %v1889_v16, %v1887_v15  ;;  %v1916_v16 = vld [vmem:[%s11735_s19 + $0x30] sm:$0xff] }
 0x85f   : > { %v1678_v20 = vsel %vm1190_vm3, %v1677_v19, -inf }
 0x860   : > { %1679 = vmax.xlane.f32.xlu1 %v1678_v20 }
 0x8ed   : > { %v1680_v21 = vpop.xlane.xlu1 %1679 }
 0x8ee   : > { %v1681_v22 = vsub.f32 %v1677_v19, %v1680_v21  ;;  %v1888_v19 = vld [vmem:[%s11736_s14 + $0x50] sm:$0xff] }
 0x8ef   : > { %v9344_v20 = vpack.c.bf16 %v1888_v19, %v1886_v18  ;;  %v1935_v18 = vld [vmem:[%s11735_s19 + $0xc8] sm:$0xff] }
 0x8f0   : > { %v1682_v23 = vmul.f32 1.442695, %v1681_v22 }
 0x8f2   : > { %9988 = vpow2.f32 %v1682_v23 }
 0x8fc   : > { %v9989_v24 = vpop.eup %9988 }
 0x8fd   : > { %v1684_v25 = vsel %vm1190_vm3, %v9989_v24, 0.0 }
 0x8fe   : > { %1685 = vadd.xlane.f32.xlu0 %v1684_v25  ;;  %v1891_v25 = vld [vmem:[%s11736_s14 + $0x68] sm:$0xff] }
 0x914   : > { %1766 = vrot.lane.b32.xlu0 %v1435_v60, %s11697_s2  ;;  %s11745_s2 = smov 96  }
 0x918   : > { %1770 = vrot.lane.b32.xlu0 %v1598_v14, %s11744_s5  ;;  %v1884_v14 = vld [vmem:[%s11736_s14 + $0x30] sm:$0xff] }
 0x98b   : > { %v1686_v27 = vpop.xlane.xlu0 %1685 }
 0x98c   : > { %9990 = vrcp.f32 %v1686_v27  ;;  %v1893_v27 = vld [vmem:[%s11736_s14 + $0x78] sm:$0xff] }
 0x98f   : > { %v1767_v58 = vpop.permute.xlu0 %1766 }
 0x990   : > { %v1777_v60 = vsel %vm1114_vm1, %v10479_v44, %v1767_v58  ;;  %v9334_v44 = vpack.c.bf16 %v1881_v5, %v1879_v4  ;;  %v1926_v58 = vld [vmem:[%s11735_s19 + $0x80] sm:$0xff]  ;;  %v1912_v4 = vld [vmem:[%s11735_s19 + $0x10] sm:$0xff]  ;;  %v1913_v5 = vld [vmem:[%s11735_s19 + $0x18] sm:$0xff] }
 0x991   : > { %v9372_v8 = vpack.c.bf16 %v1913_v5, %v1912_v4  ;;  %v7699_v5 = vld [vmem:[%s10225_s25 + $0xa0] sm:$0xff] }
 0x992   : > { %9335 = vmatprep.subr.bf16.mxu1 %v9334_v44  ;;  %v1931_v44 = vld [vmem:[%s11735_s19 + $0xa8] sm:$0xff] }
 0x993   : > { %v1771_v59 = vpop.permute.xlu0 %1770  ;;  %v9374_v9 = vpack.c.bf16 %v1931_v44, %v1930_v7  ;;  %v7700_v7 = vld [vmem:[%s10225_s25 + $0xa8] sm:$0xff] }
 0x994   : > { %v1779_v61 = vsel %vm1778_vm4, %v1777_v60, %v1771_v59  ;;  %v1927_v59 = vld [vmem:[%s11735_s19 + $0x88] sm:$0xff]  ;;  %v1910_v60 = vld [vmem:[%s11735_s19] sm:$0xff]  ;;  %v9405_v44 = vpack.c.bf16 %v7700_v7, %v7699_v5 }
 0x996   : > { %v9991_v28 = vpop.eup %9990 }
 0x997   : > { %v1688_v30 = vmul.f32 %v9991_v28, %v9989_v24  ;;  %v9346_v28 = vpack.c.bf16 %v1893_v27, %v1891_v25  ;;  %v1937_v25 = vld [vmem:[%s11735_s19 + $0xd8] sm:$0xff] }
 0x999   : > { %7689 = vst.msk [vmem:[%s10466_s23 + $0x18] sm:$0xff] %vm1190_vm3, %v1688_v30  ;;  %8594 = vmatmul.mubr.msk.f32.vlgmr.msra.gmra.mrb[14].mxu1 %vm1190_vm3, %v1688_v30  ;;  %v1890_v30 = vld [vmem:[%s11736_s14 + $0x60] sm:$0xff] }
 0x99a   : > { %2008 = vmatprep.mubr.f32.mxu1 %v10187_v6  ;;  %9337 = vmatpush1.bf16.msra.mxu1 %v9336_v11  ;;  %v9348_v32 = vpack.c.bf16 %v1892_v31, %v1890_v30  ;;  %v1915_v11 = vld [vmem:[%s11735_s19 + $0x28] sm:$0xff]  ;;  %v1920_v30 = vld [vmem:[%s11735_s19 + $0x50] sm:$0xff]  ;;  %v1921_v31 = vld [vmem:[%s11735_s19 + $0x58] sm:$0xff] }
 0x99b   : > { %9339 = vmatprep.subr.bf16.mxu1 %v9338_v12  ;;  %v1932_v12 = vld [vmem:[%s11735_s19 + $0xb0] sm:$0xff]  ;;  %v9388_v34 = vpack.c.bf16 %v1921_v31, %v1920_v30 }
 0xa6c   : > { %v1761_v56 = vpop.f32.mrb[14].mxu1 }
 0xa6d   : > { %1774 = vrot.lane.b32.xlu0 %v1761_v56, %s11745_s2  ;;  %v8595_v57 = vpop.f32.mrb[15].mxu1  ;;  %v1908_v56 = vld [vmem:[%s11736_s14 + $0xf0] sm:$0xff] }
 0xa6e   : > { %v9364_v57 = vpack.c.bf16 %v1908_v56, %v1906_v55 }
 0xadf   : > { %v1775_v62 = vpop.permute.xlu0 %1774 }
 0xae0   : > { %v1781_v63 = vsel %vm1780_vm5, %v1779_v61, %v1775_v62  ;;  %v9366_v61 = vpack.c.bf16 %v1927_v59, %v1926_v58  ;;  %v1911_v62 = vld [vmem:[%s11735_s19 + $0x8] sm:$0xff] }
 0xae1   : > { %8629 = vmatmul.mubr.f32.vlgmr.msra.gmra.mrb[2].mxu0 %v1781_v63  ;;  %v1928_v63 = vld [vmem:[%s11735_s19 + $0x90] sm:$0xff] }
 0xae2   : > { %9367 = vmatprep.subr.bf16.mxu0 %v9366_v61 }
 0xbb4   : > { %v1848_v0 = vpop.f32.mrb[2].mxu0 }
 0xbb5   : > { %v1849_v1 = vadd.f32 %v1848_v0, %v10433_v26  ;;  %v8630_v2 = vpop.f32.mrb[3].mxu0  ;;  %v9340_v26 = vpack.c.bf16 %v1884_v14, %v1882_v13  ;;  %v1929_v0 = vld [vmem:[%s11735_s19 + $0x98] sm:$0xff]  ;;  %v9376_v14 = vpack.c.bf16 %v1915_v11, %v1914_v10 }
 0xbb6   : > { %v9370_v2 = vpack.c.bf16 %v1929_v0, %v1928_v63  ;;  %v1933_v13 = vld [vmem:[%s11735_s19 + $0xb8] sm:$0xff]  ;;  %v7696_v63 = vld [vmem:[%s10225_s25 + $0x88] sm:$0xff]  ;;  %v7697_v0 = vld [vmem:[%s10225_s25 + $0x90] sm:$0xff] }
 0xbb7   : > { %1852 = vadd.xlane.f32.xlu1 %v1849_v1  ;;  %9341 = vmatpush1.bf16.msra.mxu1 %v9340_v26  ;;  %v9378_v15 = vpack.c.bf16 %v1933_v13, %v1932_v12  ;;  %v1917_v26 = vld [vmem:[%s11735_s19 + $0x38] sm:$0xff]  ;;  %v7701_v12 = vld [vmem:[%s10225_s25 + $0xb0] sm:$0xff] }
 0xbb8   : > { %9343 = vmatprep.subr.bf16.mxu1 %v9342_v17  ;;  %v1934_v17 = vld [vmem:[%s11735_s19 + $0xc0] sm:$0xff]  ;;  %v9380_v19 = vpack.c.bf16 %v1917_v26, %v1916_v16  ;;  %v7702_v13 = vld [vmem:[%s10225_s25 + $0xb8] sm:$0xff]  ;;  %v7704_v16 = vld [vmem:[%s10225_s25 + $0xc8] sm:$0xff] }
 0xbb9   : > { %v7705_v26 = vld [vmem:[%s10225_s25 + $0xd0] sm:$0xff] }
 0xbbb   : > { %9345 = vmatpush1.bf16.msra.mxu1 %v9344_v20  ;;  %v9382_v20 = vpack.c.bf16 %v1935_v18, %v1934_v17  ;;  %v7706_v18 = vld [vmem:[%s10225_s25 + $0xd8] sm:$0xff] }
 0xbbc   : > { %9347 = vmatprep.subr.bf16.mxu1 %v9346_v28 }
 0xbbf   : > { %9349 = vmatpush1.bf16.msra.mxu1 %v9348_v32  ;;  %v1938_v32 = vld [vmem:[%s11735_s19 + $0xe0] sm:$0xff] }
 0xbc0   : > { %9351 = vmatprep.subr.bf16.mxu1 %v9350_v35  ;;  %v9390_v35 = vpack.c.bf16 %v1939_v33, %v1938_v32  ;;  %v7693_v33 = vld [vmem:[%s11734_s24] ss:$0 sm:$0xff] }
 0xbc3   : > { %9353 = vmatpush1.bf16.msra.mxu1 %v9352_v39 }
 0xbc4   : > { %9355 = vmatprep.subr.bf16.mxu1 %v9354_v43  ;;  %v7691_v43 = vld [vmem:[%s11738_s3] ss:$0 sm:$0xff] }
 0xbc7   : > { %9357 = vmatpush1.bf16.msra.mxu1 %v9356_v47 }
 0xbc8   : > { %9359 = vmatprep.subr.bf16.mxu1 %v9358_v48 }
 0xbcb   : > { %9361 = vmatpush1.bf16.msra.mxu1 %v9360_v53  ;;  %v1925_v53 = vld [vmem:[%s11735_s19 + $0x78] sm:$0xff] }
 0xbcc   : > { %9363 = vmatprep.subr.bf16.mxu1 %v9362_v54  ;;  %v9396_v54 = vpack.c.bf16 %v1925_v53, %v1924_v52 }
 0xbcf   : > { %9365 = vmatpush1.bf16.msra.mxu1 %v9364_v57 }
 0xbd0   : > { %9398 = vmatprep.subr.bf16.mxu1 %v10185_v3 }
 0xc44   : > { %v1853_v21 = vpop.xlane.xlu1 %1852 }
 0xc45   : > { %v1855_v22 = vmul.f32 0.0078125, %v1853_v21  ;;  %v1918_v21 = vld [vmem:[%s11735_s19 + $0x40] sm:$0xff] }
 0xc47   : > { %v10565_v23 = vsub.f32 %v1849_v1, %v1855_v22  ;;  %v9368_v1 = vpack.c.bf16 %v1911_v62, %v1910_v60  ;;  %v1919_v22 = vld [vmem:[%s11735_s19 + $0x48] sm:$0xff]  ;;  %v7695_v62 = vld [vmem:[%s10225_s25 + $0x80] sm:$0xff] }
 0xc48   : > { %v9384_v27 = vpack.c.bf16 %v1919_v22, %v1918_v21  ;;  %v7708_v21 = vld [vmem:[%s10225_s25 + $0xe8] sm:$0xff] }
 0xc49   : > { %v1857_v24 = vmul.f32 %v10565_v23, %v10565_v23  ;;  %9369 = vmatpush3.bf16.msra.mxu0 %v9368_v1  ;;  %v9399_v1 = vpack.c.bf16 %v7696_v63, %v7695_v62 }
 0xc4a   : > { %9371 = vmatprep.subr.bf16.mxu0 %v9370_v2  ;;  %v7698_v2 = vld [vmem:[%s10225_s25 + $0x98] sm:$0xff] }
 0xc4b   : > { %1858 = vadd.xlane.f32.xlu0 %v1857_v24  ;;  %v1936_v24 = vld [vmem:[%s11735_s19 + $0xd0] sm:$0xff]  ;;  %v9402_v4 = vpack.c.bf16 %v7698_v2, %v7697_v0 }
 0xc4c   : > { %v9386_v28 = vpack.c.bf16 %v1937_v25, %v1936_v24  ;;  %v7709_v24 = vld [vmem:[%s10225_s25 + $0xf0] sm:$0xff]  ;;  %v7710_v25 = vld [vmem:[%s10225_s25 + $0xf8] sm:$0xff] }
 0xc4d   : > { %9373 = vmatpush3.bf16.msra.mxu0 %v9372_v8 }
 0xc4e   : > { %9375 = vmatprep.subr.bf16.mxu0 %v9374_v9 }
 0xc51   : > { %9377 = vmatpush3.bf16.msra.mxu0 %v9376_v14  ;;  %v9408_v14 = vpack.c.bf16 %v7702_v13, %v7701_v12 }
 0xc52   : > { %9379 = vmatprep.subr.bf16.mxu0 %v9378_v15  ;;  %v7703_v15 = vld [vmem:[%s10225_s25 + $0xc0] sm:$0xff] }
 0xc53   : > { %v9411_v17 = vpack.c.bf16 %v7704_v16, %v7703_v15 }
 0xc55   : > { %9381 = vmatpush3.bf16.msra.mxu0 %v9380_v19  ;;  %v9414_v19 = vpack.c.bf16 %v7706_v18, %v7705_v26 }
 0xc56   : > { %9383 = vmatprep.subr.bf16.mxu0 %v9382_v20  ;;  %v7707_v20 = vld [vmem:[%s10225_s25 + $0xe0] sm:$0xff] }
 0xc57   : > { %v9417_v22 = vpack.c.bf16 %v7708_v21, %v7707_v20 }
 0xc59   : > { %9385 = vmatpush3.bf16.msra.mxu0 %v9384_v27  ;;  %v9420_v27 = vpack.c.bf16 %v7710_v25, %v7709_v24 }
 0xc5a   : > { %9387 = vmatprep.subr.bf16.mxu0 %v9386_v28 }
 0xc5d   : > { %9389 = vmatpush3.bf16.msra.mxu0 %v9388_v34 }
 0xc5e   : > { %9391 = vmatprep.subr.bf16.mxu0 %v9390_v35  ;;  %v7694_v35 = vld [vmem:[%s10260_s30] ss:$0 sm:$0xff] }
 0xc61   : > { %9393 = vmatpush3.bf16.msra.mxu0 %v9392_v38 }
 0xc62   : > { %9395 = vmatprep.subr.bf16.mxu0 %v9394_v51 }
 0xc65   : > { %9397 = vmatpush3.bf16.msra.mxu0 %v9396_v54 }
 0xc66   : > { %8666 = vmatprep.subr.mxu0 %v10187_v6 }
 0xcd8   : > { %v1859_v39 = vpop.xlane.xlu0 %1858 }
 0xcd9   : > { %v1860_v40 = vmul.f32 0.0078125, %v1859_v39 }
 0xcdb   : > { %v1861_v41 = vadd.f32 1e-05, %v1860_v40 }
 0xcdd   : > { %9992 = vrsqrt.f32 %v1861_v41 }
 0xce7   : > { %v9993_v42 = vpop.eup %9992 }
 0xce8   : > { %v1863_v45 = vmul.f32 %v9993_v42, %v10565_v23 }
 0xcea   : > { %v1870_v47 = vmul.f32 %v7691_v43, %v1863_v45 }
 0xcec   : > { %v1877_v48 = vadd.f32 %v7692_v46, %v1870_v47 }
 0xcee   : > { %2009 = vmatmul.mubr.f32.vlgmr.msra.gmra.mrb[16].mxu1 %v1877_v48 }
 0xcef   : > { %8663 = vmatprep.mubr.msk.f32.mxu1 %vm10186_vm0, %v10187_v6  ;;  %9400 = vmatpush3.bf16.msra.mxu1 %v9399_v1 }
 0xcf0   : > { %9401 = vmatprep.subr.bf16.mxu1 %v10185_v3 }
 0xcf3   : > { %9403 = vmatpush3.bf16.msra.mxu1 %v9402_v4 }
 0xcf4   : > { %9404 = vmatprep.subr.bf16.mxu1 %v10185_v3 }
 0xcf7   : > { %9406 = vmatpush3.bf16.msra.mxu1 %v9405_v44 }
 0xcf8   : > { %9407 = vmatprep.subr.bf16.mxu1 %v10185_v3 }
 0xcfb   : > { %9409 = vmatpush3.bf16.msra.mxu1 %v9408_v14 }
 0xcfc   : > { %9410 = vmatprep.subr.bf16.mxu1 %v10185_v3 }
 0xcff   : > { %9412 = vmatpush3.bf16.msra.mxu1 %v9411_v17 }
 0xd00   : > { %9413 = vmatprep.subr.bf16.mxu1 %v10185_v3 }
 0xd03   : > { %9415 = vmatpush3.bf16.msra.mxu1 %v9414_v19 }
 0xd04   : > { %9416 = vmatprep.subr.bf16.mxu1 %v10185_v3 }
 0xd07   : > { %9418 = vmatpush3.bf16.msra.mxu1 %v9417_v22 }
 0xd08   : > { %9419 = vmatprep.subr.bf16.mxu1 %v10185_v3 }
 0xd0b   : > { %9421 = vmatpush3.bf16.msra.mxu1 %v9420_v27 }
 0xd0c   : > { %8671 = vmatprep.subr.mxu1 %v10187_v6 }
 0xdc1   : > { %v2010_v23 = vpop.f32.mrb[16].mxu1 }
 0xdc2   : > { %v2012_v55 = vpop.f32.mrb[17].mxu1  ;;  %v2015_v57 = vmax.f32 %v2010_v23, 0.0 }
 0xdc3   : > { %v2016_v56 = vmax.f32 %v2012_v55, 0.0 }
 0xdc5   : > { %2081 = vmatprep.mubr.f32.mxu0 %v2016_v56 }
 0xdc6   : > { %2082 = vmatmul.mubr.f32.vlgmr.msra.gmra.mrb[4].mxu0 %v2015_v57 }
 0xdc7   : > { %8668 = vmatprep.mubr.msk.f32.mxu0 %vm10186_vm0, %v10187_v6 }
 0xe99   : > { %v8112_v58 = vpop.f32.mrb[4].mxu0 }
 0xe9a   : > { %v8113_v59 = vpop.f32.mrb[5].mxu0 }
 0xe9b   : > { %v8114_v60 = vadd.f32 %v8113_v59, %v8112_v58 }
 0xe9d   : > { %v2084_v61 = vadd.f32 %v8114_v60, %v1877_v48 }
 0xe9f   : > { %2087 = vadd.xlane.f32.xlu1 %v2084_v61 }
 0xf2c   : > { %v2088_v8 = vpop.xlane.xlu1 %2087 }
 0xf2d   : > { %v2089_v9 = vmul.f32 0.0078125, %v2088_v8 }
 0xf2f   : > { %v2090_v10 = vsub.f32 %v2084_v61, %v2089_v9 }
 0xf31   : > { %v2091_v11 = vmul.f32 %v2090_v10, %v2090_v10 }
 0xf33   : > { %2092 = vadd.xlane.f32.xlu1 %v2091_v11 }
 0xfc0   : > { %v2093_v28 = vpop.xlane.xlu1 %2092 }
 0xfc1   : > { %v2094_v30 = vmul.f32 0.0078125, %v2093_v28 }
 0xfc3   : > { %v2095_v31 = vadd.f32 1e-05, %v2094_v30 }
 0xfc5   : > { %9994 = vrsqrt.f32 %v2095_v31 }
 0xfcf   : > { %v9995_v32 = vpop.eup %9994 }
 0xfd0   : > { %v2097_v34 = vmul.f32 %v9995_v32, %v2090_v10 }
 0xfd2   : > { %v2104_v36 = vmul.f32 %v7693_v33, %v2097_v34  ;;  %v7711_v33 = vld [vmem:[%s10230_s29 + $0x80] sm:$0xff]  ;;  %v7712_v34 = vld [vmem:[%s10230_s29 + $0x88] sm:$0xff] }
 0xfd4   : > { %v10656_v37 = vadd.f32 %v7694_v35, %v2104_v36  ;;  %v7713_v35 = vld [vmem:[%s10230_s29 + $0x90] sm:$0xff]  ;;  %v9423_v36 = vpack.c.bf16 %v7712_v34, %v7711_v33  ;;  %v7760_v34 = vld [vmem:[%s11736_s14 + $0x168] sm:$0xff] }
 0xfd6   : > { %8664 = vmatmul.mubr.f32.vlgmr.msra.gmra.mrb[18].mxu1 %v10656_v37 }
 0xfd7   : > { %8673 = vmatprep.mubr.msk.f32.mxu1 %vm10186_vm0, %v10187_v6 }
0x10a9   : > { %v2216_v38 = vpop.f32.mrb[18].mxu1 }
0x10aa   : > { %2707 = vrot.lane.b32.xlu0 %v2216_v38, %s11746_s13  ;;  %2381 = vrot.lane.b32.xlu1 %v2216_v38, %s11745_s2  ;;  %v8665_v39 = vpop.f32.mrb[19].mxu1 }
0x10ab   : > { %8667 = vmatpush3.xpose.msk.msra.mxu0 %vm1114_vm1, %v2216_v38  ;;  %8672 = vmatpush3.msra.mxu1 %v2216_v38 }
0x10ac   : > { %8676 = vmatprep.subr.mxu0 %v10187_v6  ;;  %8681 = vmatprep.subr.mxu1 %v10187_v6 }
0x10ae   : > { %8669 = vmatmul.mubr.msk.f32.vlgmr.msra.gmra.mrb[6].mxu0 %vm1114_vm1, %v2216_v38  ;;  %2544 = vrot.lane.b32.xlu1 %v2216_v38, %s11744_s5  ;;  %v7714_v38 = vld [vmem:[%s10230_s29 + $0x98] sm:$0xff] }
0x10af   : > { %8678 = vmatprep.mubr.msk.f32.mxu0 %vm10186_vm0, %v10187_v6  ;;  %v9426_v39 = vpack.c.bf16 %v7714_v38, %v7713_v35  ;;  %v7762_v35 = vld [vmem:[%s11736_s14 + $0x178] sm:$0xff]  ;;  %v7759_v38 = vld [vmem:[%s11736_s14 + $0x160] sm:$0xff] }
0x111c   : > { %v10670_v40 = vpop.permute.xlu1 %2381  ;;  %v10684_v42 = vpop.permute.xlu0 %2707 }
0x111d   : > { %8677 = vmatpush3.xpose.msk.msra.mxu0 %vm1114_vm1, %v10670_v40 }
0x111e   : > { %8686 = vmatprep.subr.mxu0 %v10187_v6 }
0x1120   : > { %v10675_v41 = vpop.permute.xlu1 %2544  ;;  %8679 = vmatmul.mubr.msk.f32.vlgmr.msra.gmra.mrb[8].mxu0 %vm1114_vm1, %v10670_v40 }
0x1121   : > { %8687 = vmatpush3.xpose.msk.msra.mxu0 %vm1114_vm1, %v10675_v41  ;;  %8688 = vmatprep.mubr.msk.f32.mxu0 %vm10186_vm0, %v10187_v6 }
0x1122   : > { %8696 = vmatprep.subr.mxu0 %v10187_v6 }
0x1124   : > { %8689 = vmatmul.mubr.msk.f32.vlgmr.msra.gmra.mrb[10].mxu0 %vm1114_vm1, %v10675_v41 }
0x1125   : > { %8697 = vmatpush3.xpose.msk.msra.mxu0 %vm1114_vm1, %v10684_v42  ;;  %8698 = vmatprep.mubr.msk.f32.mxu0 %vm10186_vm0, %v10187_v6 }
0x1126   : > { %9422 = vmatprep.subr.bf16.mxu0 %v10185_v3 }
0x1128   : > { %8699 = vmatmul.mubr.msk.f32.vlgmr.msra.gmra.mrb[12].mxu0 %vm1114_vm1, %v10684_v42 }
0x1129   : > { %8738 = vmatprep.mubr.msk.f32.mxu0 %vm10186_vm0, %v10187_v6  ;;  %9424 = vmatpush3.bf16.msra.mxu0 %v9423_v36  ;;  %v9458_v36 = vpack.c.bf16 %v7762_v35, %v7760_v34 }
0x112a   : > { %9425 = vmatprep.subr.bf16.mxu0 %v10185_v3 }
0x112d   : > { %9427 = vmatpush3.bf16.msra.mxu0 %v9426_v39  ;;  %v7761_v39 = vld [vmem:[%s11736_s14 + $0x170] sm:$0xff] }
0x112e   : > { %9428 = vmatprep.subr.bf16.mxu0 %v10185_v3 }
0x1181   : > { %v2289_v43 = vpop.f32.mrb[6].mxu0 }
0x1182   : > { %v2293_v45 = vmul.f32 0.17677669, %v2289_v43  ;;  %v8670_v46 = vpop.f32.mrb[7].mxu0 }
0x1183   : > { %v7717_v46 = vld [vmem:[%s10230_s29 + $0xb0] sm:$0xff] }
0x1184   : > { %v2294_v47 = vsel %vm1004_vm2, -1e+09, %v2293_v45 }
0x1185   : > { %v2295_v48 = vsel %vm1190_vm3, %v2294_v47, -inf }
0x1186   : > { %2296 = vmax.xlane.f32.xlu1 %v2295_v48 }
0x11f3   : > { %v2451_v49 = vpop.f32.mrb[8].mxu0 }
0x11f4   : > { %v2455_v50 = vmul.f32 0.17677669, %v2451_v49  ;;  %v8680_v51 = vpop.f32.mrb[9].mxu0  ;;  %v7719_v49 = vld [vmem:[%s10230_s29 + $0xc0] sm:$0xff] }
0x11f6   : > { %v2456_v52 = vsel %vm1004_vm2, -1e+09, %v2455_v50  ;;  %v7720_v50 = vld [vmem:[%s10230_s29 + $0xc8] sm:$0xff] }
0x11f7   : > { %v2614_v53 = vpop.f32.mrb[10].mxu0  ;;  %v2457_v54 = vsel %vm1190_vm3, %v2456_v52, -inf  ;;  %v9435_v51 = vpack.c.bf16 %v7720_v50, %v7719_v49  ;;  %v7770_v49 = vld [vmem:[%s11736_s14 + $0x1b8] sm:$0xff]  ;;  %v7767_v50 = vld [vmem:[%s11736_s14 + $0x1a0] sm:$0xff] }
0x11f8   : > { %v2618_v23 = vmul.f32 0.17677669, %v2614_v53  ;;  %2458 = vmax.xlane.f32.xlu0 %v2457_v54  ;;  %v8690_v55 = vpop.f32.mrb[11].mxu0  ;;  %v7722_v53 = vld [vmem:[%s10230_s29 + $0xd8] sm:$0xff] }
0x11f9   : > { %v7724_v55 = vld [vmem:[%s10230_s29 + $0xe8] sm:$0xff] }
0x11fa   : > { %v2619_v56 = vsel %vm1004_vm2, -1e+09, %v2618_v23  ;;  %v7723_v23 = vld [vmem:[%s10230_s29 + $0xe0] sm:$0xff] }
0x11fb   : > { %v2777_v57 = vpop.f32.mrb[12].mxu0  ;;  %v2620_v58 = vsel %vm1190_vm3, %v2619_v56, -inf }
0x11fc   : > { %v2781_v59 = vmul.f32 0.17677669, %v2777_v57  ;;  %2621 = vmax.xlane.f32.xlu1 %v2620_v58  ;;  %v8700_v60 = vpop.f32.mrb[13].mxu0  ;;  %v7725_v57 = vld [vmem:[%s10230_s29 + $0xf0] sm:$0xff]  ;;  %v7726_v58 = vld [vmem:[%s10230_s29 + $0xf8] sm:$0xff] }
0x11fe   : > { %v2782_v61 = vsel %vm1004_vm2, -1e+09, %v2781_v59  ;;  %v9444_v59 = vpack.c.bf16 %v7726_v58, %v7725_v57  ;;  %v7773_v57 = vld [vmem:[%s11736_s14 + $0x1d0] sm:$0xff]  ;;  %v7776_v58 = vld [vmem:[%s11736_s14 + $0x1e8] sm:$0xff] }
0x11ff   : > { %v2783_v62 = vsel %vm1190_vm3, %v2782_v61, -inf }
0x1200   : > { %2784 = vmax.xlane.f32.xlu1 %v2783_v62 }
0x1213   : > { %v2297_v63 = vpop.xlane.xlu1 %2296 }
0x1214   : > { %v2298_v0 = vsub.f32 %v2294_v47, %v2297_v63  ;;  %v7718_v47 = vld [vmem:[%s10230_s29 + $0xb8] sm:$0xff] }
0x1215   : > { %v9432_v48 = vpack.c.bf16 %v7718_v47, %v7717_v46  ;;  %v7765_v46 = vld [vmem:[%s11736_s14 + $0x190] sm:$0xff]  ;;  %v7768_v47 = vld [vmem:[%s11736_s14 + $0x1a8] sm:$0xff] }
0x1216   : > { %v2299_v1 = vmul.f32 1.442695, %v2298_v0 }
0x1218   : > { %9996 = vpow2.f32 %v2299_v1 }
0x1222   : > { %v9997_v2 = vpop.eup %9996 }
0x1223   : > { %v2301_v4 = vsel %vm1190_vm3, %v9997_v2, 0.0 }
0x1224   : > { %2302 = vadd.xlane.f32.xlu1 %v2301_v4 }
0x1285   : > { %v2459_v5 = vpop.xlane.xlu0 %2458 }
0x1286   : > { %v2460_v7 = vsub.f32 %v2456_v52, %v2459_v5  ;;  %v7721_v52 = vld [vmem:[%s10230_s29 + $0xd0] sm:$0xff] }
0x1287   : > { %v9438_v54 = vpack.c.bf16 %v7722_v53, %v7721_v52  ;;  %v9466_v52 = vpack.c.bf16 %v7770_v49, %v7768_v47  ;;  %v7772_v53 = vld [vmem:[%s11736_s14 + $0x1c8] sm:$0xff] }
0x1288   : > { %v2461_v44 = vmul.f32 1.442695, %v2460_v7 }
0x1289   : > { %v2622_v8 = vpop.xlane.xlu1 %2621 }
0x128a   : > { %9998 = vpow2.f32 %v2461_v44  ;;  %v2623_v9 = vsub.f32 %v2619_v56, %v2622_v8  ;;  %v9441_v56 = vpack.c.bf16 %v7724_v55, %v7723_v23 }
0x128c   : > { %v2624_v10 = vmul.f32 1.442695, %v2623_v9 }
0x128d   : > { %v2785_v29 = vpop.xlane.xlu1 %2784 }
0x128e   : > { %10000 = vpow2.f32 %v2624_v10  ;;  %v2786_v11 = vsub.f32 %v2782_v61, %v2785_v29 }
0x1290   : > { %v2787_v12 = vmul.f32 1.442695, %v2786_v11  ;;  %v7748_v11 = vld [vmem:[%s11736_s14 + $0x108] sm:$0xff] }
0x1292   : > { %10002 = vpow2.f32 %v2787_v12  ;;  %v7750_v12 = vld [vmem:[%s11736_s14 + $0x118] sm:$0xff] }
0x1294   : > { %v9999_v13 = vpop.eup %9998 }
0x1295   : > { %v2463_v14 = vsel %vm1190_vm3, %v9999_v13, 0.0 }
0x1296   : > { %2464 = vadd.xlane.f32.xlu1 %v2463_v14  ;;  %v9446_v14 = vpack.c.bf16 %v7750_v12, %v7748_v11  ;;  %v7782_v11 = vld [vmem:[%s11735_s19 + $0x118] sm:$0xff]  ;;  %v7799_v12 = vld [vmem:[%s11735_s19 + $0x1a0] sm:$0xff] }
0x1298   : > { %v10001_v15 = vpop.eup %10000 }
0x1299   : > { %v2626_v16 = vsel %vm1190_vm3, %v10001_v15, 0.0 }
0x129a   : > { %2627 = vadd.xlane.f32.xlu1 %v2626_v16  ;;  %v7752_v16 = vld [vmem:[%s11736_s14 + $0x128] sm:$0xff] }
0x129c   : > { %v10003_v26 = vpop.eup %10002 }
0x129d   : > { %v2789_v17 = vsel %vm1190_vm3, %v10003_v26, 0.0 }
0x129e   : > { %2790 = vadd.xlane.f32.xlu0 %v2789_v17 }
0x12b1   : > { %v2303_v18 = vpop.xlane.xlu1 %2302 }
0x12b2   : > { %10004 = vrcp.f32 %v2303_v18 }
0x12bc   : > { %v10005_v19 = vpop.eup %10004 }
0x12bd   : > { %v2305_v20 = vmul.f32 %v10005_v19, %v9997_v2  ;;  %v7751_v19 = vld [vmem:[%s11736_s14 + $0x120] sm:$0xff] }
0x12bf   : > { %7731 = vst.msk [vmem:[%s10466_s23 + $0x20] sm:$0xff] %vm1190_vm3, %v2305_v20  ;;  %8674 = vmatmul.mubr.msk.f32.vlgmr.msra.gmra.mrb[20].mxu1 %vm1190_vm3, %v2305_v20  ;;  %v7753_v20 = vld [vmem:[%s11736_s14 + $0x130] sm:$0xff] }
0x12c0   : > { %8682 = vmatpush3.msra.mxu1 %v10670_v40  ;;  %8683 = vmatprep.mubr.msk.f32.mxu1 %vm10186_vm0, %v10187_v6  ;;  %v7715_v40 = vld [vmem:[%s10230_s29 + $0xa0] sm:$0xff] }
0x12c1   : > { %8691 = vmatprep.subr.mxu1 %v10187_v6 }
0x1323   : > { %v2465_v21 = vpop.xlane.xlu1 %2464 }
0x1324   : > { %10006 = vrcp.f32 %v2465_v21  ;;  %v7756_v21 = vld [vmem:[%s11736_s14 + $0x148] sm:$0xff] }
0x1327   : > { %v2628_v22 = vpop.xlane.xlu1 %2627 }
0x1328   : > { %10008 = vrcp.f32 %v2628_v22  ;;  %v7758_v22 = vld [vmem:[%s11736_s14 + $0x158] sm:$0xff] }
0x132b   : > { %v2791_v24 = vpop.xlane.xlu0 %2790 }
0x132c   : > { %10010 = vrcp.f32 %v2791_v24  ;;  %v9454_v24 = vpack.c.bf16 %v7758_v22, %v7756_v21  ;;  %v7785_v21 = vld [vmem:[%s11735_s19 + $0x130] sm:$0xff]  ;;  %v7786_v22 = vld [vmem:[%s11735_s19 + $0x138] sm:$0xff] }
0x132e   : > { %v10007_v25 = vpop.eup %10006 }
0x132f   : > { %v2467_v27 = vmul.f32 %v10007_v25, %v9999_v13  ;;  %v7747_v13 = vld [vmem:[%s11736_s14 + $0x100] sm:$0xff] }
0x1330   : > { %v7755_v25 = vld [vmem:[%s11736_s14 + $0x140] sm:$0xff] }
0x1331   : > { %7735 = vst.msk [vmem:[%s10466_s23 + $0x28] sm:$0xff] %vm1190_vm3, %v2467_v27  ;;  %8684 = vmatmul.mubr.msk.f32.vlgmr.msra.gmra.mrb[22].mxu1 %vm1190_vm3, %v2467_v27  ;;  %v7757_v27 = vld [vmem:[%s11736_s14 + $0x150] sm:$0xff] }
0x1332   : > { %v10009_v28 = vpop.eup %10008  ;;  %8692 = vmatpush3.msra.mxu1 %v10675_v41  ;;  %8693 = vmatprep.mubr.msk.f32.mxu1 %vm10186_vm0, %v10187_v6  ;;  %v7716_v41 = vld [vmem:[%s10230_s29 + $0xa8] sm:$0xff] }
0x1333   : > { %v2630_v30 = vmul.f32 %v10009_v28, %v10001_v15  ;;  %8701 = vmatprep.subr.mxu1 %v10187_v6  ;;  %v9429_v45 = vpack.c.bf16 %v7716_v41, %v7715_v40  ;;  %v7749_v15 = vld [vmem:[%s11736_s14 + $0x110] sm:$0xff]  ;;  %v9456_v28 = vpack.c.bf16 %v7757_v27, %v7755_v25  ;;  %v9460_v40 = vpack.c.bf16 %v7761_v39, %v7759_v38  ;;  %v7764_v41 = vld [vmem:[%s11736_s14 + $0x188] sm:$0xff]  ;;  %v7790_v38 = vld [vmem:[%s11735_s19 + $0x158] sm:$0xff] }
0x1334   : > { %v9448_v17 = vpack.c.bf16 %v7749_v15, %v7747_v13  ;;  %v7800_v13 = vld [vmem:[%s11735_s19 + $0x1a8] sm:$0xff]  ;;  %v9492_v25 = vpack.c.bf16 %v7786_v22, %v7785_v21  ;;  %v7807_v39 = vld [vmem:[%s11735_s19 + $0x1e0] sm:$0xff] }
0x1335   : > { %7739 = vst.msk [vmem:[%s10466_s23 + $0x30] sm:$0xff] %vm1190_vm3, %v2630_v30  ;;  %8694 = vmatmul.mubr.msk.f32.vlgmr.msra.gmra.mrb[24].mxu1 %vm1190_vm3, %v2630_v30  ;;  %9430 = vmatpush3.bf16.msra.mxu0 %v9429_v45  ;;  %v7763_v45 = vld [vmem:[%s11736_s14 + $0x180] sm:$0xff]  ;;  %v9486_v15 = vpack.c.bf16 %v7800_v13, %v7799_v12  ;;  %v3234_v12 = vld [vmem:[%s11733_s6 + $0x78] sm:$0xff] }
0x1336   : > { %v10011_v31 = vpop.eup %10010  ;;  %8702 = vmatpush3.msra.mxu1 %v10684_v42  ;;  %8703 = vmatprep.mubr.msk.f32.mxu1 %vm10186_vm0, %v10187_v6 }
0x1337   : > { %v2793_v32 = vmul.f32 %v10011_v31, %v10003_v26  ;;  %9431 = vmatprep.subr.bf16.mxu0 %v10185_v3  ;;  %v7754_v26 = vld [vmem:[%s11736_s14 + $0x138] sm:$0xff]  ;;  %9447 = vmatprep.subr.bf16.mxu1 %v9446_v14 }
0x1338   : > { %v9450_v18 = vpack.c.bf16 %v7754_v26, %v7752_v16  ;;  %v7783_v16 = vld [vmem:[%s11735_s19 + $0x120] sm:$0xff]  ;;  %v7784_v26 = vld [vmem:[%s11735_s19 + $0x128] sm:$0xff] }
0x1339   : > { %7743 = vst.msk [vmem:[%s10466_s23 + $0x38] sm:$0xff] %vm1190_vm3, %v2793_v32  ;;  %8704 = vmatmul.mubr.msk.f32.vlgmr.msra.gmra.mrb[26].mxu1 %vm1190_vm3, %v2793_v32  ;;  %9433 = vmatpush3.bf16.msra.mxu0 %v9432_v48  ;;  %v9464_v48 = vpack.c.bf16 %v7765_v46, %v7763_v45  ;;  %v7792_v45 = vld [vmem:[%s11735_s19 + $0x168] sm:$0xff]  ;;  %s975_s23 = scalar_lea.vmem %s11747_s9, %s10428_s16  ;;  %s11751_s9 = sld [smem:[#allocation17_spill]] }
0x133a   : > { %3114 = vmatprep.mubr.f32.mxu1 %v10187_v6  ;;  %9434 = vmatprep.subr.bf16.mxu0 %v10185_v3 }
0x133b   : > { %9449 = vmatpush1.bf16.msra.mxu1 %v9448_v17  ;;  %v7801_v17 = vld [vmem:[%s11735_s19 + $0x1b0] sm:$0xff] }
0x133c   : > { %9451 = vmatprep.subr.bf16.mxu1 %v9450_v18  ;;  %v7802_v18 = vld [vmem:[%s11735_s19 + $0x1b8] sm:$0xff] }
0x133d   : > { %9436 = vmatpush3.bf16.msra.mxu0 %v9435_v51  ;;  %v7769_v51 = vld [vmem:[%s11736_s14 + $0x1b0] sm:$0xff] }
0x133e   : > { %9437 = vmatprep.subr.bf16.mxu0 %v10185_v3  ;;  %v9468_v23 = vpack.c.bf16 %v7769_v51, %v7767_v50  ;;  %v7745_v51 = vld [vmem:[%s11738_s3 + $0x1] ss:$0 sm:$0xff]  ;;  %s11749_s3 = sld [smem:[#allocation18_spill]] }
0x1341   : > { %9439 = vmatpush3.bf16.msra.mxu0 %v9438_v54  ;;  %v7774_v54 = vld [vmem:[%s11736_s14 + $0x1d8] sm:$0xff] }
0x1342   : > { %9440 = vmatprep.subr.bf16.mxu0 %v10185_v3  ;;  %v9470_v55 = vpack.c.bf16 %v7774_v54, %v7772_v53  ;;  %v3219_v53 = vld [vmem:[%s11733_s6] sm:$0xff]  ;;  %v3220_v54 = vld [vmem:[%s11733_s6 + $0x8] sm:$0xff] }
0x1345   : > { %9442 = vmatpush3.bf16.msra.mxu0 %v9441_v56  ;;  %v7771_v56 = vld [vmem:[%s11736_s14 + $0x1c0] sm:$0xff] }
0x1346   : > { %9443 = vmatprep.subr.bf16.mxu0 %v10185_v3 }
0x1349   : > { %9445 = vmatpush3.bf16.msra.mxu0 %v9444_v59  ;;  %v7778_v59 = vld [vmem:[%s11736_s14 + $0x1f8] sm:$0xff] }
0x1392   : > { %v2377_v42 = vpop.f32.mrb[20].mxu1 }
0x1393   : > { %v8675_v43 = vpop.f32.mrb[21].mxu1 }
0x1404   : > { %v2540_v60 = vpop.f32.mrb[22].mxu1 }
0x1405   : > { %2871 = vrot.lane.b32.xlu1 %v2540_v60, %s11746_s13  ;;  %v8685_v61 = vpop.f32.mrb[23].mxu1  ;;  %v9472_v60 = vpack.c.bf16 %v7773_v57, %v7771_v56  ;;  %v9511_v56 = vpack.c.bf16 %v3220_v54, %v3219_v53 }
0x1406   : > { %v9474_v61 = vpack.c.bf16 %v7778_v59, %v7776_v58  ;;  %v3221_v58 = vld [vmem:[%s11733_s6 + $0x10] sm:$0xff]  ;;  %v3222_v59 = vld [vmem:[%s11733_s6 + $0x18] sm:$0xff] }
0x1408   : > { %v2703_v62 = vpop.f32.mrb[24].mxu1 }
0x1409   : > { %2875 = vrot.lane.b32.xlu0 %v2703_v62, %s11744_s5  ;;  %v8695_v63 = vpop.f32.mrb[25].mxu1  ;;  %v7775_v62 = vld [vmem:[%s11736_s14 + $0x1e0] sm:$0xff] }
0x140a   : > { %v7777_v63 = vld [vmem:[%s11736_s14 + $0x1f0] sm:$0xff] }
0x140c   : > { %v2866_v0 = vpop.f32.mrb[26].mxu1 }
0x140d   : > { %2879 = vrot.lane.b32.xlu1 %v2866_v0, %s11745_s2  ;;  %v8705_v1 = vpop.f32.mrb[27].mxu1  ;;  %v9476_v0 = vpack.c.bf16 %v7777_v63, %v7775_v62  ;;  %v3225_v63 = vld [vmem:[%s11733_s6 + $0x30] sm:$0xff] }
0x140e   : > { %v7795_v1 = vld [vmem:[%s11735_s19 + $0x180] sm:$0xff] }
0x1477   : > { %v2872_v2 = vpop.permute.xlu1 %2871 }
0x1478   : > { %v2882_v5 = vsel %vm1114_vm1, %v2377_v42, %v2872_v2  ;;  %v7766_v42 = vld [vmem:[%s11736_s14 + $0x198] sm:$0xff]  ;;  %v7796_v2 = vld [vmem:[%s11735_s19 + $0x188] sm:$0xff]  ;;  %s11752_s14 = sld [smem:[#allocation9_spill]] }
0x1479   : > { %v9462_v43 = vpack.c.bf16 %v7766_v42, %v7764_v41 }
0x147b   : > { %v2876_v4 = vpop.permute.xlu0 %2875 }
0x147c   : > { %v2883_v7 = vsel %vm1778_vm4, %v2882_v5, %v2876_v4  ;;  %v7779_v4 = vld [vmem:[%s11735_s19 + $0x100] sm:$0xff]  ;;  %v9478_v5 = vpack.c.bf16 %v7796_v2, %v7795_v1 }
0x147d   : > { %v3227_v2 = vld [vmem:[%s11733_s6 + $0x40] sm:$0xff] }
0x147e   : > { %9479 = vmatprep.subr.bf16.mxu0 %v9478_v5 }
0x147f   : > { %v2880_v44 = vpop.permute.xlu1 %2879 }
0x1480   : > { %v2884_v8 = vsel %vm1780_vm5, %v2883_v7, %v2880_v44  ;;  %v7780_v7 = vld [vmem:[%s11735_s19 + $0x108] sm:$0xff]  ;;  %v7797_v44 = vld [vmem:[%s11735_s19 + $0x190] sm:$0xff] }
0x1481   : > { %8739 = vmatmul.mubr.f32.vlgmr.msra.gmra.mrb[14].mxu0 %v2884_v8  ;;  %v7798_v8 = vld [vmem:[%s11735_s19 + $0x198] sm:$0xff] }
0x1554   : > { %v2951_v9 = vpop.f32.mrb[14].mxu0 }
0x1555   : > { %v2952_v10 = vadd.f32 %v2951_v9, %v10656_v37  ;;  %v8740_v29 = vpop.f32.mrb[15].mxu0  ;;  %v9452_v37 = vpack.c.bf16 %v7753_v20, %v7751_v19  ;;  %v9480_v9 = vpack.c.bf16 %v7780_v7, %v7779_v4  ;;  %v9488_v19 = vpack.c.bf16 %v7784_v26, %v7783_v16  ;;  %v3228_v4 = vld [vmem:[%s11733_s6 + $0x48] sm:$0xff]  ;;  %v3229_v7 = vld [vmem:[%s11733_s6 + $0x50] sm:$0xff]  ;;  %v7810_v16 = vld [vmem:[%s11735_s19 + $0x1f8] sm:$0xff] }
0x1556   : > { %v7781_v29 = vld [vmem:[%s11735_s19 + $0x110] sm:$0xff]  ;;  %v9490_v20 = vpack.c.bf16 %v7802_v18, %v7801_v17  ;;  %v9523_v5 = vpack.c.bf16 %v3228_v4, %v3227_v2  ;;  %v7794_v18 = vld [vmem:[%s11735_s19 + $0x178] sm:$0xff] }
0x1557   : > { %2955 = vadd.xlane.f32.xlu1 %v2952_v10  ;;  %9453 = vmatpush1.bf16.msra.mxu1 %v9452_v37  ;;  %v9484_v14 = vpack.c.bf16 %v7782_v11, %v7781_v29  ;;  %v7803_v37 = vld [vmem:[%s11735_s19 + $0x1c0] sm:$0xff]  ;;  %v3233_v11 = vld [vmem:[%s11733_s6 + $0x70] sm:$0xff] }
0x1558   : > { %9455 = vmatprep.subr.bf16.mxu1 %v9454_v24  ;;  %9481 = vmatpush3.bf16.msra.mxu0 %v9480_v9  ;;  %v7804_v24 = vld [vmem:[%s11735_s19 + $0x1c8] sm:$0xff]  ;;  %v3231_v9 = vld [vmem:[%s11733_s6 + $0x60] sm:$0xff]  ;;  %v9532_v13 = vpack.c.bf16 %v3234_v12, %v3233_v11  ;;  %v7793_v17 = vld [vmem:[%s11735_s19 + $0x170] sm:$0xff] }
0x1559   : > { %v9494_v27 = vpack.c.bf16 %v7804_v24, %v7803_v37 }
0x155b   : > { %9457 = vmatpush1.bf16.msra.mxu1 %v9456_v28  ;;  %v7787_v28 = vld [vmem:[%s11735_s19 + $0x140] sm:$0xff] }
0x155c   : > { %9459 = vmatprep.subr.bf16.mxu1 %v9458_v36  ;;  %v7789_v36 = vld [vmem:[%s11735_s19 + $0x150] sm:$0xff] }
0x155d   : > { %v9500_v41 = vpack.c.bf16 %v7790_v38, %v7789_v36 }
0x155f   : > { %9461 = vmatpush1.bf16.msra.mxu1 %v9460_v40  ;;  %v7808_v40 = vld [vmem:[%s11735_s19 + $0x1e8] sm:$0xff] }
0x1560   : > { %9463 = vmatprep.subr.bf16.mxu1 %v9462_v43  ;;  %v9502_v42 = vpack.c.bf16 %v7808_v40, %v7807_v39  ;;  %v7791_v43 = vld [vmem:[%s11735_s19 + $0x160] sm:$0xff] }
0x1561   : > { %v9504_v46 = vpack.c.bf16 %v7792_v45, %v7791_v43 }
0x1563   : > { %9465 = vmatpush1.bf16.msra.mxu1 %v9464_v48 }
0x1564   : > { %9467 = vmatprep.subr.bf16.mxu1 %v9466_v52 }
0x1567   : > { %9469 = vmatpush1.bf16.msra.mxu1 %v9468_v23  ;;  %v7746_v23 = vld [vmem:[%s11737_s8 + $0x1] ss:$0 sm:$0xff]  ;;  %s11750_s8 = sld [smem:[#allocation16_spill]] }
0x1568   : > { %9471 = vmatprep.subr.bf16.mxu1 %v9470_v55 }
0x156b   : > { %9473 = vmatpush1.bf16.msra.mxu1 %v9472_v60  ;;  %v9514_v60 = vpack.c.bf16 %v3222_v59, %v3221_v58 }
0x156c   : > { %9475 = vmatprep.subr.bf16.mxu1 %v9474_v61  ;;  %v3224_v61 = vld [vmem:[%s11733_s6 + $0x28] sm:$0xff] }
0x156f   : > { %9477 = vmatpush1.bf16.msra.mxu1 %v9476_v0  ;;  %v3226_v0 = vld [vmem:[%s11733_s6 + $0x38] sm:$0xff] }
0x1570   : > { %9510 = vmatprep.subr.bf16.mxu1 %v10185_v3  ;;  %v9520_v1 = vpack.c.bf16 %v3226_v0, %v3225_v63 }
0x15e4   : > { %v2956_v30 = vpop.xlane.xlu1 %2955 }
0x15e5   : > { %v2957_v31 = vmul.f32 0.0078125, %v2956_v30  ;;  %v7788_v30 = vld [vmem:[%s11735_s19 + $0x148] sm:$0xff] }
0x15e6   : > { %v9496_v34 = vpack.c.bf16 %v7788_v30, %v7787_v28 }
0x15e7   : > { %v10779_v32 = vsub.f32 %v2952_v10, %v2957_v31  ;;  %v9482_v10 = vpack.c.bf16 %v7798_v8, %v7797_v44  ;;  %v7805_v31 = vld [vmem:[%s11735_s19 + $0x1d0] sm:$0xff]  ;;  %v3230_v44 = vld [vmem:[%s11733_s6 + $0x58] sm:$0xff] }
0x15e8   : > { %v9526_v8 = vpack.c.bf16 %v3230_v44, %v3229_v7 }
0x15e9   : > { %v2959_v33 = vmul.f32 %v10779_v32, %v10779_v32  ;;  %9483 = vmatprep.subr.bf16.mxu0 %v9482_v10  ;;  %v3232_v10 = vld [vmem:[%s11733_s6 + $0x68] sm:$0xff] }
0x15ea   : > { %9485 = vmatpush3.bf16.msra.mxu0 %v9484_v14  ;;  %v9529_v29 = vpack.c.bf16 %v3232_v10, %v3231_v9  ;;  %v10865_v14 = vld [vmem:[%s975_s23] sm:$0xff]  ;;  %s983_s23 = scalar_lea.vmem %s11748_s17, %s10428_s16  ;;  %s987_s17 = scalar_lea.vmem %s11752_s14, %s10428_s16 }
0x15eb   : > { %2960 = vadd.xlane.f32.xlu0 %v2959_v33  ;;  %9487 = vmatprep.subr.bf16.mxu0 %v9486_v15  ;;  %v7806_v33 = vld [vmem:[%s11735_s19 + $0x1d8] sm:$0xff]  ;;  %v7809_v15 = vld [vmem:[%s11735_s19 + $0x1f0] sm:$0xff]  ;;  %s11754_s14 = sld [smem:[#allocation19_spill]]  ;;  %s11755_s16 = sld [smem:[#allocation22_spill]] }
0x15ec   : > { %v9498_v35 = vpack.c.bf16 %v7806_v33, %v7805_v31  ;;  %v9506_v26 = vpack.c.bf16 %v7810_v16, %v7809_v15  ;;  %s11758_s19 = sld [smem:[#allocation21_spill]] }
0x15ee   : > { %9489 = vmatpush3.bf16.msra.mxu0 %v9488_v19  ;;  %v9508_v19 = vpack.c.bf16 %v7794_v18, %v7793_v17 }
0x15ef   : > { %9491 = vmatprep.subr.bf16.mxu0 %v9490_v20 }
0x15f2   : > { %9493 = vmatpush3.bf16.msra.mxu0 %v9492_v25 }
0x15f3   : > { %9495 = vmatprep.subr.bf16.mxu0 %v9494_v27 }
0x15f6   : > { %9497 = vmatpush3.bf16.msra.mxu0 %v9496_v34 }
0x15f7   : > { %9499 = vmatprep.subr.bf16.mxu0 %v9498_v35  ;;  %v10918_v35 = vld [vmem:[%s983_s23] sm:$0xff]  ;;  %s10939_s23 = scalar_lea.vmem %s10340_s27, %s10462_s22 }
0x15f8   : > { %vm1006_vm6 = vcmp.ne.s32.totalorder %v10918_v35, 0 }
0x15fa   : > { %9501 = vmatpush3.bf16.msra.mxu0 %v9500_v41 }
0x15fb   : > { %9503 = vmatprep.subr.bf16.mxu0 %v9502_v42 }
0x15fe   : > { %9505 = vmatpush3.bf16.msra.mxu0 %v9504_v46 }
0x15ff   : > { %9507 = vmatprep.subr.bf16.mxu0 %v9506_v26 }
0x1602   : > { %9509 = vmatpush3.bf16.msra.mxu0 %v9508_v19 }
0x1603   : > { %8776 = vmatprep.subr.mxu0 %v10187_v6 }
0x1678   : > { %v2961_v47 = vpop.xlane.xlu0 %2960 }
0x1679   : > { %v2962_v48 = vmul.f32 0.0078125, %v2961_v47 }
0x167b   : > { %v2963_v49 = vadd.f32 1e-05, %v2962_v48 }
0x167d   : > { %10012 = vrsqrt.f32 %v2963_v49 }
0x1687   : > { %v10013_v50 = vpop.eup %10012 }
0x1688   : > { %v2965_v52 = vmul.f32 %v10013_v50, %v10779_v32  ;;  %v3223_v32 = vld [vmem:[%s11733_s6 + $0x20] sm:$0xff] }
0x1689   : > { %v9517_v62 = vpack.c.bf16 %v3224_v61, %v3223_v32 }
0x168a   : > { %v2972_v55 = vmul.f32 %v7745_v51, %v2965_v52 }
0x168c   : > { %v10837_v57 = vadd.f32 %v7746_v23, %v2972_v55 }
0x168e   : > { %3115 = vmatmul.mubr.f32.vlgmr.msra.gmra.mrb[28].mxu1 %v10837_v57 }
0x168f   : > { %9512 = vmatpush3.bf16.msra.mxu1 %v9511_v56  ;;  %8773 = vmatprep.mubr.msk.f32.mxu1 %vm10186_vm0, %v10187_v6 }
0x1690   : > { %9513 = vmatprep.subr.bf16.mxu1 %v10185_v3 }
0x1693   : > { %9515 = vmatpush3.bf16.msra.mxu1 %v9514_v60 }
0x1694   : > { %9516 = vmatprep.subr.bf16.mxu1 %v10185_v3 }
0x1697   : > { %9518 = vmatpush3.bf16.msra.mxu1 %v9517_v62 }
0x1698   : > { %9519 = vmatprep.subr.bf16.mxu1 %v10185_v3 }
0x169b   : > { %9521 = vmatpush3.bf16.msra.mxu1 %v9520_v1 }
0x169c   : > { %9522 = vmatprep.subr.bf16.mxu1 %v10185_v3 }
0x169f   : > { %9524 = vmatpush3.bf16.msra.mxu1 %v9523_v5 }
0x16a0   : > { %9525 = vmatprep.subr.bf16.mxu1 %v10185_v3 }
0x16a3   : > { %9527 = vmatpush3.bf16.msra.mxu1 %v9526_v8 }
0x16a4   : > { %9528 = vmatprep.subr.bf16.mxu1 %v10185_v3 }
0x16a7   : > { %9530 = vmatpush3.bf16.msra.mxu1 %v9529_v29 }
0x16a8   : > { %9531 = vmatprep.subr.bf16.mxu1 %v10185_v3 }
0x16ab   : > { %9533 = vmatpush3.bf16.msra.mxu1 %v9532_v13 }
0x16ac   : > { %8781 = vmatprep.subr.mxu1 %v10187_v6 }
0x16ae   : > { %8774 = vmatmul.mubr.f32.vlgmr.msra.gmra.mrb[30].mxu1 %v10865_v14 }
0x16af   : > { %8783 = vmatprep.mubr.msk.f32.mxu1 %vm10186_vm0, %v10187_v6 }
0x1761   : > { %v3116_v20 = vpop.f32.mrb[28].mxu1 }
0x1762   : > { %v3118_v21 = vpop.f32.mrb[29].mxu1  ;;  %v3121_v37 = vmax.f32 %v3116_v20, 0.0 }
0x1763   : > { %v3122_v22 = vmax.f32 %v3118_v21, 0.0 }
0x1765   : > { %3187 = vmatprep.mubr.f32.mxu0 %v3122_v22 }
0x1766   : > { %3188 = vmatmul.mubr.f32.vlgmr.msra.gmra.mrb[16].mxu0 %v3121_v37 }
0x1767   : > { %8778 = vmatprep.mubr.msk.f32.mxu0 %vm10186_vm0, %v10187_v6 }
0x1781   : > { %v3319_v24 = vpop.f32.mrb[30].mxu1 }
0x1782   : > { %3646 = vrot.lane.b32.xlu1 %v3319_v24, %s11744_s5  ;;  %3483 = vrot.lane.b32.xlu0 %v3319_v24, %s11745_s2  ;;  %v8775_v25 = vpop.f32.mrb[31].mxu1 }
0x1783   : > { %8777 = vmatpush3.xpose.msk.msra.mxu0 %vm1114_vm1, %v3319_v24  ;;  %8782 = vmatpush3.msra.mxu1 %v3319_v24 }
0x1784   : > { %8786 = vmatprep.subr.mxu0 %v10187_v6  ;;  %8791 = vmatprep.subr.mxu1 %v10187_v6 }
0x1786   : > { %8779 = vmatmul.mubr.msk.f32.vlgmr.msra.gmra.mrb[18].mxu0 %vm1114_vm1, %v3319_v24  ;;  %3809 = vrot.lane.b32.xlu1 %v3319_v24, %s11746_s13 }
0x1787   : > { %8788 = vmatprep.mubr.msk.f32.mxu0 %vm10186_vm0, %v10187_v6 }
0x17f4   : > { %v10887_v27 = vpop.permute.xlu0 %3483  ;;  %v10891_v28 = vpop.permute.xlu1 %3646 }
0x17f5   : > { %8787 = vmatpush3.xpose.msk.msra.mxu0 %vm1114_vm1, %v10887_v27 }
0x17f6   : > { %8796 = vmatprep.subr.mxu0 %v10187_v6 }
0x17f8   : > { %8789 = vmatmul.mubr.msk.f32.vlgmr.msra.gmra.mrb[20].mxu0 %vm1114_vm1, %v10887_v27  ;;  %v10901_v30 = vpop.permute.xlu1 %3809 }
0x17f9   : > { %8797 = vmatpush3.xpose.msk.msra.mxu0 %vm1114_vm1, %v10891_v28  ;;  %8798 = vmatprep.mubr.msk.f32.mxu0 %vm10186_vm0, %v10187_v6 }
0x17fa   : > { %8806 = vmatprep.subr.mxu0 %v10187_v6 }
0x17fc   : > { %8799 = vmatmul.mubr.msk.f32.vlgmr.msra.gmra.mrb[22].mxu0 %vm1114_vm1, %v10891_v28 }
0x17fd   : > { %8807 = vmatpush3.xpose.msk.msra.mxu0 %vm1114_vm1, %v10901_v30  ;;  %8808 = vmatprep.mubr.msk.f32.mxu0 %vm10186_vm0, %v10187_v6 }
0x17fe   : > { %9534 = vmatprep.subr.bf16.mxu0 %v10185_v3 }
0x1800   : > { %8809 = vmatmul.mubr.msk.f32.vlgmr.msra.gmra.mrb[24].mxu0 %vm1114_vm1, %v10901_v30 }
0x1801   : > { %8848 = vmatprep.mubr.msk.f32.mxu0 %vm10186_vm0, %v10187_v6 }
0x1839   : > { %v8197_v31 = vpop.f32.mrb[16].mxu0 }
0x183a   : > { %v8198_v33 = vpop.f32.mrb[17].mxu0 }
0x183b   : > { %v10914_v34 = vadd.f32 %v8198_v33, %v8197_v31  ;;  %v3237_v31 = vld [vmem:[%s10270_s12 + $0x10] sm:$0xff] }
0x1859   : > { %v3392_v36 = vpop.f32.mrb[18].mxu0 }
0x185a   : > { %v3396_v38 = vmul.f32 0.17677669, %v3392_v36  ;;  %v8780_v39 = vpop.f32.mrb[19].mxu0  ;;  %v3238_v36 = vld [vmem:[%s10270_s12 + $0x18] sm:$0xff] }
0x185b   : > { %v3239_v39 = vld [vmem:[%s10270_s12 + $0x20] sm:$0xff] }
0x185c   : > { %v3397_v40 = vsel %vm1006_vm6, -1e+09, %v3396_v38  ;;  %v9538_v38 = vpack.c.bf16 %v3238_v36, %v3237_v31  ;;  %v4095_v31 = vld [vmem:[%s11749_s3 + $0x68] sm:$0xff]  ;;  %v4096_v36 = vld [vmem:[%s11749_s3 + $0x70] sm:$0xff] }
0x185d   : > { %v3398_v41 = vsel %vm1190_vm3, %v3397_v40, -inf }
0x185e   : > { %3399 = vmax.xlane.f32.xlu0 %v3398_v41 }
0x18cb   : > { %v3553_v42 = vpop.f32.mrb[20].mxu0 }
0x18cc   : > { %v3557_v43 = vmul.f32 0.17677669, %v3553_v42  ;;  %v8790_v45 = vpop.f32.mrb[21].mxu0  ;;  %v3241_v42 = vld [vmem:[%s10270_s12 + $0x30] sm:$0xff] }
0x18ce   : > { %v3558_v46 = vsel %vm1006_vm6, -1e+09, %v3557_v43  ;;  %v3242_v43 = vld [vmem:[%s10270_s12 + $0x38] sm:$0xff] }
0x18cf   : > { %v3716_v47 = vpop.f32.mrb[22].mxu0  ;;  %v3559_v48 = vsel %vm1190_vm3, %v3558_v46, -inf  ;;  %v9544_v45 = vpack.c.bf16 %v3242_v43, %v3241_v42 }
0x18d0   : > { %v3720_v49 = vmul.f32 0.17677669, %v3716_v47  ;;  %3560 = vmax.xlane.f32.xlu1 %v3559_v48  ;;  %v8800_v50 = vpop.f32.mrb[23].mxu0  ;;  %v3244_v47 = vld [vmem:[%s10270_s12 + $0x48] sm:$0xff] }
0x18d1   : > { %v3246_v50 = vld [vmem:[%s10270_s12 + $0x58] sm:$0xff] }
0x18d2   : > { %v3721_v51 = vsel %vm1006_vm6, -1e+09, %v3720_v49  ;;  %v3245_v49 = vld [vmem:[%s10270_s12 + $0x50] sm:$0xff] }
0x18d3   : > { %v3879_v52 = vpop.f32.mrb[24].mxu0  ;;  %v3722_v53 = vsel %vm1190_vm3, %v3721_v51, -inf }
0x18d4   : > { %v3883_v54 = vmul.f32 0.17677669, %v3879_v52  ;;  %3723 = vmax.xlane.f32.xlu0 %v3722_v53  ;;  %v8810_v23 = vpop.f32.mrb[25].mxu0  ;;  %v3247_v52 = vld [vmem:[%s10270_s12 + $0x60] sm:$0xff]  ;;  %v3248_v53 = vld [vmem:[%s10270_s12 + $0x68] sm:$0xff] }
0x18d5   : > { %v3249_v23 = vld [vmem:[%s10270_s12 + $0x70] sm:$0xff] }
0x18d6   : > { %v3884_v55 = vsel %vm1006_vm6, -1e+09, %v3883_v54  ;;  %v9553_v54 = vpack.c.bf16 %v3248_v53, %v3247_v52 }
0x18d7   : > { %v3885_v56 = vsel %vm1190_vm3, %v3884_v55, -inf }
0x18d8   : > { %3886 = vmax.xlane.f32.xlu0 %v3885_v56 }
0x18eb   : > { %v3400_v58 = vpop.xlane.xlu0 %3399 }
0x18ec   : > { %v3401_v59 = vsub.f32 %v3397_v40, %v3400_v58  ;;  %v3240_v40 = vld [vmem:[%s10270_s12 + $0x28] sm:$0xff] }
0x18ed   : > { %v9541_v41 = vpack.c.bf16 %v3240_v40, %v3239_v39 }
0x18ee   : > { %v3402_v60 = vmul.f32 1.442695, %v3401_v59 }
0x18f0   : > { %10014 = vpow2.f32 %v3402_v60 }
0x18fa   : > { %v10015_v32 = vpop.eup %10014 }
0x18fb   : > { %v3404_v61 = vsel %vm1190_vm3, %v10015_v32, 0.0 }
0x18fc   : > { %3405 = vadd.xlane.f32.xlu1 %v3404_v61 }
0x195d   : > { %v3561_v62 = vpop.xlane.xlu1 %3560 }
0x195e   : > { %v3562_v63 = vsub.f32 %v3558_v46, %v3561_v62  ;;  %v3243_v46 = vld [vmem:[%s10270_s12 + $0x40] sm:$0xff] }
0x195f   : > { %v9547_v48 = vpack.c.bf16 %v3244_v47, %v3243_v46 }
0x1960   : > { %v3563_v0 = vmul.f32 1.442695, %v3562_v63  ;;  %v3190_v63 = vadd.f32 %v10914_v34, %v10837_v57 }
0x1961   : > { %v3724_v1 = vpop.xlane.xlu0 %3723 }
0x1962   : > { %10016 = vpow2.f32 %v3563_v0  ;;  %v3725_v2 = vsub.f32 %v3721_v51, %v3724_v1  ;;  %v9550_v51 = vpack.c.bf16 %v3246_v50, %v3245_v49  ;;  %v7813_v49 = vld [vmem:[%s11734_s24 + $0x1] ss:$0 sm:$0xff]  ;;  %s11760_s24 = sld [smem:[#allocation25_spill]] }
0x1964   : > { %v3726_v4 = vmul.f32 1.442695, %v3725_v2 }
0x1965   : > { %v3887_v5 = vpop.xlane.xlu0 %3886 }
0x1966   : > { %10018 = vpow2.f32 %v3726_v4  ;;  %v3888_v7 = vsub.f32 %v3884_v55, %v3887_v5  ;;  %v3250_v55 = vld [vmem:[%s10270_s12 + $0x78] sm:$0xff] }
0x1967   : > { %v9556_v56 = vpack.c.bf16 %v3250_v55, %v3249_v23 }
0x1968   : > { %v3889_v44 = vmul.f32 1.442695, %v3888_v7 }
0x196a   : > { %10020 = vpow2.f32 %v3889_v44  ;;  %v4082_v44 = vld [vmem:[%s11749_s3] sm:$0xff] }
0x196c   : > { %v10017_v8 = vpop.eup %10016 }
0x196d   : > { %v3565_v9 = vsel %vm1190_vm3, %v10017_v8, 0.0 }
0x196e   : > { %3566 = vadd.xlane.f32.xlu0 %v3565_v9  ;;  %v4084_v9 = vld [vmem:[%s11749_s3 + $0x10] sm:$0xff] }
0x1970   : > { %v10019_v10 = vpop.eup %10018 }
0x1971   : > { %v3728_v29 = vsel %vm1190_vm3, %v10019_v10, 0.0 }
0x1972   : > { %3729 = vadd.xlane.f32.xlu1 %v3728_v29  ;;  %v4085_v29 = vld [vmem:[%s11749_s3 + $0x18] sm:$0xff] }
0x1973   : > { %v9562_v57 = vpack.c.bf16 %v4085_v29, %v4084_v9 }
0x1974   : > { %v10021_v11 = vpop.eup %10020 }
0x1975   : > { %v3891_v12 = vsel %vm1190_vm3, %v10021_v11, 0.0 }
0x1976   : > { %3892 = vadd.xlane.f32.xlu0 %v3891_v12 }
0x1989   : > { %v3406_v13 = vpop.xlane.xlu1 %3405 }
0x198a   : > { %10022 = vrcp.f32 %v3406_v13 }
0x1994   : > { %v10023_v15 = vpop.eup %10022 }
0x1995   : > { %v3408_v16 = vmul.f32 %v10023_v15, %v10015_v32 }
0x1997   : > { %3409 = vst.msk [vmem:[%s10939_s23] sm:$0xff] %vm1190_vm3, %v3408_v16  ;;  %8784 = vmatmul.mubr.msk.f32.vlgmr.msra.gmra.mrb[32].mxu1 %vm1190_vm3, %v3408_v16 }
0x1998   : > { %8792 = vmatpush3.msra.mxu1 %v10887_v27  ;;  %8793 = vmatprep.mubr.msk.f32.mxu1 %vm10186_vm0, %v10187_v6 }
0x1999   : > { %8801 = vmatprep.subr.mxu1 %v10187_v6 }
0x19fb   : > { %v3567_v26 = vpop.xlane.xlu0 %3566 }
0x19fc   : > { %10024 = vrcp.f32 %v3567_v26 }
0x19ff   : > { %v3730_v17 = vpop.xlane.xlu1 %3729 }
0x1a00   : > { %10026 = vrcp.f32 %v3730_v17  ;;  %v4086_v17 = vld [vmem:[%s11749_s3 + $0x20] sm:$0xff] }
0x1a03   : > { %v3893_v18 = vpop.xlane.xlu0 %3892 }
0x1a04   : > { %10028 = vrcp.f32 %v3893_v18  ;;  %v4087_v18 = vld [vmem:[%s11749_s3 + $0x28] sm:$0xff] }
0x1a06   : > { %v10025_v19 = vpop.eup %10024 }
0x1a07   : > { %v3569_v20 = vmul.f32 %v10025_v19, %v10017_v8  ;;  %v4083_v8 = vld [vmem:[%s11749_s3 + $0x8] sm:$0xff]  ;;  %v9565_v19 = vpack.c.bf16 %v4087_v18, %v4086_v17 }
0x1a09   : > { %7820 = vst.msk [vmem:[%s10939_s23 + $0x8] sm:$0xff] %vm1190_vm3, %v3569_v20  ;;  %8794 = vmatmul.mubr.msk.f32.vlgmr.msra.gmra.mrb[34].mxu1 %vm1190_vm3, %v3569_v20  ;;  %v4088_v20 = vld [vmem:[%s11749_s3 + $0x30] sm:$0xff] }
0x1a0a   : > { %v10027_v21 = vpop.eup %10026  ;;  %8802 = vmatpush3.msra.mxu1 %v10891_v28  ;;  %8803 = vmatprep.mubr.msk.f32.mxu1 %vm10186_vm0, %v10187_v6  ;;  %v3235_v28 = vld [vmem:[%s10270_s12] sm:$0xff] }
0x1a0b   : > { %v3732_v22 = vmul.f32 %v10027_v21, %v10019_v10  ;;  %8811 = vmatprep.subr.mxu1 %v10187_v6  ;;  %v9559_v10 = vpack.c.bf16 %v4083_v8, %v4082_v44  ;;  %v4089_v21 = vld [vmem:[%s11749_s3 + $0x38] sm:$0xff] }
0x1a0d   : > { %7824 = vst.msk [vmem:[%s10939_s23 + $0x10] sm:$0xff] %vm1190_vm3, %v3732_v22  ;;  %8804 = vmatmul.mubr.msk.f32.vlgmr.msra.gmra.mrb[36].mxu1 %vm1190_vm3, %v3732_v22  ;;  %v4090_v22 = vld [vmem:[%s11749_s3 + $0x40] sm:$0xff] }
0x1a0e   : > { %v10029_v37 = vpop.eup %10028  ;;  %8812 = vmatpush3.msra.mxu1 %v10901_v30  ;;  %8813 = vmatprep.mubr.msk.f32.mxu1 %vm10186_vm0, %v10187_v6  ;;  %v3236_v30 = vld [vmem:[%s10270_s12 + $0x8] sm:$0xff] }
0x1a0f   : > { %v3895_v24 = vmul.f32 %v10029_v37, %v10021_v11  ;;  %9558 = vmatprep.subr.bf16.mxu1 %v10185_v3  ;;  %v9535_v33 = vpack.c.bf16 %v3236_v30, %v3235_v28  ;;  %v4091_v37 = vld [vmem:[%s11749_s3 + $0x48] sm:$0xff]  ;;  %v4094_v30 = vld [vmem:[%s11749_s3 + $0x60] sm:$0xff] }
0x1a11   : > { %7828 = vst.msk [vmem:[%s10939_s23 + $0x18] sm:$0xff] %vm1190_vm3, %v3895_v24  ;;  %8814 = vmatmul.mubr.msk.f32.vlgmr.msra.gmra.mrb[38].mxu1 %vm1190_vm3, %v3895_v24  ;;  %9536 = vmatpush3.bf16.msra.mxu0 %v9535_v33  ;;  %v9571_v24 = vpack.c.bf16 %v4091_v37, %v4090_v22  ;;  %v9577_v33 = vpack.c.bf16 %v4095_v31, %v4094_v30 }
0x1a12   : > { %8883 = vmatprep.mubr.msk.f32.mxu1 %vm10186_vm0, %v10187_v6  ;;  %9537 = vmatprep.subr.bf16.mxu0 %v10185_v3 }
0x1a13   : > { %9560 = vmatpush3.bf16.msra.mxu1 %v9559_v10 }
0x1a14   : > { %9561 = vmatprep.subr.bf16.mxu1 %v10185_v3 }
0x1a15   : > { %9539 = vmatpush3.bf16.msra.mxu0 %v9538_v38  ;;  %v4097_v38 = vld [vmem:[%s11749_s3 + $0x78] sm:$0xff] }
0x1a16   : > { %9540 = vmatprep.subr.bf16.mxu0 %v10185_v3  ;;  %v9580_v39 = vpack.c.bf16 %v4097_v38, %v4096_v36 }
0x1a17   : > { %9563 = vmatpush3.bf16.msra.mxu1 %v9562_v57 }
0x1a18   : > { %9564 = vmatprep.subr.bf16.mxu1 %v10185_v3 }
0x1a19   : > { %9542 = vmatpush3.bf16.msra.mxu0 %v9541_v41 }
0x1a1a   : > { %9543 = vmatprep.subr.bf16.mxu0 %v10185_v3 }
0x1a1b   : > { %9566 = vmatpush3.bf16.msra.mxu1 %v9565_v19 }
0x1a1c   : > { %9567 = vmatprep.subr.bf16.mxu1 %v10185_v3 }
0x1a1d   : > { %9545 = vmatpush3.bf16.msra.mxu0 %v9544_v45 }
0x1a1e   : > { %9546 = vmatprep.subr.bf16.mxu0 %v10185_v3 }
0x1a21   : > { %9548 = vmatpush3.bf16.msra.mxu0 %v9547_v48 }
0x1a22   : > { %9549 = vmatprep.subr.bf16.mxu0 %v10185_v3 }
0x1a25   : > { %9551 = vmatpush3.bf16.msra.mxu0 %v9550_v51  ;;  %v7814_v51 = vld [vmem:[%s10260_s30 + $0x1] ss:$0 sm:$0xff] }
0x1a26   : > { %9552 = vmatprep.subr.bf16.mxu0 %v10185_v3 }
0x1a29   : > { %9554 = vmatpush3.bf16.msra.mxu0 %v9553_v54 }
0x1a2a   : > { %9555 = vmatprep.subr.bf16.mxu0 %v10185_v3 }
0x1a2d   : > { %9557 = vmatpush3.bf16.msra.mxu0 %v9556_v56 }
0x1a2e   : > { %9582 = vmatprep.subr.bf16.mxu0 %v10185_v3 }
0x1a6a   : > { %v3479_v25 = vpop.f32.mrb[32].mxu1 }
0x1a6b   : > { %v8785_v27 = vpop.f32.mrb[33].mxu1 }
0x1a6c   : > { %v4093_v27 = vld [vmem:[%s11749_s3 + $0x58] sm:$0xff] }
0x1adc   : > { %v3642_v58 = vpop.f32.mrb[34].mxu1 }
0x1add   : > { %3973 = vrot.lane.b32.xlu1 %v3642_v58, %s11746_s13  ;;  %v8795_v59 = vpop.f32.mrb[35].mxu1  ;;  %v7830_v58 = vld [vmem:[%s11750_s8] ss:$0 sm:$0xff] }
0x1ae0   : > { %v3805_v60 = vpop.f32.mrb[36].mxu1 }
0x1ae1   : > { %3977 = vrot.lane.b32.xlu0 %v3805_v60, %s11744_s5  ;;  %v8805_v32 = vpop.f32.mrb[37].mxu1  ;;  %v7831_v60 = vld [vmem:[%s11751_s9] ss:$0 sm:$0xff] }
0x1ae4   : > { %v3968_v61 = vpop.f32.mrb[38].mxu1 }
0x1ae5   : > { %3981 = vrot.lane.b32.xlu1 %v3968_v61, %s11745_s2  ;;  %v8815_v62 = vpop.f32.mrb[39].mxu1 }
0x1b09   : > { %3193 = vadd.xlane.f32.xlu1 %v3190_v63 }
0x1b4f   : > { %v3974_v0 = vpop.permute.xlu1 %3973 }
0x1b50   : > { %v3984_v2 = vsel %vm1114_vm1, %v3479_v25, %v3974_v0  ;;  %v4092_v25 = vld [vmem:[%s11749_s3 + $0x50] sm:$0xff] }
0x1b51   : > { %v9574_v28 = vpack.c.bf16 %v4093_v27, %v4092_v25 }
0x1b53   : > { %v3978_v1 = vpop.permute.xlu0 %3977 }
0x1b54   : > { %v3985_v4 = vsel %vm1778_vm4, %v3984_v2, %v3978_v1  ;;  %v11063_v2 = vld [vmem:[%s987_s17] sm:$0xff]  ;;  %s11076_s17 = scalar_lea.vmem %s11753_s4, %s10462_s22  ;;  %s11756_s22 = sld [smem:[#allocation23_spill]] }
0x1b55   : > { %vm1008_vm7 = vcmp.ne.s32.totalorder %v11063_v2, 0  ;;  %s11757_s4 = sld [smem:[#allocation20_spill]] }
0x1b57   : > { %v3982_v5 = vpop.permute.xlu1 %3981 }
0x1b58   : > { %v3986_v7 = vsel %vm1780_vm5, %v3985_v4, %v3982_v5 }
0x1b59   : > { %8849 = vmatmul.mubr.f32.vlgmr.msra.gmra.mrb[26].mxu0 %v3986_v7 }
0x1b5a   : > { %8918 = vmatprep.mubr.msk.f32.mxu0 %vm10186_vm0, %v10187_v6  ;;  %9584 = vmatpush3.bf16.msra.mxu0 %v9559_v10 }
0x1b5b   : > { %9585 = vmatprep.subr.bf16.mxu0 %v10185_v3 }
0x1b5e   : > { %9587 = vmatpush3.bf16.msra.mxu0 %v9562_v57 }
0x1b5f   : > { %9588 = vmatprep.subr.bf16.mxu0 %v10185_v3 }
0x1b62   : > { %9590 = vmatpush3.bf16.msra.mxu0 %v9565_v19 }
0x1b63   : > { %9591 = vmatprep.subr.bf16.mxu0 %v10185_v3 }
0x1b96   : > { %v3194_v34 = vpop.xlane.xlu1 %3193 }
0x1b97   : > { %v3195_v11 = vmul.f32 0.0078125, %v3194_v34 }
0x1b99   : > { %v3196_v13 = vsub.f32 %v3190_v63, %v3195_v11 }
0x1b9b   : > { %v3197_v26 = vmul.f32 %v3196_v13, %v3196_v13 }
0x1c2c   : > { %v4053_v12 = vpop.f32.mrb[26].mxu0 }
0x1c2d   : > { %v4054_v15 = vadd.f32 %v4053_v12, %v10865_v14  ;;  %v8850_v16 = vpop.f32.mrb[27].mxu0  ;;  %v9568_v14 = vpack.c.bf16 %v4089_v21, %v4088_v20 }
0x1c2f   : > { %4057 = vadd.xlane.f32.xlu0 %v4054_v15  ;;  %9593 = vmatpush3.bf16.msra.mxu0 %v9568_v14 }
0x1c30   : > { %9569 = vmatpush3.bf16.msra.mxu1 %v9568_v14  ;;  %9594 = vmatprep.subr.bf16.mxu0 %v10185_v3 }
0x1c31   : > { %9570 = vmatprep.subr.bf16.mxu1 %v10185_v3 }
0x1c33   : > { %3198 = vadd.xlane.f32.xlu0 %v3197_v26  ;;  %9596 = vmatpush3.bf16.msra.mxu0 %v9571_v24 }
0x1c34   : > { %9572 = vmatpush3.bf16.msra.mxu1 %v9571_v24  ;;  %9597 = vmatprep.subr.bf16.mxu0 %v10185_v3 }
0x1c35   : > { %9573 = vmatprep.subr.bf16.mxu1 %v10185_v3 }
0x1c37   : > { %9599 = vmatpush3.bf16.msra.mxu0 %v9574_v28 }
0x1c38   : > { %9575 = vmatpush3.bf16.msra.mxu1 %v9574_v28  ;;  %9600 = vmatprep.subr.bf16.mxu0 %v10185_v3 }
0x1c39   : > { %9576 = vmatprep.subr.bf16.mxu1 %v10185_v3 }
0x1c3b   : > { %9602 = vmatpush3.bf16.msra.mxu0 %v9577_v33 }
0x1c3c   : > { %9578 = vmatpush3.bf16.msra.mxu1 %v9577_v33  ;;  %9603 = vmatprep.subr.bf16.mxu0 %v10185_v3 }
0x1c3d   : > { %9579 = vmatprep.subr.bf16.mxu1 %v10185_v3 }
0x1c3f   : > { %9605 = vmatpush3.bf16.msra.mxu0 %v9580_v39 }
0x1c40   : > { %9581 = vmatpush3.bf16.msra.mxu1 %v9580_v39  ;;  %9606 = vmatprep.subr.bf16.mxu0 %v10185_v3 }
0x1c41   : > { %8921 = vmatprep.subr.mxu1 %v10187_v6 }
0x1cbc   : > { %v4058_v40 = vpop.xlane.xlu0 %4057 }
0x1cbd   : > { %v4059_v41 = vmul.f32 0.0078125, %v4058_v40 }
0x1cbf   : > { %v4060_v42 = vsub.f32 %v4054_v15, %v4059_v41 }
0x1cc0   : > { %v3199_v43 = vpop.xlane.xlu0 %3198 }
0x1cc1   : > { %v3200_v45 = vmul.f32 0.0078125, %v3199_v43  ;;  %v4061_v46 = vmul.f32 %v4060_v42, %v4060_v42 }
0x1cc3   : > { %v3201_v47 = vadd.f32 1e-05, %v3200_v45  ;;  %4062 = vadd.xlane.f32.xlu1 %v4061_v46 }
0x1cc5   : > { %10030 = vrsqrt.f32 %v3201_v47 }
0x1ccf   : > { %v10031_v48 = vpop.eup %10030 }
0x1cd0   : > { %v3203_v50 = vmul.f32 %v10031_v48, %v3196_v13 }
0x1cd2   : > { %v3210_v52 = vmul.f32 %v7813_v49, %v3203_v50 }
0x1cd4   : > { %v11036_v53 = vadd.f32 %v7814_v51, %v3210_v52 }
0x1cd6   : > { %8919 = vmatmul.mubr.f32.vlgmr.msra.gmra.mrb[28].mxu0 %v11036_v53 }
0x1cd7   : > { %8993 = vmatprep.mubr.msk.f32.mxu0 %vm10186_vm0, %v10187_v6 }
0x1d50   : > { %v4063_v54 = vpop.xlane.xlu1 %4062 }
0x1d51   : > { %v4064_v23 = vmul.f32 0.0078125, %v4063_v54 }
0x1d53   : > { %v4065_v55 = vadd.f32 1e-05, %v4064_v23 }
0x1d55   : > { %10032 = vrsqrt.f32 %v4065_v55 }
0x1d5f   : > { %v10033_v56 = vpop.eup %10032 }
0x1d60   : > { %v4067_v59 = vmul.f32 %v10033_v56, %v4060_v42 }
0x1d62   : > { %v4074_v32 = vmul.f32 %v7830_v58, %v4067_v59 }
0x1d64   : > { %v11043_v61 = vadd.f32 %v7831_v60, %v4074_v32 }
0x1d66   : > { %8884 = vmatmul.mubr.f32.vlgmr.msra.gmra.mrb[40].mxu1 %v11043_v61 }
0x1d67   : > { %8923 = vmatprep.mubr.msk.f32.mxu1 %vm10186_vm0, %v10187_v6 }
0x1da9   : > { %v11048_v62 = vpop.f32.mrb[28].mxu0 }
0x1daa   : > { %v8920_v63 = vpop.f32.mrb[29].mxu0  ;;  %8922 = vmatpush3.xpose.msk.msra.mxu1 %vm1114_vm1, %v11048_v62 }
0x1dab   : > { %8926 = vmatprep.subr.mxu1 %v10187_v6 }
0x1e39   : > { %v11053_v0 = vpop.f32.mrb[40].mxu1 }
0x1e3a   : > { %v8885_v1 = vpop.f32.mrb[41].mxu1  ;;  %8924 = vmatmul.mubr.msk.f32.vlgmr.msra.gmra.mrb[42].mxu1 %vm1114_vm1, %v11053_v0 }
0x1e3b   : > { %8927 = vmatpush3.msra.mxu1 %v11048_v62  ;;  %8928 = vmatprep.mubr.msk.f32.mxu1 %vm10186_vm0, %v10187_v6 }
0x1e3c   : > { %8931 = vmatprep.subr.mxu1 %v10187_v6 }
0x1f0d   : > { %v4328_v4 = vpop.f32.mrb[42].mxu1 }
0x1f0e   : > { %v4332_v5 = vmul.f32 0.17677669, %v4328_v4  ;;  %v8925_v7 = vpop.f32.mrb[43].mxu1 }
0x1f10   : > { %v4333_v44 = vsel %vm1008_vm7, -1e+09, %v4332_v5 }
0x1f11   : > { %v4334_v8 = vsel %vm1190_vm3, %v4333_v44, -inf }
0x1f12   : > { %4335 = vmax.xlane.f32.xlu0 %v4334_v8 }
0x1f28   : > { %4421 = vrot.lane.b32.xlu0 %v11048_v62, %s11745_s2 }
0x1f9f   : > { %v4336_v9 = vpop.xlane.xlu0 %4335 }
0x1fa0   : > { %v4337_v10 = vsub.f32 %v4333_v44, %v4336_v9 }
0x1fa2   : > { %v4338_v29 = vmul.f32 1.442695, %v4337_v10  ;;  %v4098_v10 = vld [vmem:[%s11754_s14] sm:$0xff] }
0x1fa3   : > { %v4422_v15 = vpop.permute.xlu0 %4421 }
0x1fa4   : > { %10034 = vpow2.f32 %v4338_v29  ;;  %v4099_v29 = vld [vmem:[%s11754_s14 + $0x8] sm:$0xff] }
0x1fae   : > { %v10035_v57 = vpop.eup %10034 }
0x1faf   : > { %v4340_v34 = vsel %vm1190_vm3, %v10035_v57, 0.0 }
0x1fb0   : > { %4341 = vadd.xlane.f32.xlu1 %v4340_v34  ;;  %v9607_v34 = vpack.c.bf16 %v4099_v29, %v4098_v10  ;;  %v5042_v29 = vld [vmem:[%s11755_s16 + $0x60] sm:$0xff] }
0x1fb2   : > { %9608 = vmatpush3.bf16.msra.mxu0 %v9607_v34 }
0x1fb3   : > { %9609 = vmatprep.subr.bf16.mxu0 %v10185_v3 }
0x1fc1   : > { %4419 = vrot.lane.b32.xlu1 %v11053_v0, %s11745_s2 }
0x203d   : > { %v4342_v11 = vpop.xlane.xlu1 %4341 }
0x203e   : > { %10036 = vrcp.f32 %v4342_v11  ;;  %v4101_v11 = vld [vmem:[%s11754_s14 + $0x18] sm:$0xff] }
0x2041   : > { %v4420_v16 = vpop.permute.xlu1 %4419 }
0x2048   : > { %v10037_v12 = vpop.eup %10036 }
0x2049   : > { %v4344_v13 = vmul.f32 %v10037_v12, %v10035_v57  ;;  %v4100_v57 = vld [vmem:[%s11754_s14 + $0x10] sm:$0xff] }
0x204a   : > { %v9610_v12 = vpack.c.bf16 %v4101_v11, %v4100_v57  ;;  %v5044_v57 = vld [vmem:[%s11755_s16 + $0x70] sm:$0xff]  ;;  %v5047_v11 = vld [vmem:[%s11755_s16 + $0x88] sm:$0xff] }
0x204b   : > { %4345 = vst.msk [vmem:[%s11076_s17] sm:$0xff] %vm1190_vm3, %v4344_v13  ;;  %8929 = vmatmul.mubr.msk.f32.vlgmr.msra.gmra.mrb[44].mxu1 %vm1190_vm3, %v4344_v13  ;;  %v4102_v13 = vld [vmem:[%s11754_s14 + $0x20] sm:$0xff]  ;;  %v9644_v34 = vpack.c.bf16 %v5044_v57, %v5042_v29 }
0x204c   : > { %8932 = vmatpush3.xpose.msk.msra.mxu1 %vm1114_vm1, %v4422_v15  ;;  %8933 = vmatprep.mubr.msk.f32.mxu1 %vm10186_vm0, %v10187_v6 }
0x204d   : > { %8936 = vmatprep.subr.mxu1 %v10187_v6  ;;  %9611 = vmatpush3.bf16.msra.mxu0 %v9610_v12  ;;  %v5049_v12 = vld [vmem:[%s11755_s16 + $0x98] sm:$0xff] }
0x204e   : > { %9612 = vmatprep.subr.bf16.mxu0 %v10185_v3 }
0x204f   : > { %8934 = vmatmul.mubr.msk.f32.vlgmr.msra.gmra.mrb[46].mxu1 %vm1114_vm1, %v4420_v16 }
0x2050   : > { %8937 = vmatpush3.msra.mxu1 %v4422_v15  ;;  %8938 = vmatprep.mubr.msk.f32.mxu1 %vm10186_vm0, %v10187_v6  ;;  %v4103_v15 = vld [vmem:[%s11754_s14 + $0x28] sm:$0xff] }
0x2051   : > { %8941 = vmatprep.subr.mxu1 %v10187_v6  ;;  %v9613_v16 = vpack.c.bf16 %v4103_v15, %v4102_v13  ;;  %v5046_v13 = vld [vmem:[%s11755_s16 + $0x80] sm:$0xff]  ;;  %v9646_v15 = vpack.c.bf16 %v5049_v12, %v5047_v11  ;;  %v5073_v11 = vld [vmem:[%s11756_s22 + $0x58] sm:$0xff] }
0x2052   : > { %v5090_v12 = vld [vmem:[%s11756_s22 + $0xe0] sm:$0xff] }
0x2053   : > { %9614 = vmatpush3.bf16.msra.mxu0 %v9613_v16  ;;  %v5048_v16 = vld [vmem:[%s11755_s16 + $0x90] sm:$0xff] }
0x2054   : > { %9615 = vmatprep.subr.bf16.mxu0 %v10185_v3 }
0x211e   : > { %v11089_v26 = vpop.f32.mrb[44].mxu1 }
0x211f   : > { %v8930_v17 = vpop.f32.mrb[45].mxu1 }
0x2120   : > { %v4104_v17 = vld [vmem:[%s11754_s14 + $0x30] sm:$0xff] }
0x2122   : > { %v4493_v18 = vpop.f32.mrb[46].mxu1 }
0x2123   : > { %v4497_v19 = vmul.f32 0.17677669, %v4493_v18  ;;  %v8935_v20 = vpop.f32.mrb[47].mxu1  ;;  %v4105_v18 = vld [vmem:[%s11754_s14 + $0x38] sm:$0xff] }
0x2124   : > { %v4106_v20 = vld [vmem:[%s11754_s14 + $0x40] sm:$0xff] }
0x2125   : > { %v4498_v21 = vsel %vm1008_vm7, -1e+09, %v4497_v19  ;;  %v9616_v19 = vpack.c.bf16 %v4105_v18, %v4104_v17  ;;  %v5051_v17 = vld [vmem:[%s11755_s16 + $0xa8] sm:$0xff]  ;;  %v5053_v18 = vld [vmem:[%s11755_s16 + $0xb8] sm:$0xff] }
0x2126   : > { %v4499_v14 = vsel %vm1190_vm3, %v4498_v21, -inf }
0x2127   : > { %4500 = vmax.xlane.f32.xlu1 %v4499_v14  ;;  %9617 = vmatpush3.bf16.msra.mxu0 %v9616_v19  ;;  %v9648_v19 = vpack.c.bf16 %v5048_v16, %v5046_v13  ;;  %v5091_v13 = vld [vmem:[%s11756_s22 + $0xe8] sm:$0xff] }
0x2128   : > { %9618 = vmatprep.subr.bf16.mxu0 %v10185_v3  ;;  %v9686_v16 = vpack.c.bf16 %v5091_v13, %v5090_v12 }
0x2138   : > { %4586 = vrot.lane.b32.xlu1 %v11053_v0, %s11744_s5 }
0x21b4   : > { %v4501_v22 = vpop.xlane.xlu1 %4500 }
0x21b5   : > { %v4502_v37 = vsub.f32 %v4498_v21, %v4501_v22  ;;  %v4107_v21 = vld [vmem:[%s11754_s14 + $0x48] sm:$0xff]  ;;  %v4108_v22 = vld [vmem:[%s11754_s14 + $0x50] sm:$0xff] }
0x21b6   : > { %v9619_v14 = vpack.c.bf16 %v4107_v21, %v4106_v20  ;;  %v9650_v20 = vpack.c.bf16 %v5053_v18, %v5051_v17  ;;  %v5050_v21 = vld [vmem:[%s11755_s16 + $0xa0] sm:$0xff]  ;;  %v5075_v18 = vld [vmem:[%s11756_s22 + $0x68] sm:$0xff] }
0x21b7   : > { %v4503_v24 = vmul.f32 1.442695, %v4502_v37  ;;  %v4109_v37 = vld [vmem:[%s11754_s14 + $0x58] sm:$0xff]  ;;  %v5074_v17 = vld [vmem:[%s11756_s22 + $0x60] sm:$0xff] }
0x21b8   : > { %v4587_v36 = vpop.permute.xlu1 %4586  ;;  %9620 = vmatpush3.bf16.msra.mxu0 %v9619_v14  ;;  %v5052_v14 = vld [vmem:[%s11755_s16 + $0xb0] sm:$0xff] }
0x21b9   : > { %10038 = vpow2.f32 %v4503_v24  ;;  %v9622_v24 = vpack.c.bf16 %v4109_v37, %v4108_v22  ;;  %9621 = vmatprep.subr.bf16.mxu0 %v10185_v3  ;;  %v5055_v22 = vld [vmem:[%s11755_s16 + $0xc8] sm:$0xff]  ;;  %v5057_v37 = vld [vmem:[%s11755_s16 + $0xd8] sm:$0xff] }
0x21bc   : > { %9623 = vmatpush3.bf16.msra.mxu0 %v9622_v24  ;;  %v9652_v24 = vpack.c.bf16 %v5052_v14, %v5050_v21 }
0x21bd   : > { %9624 = vmatprep.subr.bf16.mxu0 %v10185_v3 }
0x21c3   : > { %v10039_v25 = vpop.eup %10038 }
0x21c4   : > { %v4505_v27 = vsel %vm1190_vm3, %v10039_v25, 0.0 }
0x21c5   : > { %4506 = vadd.xlane.f32.xlu0 %v4505_v27  ;;  %v4111_v27 = vld [vmem:[%s11754_s14 + $0x68] sm:$0xff] }
0x21db   : > { %4588 = vrot.lane.b32.xlu0 %v11048_v62, %s11744_s5 }
0x2252   : > { %v4507_v28 = vpop.xlane.xlu0 %4506 }
0x2253   : > { %10040 = vrcp.f32 %v4507_v28 }
0x2256   : > { %v4589_v33 = vpop.permute.xlu0 %4588 }
0x225d   : > { %v10041_v30 = vpop.eup %10040 }
0x225e   : > { %v4509_v31 = vmul.f32 %v10041_v30, %v10039_v25  ;;  %v4110_v25 = vld [vmem:[%s11754_s14 + $0x60] sm:$0xff]  ;;  %v4112_v30 = vld [vmem:[%s11754_s14 + $0x70] sm:$0xff] }
0x225f   : > { %v9625_v28 = vpack.c.bf16 %v4111_v27, %v4110_v25  ;;  %v9654_v25 = vpack.c.bf16 %v5057_v37, %v5055_v22  ;;  %v5054_v27 = vld [vmem:[%s11755_s16 + $0xc0] sm:$0xff] }
0x2260   : > { %7837 = vst.msk [vmem:[%s11076_s17 + $0x8] sm:$0xff] %vm1190_vm3, %v4509_v31  ;;  %8939 = vmatmul.mubr.msk.f32.vlgmr.msra.gmra.mrb[48].mxu1 %vm1190_vm3, %v4509_v31  ;;  %v4113_v31 = vld [vmem:[%s11754_s14 + $0x78] sm:$0xff]  ;;  %v7847_v37 = vld [vmem:[%s11757_s4] ss:$0 sm:$0xff] }
0x2261   : > { %8942 = vmatpush3.xpose.msk.msra.mxu1 %vm1114_vm1, %v4589_v33  ;;  %8943 = vmatprep.mubr.msk.f32.mxu1 %vm10186_vm0, %v10187_v6 }
0x2262   : > { %8946 = vmatprep.subr.mxu1 %v10187_v6  ;;  %9626 = vmatpush3.bf16.msra.mxu0 %v9625_v28  ;;  %v5056_v28 = vld [vmem:[%s11755_s16 + $0xd0] sm:$0xff] }
0x2263   : > { %9627 = vmatprep.subr.bf16.mxu0 %v10185_v3 }
0x2264   : > { %8944 = vmatmul.mubr.msk.f32.vlgmr.msra.gmra.mrb[50].mxu1 %vm1114_vm1, %v4587_v36 }
0x2265   : > { %8947 = vmatpush3.msra.mxu1 %v4589_v33  ;;  %8948 = vmatprep.mubr.msk.f32.mxu1 %vm10186_vm0, %v10187_v6  ;;  %v9628_v33 = vpack.c.bf16 %v4113_v31, %v4112_v30  ;;  %v5059_v30 = vld [vmem:[%s11755_s16 + $0xe8] sm:$0xff]  ;;  %v5061_v31 = vld [vmem:[%s11755_s16 + $0xf8] sm:$0xff] }
0x2266   : > { %8951 = vmatprep.subr.mxu1 %v10187_v6 }
0x2267   : > { %9629 = vmatpush3.bf16.msra.mxu0 %v9628_v33  ;;  %v9656_v33 = vpack.c.bf16 %v5056_v28, %v5054_v27 }
0x2333   : > { %v4582_v38 = vpop.f32.mrb[48].mxu1 }
0x2334   : > { %v8940_v39 = vpop.f32.mrb[49].mxu1 }
0x2337   : > { %v4660_v40 = vpop.f32.mrb[50].mxu1 }
0x2338   : > { %v4664_v41 = vmul.f32 0.17677669, %v4660_v40  ;;  %v8945_v42 = vpop.f32.mrb[51].mxu1 }
0x233a   : > { %v4665_v43 = vsel %vm1008_vm7, -1e+09, %v4664_v41 }
0x233b   : > { %v4666_v45 = vsel %vm1190_vm3, %v4665_v43, -inf }
0x233c   : > { %4667 = vmax.xlane.f32.xlu1 %v4666_v45 }
0x234d   : > { %4753 = vrot.lane.b32.xlu1 %v11053_v0, %s11746_s13 }
0x23c9   : > { %v4668_v46 = vpop.xlane.xlu1 %4667 }
0x23ca   : > { %v4669_v47 = vsub.f32 %v4665_v43, %v4668_v46 }
0x23cc   : > { %v4670_v48 = vmul.f32 1.442695, %v4669_v47 }
0x23cd   : > { %v4754_v55 = vpop.permute.xlu1 %4753 }
0x23ce   : > { %10042 = vpow2.f32 %v4670_v48 }
0x23d8   : > { %v10043_v49 = vpop.eup %10042 }
0x23d9   : > { %v4672_v50 = vsel %vm1190_vm3, %v10043_v49, 0.0 }
0x23da   : > { %4673 = vadd.xlane.f32.xlu0 %v4672_v50  ;;  %v5033_v50 = vld [vmem:[%s11755_s16 + $0x18] sm:$0xff] }
0x23f0   : > { %4755 = vrot.lane.b32.xlu0 %v11048_v62, %s11746_s13 }
0x2467   : > { %v4674_v51 = vpop.xlane.xlu0 %4673 }
0x2468   : > { %10044 = vrcp.f32 %v4674_v51  ;;  %v5030_v51 = vld [vmem:[%s11755_s16] sm:$0xff] }
0x246b   : > { %v4756_v23 = vpop.permute.xlu0 %4755 }
0x2472   : > { %v10045_v52 = vpop.eup %10044 }
0x2473   : > { %v4676_v54 = vmul.f32 %v10045_v52, %v10043_v49  ;;  %v5031_v49 = vld [vmem:[%s11755_s16 + $0x8] sm:$0xff]  ;;  %v5032_v52 = vld [vmem:[%s11755_s16 + $0x10] sm:$0xff] }
0x2475   : > { %7841 = vst.msk [vmem:[%s11076_s17 + $0x10] sm:$0xff] %vm1190_vm3, %v4676_v54  ;;  %8949 = vmatmul.mubr.msk.f32.vlgmr.msra.gmra.mrb[52].mxu1 %vm1190_vm3, %v4676_v54  ;;  %v5035_v54 = vld [vmem:[%s11755_s16 + $0x28] sm:$0xff] }
0x2476   : > { %8952 = vmatpush3.xpose.msk.msra.mxu1 %vm1114_vm1, %v4756_v23  ;;  %8953 = vmatprep.mubr.msk.f32.mxu1 %vm10186_vm0, %v10187_v6 }
0x2477   : > { %8956 = vmatprep.subr.mxu1 %v10187_v6 }
0x2479   : > { %8954 = vmatmul.mubr.msk.f32.vlgmr.msra.gmra.mrb[54].mxu1 %vm1114_vm1, %v4754_v55  ;;  %v9632_v55 = vpack.c.bf16 %v5032_v52, %v5030_v51  ;;  %v5064_v51 = vld [vmem:[%s11756_s22 + $0x10] sm:$0xff]  ;;  %v5082_v52 = vld [vmem:[%s11756_s22 + $0xa0] sm:$0xff] }
0x247a   : > { %8957 = vmatpush3.msra.mxu1 %v4756_v23  ;;  %8958 = vmatprep.mubr.msk.f32.mxu1 %vm10186_vm0, %v10187_v6  ;;  %v5037_v23 = vld [vmem:[%s11755_s16 + $0x38] sm:$0xff] }
0x2548   : > { %v4749_v56 = vpop.f32.mrb[52].mxu1 }
0x2549   : > { %v8950_v58 = vpop.f32.mrb[53].mxu1 }
0x254a   : > { %v5034_v58 = vld [vmem:[%s11755_s16 + $0x20] sm:$0xff] }
0x254c   : > { %v4827_v59 = vpop.f32.mrb[54].mxu1 }
0x254d   : > { %v4831_v60 = vmul.f32 0.17677669, %v4827_v59  ;;  %v8955_v32 = vpop.f32.mrb[55].mxu1  ;;  %v5036_v59 = vld [vmem:[%s11755_s16 + $0x30] sm:$0xff] }
0x254e   : > { %v5041_v32 = vld [vmem:[%s11755_s16 + $0x58] sm:$0xff] }
0x254f   : > { %v4832_v62 = vsel %vm1008_vm7, -1e+09, %v4831_v60  ;;  %v5039_v60 = vld [vmem:[%s11755_s16 + $0x48] sm:$0xff] }
0x2550   : > { %v4833_v63 = vsel %vm1190_vm3, %v4832_v62, -inf }
0x2551   : > { %4834 = vmax.xlane.f32.xlu1 %v4833_v63  ;;  %v5038_v63 = vld [vmem:[%s11755_s16 + $0x40] sm:$0xff] }
0x2562   : > { %4925 = vrot.lane.b32.xlu1 %v4749_v56, %s11744_s5  ;;  %v9634_v56 = vpack.c.bf16 %v5037_v23, %v5035_v54  ;;  %v5083_v54 = vld [vmem:[%s11756_s22 + $0xa8] sm:$0xff] }
0x25de   : > { %v4835_v0 = vpop.xlane.xlu1 %4834 }
0x25df   : > { %v4836_v1 = vsub.f32 %v4832_v62, %v4835_v0  ;;  %v9638_v62 = vpack.c.bf16 %v5041_v32, %v5039_v60  ;;  %v5040_v0 = vld [vmem:[%s11755_s16 + $0x50] sm:$0xff]  ;;  %v5085_v60 = vld [vmem:[%s11756_s22 + $0xb8] sm:$0xff] }
0x25e1   : > { %v4837_v4 = vmul.f32 1.442695, %v4836_v1  ;;  %v9640_v1 = vpack.c.bf16 %v5040_v0, %v5038_v63  ;;  %v5069_v63 = vld [vmem:[%s11756_s22 + $0x38] sm:$0xff]  ;;  %v5086_v0 = vld [vmem:[%s11756_s22 + $0xc0] sm:$0xff] }
0x25e2   : > { %v4926_v40 = vpop.permute.xlu1 %4925 }
0x25e3   : > { %10046 = vpow2.f32 %v4837_v4 }
0x25ed   : > { %v10047_v5 = vpop.eup %10046 }
0x25ee   : > { %v4839_v7 = vsel %vm1190_vm3, %v10047_v5, 0.0 }
0x25ef   : > { %4840 = vadd.xlane.f32.xlu0 %v4839_v7 }
0x2605   : > { %4921 = vrot.lane.b32.xlu0 %v4582_v38, %s11746_s13 }
0x267c   : > { %v4841_v44 = vpop.xlane.xlu0 %4840 }
0x267d   : > { %10048 = vrcp.f32 %v4841_v44 }
0x2680   : > { %v4922_v39 = vpop.permute.xlu0 %4921 }
0x2681   : > { %v4932_v41 = vsel %vm1114_vm1, %v11089_v26, %v4922_v39  ;;  %v9630_v26 = vpack.c.bf16 %v5033_v50, %v5031_v49  ;;  %v5060_v39 = vld [vmem:[%s11755_s16 + $0xf0] sm:$0xff] }
0x2682   : > { %v4933_v42 = vsel %vm1778_vm4, %v4932_v41, %v4926_v40  ;;  %v5078_v41 = vld [vmem:[%s11756_s22 + $0x80] sm:$0xff] }
0x2683   : > { %9631 = vmatprep.subr.bf16.mxu1 %v9630_v26  ;;  %v5065_v26 = vld [vmem:[%s11756_s22 + $0x18] sm:$0xff] }
0x2684   : > { %v9668_v23 = vpack.c.bf16 %v5065_v26, %v5064_v51  ;;  %v7854_v26 = vld [vmem:[%s11733_s6 + $0x98] sm:$0xff] }
0x2687   : > { %v10049_v8 = vpop.eup %10048 }
0x2688   : > { %v4843_v9 = vmul.f32 %v10049_v8, %v10047_v5  ;;  %v5043_v8 = vld [vmem:[%s11755_s16 + $0x68] sm:$0xff] }
0x268a   : > { %7845 = vst.msk [vmem:[%s11076_s17 + $0x18] sm:$0xff] %vm1190_vm3, %v4843_v9  ;;  %8959 = vmatmul.mubr.msk.f32.vlgmr.msra.gmra.mrb[56].mxu1 %vm1190_vm3, %v4843_v9  ;;  %v5045_v9 = vld [vmem:[%s11755_s16 + $0x78] sm:$0xff] }
0x268b   : > { %5160 = vmatprep.mubr.f32.mxu1 %v10187_v6  ;;  %9633 = vmatpush1.bf16.msra.mxu1 %v9632_v55  ;;  %v9642_v10 = vpack.c.bf16 %v5045_v9, %v5043_v8  ;;  %v9670_v55 = vpack.c.bf16 %v5083_v54, %v5082_v52  ;;  %v5071_v8 = vld [vmem:[%s11756_s22 + $0x48] sm:$0xff]  ;;  %v5088_v9 = vld [vmem:[%s11756_s22 + $0xd0] sm:$0xff]  ;;  %v7855_v54 = vld [vmem:[%s11733_s6 + $0xa0] sm:$0xff] }
0x268c   : > { %9635 = vmatprep.subr.bf16.mxu1 %v9634_v56  ;;  %v5066_v56 = vld [vmem:[%s11756_s22 + $0x20] sm:$0xff] }
0x275d   : > { %v4916_v36 = vpop.f32.mrb[56].mxu1 }
0x275e   : > { %4929 = vrot.lane.b32.xlu1 %v4916_v36, %s11745_s2  ;;  %v8960_v38 = vpop.f32.mrb[57].mxu1  ;;  %v9658_v36 = vpack.c.bf16 %v5061_v31, %v5059_v30  ;;  %v5092_v30 = vld [vmem:[%s11756_s22 + $0xf0] sm:$0xff]  ;;  %v5093_v31 = vld [vmem:[%s11756_s22 + $0xf8] sm:$0xff] }
0x275f   : > { %v5058_v38 = vld [vmem:[%s11755_s16 + $0xe0] sm:$0xff] }
0x2760   : > { %v9660_v40 = vpack.c.bf16 %v5060_v39, %v5058_v38  ;;  %v5077_v38 = vld [vmem:[%s11756_s22 + $0x78] sm:$0xff] }
0x27d0   : > { %v4930_v43 = vpop.permute.xlu1 %4929 }
0x27d1   : > { %v4934_v45 = vsel %vm1780_vm5, %v4933_v42, %v4930_v43  ;;  %v5079_v42 = vld [vmem:[%s11756_s22 + $0x88] sm:$0xff]  ;;  %v5062_v43 = vld [vmem:[%s11756_s22] sm:$0xff] }
0x27d2   : > { %8994 = vmatmul.mubr.f32.vlgmr.msra.gmra.mrb[30].mxu0 %v4934_v45  ;;  %v9662_v45 = vpack.c.bf16 %v5079_v42, %v5078_v41 }
0x27d4   : > { %9663 = vmatprep.subr.bf16.mxu0 %v9662_v45 }
0x28a5   : > { %v5001_v46 = vpop.f32.mrb[30].mxu0 }
0x28a6   : > { %v5002_v47 = vadd.f32 %v5001_v46, %v11043_v61  ;;  %v8995_v48 = vpop.f32.mrb[31].mxu0  ;;  %v9636_v61 = vpack.c.bf16 %v5036_v59, %v5034_v58  ;;  %v5063_v46 = vld [vmem:[%s11756_s22 + $0x8] sm:$0xff]  ;;  %v5084_v59 = vld [vmem:[%s11756_s22 + $0xb0] sm:$0xff] }
0x28a7   : > { %v5081_v48 = vld [vmem:[%s11756_s22 + $0x98] sm:$0xff]  ;;  %v9664_v49 = vpack.c.bf16 %v5063_v46, %v5062_v43  ;;  %v5067_v58 = vld [vmem:[%s11756_s22 + $0x28] sm:$0xff] }
0x28a8   : > { %5005 = vadd.xlane.f32.xlu0 %v5002_v47  ;;  %9637 = vmatpush1.bf16.msra.mxu1 %v9636_v61  ;;  %v9672_v32 = vpack.c.bf16 %v5067_v58, %v5066_v56  ;;  %v9674_v61 = vpack.c.bf16 %v5085_v60, %v5084_v59 }
0x28a9   : > { %9639 = vmatprep.subr.bf16.mxu1 %v9638_v62  ;;  %9665 = vmatpush3.bf16.msra.mxu0 %v9664_v49  ;;  %v5068_v62 = vld [vmem:[%s11756_s22 + $0x30] sm:$0xff]  ;;  %v7852_v49 = vld [vmem:[%s11733_s6 + $0x88] sm:$0xff] }
0x28ac   : > { %9641 = vmatpush1.bf16.msra.mxu1 %v9640_v1  ;;  %v5087_v1 = vld [vmem:[%s11756_s22 + $0xc8] sm:$0xff] }
0x28ad   : > { %9643 = vmatprep.subr.bf16.mxu1 %v9642_v10  ;;  %v5089_v10 = vld [vmem:[%s11756_s22 + $0xd8] sm:$0xff] }
0x28ae   : > { %v9682_v57 = vpack.c.bf16 %v5089_v10, %v5088_v9  ;;  %v7864_v9 = vld [vmem:[%s11733_s6 + $0xe8] sm:$0xff] }
0x28b0   : > { %9645 = vmatpush1.bf16.msra.mxu1 %v9644_v34  ;;  %v5072_v34 = vld [vmem:[%s11756_s22 + $0x50] sm:$0xff] }
0x28b1   : > { %9647 = vmatprep.subr.bf16.mxu1 %v9646_v15  ;;  %v9684_v15 = vpack.c.bf16 %v5073_v11, %v5072_v34 }
0x28b4   : > { %9649 = vmatpush1.bf16.msra.mxu1 %v9648_v19  ;;  %v9688_v19 = vpack.c.bf16 %v5075_v18, %v5074_v17  ;;  %v7850_v18 = vld [vmem:[%s11760_s24] ss:$0 sm:$0xff] }
0x28b5   : > { %9651 = vmatprep.subr.bf16.mxu1 %v9650_v20 }
0x28b8   : > { %9653 = vmatpush1.bf16.msra.mxu1 %v9652_v24 }
0x28b9   : > { %9655 = vmatprep.subr.bf16.mxu1 %v9654_v25  ;;  %v7848_v25 = vld [vmem:[%s11758_s19] ss:$0 sm:$0xff] }
0x28bc   : > { %9657 = vmatpush1.bf16.msra.mxu1 %v9656_v33  ;;  %v9690_v33 = vpack.c.bf16 %v5093_v31, %v5092_v30 }
0x28bd   : > { %9659 = vmatprep.subr.bf16.mxu1 %v9658_v36  ;;  %v5076_v36 = vld [vmem:[%s11756_s22 + $0x70] sm:$0xff] }
0x28be   : > { %v9692_v39 = vpack.c.bf16 %v5077_v38, %v5076_v36 }
0x28c0   : > { %9661 = vmatpush1.bf16.msra.mxu1 %v9660_v40 }
0x28c1   : > { %9694 = vmatprep.subr.bf16.mxu1 %v10185_v3 }
0x2935   : > { %v5006_v4 = vpop.xlane.xlu0 %5005 }
0x2936   : > { %v5007_v5 = vmul.f32 0.0078125, %v5006_v4  ;;  %v9676_v4 = vpack.c.bf16 %v5069_v63, %v5068_v62  ;;  %v7859_v63 = vld [vmem:[%s11733_s6 + $0xc0] sm:$0xff] }
0x2938   : > { %v11179_v7 = vsub.f32 %v5002_v47, %v5007_v5  ;;  %v5080_v47 = vld [vmem:[%s11756_s22 + $0x90] sm:$0xff]  ;;  %v9678_v5 = vpack.c.bf16 %v5087_v1, %v5086_v0  ;;  %v7860_v0 = vld [vmem:[%s11733_s6 + $0xc8] sm:$0xff] }
0x2939   : > { %v9666_v50 = vpack.c.bf16 %v5081_v48, %v5080_v47  ;;  %v7851_v48 = vld [vmem:[%s11733_s6 + $0x80] sm:$0xff]  ;;  %v9707_v1 = vpack.c.bf16 %v7860_v0, %v7859_v63 }
0x293a   : > { %v5009_v44 = vmul.f32 %v11179_v7, %v11179_v7  ;;  %v9695_v51 = vpack.c.bf16 %v7852_v49, %v7851_v48 }
0x293b   : > { %9667 = vmatprep.subr.bf16.mxu0 %v9666_v50  ;;  %v7853_v50 = vld [vmem:[%s11733_s6 + $0x90] sm:$0xff] }
0x293c   : > { %5010 = vadd.xlane.f32.xlu1 %v5009_v44  ;;  %9669 = vmatpush3.bf16.msra.mxu0 %v9668_v23  ;;  %v5070_v44 = vld [vmem:[%s11756_s22 + $0x40] sm:$0xff]  ;;  %v9698_v52 = vpack.c.bf16 %v7854_v26, %v7853_v50  ;;  %v7856_v23 = vld [vmem:[%s11733_s6 + $0xa8] sm:$0xff] }
0x293d   : > { %9671 = vmatprep.subr.bf16.mxu0 %v9670_v55  ;;  %v9680_v29 = vpack.c.bf16 %v5071_v8, %v5070_v44  ;;  %v9701_v55 = vpack.c.bf16 %v7856_v23, %v7855_v54  ;;  %v7863_v8 = vld [vmem:[%s11733_s6 + $0xe0] sm:$0xff] }
0x293e   : > { %v9713_v10 = vpack.c.bf16 %v7864_v9, %v7863_v8 }
0x2940   : > { %9673 = vmatpush3.bf16.msra.mxu0 %v9672_v32  ;;  %v7857_v32 = vld [vmem:[%s11733_s6 + $0xb0] sm:$0xff] }
0x2941   : > { %9675 = vmatprep.subr.bf16.mxu0 %v9674_v61  ;;  %v7858_v61 = vld [vmem:[%s11733_s6 + $0xb8] sm:$0xff] }
0x2942   : > { %v9704_v62 = vpack.c.bf16 %v7858_v61, %v7857_v32 }
0x2944   : > { %9677 = vmatpush3.bf16.msra.mxu0 %v9676_v4  ;;  %v7861_v4 = vld [vmem:[%s11733_s6 + $0xd0] sm:$0xff] }
0x2945   : > { %9679 = vmatprep.subr.bf16.mxu0 %v9678_v5  ;;  %v7862_v5 = vld [vmem:[%s11733_s6 + $0xd8] sm:$0xff] }
0x2946   : > { %v9710_v44 = vpack.c.bf16 %v7862_v5, %v7861_v4 }
0x2948   : > { %9681 = vmatpush3.bf16.msra.mxu0 %v9680_v29  ;;  %v7865_v29 = vld [vmem:[%s11733_s6 + $0xf0] sm:$0xff] }
0x2949   : > { %9683 = vmatprep.subr.bf16.mxu0 %v9682_v57  ;;  %v7866_v57 = vld [vmem:[%s11733_s6 + $0xf8] sm:$0xff] }
0x294a   : > { %v9716_v34 = vpack.c.bf16 %v7866_v57, %v7865_v29 }
0x294c   : > { %9685 = vmatpush3.bf16.msra.mxu0 %v9684_v15 }
0x294d   : > { %9687 = vmatprep.subr.bf16.mxu0 %v9686_v16  ;;  %v7849_v16 = vld [vmem:[%s11759_s20] ss:$0 sm:$0xff] }
0x2950   : > { %9689 = vmatpush3.bf16.msra.mxu0 %v9688_v19 }
0x2951   : > { %9691 = vmatprep.subr.bf16.mxu0 %v9690_v33 }
0x2954   : > { %9693 = vmatpush3.bf16.msra.mxu0 %v9692_v39 }
0x2955   : > { %9031 = vmatprep.subr.mxu0 %v10187_v6 }
0x29c9   : > { %v5011_v20 = vpop.xlane.xlu1 %5010 }
0x29ca   : > { %v5012_v21 = vmul.f32 0.0078125, %v5011_v20 }
0x29cc   : > { %v5013_v14 = vadd.f32 1e-05, %v5012_v21 }
0x29ce   : > { %10050 = vrsqrt.f32 %v5013_v14 }
0x29d8   : > { %v10051_v22 = vpop.eup %10050 }
0x29d9   : > { %v5015_v24 = vmul.f32 %v10051_v22, %v11179_v7 }
0x29db   : > { %v5022_v27 = vmul.f32 %v7847_v37, %v5015_v24 }
0x29dd   : > { %v5029_v28 = vadd.f32 %v7848_v25, %v5022_v27 }
0x29df   : > { %5161 = vmatmul.mubr.f32.vlgmr.msra.gmra.mrb[58].mxu1 %v5029_v28 }
0x29e0   : > { %9028 = vmatprep.mubr.msk.f32.mxu1 %vm10186_vm0, %v10187_v6  ;;  %9696 = vmatpush3.bf16.msra.mxu1 %v9695_v51 }
0x29e1   : > { %9697 = vmatprep.subr.bf16.mxu1 %v10185_v3 }
0x29e4   : > { %9699 = vmatpush3.bf16.msra.mxu1 %v9698_v52 }
0x29e5   : > { %9700 = vmatprep.subr.bf16.mxu1 %v10185_v3 }
0x29e8   : > { %9702 = vmatpush3.bf16.msra.mxu1 %v9701_v55 }
0x29e9   : > { %9703 = vmatprep.subr.bf16.mxu1 %v10185_v3 }
0x29ec   : > { %9705 = vmatpush3.bf16.msra.mxu1 %v9704_v62 }
0x29ed   : > { %9706 = vmatprep.subr.bf16.mxu1 %v10185_v3 }
0x29f0   : > { %9708 = vmatpush3.bf16.msra.mxu1 %v9707_v1 }
0x29f1   : > { %9709 = vmatprep.subr.bf16.mxu1 %v10185_v3 }
0x29f4   : > { %9711 = vmatpush3.bf16.msra.mxu1 %v9710_v44 }
0x29f5   : > { %9712 = vmatprep.subr.bf16.mxu1 %v10185_v3 }
0x29f8   : > { %9714 = vmatpush3.bf16.msra.mxu1 %v9713_v10 }
0x29f9   : > { %9715 = vmatprep.subr.bf16.mxu1 %v10185_v3 }
0x29fc   : > { %9717 = vmatpush3.bf16.msra.mxu1 %v9716_v34 }
0x29fd   : > { %9036 = vmatprep.subr.mxu1 %v10187_v6 }
0x2ab2   : > { %v5162_v7 = vpop.f32.mrb[58].mxu1 }
0x2ab3   : > { %v5164_v40 = vpop.f32.mrb[59].mxu1  ;;  %v5167_v42 = vmax.f32 %v5162_v7, 0.0 }
0x2ab4   : > { %v5168_v41 = vmax.f32 %v5164_v40, 0.0 }
0x2ab6   : > { %5233 = vmatprep.mubr.f32.mxu0 %v5168_v41 }
0x2ab7   : > { %5234 = vmatmul.mubr.f32.vlgmr.msra.gmra.mrb[32].mxu0 %v5167_v42 }
0x2ab8   : > { %9033 = vmatprep.mubr.msk.f32.mxu0 %vm10186_vm0, %v10187_v6 }
0x2b8a   : > { %v8349_v43 = vpop.f32.mrb[32].mxu0 }
0x2b8b   : > { %v8350_v45 = vpop.f32.mrb[33].mxu0 }
0x2b8c   : > { %v8351_v46 = vadd.f32 %v8350_v45, %v8349_v43 }
0x2b8e   : > { %v5236_v47 = vadd.f32 %v8351_v46, %v5029_v28 }
0x2b90   : > { %5239 = vadd.xlane.f32.xlu0 %v5236_v47 }
0x2c1d   : > { %v5240_v56 = vpop.xlane.xlu0 %5239 }
0x2c1e   : > { %v5241_v58 = vmul.f32 0.0078125, %v5240_v56 }
0x2c20   : > { %v5242_v59 = vsub.f32 %v5236_v47, %v5241_v58 }
0x2c22   : > { %v5243_v60 = vmul.f32 %v5242_v59, %v5242_v59 }
0x2c24   : > { %5244 = vadd.xlane.f32.xlu0 %v5243_v60 }
0x2cb1   : > { %v5245_v11 = vpop.xlane.xlu0 %5244 }
0x2cb2   : > { %v5246_v12 = vmul.f32 0.0078125, %v5245_v11 }
0x2cb4   : > { %v5247_v13 = vadd.f32 1e-05, %v5246_v12 }
0x2cb6   : > { %10052 = vrsqrt.f32 %v5247_v13 }
0x2cc0   : > { %v10053_v15 = vpop.eup %10052 }
0x2cc1   : > { %v5249_v17 = vmul.f32 %v10053_v15, %v5242_v59 }
0x2cc3   : > { %v5256_v19 = vmul.f32 %v7849_v16, %v5249_v17 }
0x2cc5   : > { %v11270_v20 = vadd.f32 %v7850_v18, %v5256_v19  ;;  %v7867_v18 = vld [vmem:[%s10270_s12 + $0x80] sm:$0xff]  ;;  %v7868_v19 = vld [vmem:[%s10270_s12 + $0x88] sm:$0xff] }
0x2cc7   : > { %9029 = vmatmul.mubr.f32.vlgmr.msra.gmra.mrb[60].mxu1 %v11270_v20 }
0x2cc8   : > { %9038 = vmatprep.mubr.msk.f32.mxu1 %vm10186_vm0, %v10187_v6 }
0x2d9a   : > { %v5368_v21 = vpop.f32.mrb[60].mxu1 }
0x2d9b   : > { %5696 = vrot.lane.b32.xlu0 %v5368_v21, %s11744_s5  ;;  %5533 = vrot.lane.b32.xlu1 %v5368_v21, %s11745_s2  ;;  %v9030_v14 = vpop.f32.mrb[61].mxu1 }
0x2d9c   : > { %9032 = vmatpush3.xpose.msk.msra.mxu0 %vm1114_vm1, %v5368_v21  ;;  %9037 = vmatpush3.msra.mxu1 %v5368_v21  ;;  %v9719_v14 = vpack.c.bf16 %v7868_v19, %v7867_v18 }
0x2d9d   : > { %9041 = vmatprep.subr.mxu0 %v10187_v6  ;;  %9046 = vmatprep.subr.mxu1 %v10187_v6 }
0x2d9f   : > { %9034 = vmatmul.mubr.msk.f32.vlgmr.msra.gmra.mrb[34].mxu0 %vm1114_vm1, %v5368_v21  ;;  %5859 = vrot.lane.b32.xlu1 %v5368_v21, %s11746_s13  ;;  %v7869_v21 = vld [vmem:[%s10270_s12 + $0x90] sm:$0xff] }
0x2da0   : > { %9043 = vmatprep.mubr.msk.f32.mxu0 %vm10186_vm0, %v10187_v6 }
0x2e0d   : > { %v11284_v22 = vpop.permute.xlu1 %5533  ;;  %v11289_v37 = vpop.permute.xlu0 %5696 }
0x2e0e   : > { %9042 = vmatpush3.xpose.msk.msra.mxu0 %vm1114_vm1, %v11284_v22 }
0x2e0f   : > { %9051 = vmatprep.subr.mxu0 %v10187_v6 }
0x2e11   : > { %9044 = vmatmul.mubr.msk.f32.vlgmr.msra.gmra.mrb[36].mxu0 %vm1114_vm1, %v11284_v22  ;;  %v11298_v24 = vpop.permute.xlu1 %5859 }
0x2e12   : > { %9052 = vmatpush3.xpose.msk.msra.mxu0 %vm1114_vm1, %v11289_v37  ;;  %9053 = vmatprep.mubr.msk.f32.mxu0 %vm10186_vm0, %v10187_v6 }
0x2e13   : > { %9061 = vmatprep.subr.mxu0 %v10187_v6 }
0x2e15   : > { %9054 = vmatmul.mubr.msk.f32.vlgmr.msra.gmra.mrb[38].mxu0 %vm1114_vm1, %v11289_v37 }
0x2e16   : > { %9062 = vmatpush3.xpose.msk.msra.mxu0 %vm1114_vm1, %v11298_v24  ;;  %9063 = vmatprep.mubr.msk.f32.mxu0 %vm10186_vm0, %v10187_v6 }
0x2e17   : > { %9718 = vmatprep.subr.bf16.mxu0 %v10185_v3 }
0x2e19   : > { %9064 = vmatmul.mubr.msk.f32.vlgmr.msra.gmra.mrb[40].mxu0 %vm1114_vm1, %v11298_v24 }
0x2e1a   : > { %9103 = vmatprep.mubr.msk.f32.mxu0 %vm10186_vm0, %v10187_v6  ;;  %9720 = vmatpush3.bf16.msra.mxu0 %v9719_v14 }
0x2e1b   : > { %9721 = vmatprep.subr.bf16.mxu0 %v10185_v3 }
0x2e72   : > { %v5441_v25 = vpop.f32.mrb[34].mxu0 }
0x2e73   : > { %v5445_v27 = vmul.f32 0.17677669, %v5441_v25  ;;  %v9035_v28 = vpop.f32.mrb[35].mxu0  ;;  %v7872_v25 = vld [vmem:[%s10270_s12 + $0xa8] sm:$0xff] }
0x2e75   : > { %v5446_v30 = vsel %vm1006_vm6, -1e+09, %v5445_v27 }
0x2e76   : > { %v5447_v31 = vsel %vm1190_vm3, %v5446_v30, -inf }
0x2e77   : > { %5448 = vmax.xlane.f32.xlu1 %v5447_v31  ;;  %v7873_v31 = vld [vmem:[%s10270_s12 + $0xb0] sm:$0xff] }
0x2ee4   : > { %v5603_v33 = vpop.f32.mrb[36].mxu0 }
0x2ee5   : > { %v5607_v36 = vmul.f32 0.17677669, %v5603_v33  ;;  %v9045_v38 = vpop.f32.mrb[37].mxu0  ;;  %v7874_v33 = vld [vmem:[%s10270_s12 + $0xb8] sm:$0xff] }
0x2ee6   : > { %v7875_v38 = vld [vmem:[%s10270_s12 + $0xc0] sm:$0xff] }
0x2ee7   : > { %v5608_v39 = vsel %vm1006_vm6, -1e+09, %v5607_v36  ;;  %v9728_v36 = vpack.c.bf16 %v7874_v33, %v7873_v31 }
0x2ee8   : > { %v5766_v7 = vpop.f32.mrb[38].mxu0  ;;  %v5609_v40 = vsel %vm1190_vm3, %v5608_v39, -inf }
0x2ee9   : > { %v5770_v41 = vmul.f32 0.17677669, %v5766_v7  ;;  %5610 = vmax.xlane.f32.xlu0 %v5609_v40  ;;  %v9055_v42 = vpop.f32.mrb[39].mxu0  ;;  %v7877_v40 = vld [vmem:[%s10270_s12 + $0xd0] sm:$0xff] }
0x2eeb   : > { %v5771_v43 = vsel %vm1006_vm6, -1e+09, %v5770_v41  ;;  %v7878_v41 = vld [vmem:[%s10270_s12 + $0xd8] sm:$0xff] }
0x2eec   : > { %v5929_v45 = vpop.f32.mrb[40].mxu0  ;;  %v5772_v46 = vsel %vm1190_vm3, %v5771_v43, -inf  ;;  %v9734_v42 = vpack.c.bf16 %v7878_v41, %v7877_v40 }
0x2eed   : > { %v5933_v47 = vmul.f32 0.17677669, %v5929_v45  ;;  %5773 = vmax.xlane.f32.xlu0 %v5772_v46  ;;  %v9065_v48 = vpop.f32.mrb[41].mxu0  ;;  %v7880_v45 = vld [vmem:[%s10270_s12 + $0xe8] sm:$0xff] }
0x2eee   : > { %v7882_v48 = vld [vmem:[%s10270_s12 + $0xf8] sm:$0xff] }
0x2eef   : > { %v5934_v49 = vsel %vm1006_vm6, -1e+09, %v5933_v47  ;;  %v7881_v47 = vld [vmem:[%s10270_s12 + $0xf0] sm:$0xff] }
0x2ef0   : > { %v5935_v50 = vsel %vm1190_vm3, %v5934_v49, -inf }
0x2ef1   : > { %5936 = vmax.xlane.f32.xlu1 %v5935_v50  ;;  %v7903_v50 = vld [vmem:[%s11749_s3 + $0x80] sm:$0xff] }
0x2f04   : > { %v5449_v51 = vpop.xlane.xlu1 %5448 }
0x2f05   : > { %v5450_v26 = vsub.f32 %v5446_v30, %v5449_v51  ;;  %v7904_v51 = vld [vmem:[%s11749_s3 + $0x88] sm:$0xff] }
0x2f07   : > { %v5451_v52 = vmul.f32 1.442695, %v5450_v26  ;;  %v9743_v26 = vpack.c.bf16 %v7904_v51, %v7903_v50 }
0x2f09   : > { %10054 = vpow2.f32 %v5451_v52  ;;  %v7905_v52 = vld [vmem:[%s11749_s3 + $0x90] sm:$0xff] }
0x2f13   : > { %v10055_v54 = vpop.eup %10054 }
0x2f14   : > { %v5453_v23 = vsel %vm1190_vm3, %v10055_v54, 0.0 }
0x2f15   : > { %5454 = vadd.xlane.f32.xlu0 %v5453_v23 }
0x2f76   : > { %v5611_v55 = vpop.xlane.xlu0 %5610 }
0x2f77   : > { %v5612_v56 = vsub.f32 %v5608_v39, %v5611_v55  ;;  %v7876_v39 = vld [vmem:[%s10270_s12 + $0xc8] sm:$0xff] }
0x2f78   : > { %v9731_v7 = vpack.c.bf16 %v7876_v39, %v7875_v38  ;;  %v7901_v38 = vld [vmem:[%s11750_s8 + $0x1] ss:$0 sm:$0xff] }
0x2f79   : > { %v5613_v58 = vmul.f32 1.442695, %v5612_v56 }
0x2f7a   : > { %v5774_v59 = vpop.xlane.xlu0 %5773 }
0x2f7b   : > { %10056 = vpow2.f32 %v5613_v58  ;;  %v5775_v60 = vsub.f32 %v5771_v43, %v5774_v59  ;;  %v7879_v43 = vld [vmem:[%s10270_s12 + $0xe0] sm:$0xff]  ;;  %v7908_v59 = vld [vmem:[%s11749_s3 + $0xa8] sm:$0xff] }
0x2f7c   : > { %v9737_v46 = vpack.c.bf16 %v7880_v45, %v7879_v43  ;;  %v7907_v58 = vld [vmem:[%s11749_s3 + $0xa0] sm:$0xff] }
0x2f7d   : > { %v5776_v32 = vmul.f32 1.442695, %v5775_v60 }
0x2f7e   : > { %v5937_v35 = vpop.xlane.xlu1 %5936 }
0x2f7f   : > { %10058 = vpow2.f32 %v5776_v32  ;;  %v5938_v61 = vsub.f32 %v5934_v49, %v5937_v35  ;;  %v9740_v49 = vpack.c.bf16 %v7882_v48, %v7881_v47  ;;  %v9749_v35 = vpack.c.bf16 %v7908_v59, %v7907_v58 }
0x2f81   : > { %v5939_v62 = vmul.f32 1.442695, %v5938_v61  ;;  %v7909_v61 = vld [vmem:[%s11749_s3 + $0xb0] sm:$0xff] }
0x2f83   : > { %10060 = vpow2.f32 %v5939_v62  ;;  %v7910_v62 = vld [vmem:[%s11749_s3 + $0xb8] sm:$0xff] }
0x2f85   : > { %v10057_v63 = vpop.eup %10056 }
0x2f86   : > { %v5615_v0 = vsel %vm1190_vm3, %v10057_v63, 0.0 }
0x2f87   : > { %5616 = vadd.xlane.f32.xlu1 %v5615_v0 }
0x2f89   : > { %v10059_v1 = vpop.eup %10058 }
0x2f8a   : > { %v5778_v4 = vsel %vm1190_vm3, %v10059_v1, 0.0 }
0x2f8b   : > { %5779 = vadd.xlane.f32.xlu0 %v5778_v4  ;;  %v7911_v4 = vld [vmem:[%s11749_s3 + $0xc0] sm:$0xff] }
0x2f8d   : > { %v10061_v5 = vpop.eup %10060 }
0x2f8e   : > { %v5941_v44 = vsel %vm1190_vm3, %v10061_v5, 0.0 }
0x2f8f   : > { %5942 = vadd.xlane.f32.xlu1 %v5941_v44 }
0x2fa2   : > { %v5455_v8 = vpop.xlane.xlu0 %5454 }
0x2fa3   : > { %10062 = vrcp.f32 %v5455_v8  ;;  %v7913_v8 = vld [vmem:[%s11749_s3 + $0xd0] sm:$0xff] }
0x2fad   : > { %v10063_v9 = vpop.eup %10062 }
0x2fae   : > { %v5457_v10 = vmul.f32 %v10063_v9, %v10055_v54  ;;  %v7906_v54 = vld [vmem:[%s11749_s3 + $0x98] sm:$0xff] }
0x2faf   : > { %v9746_v56 = vpack.c.bf16 %v7906_v54, %v7905_v52  ;;  %v7914_v9 = vld [vmem:[%s11749_s3 + $0xd8] sm:$0xff] }
0x2fb0   : > { %7887 = vst.msk [vmem:[%s10939_s23 + $0x20] sm:$0xff] %vm1190_vm3, %v5457_v10  ;;  %9039 = vmatmul.mubr.msk.f32.vlgmr.msra.gmra.mrb[62].mxu1 %vm1190_vm3, %v5457_v10  ;;  %v9758_v10 = vpack.c.bf16 %v7914_v9, %v7913_v8 }
0x2fb1   : > { %9047 = vmatpush3.msra.mxu1 %v11284_v22  ;;  %9048 = vmatprep.mubr.msk.f32.mxu1 %vm10186_vm0, %v10187_v6  ;;  %v7870_v22 = vld [vmem:[%s10270_s12 + $0x98] sm:$0xff] }
0x2fb2   : > { %9056 = vmatprep.subr.mxu1 %v10187_v6 }
0x3014   : > { %v5617_v29 = vpop.xlane.xlu1 %5616 }
0x3015   : > { %10064 = vrcp.f32 %v5617_v29  ;;  %v7915_v29 = vld [vmem:[%s11749_s3 + $0xe0] sm:$0xff] }
0x3018   : > { %v5780_v57 = vpop.xlane.xlu0 %5779 }
0x3019   : > { %10066 = vrcp.f32 %v5780_v57  ;;  %v7916_v57 = vld [vmem:[%s11749_s3 + $0xe8] sm:$0xff] }
0x301c   : > { %v5943_v34 = vpop.xlane.xlu1 %5942 }
0x301d   : > { %10068 = vrcp.f32 %v5943_v34  ;;  %v9761_v34 = vpack.c.bf16 %v7916_v57, %v7915_v29 }
0x301f   : > { %v10065_v11 = vpop.eup %10064 }
0x3020   : > { %v5619_v12 = vmul.f32 %v10065_v11, %v10057_v63  ;;  %v7917_v11 = vld [vmem:[%s11749_s3 + $0xf0] sm:$0xff] }
0x3022   : > { %7891 = vst.msk [vmem:[%s10939_s23 + $0x28] sm:$0xff] %vm1190_vm3, %v5619_v12  ;;  %9049 = vmatmul.mubr.msk.f32.vlgmr.msra.gmra.mrb[64].mxu1 %vm1190_vm3, %v5619_v12  ;;  %v7918_v12 = vld [vmem:[%s11749_s3 + $0xf8] sm:$0xff] }
0x3023   : > { %v10067_v13 = vpop.eup %10066  ;;  %9057 = vmatpush3.msra.mxu1 %v11289_v37  ;;  %9058 = vmatprep.mubr.msk.f32.mxu1 %vm10186_vm0, %v10187_v6  ;;  %v9722_v37 = vpack.c.bf16 %v7870_v22, %v7869_v21 }
0x3024   : > { %v5782_v15 = vmul.f32 %v10067_v13, %v10059_v1  ;;  %9066 = vmatprep.subr.mxu1 %v10187_v6  ;;  %v9752_v1 = vpack.c.bf16 %v7910_v62, %v7909_v61  ;;  %v9764_v13 = vpack.c.bf16 %v7918_v12, %v7917_v11 }
0x3025   : > { %9723 = vmatpush3.bf16.msra.mxu0 %v9722_v37 }
0x3026   : > { %7895 = vst.msk [vmem:[%s10939_s23 + $0x30] sm:$0xff] %vm1190_vm3, %v5782_v15  ;;  %9059 = vmatmul.mubr.msk.f32.vlgmr.msra.gmra.mrb[66].mxu1 %vm1190_vm3, %v5782_v15  ;;  %9724 = vmatprep.subr.bf16.mxu0 %v10185_v3 }
0x3027   : > { %v10069_v16 = vpop.eup %10068  ;;  %9067 = vmatpush3.msra.mxu1 %v11298_v24  ;;  %9068 = vmatprep.mubr.msk.f32.mxu1 %vm10186_vm0, %v10187_v6  ;;  %v7871_v24 = vld [vmem:[%s10270_s12 + $0xa0] sm:$0xff] }
0x3028   : > { %v5945_v17 = vmul.f32 %v10069_v16, %v10061_v5  ;;  %9742 = vmatprep.subr.bf16.mxu1 %v10185_v3  ;;  %v9725_v30 = vpack.c.bf16 %v7872_v25, %v7871_v24  ;;  %v7912_v5 = vld [vmem:[%s11749_s3 + $0xc8] sm:$0xff] }
0x3029   : > { %v9755_v44 = vpack.c.bf16 %v7912_v5, %v7911_v4 }
0x302a   : > { %7899 = vst.msk [vmem:[%s10939_s23 + $0x38] sm:$0xff] %vm1190_vm3, %v5945_v17  ;;  %9069 = vmatmul.mubr.msk.f32.vlgmr.msra.gmra.mrb[68].mxu1 %vm1190_vm3, %v5945_v17  ;;  %9726 = vmatpush3.bf16.msra.mxu0 %v9725_v30  ;;  %s8024_s23 = sshll.u32 %s10368_s0, 7  ;;  %s10191_s0 = smov [#allocation2]  }
0x302b   : > { %9138 = vmatprep.mubr.msk.f32.mxu1 %vm10186_vm0, %v10187_v6  ;;  %9727 = vmatprep.subr.bf16.mxu0 %v10185_v3 }
0x302c   : > { %9744 = vmatpush3.bf16.msra.mxu1 %v9743_v26 }
0x302d   : > { %9745 = vmatprep.subr.bf16.mxu1 %v10185_v3 }
0x302e   : > { %9729 = vmatpush3.bf16.msra.mxu0 %v9728_v36 }
0x302f   : > { %9730 = vmatprep.subr.bf16.mxu0 %v10185_v3 }
0x3030   : > { %9747 = vmatpush3.bf16.msra.mxu1 %v9746_v56 }
0x3031   : > { %9748 = vmatprep.subr.bf16.mxu1 %v10185_v3 }
0x3032   : > { %9732 = vmatpush3.bf16.msra.mxu0 %v9731_v7  ;;  %v7902_v7 = vld [vmem:[%s11751_s9 + $0x1] ss:$0 sm:$0xff] }
0x3033   : > { %9733 = vmatprep.subr.bf16.mxu0 %v10185_v3 }
0x3034   : > { %9750 = vmatpush3.bf16.msra.mxu1 %v9749_v35 }
0x3035   : > { %9751 = vmatprep.subr.bf16.mxu1 %v10185_v3 }
0x3036   : > { %9735 = vmatpush3.bf16.msra.mxu0 %v9734_v42 }
0x3037   : > { %9736 = vmatprep.subr.bf16.mxu0 %v10185_v3 }
0x3038   : > { %9753 = vmatpush3.bf16.msra.mxu1 %v9752_v1 }
0x3039   : > { %9754 = vmatprep.subr.bf16.mxu1 %v10185_v3 }
0x303a   : > { %9738 = vmatpush3.bf16.msra.mxu0 %v9737_v46 }
0x303b   : > { %9739 = vmatprep.subr.bf16.mxu0 %v10185_v3 }
0x303c   : > { %9756 = vmatpush3.bf16.msra.mxu1 %v9755_v44 }
0x303d   : > { %9757 = vmatprep.subr.bf16.mxu1 %v10185_v3 }
0x303e   : > { %9741 = vmatpush3.bf16.msra.mxu0 %v9740_v49 }
0x303f   : > { %9766 = vmatprep.subr.bf16.mxu0 %v10185_v3 }
0x3040   : > { %9759 = vmatpush3.bf16.msra.mxu1 %v9758_v10 }
0x3041   : > { %9760 = vmatprep.subr.bf16.mxu1 %v10185_v3 }
0x3044   : > { %9762 = vmatpush3.bf16.msra.mxu1 %v9761_v34 }
0x3045   : > { %9763 = vmatprep.subr.bf16.mxu1 %v10185_v3 }
0x3048   : > { %9765 = vmatpush3.bf16.msra.mxu1 %v9764_v13 }
0x3049   : > { %9176 = vmatprep.subr.mxu1 %v10187_v6 }
0x3083   : > { %v11360_v27 = vpop.f32.mrb[62].mxu1 }
0x3084   : > { %v9040_v28 = vpop.f32.mrb[63].mxu1 }
0x30f5   : > { %v5692_v23 = vpop.f32.mrb[64].mxu1 }
0x30f6   : > { %6023 = vrot.lane.b32.xlu0 %v5692_v23, %s11746_s13  ;;  %v9050_v55 = vpop.f32.mrb[65].mxu1 }
0x30f9   : > { %v5855_v60 = vpop.f32.mrb[66].mxu1 }
0x30fa   : > { %6027 = vrot.lane.b32.xlu1 %v5855_v60, %s11744_s5  ;;  %v9060_v32 = vpop.f32.mrb[67].mxu1 }
0x30fd   : > { %v6018_v63 = vpop.f32.mrb[68].mxu1 }
0x30fe   : > { %6031 = vrot.lane.b32.xlu1 %v6018_v63, %s11745_s2  ;;  %v9070_v0 = vpop.f32.mrb[69].mxu1 }
0x3168   : > { %v6024_v15 = vpop.permute.xlu0 %6023 }
0x3169   : > { %v6034_v17 = vsel %vm1114_vm1, %v11360_v27, %v6024_v15 }
0x316c   : > { %v6028_v16 = vpop.permute.xlu1 %6027 }
0x316d   : > { %v6035_v18 = vsel %vm1778_vm4, %v6034_v17, %v6028_v16 }
0x3170   : > { %v6032_v19 = vpop.permute.xlu1 %6031 }
0x3171   : > { %v6036_v21 = vsel %vm1780_vm5, %v6035_v18, %v6032_v19 }
0x3172   : > { %9104 = vmatmul.mubr.f32.vlgmr.msra.gmra.mrb[42].mxu0 %v6036_v21 }
0x3173   : > { %9768 = vmatpush3.bf16.msra.mxu0 %v9743_v26  ;;  %9173 = vmatprep.mubr.msk.f32.mxu0 %vm10186_vm0, %v10187_v6 }
0x3174   : > { %9769 = vmatprep.subr.bf16.mxu0 %v10185_v3 }
0x3177   : > { %9771 = vmatpush3.bf16.msra.mxu0 %v9746_v56 }
0x3178   : > { %9772 = vmatprep.subr.bf16.mxu0 %v10185_v3 }
0x317b   : > { %9774 = vmatpush3.bf16.msra.mxu0 %v9749_v35 }
0x317c   : > { %9775 = vmatprep.subr.bf16.mxu0 %v10185_v3 }
0x317f   : > { %9777 = vmatpush3.bf16.msra.mxu0 %v9752_v1 }
0x3180   : > { %9778 = vmatprep.subr.bf16.mxu0 %v10185_v3 }
0x3183   : > { %9780 = vmatpush3.bf16.msra.mxu0 %v9755_v44 }
0x3184   : > { %9781 = vmatprep.subr.bf16.mxu0 %v10185_v3 }
0x3187   : > { %9783 = vmatpush3.bf16.msra.mxu0 %v9758_v10 }
0x3188   : > { %9784 = vmatprep.subr.bf16.mxu0 %v10185_v3 }
0x318b   : > { %9786 = vmatpush3.bf16.msra.mxu0 %v9761_v34 }
0x318c   : > { %9787 = vmatprep.subr.bf16.mxu0 %v10185_v3 }
0x318f   : > { %9789 = vmatpush3.bf16.msra.mxu0 %v9764_v13 }
0x3190   : > { %9790 = vmatprep.subr.bf16.mxu0 %v10185_v3 }
0x3192   : > { %9174 = vmatmul.mubr.f32.vlgmr.msra.gmra.mrb[44].mxu0 %v11036_v53 }
0x3193   : > { %9248 = vmatprep.mubr.msk.f32.mxu0 %vm10186_vm0, %v10187_v6 }
0x3245   : > { %v6103_v14 = vpop.f32.mrb[42].mxu0 }
0x3246   : > { %v6104_v22 = vadd.f32 %v6103_v14, %v11270_v20  ;;  %v9105_v37 = vpop.f32.mrb[43].mxu0 }
0x3248   : > { %6107 = vadd.xlane.f32.xlu0 %v6104_v22 }
0x3265   : > { %v11424_v24 = vpop.f32.mrb[44].mxu0 }
0x3266   : > { %v9175_v25 = vpop.f32.mrb[45].mxu0 }
0x32d5   : > { %v6108_v27 = vpop.xlane.xlu0 %6107 }
0x32d6   : > { %v6109_v28 = vmul.f32 0.0078125, %v6108_v27 }
0x32d8   : > { %v6110_v30 = vsub.f32 %v6104_v22, %v6109_v28 }
0x32da   : > { %v6111_v31 = vmul.f32 %v6110_v30, %v6110_v30 }
0x32dc   : > { %6112 = vadd.xlane.f32.xlu1 %v6111_v31 }
0x32ed   : > { %6476 = vrot.lane.b32.xlu1 %v11424_v24, %s11745_s2 }
0x3369   : > { %v6113_v53 = vpop.xlane.xlu1 %6112 }
0x336a   : > { %v6114_v33 = vmul.f32 0.0078125, %v6113_v53 }
0x336c   : > { %v6115_v36 = vadd.f32 1e-05, %v6114_v33 }
0x336d   : > { %v6477_v58 = vpop.permute.xlu1 %6476 }
0x336e   : > { %10070 = vrsqrt.f32 %v6115_v36 }
0x3378   : > { %v10071_v20 = vpop.eup %10070 }
0x3379   : > { %v6117_v39 = vmul.f32 %v10071_v20, %v6110_v30 }
0x337b   : > { %v6124_v40 = vmul.f32 %v7901_v38, %v6117_v39 }
0x337d   : > { %v11430_v41 = vadd.f32 %v7902_v7, %v6124_v40 }
0x337f   : > { %9139 = vmatmul.mubr.f32.vlgmr.msra.gmra.mrb[70].mxu1 %v11430_v41 }
0x3380   : > { %9177 = vmatpush3.xpose.msk.msra.mxu1 %vm1114_vm1, %v11424_v24  ;;  %9178 = vmatprep.mubr.msk.f32.mxu1 %vm10186_vm0, %v10187_v6 }
0x3381   : > { %9181 = vmatprep.subr.mxu1 %v10187_v6 }
0x3452   : > { %v11438_v42 = vpop.f32.mrb[70].mxu1 }
0x3453   : > { %v9140_v43 = vpop.f32.mrb[71].mxu1  ;;  %9179 = vmatmul.mubr.msk.f32.vlgmr.msra.gmra.mrb[72].mxu1 %vm1114_vm1, %v11438_v42 }
0x3454   : > { %9182 = vmatpush3.msra.mxu1 %v11424_v24  ;;  %9183 = vmatprep.mubr.msk.f32.mxu1 %vm10186_vm0, %v10187_v6 }
0x3455   : > { %9186 = vmatprep.subr.mxu1 %v10187_v6 }
0x3526   : > { %v6382_v45 = vpop.f32.mrb[72].mxu1 }
0x3527   : > { %v6386_v46 = vmul.f32 0.17677669, %v6382_v45  ;;  %v9180_v47 = vpop.f32.mrb[73].mxu1 }
0x3529   : > { %v6387_v48 = vsel %vm1008_vm7, -1e+09, %v6386_v46 }
0x352a   : > { %v6388_v49 = vsel %vm1190_vm3, %v6387_v48, -inf }
0x352b   : > { %6389 = vmax.xlane.f32.xlu0 %v6388_v49  ;;  %v7920_v49 = vld [vmem:[%s11754_s14 + $0x88] sm:$0xff] }
0x35b8   : > { %v6390_v50 = vpop.xlane.xlu0 %6389 }
0x35b9   : > { %v6391_v51 = vsub.f32 %v6387_v48, %v6390_v50  ;;  %v7919_v48 = vld [vmem:[%s11754_s14 + $0x80] sm:$0xff]  ;;  %v7921_v50 = vld [vmem:[%s11754_s14 + $0x90] sm:$0xff] }
0x35bb   : > { %v6392_v26 = vmul.f32 1.442695, %v6391_v51  ;;  %v9791_v51 = vpack.c.bf16 %v7920_v49, %v7919_v48  ;;  %v7972_v49 = vld [vmem:[%s11755_s16 + $0x188] sm:$0xff] }
0x35bd   : > { %10072 = vpow2.f32 %v6392_v26  ;;  %v7922_v26 = vld [vmem:[%s11754_s14 + $0x98] sm:$0xff]  ;;  %9792 = vmatpush3.bf16.msra.mxu0 %v9791_v51  ;;  %v7971_v51 = vld [vmem:[%s11755_s16 + $0x180] sm:$0xff] }
0x35be   : > { %9793 = vmatprep.subr.bf16.mxu0 %v10185_v3 }
0x35c7   : > { %v10073_v52 = vpop.eup %10072 }
0x35c8   : > { %v6394_v54 = vsel %vm1190_vm3, %v10073_v52, 0.0 }
0x35c9   : > { %6395 = vadd.xlane.f32.xlu0 %v6394_v54  ;;  %v7923_v54 = vld [vmem:[%s11754_s14 + $0xa0] sm:$0xff] }
0x35df   : > { %6474 = vrot.lane.b32.xlu0 %v11438_v42, %s11745_s2 }
0x3656   : > { %v6396_v23 = vpop.xlane.xlu0 %6395 }
0x3657   : > { %10074 = vrcp.f32 %v6396_v23  ;;  %v7924_v23 = vld [vmem:[%s11754_s14 + $0xa8] sm:$0xff] }
0x365a   : > { %v6475_v59 = vpop.permute.xlu0 %6474 }
0x3661   : > { %v10075_v55 = vpop.eup %10074 }
0x3662   : > { %v6398_v56 = vmul.f32 %v10075_v55, %v10073_v52  ;;  %v9794_v52 = vpack.c.bf16 %v7922_v26, %v7921_v50  ;;  %v9797_v55 = vpack.c.bf16 %v7924_v23, %v7923_v54  ;;  %v7974_v50 = vld [vmem:[%s11755_s16 + $0x198] sm:$0xff]  ;;  %v7976_v54 = vld [vmem:[%s11755_s16 + $0x1a8] sm:$0xff] }
0x3663   : > { %v9830_v26 = vpack.c.bf16 %v7974_v50, %v7972_v49  ;;  %v7978_v23 = vld [vmem:[%s11755_s16 + $0x1b8] sm:$0xff] }
0x3664   : > { %7939 = vst.msk [vmem:[%s11076_s17 + $0x20] sm:$0xff] %vm1190_vm3, %v6398_v56  ;;  %9184 = vmatmul.mubr.msk.f32.vlgmr.msra.gmra.mrb[74].mxu1 %vm1190_vm3, %v6398_v56  ;;  %9795 = vmatpush3.bf16.msra.mxu0 %v9794_v52  ;;  %v7925_v56 = vld [vmem:[%s11754_s14 + $0xb0] sm:$0xff] }
0x3665   : > { %9187 = vmatpush3.xpose.msk.msra.mxu1 %vm1114_vm1, %v6477_v58  ;;  %9188 = vmatprep.mubr.msk.f32.mxu1 %vm10186_vm0, %v10187_v6  ;;  %v7973_v52 = vld [vmem:[%s11755_s16 + $0x190] sm:$0xff] }
0x3666   : > { %9191 = vmatprep.subr.mxu1 %v10187_v6  ;;  %9796 = vmatprep.subr.bf16.mxu0 %v10185_v3 }
0x3668   : > { %9189 = vmatmul.mubr.msk.f32.vlgmr.msra.gmra.mrb[76].mxu1 %vm1114_vm1, %v6475_v59  ;;  %9798 = vmatpush3.bf16.msra.mxu0 %v9797_v55  ;;  %v9832_v55 = vpack.c.bf16 %v7973_v52, %v7971_v51  ;;  %v7999_v51 = vld [vmem:[%s11756_s22 + $0x160] sm:$0xff] }
0x3669   : > { %9192 = vmatpush3.msra.mxu1 %v6477_v58  ;;  %9193 = vmatprep.mubr.msk.f32.mxu1 %vm10186_vm0, %v10187_v6  ;;  %v7926_v58 = vld [vmem:[%s11754_s14 + $0xb8] sm:$0xff] }
0x366a   : > { %9196 = vmatprep.subr.mxu1 %v10187_v6  ;;  %v9800_v59 = vpack.c.bf16 %v7926_v58, %v7925_v56  ;;  %9799 = vmatprep.subr.bf16.mxu0 %v10185_v3  ;;  %v9834_v56 = vpack.c.bf16 %v7978_v23, %v7976_v54  ;;  %v7975_v58 = vld [vmem:[%s11755_s16 + $0x1a0] sm:$0xff] }
0x366c   : > { %9801 = vmatpush3.bf16.msra.mxu0 %v9800_v59  ;;  %v7977_v59 = vld [vmem:[%s11755_s16 + $0x1b0] sm:$0xff] }
0x366d   : > { %9802 = vmatprep.subr.bf16.mxu0 %v10185_v3 }
0x3737   : > { %v11463_v60 = vpop.f32.mrb[74].mxu1 }
0x3738   : > { %v9185_v32 = vpop.f32.mrb[75].mxu1 }
0x3739   : > { %v7927_v32 = vld [vmem:[%s11754_s14 + $0xc0] sm:$0xff] }
0x373b   : > { %v6548_v35 = vpop.f32.mrb[76].mxu1 }
0x373c   : > { %v6552_v61 = vmul.f32 0.17677669, %v6548_v35  ;;  %v9190_v62 = vpop.f32.mrb[77].mxu1  ;;  %v7928_v35 = vld [vmem:[%s11754_s14 + $0xc8] sm:$0xff] }
0x373d   : > { %v7929_v62 = vld [vmem:[%s11754_s14 + $0xd0] sm:$0xff] }
0x373e   : > { %v6553_v63 = vsel %vm1008_vm7, -1e+09, %v6552_v61  ;;  %v9803_v61 = vpack.c.bf16 %v7928_v35, %v7927_v32  ;;  %v7980_v32 = vld [vmem:[%s11755_s16 + $0x1c8] sm:$0xff]  ;;  %v7982_v35 = vld [vmem:[%s11755_s16 + $0x1d8] sm:$0xff] }
0x373f   : > { %v6554_v0 = vsel %vm1190_vm3, %v6553_v63, -inf }
0x3740   : > { %6555 = vmax.xlane.f32.xlu1 %v6554_v0  ;;  %9804 = vmatpush3.bf16.msra.mxu0 %v9803_v61  ;;  %v9836_v61 = vpack.c.bf16 %v7977_v59, %v7975_v58  ;;  %v7953_v58 = vld [vmem:[%s11757_s4 + $0x1] ss:$0 sm:$0xff]  ;;  %s11643_s4 = scalar_lea.hbm %s10330_s21, %s8024_s23 }
0x3741   : > { %9805 = vmatprep.subr.bf16.mxu0 %v10185_v3 }
0x3751   : > { %6643 = vrot.lane.b32.xlu1 %v11424_v24, %s11744_s5 }
0x37cd   : > { %v6556_v1 = vpop.xlane.xlu1 %6555 }
0x37ce   : > { %v6557_v4 = vsub.f32 %v6553_v63, %v6556_v1  ;;  %v7930_v63 = vld [vmem:[%s11754_s14 + $0xd8] sm:$0xff]  ;;  %v7931_v1 = vld [vmem:[%s11754_s14 + $0xe0] sm:$0xff] }
0x37cf   : > { %v9806_v0 = vpack.c.bf16 %v7930_v63, %v7929_v62  ;;  %v9838_v62 = vpack.c.bf16 %v7982_v35, %v7980_v32  ;;  %v7979_v63 = vld [vmem:[%s11755_s16 + $0x1c0] sm:$0xff] }
0x37d0   : > { %v6558_v5 = vmul.f32 1.442695, %v6557_v4  ;;  %v7932_v4 = vld [vmem:[%s11754_s14 + $0xe8] sm:$0xff]  ;;  %v7954_v32 = vld [vmem:[%s11758_s19 + $0x1] ss:$0 sm:$0xff] }
0x37d1   : > { %v6644_v57 = vpop.permute.xlu1 %6643  ;;  %9807 = vmatpush3.bf16.msra.mxu0 %v9806_v0  ;;  %v7981_v0 = vld [vmem:[%s11755_s16 + $0x1d0] sm:$0xff] }
0x37d2   : > { %10076 = vpow2.f32 %v6558_v5  ;;  %v9809_v5 = vpack.c.bf16 %v7932_v4, %v7931_v1  ;;  %9808 = vmatprep.subr.bf16.mxu0 %v10185_v3  ;;  %v7984_v1 = vld [vmem:[%s11755_s16 + $0x1e8] sm:$0xff]  ;;  %v7986_v4 = vld [vmem:[%s11755_s16 + $0x1f8] sm:$0xff] }
0x37d5   : > { %9810 = vmatpush3.bf16.msra.mxu0 %v9809_v5  ;;  %v9840_v5 = vpack.c.bf16 %v7981_v0, %v7979_v63  ;;  %v8018_v63 = vld [vmem:[%s11756_s22 + $0x1f8] sm:$0xff] }
0x37d6   : > { %9811 = vmatprep.subr.bf16.mxu0 %v10185_v3 }
0x37dc   : > { %v10077_v44 = vpop.eup %10076 }
0x37dd   : > { %v6560_v8 = vsel %vm1190_vm3, %v10077_v44, 0.0 }
0x37de   : > { %6561 = vadd.xlane.f32.xlu0 %v6560_v8  ;;  %v7934_v8 = vld [vmem:[%s11754_s14 + $0xf8] sm:$0xff] }
0x37f4   : > { %6641 = vrot.lane.b32.xlu0 %v11438_v42, %s11744_s5 }
0x386b   : > { %v6562_v9 = vpop.xlane.xlu0 %6561 }
0x386c   : > { %10078 = vrcp.f32 %v6562_v9 }
0x386f   : > { %v6642_v34 = vpop.permute.xlu0 %6641 }
0x3876   : > { %v10079_v10 = vpop.eup %10078 }
0x3877   : > { %v6564_v29 = vmul.f32 %v10079_v10, %v10077_v44  ;;  %v7933_v44 = vld [vmem:[%s11754_s14 + $0xf0] sm:$0xff] }
0x3878   : > { %v9812_v9 = vpack.c.bf16 %v7934_v8, %v7933_v44  ;;  %v9842_v44 = vpack.c.bf16 %v7986_v4, %v7984_v1  ;;  %v7983_v8 = vld [vmem:[%s11755_s16 + $0x1e0] sm:$0xff]  ;;  %v8001_v1 = vld [vmem:[%s11756_s22 + $0x170] sm:$0xff]  ;;  %v8002_v4 = vld [vmem:[%s11756_s22 + $0x178] sm:$0xff] }
0x3879   : > { %7943 = vst.msk [vmem:[%s11076_s17 + $0x28] sm:$0xff] %vm1190_vm3, %v6564_v29  ;;  %9194 = vmatmul.mubr.msk.f32.vlgmr.msra.gmra.mrb[78].mxu1 %vm1190_vm3, %v6564_v29 }
0x387a   : > { %9197 = vmatpush3.xpose.msk.msra.mxu1 %vm1114_vm1, %v6644_v57  ;;  %9198 = vmatprep.mubr.msk.f32.mxu1 %vm10186_vm0, %v10187_v6 }
0x387b   : > { %9201 = vmatprep.subr.mxu1 %v10187_v6  ;;  %9813 = vmatpush3.bf16.msra.mxu0 %v9812_v9  ;;  %v7985_v9 = vld [vmem:[%s11755_s16 + $0x1f0] sm:$0xff] }
0x387d   : > { %9199 = vmatmul.mubr.msk.f32.vlgmr.msra.gmra.mrb[80].mxu1 %vm1114_vm1, %v6642_v34 }
0x387e   : > { %9202 = vmatpush3.msra.mxu1 %v6644_v57  ;;  %9203 = vmatprep.mubr.msk.f32.mxu1 %vm10186_vm0, %v10187_v6 }
0x387f   : > { %9206 = vmatprep.subr.mxu1 %v10187_v6 }
0x394c   : > { %v6637_v11 = vpop.f32.mrb[78].mxu1 }
0x394d   : > { %v9195_v12 = vpop.f32.mrb[79].mxu1 }
0x3950   : > { %v6715_v13 = vpop.f32.mrb[80].mxu1 }
0x3951   : > { %v6719_v15 = vmul.f32 0.17677669, %v6715_v13  ;;  %v9200_v16 = vpop.f32.mrb[81].mxu1 }
0x3953   : > { %v6720_v17 = vsel %vm1008_vm7, -1e+09, %v6719_v15 }
0x3954   : > { %v6721_v18 = vsel %vm1190_vm3, %v6720_v17, -inf }
0x3955   : > { %6722 = vmax.xlane.f32.xlu1 %v6721_v18 }
0x3966   : > { %6810 = vrot.lane.b32.xlu1 %v11424_v24, %s11746_s13 }
0x39e2   : > { %v6723_v19 = vpop.xlane.xlu1 %6722 }
0x39e3   : > { %v6724_v21 = vsub.f32 %v6720_v17, %v6723_v19  ;;  %v7956_v19 = vld [vmem:[%s11755_s16 + $0x108] sm:$0xff] }
0x39e5   : > { %v6725_v14 = vmul.f32 1.442695, %v6724_v21  ;;  %v7958_v21 = vld [vmem:[%s11755_s16 + $0x118] sm:$0xff] }
0x39e6   : > { %v6811_v30 = vpop.permute.xlu1 %6810 }
0x39e7   : > { %10080 = vpow2.f32 %v6725_v14  ;;  %v7955_v14 = vld [vmem:[%s11755_s16 + $0x100] sm:$0xff] }
0x39f1   : > { %v10081_v22 = vpop.eup %10080 }
0x39f2   : > { %v6727_v37 = vsel %vm1190_vm3, %v10081_v22, 0.0 }
0x39f3   : > { %6728 = vadd.xlane.f32.xlu0 %v6727_v37  ;;  %v7960_v37 = vld [vmem:[%s11755_s16 + $0x128] sm:$0xff] }
0x3a09   : > { %6808 = vrot.lane.b32.xlu0 %v11438_v42, %s11746_s13 }
0x3a80   : > { %v6729_v25 = vpop.xlane.xlu0 %6728 }
0x3a81   : > { %10082 = vrcp.f32 %v6729_v25  ;;  %v7962_v25 = vld [vmem:[%s11755_s16 + $0x138] sm:$0xff] }
0x3a84   : > { %v6809_v24 = vpop.permute.xlu0 %6808 }
0x3a8b   : > { %v10083_v27 = vpop.eup %10082 }
0x3a8c   : > { %v6731_v28 = vmul.f32 %v10083_v27, %v10081_v22  ;;  %v7957_v22 = vld [vmem:[%s11755_s16 + $0x110] sm:$0xff] }
0x3a8d   : > { %v9816_v27 = vpack.c.bf16 %v7957_v22, %v7955_v14  ;;  %v8008_v14 = vld [vmem:[%s11756_s22 + $0x1a8] sm:$0xff] }
0x3a8e   : > { %7947 = vst.msk [vmem:[%s11076_s17 + $0x30] sm:$0xff] %vm1190_vm3, %v6731_v28  ;;  %9204 = vmatmul.mubr.msk.f32.vlgmr.msra.gmra.mrb[82].mxu1 %vm1190_vm3, %v6731_v28  ;;  %v9818_v28 = vpack.c.bf16 %v7962_v25, %v7960_v37  ;;  %v7991_v37 = vld [vmem:[%s11756_s22 + $0x120] sm:$0xff]  ;;  %v7992_v25 = vld [vmem:[%s11756_s22 + $0x128] sm:$0xff] }
0x3a8f   : > { %9207 = vmatpush3.xpose.msk.msra.mxu1 %vm1114_vm1, %v6811_v30  ;;  %9208 = vmatprep.mubr.msk.f32.mxu1 %vm10186_vm0, %v10187_v6 }
0x3a90   : > { %9211 = vmatprep.subr.mxu1 %v10187_v6 }
0x3a92   : > { %9209 = vmatmul.mubr.msk.f32.vlgmr.msra.gmra.mrb[84].mxu1 %vm1114_vm1, %v6809_v24  ;;  %v7961_v24 = vld [vmem:[%s11755_s16 + $0x130] sm:$0xff] }
0x3a93   : > { %9212 = vmatpush3.msra.mxu1 %v6811_v30  ;;  %9213 = vmatprep.mubr.msk.f32.mxu1 %vm10186_vm0, %v10187_v6  ;;  %v7959_v30 = vld [vmem:[%s11755_s16 + $0x120] sm:$0xff] }
0x3b61   : > { %v6804_v31 = vpop.f32.mrb[82].mxu1 }
0x3b62   : > { %v9205_v53 = vpop.f32.mrb[83].mxu1 }
0x3b63   : > { %v7966_v53 = vld [vmem:[%s11755_s16 + $0x158] sm:$0xff] }
0x3b65   : > { %v6882_v33 = vpop.f32.mrb[84].mxu1 }
0x3b66   : > { %v6886_v36 = vmul.f32 0.17677669, %v6882_v33  ;;  %v9210_v20 = vpop.f32.mrb[85].mxu1 }
0x3b67   : > { %v7965_v20 = vld [vmem:[%s11755_s16 + $0x150] sm:$0xff] }
0x3b68   : > { %v6887_v38 = vsel %vm1008_vm7, -1e+09, %v6886_v36  ;;  %v7963_v36 = vld [vmem:[%s11755_s16 + $0x140] sm:$0xff] }
0x3b69   : > { %v6888_v39 = vsel %vm1190_vm3, %v6887_v38, -inf }
0x3b6a   : > { %6889 = vmax.xlane.f32.xlu1 %v6888_v39 }
0x3b7b   : > { %6976 = vrot.lane.b32.xlu1 %v6637_v11, %s11746_s13  ;;  %s944_s13 = sand.u32 1, %s10146_s10  }
0x3bf7   : > { %v6890_v7 = vpop.xlane.xlu1 %6889 }
0x3bf8   : > { %v6891_v40 = vsub.f32 %v6887_v38, %v6890_v7  ;;  %v9824_v38 = vpack.c.bf16 %v7965_v20, %v7963_v36 }
0x3bfa   : > { %v6892_v42 = vmul.f32 1.442695, %v6891_v40 }
0x3bfb   : > { %v6977_v57 = vpop.permute.xlu1 %6976 }
0x3bfc   : > { %10084 = vpow2.f32 %v6892_v42  ;;  %v6987_v11 = vsel %vm1114_vm1, %v11463_v60, %v6977_v57  ;;  %v9814_v60 = vpack.c.bf16 %v7958_v21, %v7956_v19  ;;  %v8004_v57 = vld [vmem:[%s11756_s22 + $0x188] sm:$0xff]  ;;  %v7990_v19 = vld [vmem:[%s11756_s22 + $0x118] sm:$0xff]  ;;  %v8007_v21 = vld [vmem:[%s11756_s22 + $0x1a0] sm:$0xff] }
0x3bfd   : > { %v9854_v22 = vpack.c.bf16 %v8008_v14, %v8007_v21 }
0x3bfe   : > { %9815 = vmatprep.subr.bf16.mxu1 %v9814_v60 }
0x3c06   : > { %v10085_v43 = vpop.eup %10084 }
0x3c07   : > { %v6894_v45 = vsel %vm1190_vm3, %v10085_v43, 0.0 }
0x3c08   : > { %6895 = vadd.xlane.f32.xlu0 %v6894_v45  ;;  %v7970_v45 = vld [vmem:[%s11755_s16 + $0x178] sm:$0xff] }
0x3c1e   : > { %6980 = vrot.lane.b32.xlu0 %v6804_v31, %s11744_s5  ;;  %v7964_v31 = vld [vmem:[%s11755_s16 + $0x148] sm:$0xff]  ;;  %s11761_s5 = sld [smem:[#allocation26_spill]] }
0x3c1f   : > { %v9822_v33 = vpack.c.bf16 %v7966_v53, %v7964_v31  ;;  %v7993_v31 = vld [vmem:[%s11756_s22 + $0x130] sm:$0xff]  ;;  %v7994_v53 = vld [vmem:[%s11756_s22 + $0x138] sm:$0xff] }
0x3c20   : > { %v9860_v36 = vpack.c.bf16 %v7994_v53, %v7993_v31 }
0x3c24   : > { %v7333_v31 = vld [vmem:[%s11761_s5 + $0x50] sm:$0xff]  ;;  %v7334_v53 = vld [vmem:[%s11761_s5 + $0x58] sm:$0xff] }
0x3c95   : > { %v6896_v2 = vpop.xlane.xlu0 %6895 }
0x3c96   : > { %10086 = vrcp.f32 %v6896_v2 }
0x3c99   : > { %v6981_v34 = vpop.permute.xlu0 %6980 }
0x3c9a   : > { %v6988_v12 = vsel %vm1778_vm4, %v6987_v11, %v6981_v34  ;;  %v7987_v34 = vld [vmem:[%s11756_s22 + $0x100] sm:$0xff] }
0x3ca0   : > { %v10087_v46 = vpop.eup %10086 }
0x3ca1   : > { %v6898_v47 = vmul.f32 %v10087_v46, %v10085_v43  ;;  %v7968_v43 = vld [vmem:[%s11755_s16 + $0x168] sm:$0xff]  ;;  %v7967_v46 = vld [vmem:[%s11755_s16 + $0x160] sm:$0xff] }
0x3ca2   : > { %v9826_v2 = vpack.c.bf16 %v7970_v45, %v7968_v43 }
0x3ca3   : > { %7951 = vst.msk [vmem:[%s11076_s17 + $0x38] sm:$0xff] %vm1190_vm3, %v6898_v47  ;;  %9214 = vmatmul.mubr.msk.f32.vlgmr.msra.gmra.mrb[86].mxu1 %vm1190_vm3, %v6898_v47  ;;  %v7969_v47 = vld [vmem:[%s11755_s16 + $0x170] sm:$0xff] }
0x3ca4   : > { %7219 = vmatprep.mubr.f32.mxu1 %v10187_v6  ;;  %9817 = vmatpush1.bf16.msra.mxu1 %v9816_v27  ;;  %v9828_v48 = vpack.c.bf16 %v7969_v47, %v7967_v46  ;;  %v8009_v27 = vld [vmem:[%s11756_s22 + $0x1b0] sm:$0xff]  ;;  %v7998_v46 = vld [vmem:[%s11756_s22 + $0x158] sm:$0xff]  ;;  %v8015_v47 = vld [vmem:[%s11756_s22 + $0x1e0] sm:$0xff] }
0x3ca5   : > { %9819 = vmatprep.subr.bf16.mxu1 %v9818_v28  ;;  %v8010_v28 = vld [vmem:[%s11756_s22 + $0x1b8] sm:$0xff] }
0x3d76   : > { %v6971_v10 = vpop.f32.mrb[86].mxu1 }
0x3d77   : > { %6984 = vrot.lane.b32.xlu1 %v6971_v10, %s11745_s2  ;;  %v9215_v29 = vpop.f32.mrb[87].mxu1  ;;  %v9844_v10 = vpack.c.bf16 %v7985_v9, %v7983_v8  ;;  %s7664_s2 = sshll.u32 %s944_s13, 3 }
0x3d78   : > { %v8003_v29 = vld [vmem:[%s11756_s22 + $0x180] sm:$0xff]  ;;  %s946_s17 = scalar_lea.vmem [#allocation2], %s7664_s2  ;;  %s10096_s2 = sshll.u32 %s10191_s0, 4  ;;  %s10097_s2 = int_to_ptr.vmem [resolvable:$false] %s10096_s2 }
0x3d79   : > { %v9846_v11 = vpack.c.bf16 %v8004_v57, %v8003_v29  ;;  %s7440_s3 = sshll.u32 %s946_s17, 4  ;;  %s10098_s8 = scalar_lea.vmem %s10097_s2, 256  ;;  %s11645_s3 = int_to_ptr.vmem [resolvable:$true] %s7440_s3 }
0x3d7a   : > { %s10092_s6 = scalar_lea.vmem %s11645_s3, 128  ;;  %p10099_p0 = scmp.lt.s32.totalorder %s11645_s3, %s10097_s2 }
0x3d7b   : > { %9847 = vmatprep.subr.bf16.mxu0 %v9846_v11  ;;  %v7324_v11 = vld [vmem:[%s11761_s5 + $0x8] sm:$0xff]  ;;  %p10093_p11 = scmp.ne.s32.totalorder %s11645_s3, %s10092_s6  ;;  %p10100_p1 = scmp.lt.s32.totalorder %s10098_s8, %s10092_s6 }
0x3d7d   : > { %p10094_p12 = pnand %p10093_p11, %p10385_p5  ;;  %p10101_p2 = por %p10100_p1, %p10099_p0 }
0x3d7f   : > { %p10095_p13 = pneg %p10094_p12 }
0x3d81   : > { %p10102_p3 = pnand %p10101_p2, %p10095_p13 }
0x3de9   : > { %v6985_v13 = vpop.permute.xlu1 %6984 }
0x3dea   : > { %v6989_v15 = vsel %vm1780_vm5, %v6988_v12, %v6985_v13  ;;  %v7988_v12 = vld [vmem:[%s11756_s22 + $0x108] sm:$0xff]  ;;  %v8005_v13 = vld [vmem:[%s11756_s22 + $0x190] sm:$0xff] }
0x3deb   : > { %9249 = vmatmul.mubr.f32.vlgmr.msra.gmra.mrb[46].mxu0 %v6989_v15  ;;  %v8006_v15 = vld [vmem:[%s11756_s22 + $0x198] sm:$0xff] }
0x3ebe   : > { %v7056_v16 = vpop.f32.mrb[46].mxu0 }
0x3ebf   : > { %v7057_v17 = vadd.f32 %v7056_v16, %v11430_v41  ;;  %v9250_v18 = vpop.f32.mrb[47].mxu0  ;;  %v9820_v41 = vpack.c.bf16 %v7961_v24, %v7959_v30  ;;  %v9848_v16 = vpack.c.bf16 %v7988_v12, %v7987_v34  ;;  %v9856_v30 = vpack.c.bf16 %v7992_v25, %v7991_v37  ;;  %v7323_v34 = vld [vmem:[%s11761_s5] sm:$0xff]  ;;  %v7325_v12 = vld [vmem:[%s11761_s5 + $0x10] sm:$0xff]  ;;  %v7330_v25 = vld [vmem:[%s11761_s5 + $0x38] sm:$0xff] }
0x3ec0   : > { %v7989_v18 = vld [vmem:[%s11756_s22 + $0x110] sm:$0xff]  ;;  %v9858_v24 = vpack.c.bf16 %v8010_v28, %v8009_v27  ;;  %v7331_v28 = vld [vmem:[%s11761_s5 + $0x40] sm:$0xff] }
0x3ec1   : > { %7060 = vadd.xlane.f32.xlu1 %v7057_v17  ;;  %9821 = vmatpush1.bf16.msra.mxu1 %v9820_v41  ;;  %v9852_v60 = vpack.c.bf16 %v7990_v19, %v7989_v18  ;;  %v8011_v41 = vld [vmem:[%s11756_s22 + $0x1c0] sm:$0xff]  ;;  %v7328_v18 = vld [vmem:[%s11761_s5 + $0x28] sm:$0xff]  ;;  %v7329_v37 = vld [vmem:[%s11761_s5 + $0x30] sm:$0xff] }
0x3ec2   : > { %9823 = vmatprep.subr.bf16.mxu1 %v9822_v33  ;;  %9849 = vmatpush3.bf16.msra.mxu0 %v9848_v16  ;;  %v8012_v33 = vld [vmem:[%s11756_s22 + $0x1c8] sm:$0xff]  ;;  %v9888_v27 = vpack.c.bf16 %v7330_v25, %v7329_v37 }
0x3ec3   : > { %v9862_v20 = vpack.c.bf16 %v8012_v33, %v8011_v41  ;;  %v9894_v41 = vpack.c.bf16 %v7334_v53, %v7333_v31  ;;  %v7335_v33 = vld [vmem:[%s11761_s5 + $0x60] sm:$0xff] }
0x3ec5   : > { %9825 = vmatpush1.bf16.msra.mxu1 %v9824_v38  ;;  %v7995_v38 = vld [vmem:[%s11756_s22 + $0x140] sm:$0xff] }
0x3ec6   : > { %9827 = vmatprep.subr.bf16.mxu1 %v9826_v2  ;;  %v7997_v2 = vld [vmem:[%s11756_s22 + $0x150] sm:$0xff] }
0x3ec7   : > { %v9868_v49 = vpack.c.bf16 %v7998_v46, %v7997_v2  ;;  %v8021_v46 = vld [vmem:[%s11759_s20 + $0x1] ss:$0 sm:$0xff] }
0x3ec9   : > { %9829 = vmatpush1.bf16.msra.mxu1 %v9828_v48  ;;  %v8016_v48 = vld [vmem:[%s11756_s22 + $0x1e8] sm:$0xff] }
0x3eca   : > { %9831 = vmatprep.subr.bf16.mxu1 %v9830_v26  ;;  %v9870_v50 = vpack.c.bf16 %v8016_v48, %v8015_v47  ;;  %v8000_v26 = vld [vmem:[%s11756_s22 + $0x168] sm:$0xff]  ;;  %v8022_v48 = vld [vmem:[%s11760_s24 + $0x1] ss:$0 sm:$0xff] }
0x3ecb   : > { %v9872_v52 = vpack.c.bf16 %v8000_v26, %v7999_v51 }
0x3ecd   : > { %9833 = vmatpush1.bf16.msra.mxu1 %v9832_v55 }
0x3ece   : > { %9835 = vmatprep.subr.bf16.mxu1 %v9834_v56 }
0x3ed1   : > { %9837 = vmatpush1.bf16.msra.mxu1 %v9836_v61 }
0x3ed2   : > { %9839 = vmatprep.subr.bf16.mxu1 %v9838_v62  ;;  %v8017_v62 = vld [vmem:[%s11756_s22 + $0x1f0] sm:$0xff] }
0x3ed3   : > { %v9874_v0 = vpack.c.bf16 %v8018_v63, %v8017_v62 }
0x3ed5   : > { %9841 = vmatpush1.bf16.msra.mxu1 %v9840_v5  ;;  %v9876_v5 = vpack.c.bf16 %v8002_v4, %v8001_v1 }
0x3ed6   : > { %9843 = vmatprep.subr.bf16.mxu1 %v9842_v44 }
0x3ed9   : > { %9845 = vmatpush1.bf16.msra.mxu1 %v9844_v10 }
0x3eda   : > { %9878 = vmatprep.subr.bf16.mxu1 %v10185_v3 }
0x3f4e   : > { %v7061_v39 = vpop.xlane.xlu1 %7060 }
0x3f4f   : > { %v7062_v7 = vmul.f32 0.0078125, %v7061_v39  ;;  %v7996_v39 = vld [vmem:[%s11756_s22 + $0x148] sm:$0xff] }
0x3f50   : > { %v9864_v43 = vpack.c.bf16 %v7996_v39, %v7995_v38  ;;  %v7337_v38 = vld [vmem:[%s11761_s5 + $0x70] sm:$0xff]  ;;  %v7338_v39 = vld [vmem:[%s11761_s5 + $0x78] sm:$0xff] }
0x3f51   : > { %v11553_v40 = vsub.f32 %v7057_v17, %v7062_v7  ;;  %v9850_v17 = vpack.c.bf16 %v8006_v15, %v8005_v13  ;;  %v8013_v7 = vld [vmem:[%s11756_s22 + $0x1d0] sm:$0xff]  ;;  %v9879_v13 = vpack.c.bf16 %v7324_v11, %v7323_v34  ;;  %v7326_v15 = vld [vmem:[%s11761_s5 + $0x18] sm:$0xff] }
0x3f52   : > { %v9882_v16 = vpack.c.bf16 %v7326_v15, %v7325_v12 }
0x3f53   : > { %v7064_v42 = vmul.f32 %v11553_v40, %v11553_v40  ;;  %9851 = vmatprep.subr.bf16.mxu0 %v9850_v17  ;;  %v7327_v17 = vld [vmem:[%s11761_s5 + $0x20] sm:$0xff] }
0x3f54   : > { %9853 = vmatpush3.bf16.msra.mxu0 %v9852_v60  ;;  %v9885_v19 = vpack.c.bf16 %v7328_v18, %v7327_v17 }
0x3f55   : > { %7065 = vadd.xlane.f32.xlu0 %v7064_v42  ;;  %9855 = vmatprep.subr.bf16.mxu0 %v9854_v22  ;;  %v8014_v42 = vld [vmem:[%s11756_s22 + $0x1d8] sm:$0xff] }
0x3f56   : > { %v9866_v45 = vpack.c.bf16 %v8014_v42, %v8013_v7  ;;  %v9900_v7 = vpack.c.bf16 %v7338_v39, %v7337_v38 }
0x3f58   : > { %9857 = vmatpush3.bf16.msra.mxu0 %v9856_v30  ;;  %v7332_v30 = vld [vmem:[%s11761_s5 + $0x48] sm:$0xff] }
0x3f59   : > { %9859 = vmatprep.subr.bf16.mxu0 %v9858_v24  ;;  %v9891_v24 = vpack.c.bf16 %v7332_v30, %v7331_v28 }
0x3f5c   : > { %9861 = vmatpush3.bf16.msra.mxu0 %v9860_v36  ;;  %v7336_v36 = vld [vmem:[%s11761_s5 + $0x68] sm:$0xff]  ;;  %s7412_s5 = scalar_lea.sflag [#allocation3], %s944_s13 }
0x3f5d   : > { %9863 = vmatprep.subr.bf16.mxu0 %v9862_v20  ;;  %v9897_v20 = vpack.c.bf16 %v7336_v36, %v7335_v33 }
0x3f60   : > { %9865 = vmatpush3.bf16.msra.mxu0 %v9864_v43 }
0x3f61   : > { %9867 = vmatprep.subr.bf16.mxu0 %v9866_v45 }
0x3f64   : > { %9869 = vmatpush3.bf16.msra.mxu0 %v9868_v49 }
0x3f65   : > { %9871 = vmatprep.subr.bf16.mxu0 %v9870_v50 }
0x3f68   : > { %9873 = vmatpush3.bf16.msra.mxu0 %v9872_v52 }
0x3f69   : > { %9875 = vmatprep.subr.bf16.mxu0 %v9874_v0 }
0x3f6c   : > { %9877 = vmatpush3.bf16.msra.mxu0 %v9876_v5 }
0x3fe2   : > { %v7066_v54 = vpop.xlane.xlu0 %7065 }
0x3fe3   : > { %v7067_v23 = vmul.f32 0.0078125, %v7066_v54 }
0x3fe5   : > { %v7068_v55 = vadd.f32 1e-05, %v7067_v23 }
0x3fe7   : > { %10088 = vrsqrt.f32 %v7068_v55 }
0x3ff1   : > { %v10089_v56 = vpop.eup %10088 }
0x3ff2   : > { %v7070_v59 = vmul.f32 %v10089_v56, %v11553_v40 }
0x3ff4   : > { %v7077_v35 = vmul.f32 %v7953_v58, %v7070_v59 }
0x3ff6   : > { %v7084_v61 = vadd.f32 %v7954_v32, %v7077_v35 }
0x3ff8   : > { %7220 = vmatmul.mubr.f32.vlgmr.msra.gmra.mrb[88].mxu1 %v7084_v61 }
0x3ff9   : > { %9283 = vmatprep.mubr.msk.f32.mxu1 %vm10186_vm0, %v10187_v6  ;;  %9880 = vmatpush3.bf16.msra.mxu1 %v9879_v13 }
0x3ffa   : > { %9881 = vmatprep.subr.bf16.mxu1 %v10185_v3 }
0x3ffd   : > { %9883 = vmatpush3.bf16.msra.mxu1 %v9882_v16 }
0x3ffe   : > { %9884 = vmatprep.subr.bf16.mxu1 %v10185_v3 }
0x4001   : > { %9886 = vmatpush3.bf16.msra.mxu1 %v9885_v19 }
0x4002   : > { %9887 = vmatprep.subr.bf16.mxu1 %v10185_v3 }
0x4005   : > { %9889 = vmatpush3.bf16.msra.mxu1 %v9888_v27 }
0x4006   : > { %9890 = vmatprep.subr.bf16.mxu1 %v10185_v3 }
0x4009   : > { %9892 = vmatpush3.bf16.msra.mxu1 %v9891_v24 }
0x400a   : > { %9893 = vmatprep.subr.bf16.mxu1 %v10185_v3 }
0x400d   : > { %9895 = vmatpush3.bf16.msra.mxu1 %v9894_v41 }
0x400e   : > { %9896 = vmatprep.subr.bf16.mxu1 %v10185_v3 }
0x4011   : > { %9898 = vmatpush3.bf16.msra.mxu1 %v9897_v20 }
0x4012   : > { %9899 = vmatprep.subr.bf16.mxu1 %v10185_v3 }
0x4015   : > { %9901 = vmatpush3.bf16.msra.mxu1 %v9900_v7 }
0x40cb   : > { %v7221_v40 = vpop.f32.mrb[88].mxu1 }
0x40cc   : > { %v7223_v44 = vpop.f32.mrb[89].mxu1  ;;  %v7226_v9 = vmax.f32 %v7221_v40, 0.0 }
0x40cd   : > { %v7227_v8 = vmax.f32 %v7223_v44, 0.0 }
0x40cf   : > { %7292 = vmatprep.mubr.f32.mxu0 %v7227_v8 }
0x40d0   : > { %7293 = vmatmul.mubr.f32.vlgmr.msra.gmra.mrb[48].mxu0 %v7226_v9 }
0x41a3   : > { %v8501_v6 = vpop.f32.mrb[48].mxu0 }
0x41a4   : > { %v8502_v10 = vpop.f32.mrb[49].mxu0 }
0x41a5   : > { %v8503_v29 = vadd.f32 %v8502_v10, %v8501_v6 }
0x41a7   : > { %v7295_v57 = vadd.f32 %v8503_v29, %v7084_v61 }
0x41a9   : > { %7298 = vadd.xlane.f32.xlu0 %v7295_v57 }
0x4236   : > { %v7299_v21 = vpop.xlane.xlu0 %7298 }
0x4237   : > { %v7300_v14 = vmul.f32 0.0078125, %v7299_v21 }
0x4239   : > { %v7301_v60 = vsub.f32 %v7295_v57, %v7300_v14 }
0x423b   : > { %v7302_v22 = vmul.f32 %v7301_v60, %v7301_v60 }
0x423d   : > { %7303 = vadd.xlane.f32.xlu1 %v7302_v22 }
0x42ca   : > { %v7304_v42 = vpop.xlane.xlu1 %7303 }
0x42cb   : > { %v7305_v43 = vmul.f32 0.0078125, %v7304_v42 }
0x42cd   : > { %v7306_v45 = vadd.f32 1e-05, %v7305_v43 }
0x42cf   : > { %10090 = vrsqrt.f32 %v7306_v45 }
0x42d9   : > { %v10091_v2 = vpop.eup %10090 }
0x42da   : > { %v7308_v47 = vmul.f32 %v10091_v2, %v7301_v60 }
0x42dc   : > { %v7315_v49 = vmul.f32 %v8021_v46, %v7308_v47 }
0x42de   : > { %v7322_v50 = vadd.f32 %v8022_v48, %v7315_v49 }
0x42e0   : > { %9284 = vmatmul.mubr.f32.vlgmr.msra.gmra.mrb[90].mxu1 %v7322_v50 }
0x43b3   : > { %v7405_v3 = vpop.f32.mrb[90].mxu1 }
0x43b4   : > { %7410 = vst.msk [vmem:[%s946_s17] sm:$0xff] %vm7409_vm8, %v7405_v3  ;;  %v9285_v51 = vpop.f32.mrb[91].mxu1 }
0x43b5   : > { %10105 = shalt.err (!%p10102_p3)
}
0x43b6   : > { %s10106_s13 = scalar_lea.hbm %s11643_s4, 128  ;;  %s10110_s23 = scalar_lea.hbm %s10330_s21, 256 }
0x43b7   : > { %p10107_p4 = scmp.ne.s32.totalorder %s11643_s4, %s10106_s13  ;;  %p10111_p9 = scmp.lt.u32.totalorder %s11643_s4, %s10330_s21 }
0x43b8   : > { %p10112_p10 = scmp.lt.u32.totalorder %s10110_s23, %s10106_s13  ;;  %p10114_p12 = scmp.lt.u32.totalorder %s10106_s13, %s11643_s4 }
0x43b9   : > { %p10108_p7 = pnand %p10107_p4, %p10385_p5 }
0x43ba   : > { %p10113_p11 = por %p10112_p10, %p10111_p9 }
0x43bb   : > { %p10109_p8 = pneg %p10108_p7 }
0x43bc   : > { %p10115_p0 = por %p10114_p12, %p10113_p11 }
0x43be   : > { %p10116_p13 = pnand %p10115_p0, %p10109_p8 }
0x43c0   : > { %10119 = shalt.err (!%p10116_p13)
}
0x43c1   : > { %9902 = dma.vmem_to_hbm [thread:$0]  (%p10385_p5), %s11645_s3, 128, %s11643_s4, %s7412_s5  }
0x43c2 PF: > { %p9908_p1 = scmp.ge.s32.totalorder %s10154_s15, 2  ;;  %s7461_s8 = sand.u32 1, %s10142_s7  }
0x43c3   : > { %s7462_s6 = scalar_lea.sflag [#allocation3], %s7461_s8 }
0x43c4   : > { %p9905_p2 = pnand %p9908_p1, %p10389_p6 }
0x43c6   : > { %10137 = dma.done.wait (!%p9905_p2), %s7462_s6, 128  }
0x43c7   : > { %10139 = vsyncadd (!%p9905_p2), %s7462_s6, 4294967168  ;;  %p70_p3 = scmp.ge.s32.totalorder %s10372_s18, 4   ;;  %s11762_s7 = smov %s10146_s10 }
0x43c8   : > { %s11763_s10 = smov %s10150_s11  ;;  %s11764_s11 = smov %s10383_s26 }
0x43c9   : > { %s11765_s15 = smov %s10372_s18  ;;  %72 = sbr.rel (!%p70_p3) target bundleno = 67 (0x43), region = 277 }
0x43d0   :  { %7491 = vsyncpa [#allocation3], 1 }
0x43d1   :  { %7493 = vsyncpa [#allocation3 + $0x1], 1 }

</bundles_post_ra>
